<compile_context>
chip_gen: v7x
topology: tpu7x:2x2x1
jax: 0.10.0
libtpu: 0.0.40
codegen_flags: <defaults>
</compile_context>

<pallas_src>
import math

import jax
import jax.numpy as jnp
from jax.experimental import pallas as pl
from jax.experimental.pallas import tpu as pltpu

_LANES = 128
_SUBLANES = 8
_TARGET_OUT_TILE_BYTES = 2 * 1024 * 1024  # 1-4 MiB is the measured HBM-roofline sweet spot


def _round_up(x: int, m: int) -> int:
    return ((x + m - 1) // m) * m


# --------------------------------------------------------------------------
# Kernels
# --------------------------------------------------------------------------

def _packed_kernel(x_ref, rep_ref, phase_ref, o_ref):
    # x_ref:     (tile_rows, k)   f32 — `pack` x values per 128-lane output row
    #                                   (columns pack..k-1 are explicit zeros).
    # rep_ref:   (k, 128)         f32 — block-diagonal: rep[p, p*dim + j] = freqs_full[j].
    # phase_ref: (1, 128)         f32 — 0 on the sin half, pi/2 on the cos half (per segment).
    # o_ref:     (tile_rows, 128) f32 — lane-dense output view.
    #
    # The lane replication of x rides the otherwise-idle MXU so VALU/EUP stay
    # on the sin polynomial (matters on v7x where this kernel is compute-bound).
    arg = jnp.dot(
        x_ref[...], rep_ref[...],
        precision=jax.lax.Precision.HIGHEST,        # keep the f32 product exact-ish
        preferred_element_type=jnp.float32,
    )
    # cos(a) == sin(a + pi/2): one transcendental + one unmasked 128-lane store.
    o_ref[...] = jnp.sin(arg + phase_ref[...])


def _general_kernel(x_ref, freqs_ref, phase_ref, o_ref):
    # x_ref:     (tile_n, 1)   f32
    # freqs_ref: (1, dim)      f32 — [freqs, freqs]
    # phase_ref: (1, dim)      f32 — [0..0, pi/2..pi/2]
    # o_ref:     (tile_n, dim) f32
    # Single full-width store; lane-dense whenever dim % 128 == 0.
    o_ref[...] = jnp.sin(x_ref[...] * freqs_ref[...] + phase_ref[...])


# --------------------------------------------------------------------------
# Wrapper
# --------------------------------------------------------------------------

def _freq_tables(dim: int, theta: float):
    half = dim // 2
    scale = math.log(theta) / (half - 1)
    freqs = jnp.exp(jnp.arange(half, dtype=jnp.float32) * (-scale))
    freqs_full = jnp.concatenate([freqs, freqs])                              # (dim,)
    phase_full = jnp.concatenate(
        [jnp.zeros((half,), jnp.float32),
         jnp.full((half,), math.pi / 2, dtype=jnp.float32)])                  # (dim,)
    return freqs_full, phase_full


def _compiler_params(out_tile_bytes: int, in_tile_bytes: int, const_bytes: int):
    # Scoped-VMEM limit derived from the real double-buffered footprint (2x
    # headroom), capped at 32 MiB so it is valid on every generation
    # (v5e/v6e: 128 MiB physical; v7x: 64 MiB physical / 32 MiB default scoped).
    need = 2 * (out_tile_bytes + in_tile_bytes) + const_bytes
    limit = int(min(32 * 1024 * 1024, max(16 * 1024 * 1024, 2 * need)))
    return pltpu.CompilerParams(
        dimension_semantics=("parallel",),
        vmem_limit_bytes=limit,
    )


def _forward_packed(x_flat: jax.Array, dim: int, freqs_full, phase_full) -> jax.Array:
    """dim < 128 and 128 % dim == 0: pack 128/dim output rows per 128-lane row."""
    n = x_flat.shape[0]
    pack = _LANES // dim
    align = _SUBLANES * pack                 # keeps the packed view 8-row aligned
    n_pad = _round_up(n, align)
    if n_pad != n:
        x_flat = jnp.pad(x_flat, (0, n_pad - n))
    rows = n_pad // pack                     # multiple of 8

    x2 = x_flat.reshape(rows, pack)
    k = _round_up(pack, _SUBLANES)           # MXU contraction dim padded with explicit zeros
    if k != pack:
        x2 = jnp.pad(x2, ((0, 0), (0, k - pack)))

    # rep[p, p*dim + j] = freqs_full[j]; zero elsewhere (including padded rows).
    rep = jnp.kron(jnp.eye(pack, dtype=jnp.float32), freqs_full[None, :])     # (pack, 128)
    if k != pack:
        rep = jnp.pad(rep, ((0, k - pack), (0, 0)))                            # (k, 128)
    phase128 = jnp.tile(phase_full, pack)[None, :]                             # (1, 128)

    target_rows = max(_SUBLANES,
                      (_TARGET_OUT_TILE_BYTES // (_LANES * 4)) // _SUBLANES * _SUBLANES)
    tile_rows = min(target_rows, rows)

    out_tile_bytes = tile_rows * _LANES * 4
    x_tile_bytes = tile_rows * _LANES * 4    # (tile_rows, k) lane-pads to 128 lanes in VMEM
    const_bytes = (k + _SUBLANES) * _LANES * 4

    out = pl.pallas_call(
        _packed_kernel,
        out_shape=jax.ShapeDtypeStruct((rows, _LANES), jnp.float32),
        grid=(pl.cdiv(rows, tile_rows),),
        in_specs=[
            pl.BlockSpec((tile_rows, k), lambda i: (i, 0)),
            pl.BlockSpec((k, _LANES), lambda i: (0, 0)),
            pl.BlockSpec((1, _LANES), lambda i: (0, 0)),
        ],
        out_specs=pl.BlockSpec((tile_rows, _LANES), lambda i: (i, 0)),
        compiler_params=_compiler_params(out_tile_bytes, x_tile_bytes, const_bytes),
        cost_estimate=pl.CostEstimate(
            flops=4 * n_pad * dim,
            transcendentals=n_pad * dim,
            bytes_accessed=n_pad * dim * 4 + n_pad * 4),
    )(x2, rep, phase128)

    out = out.reshape(n_pad, dim)            # contiguous view of the packed result
    if n_pad != n:                           # trim only when N itself was unaligned
        out = out[:n]
    return out


def _forward_general(x_flat: jax.Array, dim: int, freqs_full, phase_full) -> jax.Array:
    """General dims (incl. dim % 128 == 0, which stays fully lane-dense)."""
    n = x_flat.shape[0]
    n_pad = _round_up(n, _SUBLANES)          # minimal alignment pad only
    if n_pad != n:
        x_flat = jnp.pad(x_flat, (0, n_pad - n))
    x2 = x_flat.reshape(n_pad, 1)

    row_bytes = dim * 4
    target_rows = max(_SUBLANES,
                      (_TARGET_OUT_TILE_BYTES // row_bytes) // _SUBLANES * _SUBLANES)
    tile_n = min(target_rows, n_pad)

    out_tile_bytes = tile_n * row_bytes
    x_tile_bytes = tile_n * _LANES * 4       # (tile_n, 1) lane-pads to 128 lanes in VMEM
    const_bytes = 2 * _SUBLANES * dim * 4

    out = pl.pallas_call(
        _general_kernel,
        out_shape=jax.ShapeDtypeStruct((n_pad, dim), jnp.float32),
        grid=(pl.cdiv(n_pad, tile_n),),
        in_specs=[
            pl.BlockSpec((tile_n, 1), lambda i: (i, 0)),
            pl.BlockSpec((1, dim), lambda i: (0, 0)),
            pl.BlockSpec((1, dim), lambda i: (0, 0)),
        ],
        out_specs=pl.BlockSpec((tile_n, dim), lambda i: (i, 0)),
        compiler_params=_compiler_params(out_tile_bytes, x_tile_bytes, const_bytes),
        cost_estimate=pl.CostEstimate(
            flops=2 * n_pad * dim,
            transcendentals=n_pad * dim,
            bytes_accessed=n_pad * dim * 4 + n_pad * 4),
    )(x2, freqs_full[None, :], phase_full[None, :])

    if n_pad != n:
        out = out[:n]
    return out


def sinusoidal_pos_emb_3d(x: jax.Array, dim: int, theta: float = 10000.0) -> jax.Array:
    """Pallas implementation of SinusoidalPosEmb3D.forward (fp32 output)."""
    assert dim % 2 == 0 and dim >= 4, "dim must be even and >= 4 (half - 1 > 0)"
    orig_shape = x.shape
    x_flat = x.reshape(-1).astype(jnp.float32)
    freqs_full, phase_full = _freq_tables(dim, theta)

    if dim < _LANES and _LANES % dim == 0:
        out = _forward_packed(x_flat, dim, freqs_full, phase_full)
    else:
        out = _forward_general(x_flat, dim, freqs_full, phase_full)
    return out.reshape(*orig_shape, dim)


# --------------------------------------------------------------------------
# Reference + self-test
# --------------------------------------------------------------------------

def _reference(x, dim, theta=10000.0):
    half = dim // 2
    scale = math.log(theta) / (half - 1)
    freqs = jnp.exp(jnp.arange(half, dtype=jnp.float32) * -scale)
    arg = x.astype(jnp.float32)[..., None] * freqs
    return jnp.concatenate([jnp.sin(arg), jnp.cos(arg)], axis=-1)


if __name__ == "__main__":
    key = jax.random.PRNGKey(0)
    # 3-D positional grid: x has shape (B, X, Y, Z); values act like coordinates.
    x = jax.random.uniform(key, (2, 4, 16, 16), dtype=jnp.float32) * 64.0

    # dim=32 exercises the packed (lane-dense 128-wide store + MXU replication) path.
    out = jax.block_until_ready(sinusoidal_pos_emb_3d(x, dim=32, theta=10000.0))
    ref = _reference(x, dim=32)
    assert out.shape == (2, 4, 16, 16, 32), out.shape
    assert jnp.allclose(out, ref, atol=5e-4, rtol=1e-4), "mismatch vs reference (packed)"

    # dim=256 exercises the general full-width single-store path (dim % 128 == 0).
    out256 = jax.block_until_ready(sinusoidal_pos_emb_3d(x, dim=256, theta=10000.0))
    ref256 = _reference(x, dim=256)
    assert out256.shape == (2, 4, 16, 16, 256), out256.shape
    assert jnp.allclose(out256, ref256, atol=5e-4, rtol=1e-4), "mismatch vs reference (general)"

    # Ragged N (not a multiple of 8*pack) exercises the minimal-pad + trim path.
    x2 = jax.random.uniform(jax.random.PRNGKey(1), (3, 5, 7, 2), dtype=jnp.float32) * 50.0
    out2 = jax.block_until_ready(sinusoidal_pos_emb_3d(x2, dim=32, theta=10000.0))
    ref2 = _reference(x2, dim=32)
    assert out2.shape == (3, 5, 7, 2, 32), out2.shape
    assert jnp.allclose(out2, ref2, atol=5e-4, rtol=1e-4), "mismatch vs reference (ragged)"

    print("KERNEL_OK")
</pallas_src>

<mosaic_0001>
module attributes {stable_mosaic.version = 11 : i64} {
  func.func @_packed_kernel(%arg0: i32, %arg1: memref<512x8xf32, #tpu.memory_space<vmem>>, %arg2: memref<8x128xf32, #tpu.memory_space<vmem>>, %arg3: memref<1x128xf32, #tpu.memory_space<vmem>>, %arg4: memref<512x128xf32, #tpu.memory_space<vmem>>) attributes {dimension_semantics = [#tpu.dimension_semantics<parallel>], iteration_bounds = array<i64: 1>, scalar_prefetch = 0 : i64, scratch_operands = 0 : i64, tpu.core_type = #tpu.core_type<tc>, window_params = [{transform_indices = @transform_0, window_bounds = array<i64: 512, 8>}, {pipeline_mode = #tpu.pipeline_mode<synchronous>, transform_indices = @transform_1, window_bounds = array<i64: 8, 128>}, {pipeline_mode = #tpu.pipeline_mode<synchronous>, transform_indices = @transform_2, window_bounds = array<i64: 1, 128>}, {transform_indices = @transform_3, window_bounds = array<i64: 512, 128>}]} {
    %c0 = arith.constant 0 : index
    %c0_0 = arith.constant 0 : index
    %0 = vector.load %arg1[%c0, %c0_0] : memref<512x8xf32, #tpu.memory_space<vmem>>, vector<512x8xf32>
    %c0_1 = arith.constant 0 : index
    %c0_2 = arith.constant 0 : index
    %1 = vector.load %arg2[%c0_1, %c0_2] : memref<8x128xf32, #tpu.memory_space<vmem>>, vector<8x128xf32>
    %cst = arith.constant dense<0.000000e+00> : vector<512x128xf32>
    %2 = tpu.matmul %0, %1, %cst {dimension_numbers = #tpu.dot_dimension_numbers<[1], [0], [0], [1], [0, 0, 1, 1], [], []>, precision = #tpu.contract_precision<fp32>} : vector<512x8xf32>, vector<8x128xf32>, vector<512x128xf32> -> vector<512x128xf32>
    %c0_3 = arith.constant 0 : index
    %c0_4 = arith.constant 0 : index
    %3 = vector.load %arg3[%c0_3, %c0_4] : memref<1x128xf32, #tpu.memory_space<vmem>>, vector<1x128xf32>
    %4 = vector.broadcast %3 : vector<1x128xf32> to vector<512x128xf32>
    %5 = arith.addf %2, %4 : vector<512x128xf32>
    %6 = math.sin %5 : vector<512x128xf32>
    %c0_5 = arith.constant 0 : index
    %c0_6 = arith.constant 0 : index
    %7 = vector.load %arg4[%c0_5, %c0_6] : memref<512x128xf32, #tpu.memory_space<vmem>>, vector<512x128xf32>
    tpu.vector_store %arg4[%c0_5, %c0_6], %6 {strides = array<i32>} : memref<512x128xf32, #tpu.memory_space<vmem>>, vector<512x128xf32>,
    return
  }
  func.func @transform_0(%arg0: i32) -> (i32, i32) {
    %c0_i32 = arith.constant 0 : i32
    %c0_i32_0 = arith.constant 0 : i32
    return %arg0, %c0_i32 : i32, i32
  }
  func.func @transform_1(%arg0: i32) -> (i32, i32) {
    %c0_i32 = arith.constant 0 : i32
    %c0_i32_0 = arith.constant 0 : i32
    %c0_i32_1 = arith.constant 0 : i32
    return %c0_i32, %c0_i32_0 : i32, i32
  }
  func.func @transform_2(%arg0: i32) -> (i32, i32) {
    %c0_i32 = arith.constant 0 : i32
    %c0_i32_0 = arith.constant 0 : i32
    %c0_i32_1 = arith.constant 0 : i32
    return %c0_i32, %c0_i32_0 : i32, i32
  }
  func.func @transform_3(%arg0: i32) -> (i32, i32) {
    %c0_i32 = arith.constant 0 : i32
    %c0_i32_0 = arith.constant 0 : i32
    return %arg0, %c0_i32 : i32, i32
  }
}

</mosaic_0001>

<bundles_post_ra>
// kernel: tpu_custom_call.1
= control target key start
LH: loop header
LB: loop body
LE: loop exit
PB: predicated region body
PF: predicated region fallthrough
CT: control target
= control target key end

     0   :  { %vm87_vm0 = vcmask 64512   ;;  %s18929_s0 = inlined_call_operand.vmem [shape: f32[512,8], index: 0, kind: input, shape index: {}]   ;;  %s18930_s1 = inlined_call_operand.vmem [shape: f32[8,128], index: 1, kind: input, shape index: {}]   ;;  %s18931_s2 = inlined_call_operand.vmem [shape: f32[1,128], index: 2, kind: input, shape index: {}]   ;;  %s18932_s3 = inlined_call_operand.hbm [shape: f32[512,128], index: 3, kind: output, shape index: {}]  }
   0x1   :  { %v79_v0 = vld [vmem:[%s18930_s1] sm:$0xff]  ;;  %v16_v2 = vld [vmem:[%s18929_s0 + $0x8] sm:$0xff]  ;;  %v17_v6 = vld [vmem:[%s18929_s0 + $0x10] sm:$0xff] }
   0x2   :  { %v15_v1 = vld [vmem:[%s18929_s0] sm:$0xff]  ;;  %v12383_v3 = vand.u32 4294901760, %v79_v0  ;;  %v92_v5 = vsel %vm87_vm0, %v16_v2, 0  ;;  %v18_v7 = vld [vmem:[%s18929_s0 + $0x18] sm:$0xff]  ;;  %v95_v11 = vsel %vm87_vm0, %v17_v6, 0  ;;  %v20_v13 = vld [vmem:[%s18929_s0 + $0x28] sm:$0xff] }
   0x3   :  { %v89_v4 = vsel %vm87_vm0, %v15_v1, 0  ;;  %v19_v8 = vld [vmem:[%s18929_s0 + $0x20] sm:$0xff]  ;;  %v12398_v10 = vand.u32 4294901760, %v92_v5  ;;  %v98_v12 = vsel %vm87_vm0, %v18_v7, 0  ;;  %v12410_v15 = vand.u32 4294901760, %v95_v11  ;;  %v21_v18 = vld [vmem:[%s18929_s0 + $0x30] sm:$0xff] }
   0x4   :  { %v12396_v9 = vand.u32 4294901760, %v89_v4  ;;  %11112 = vmatprep.subr.mxu0 %v12383_v3  ;;  %10818 = vmatprep.subr.mxu1 %v12383_v3  ;;  %v12408_v14 = vsub.f32 %v79_v0, %v12383_v3  ;;  %v12412_v16 = vand.u32 4294901760, %v98_v12  ;;  %v101_v17 = vsel %vm87_vm0, %v19_v8, 0  ;;  %v22_v39 = vld [vmem:[%s18929_s0 + $0x38] sm:$0xff]  ;;  %v23_v44 = vld [vmem:[%s18929_s0 + $0x40] sm:$0xff]  ;;  %v24_v49 = vld [vmem:[%s18929_s0 + $0x48] sm:$0xff] }
   0x5   :  { %11113 = vmatpush3.msra.mxu0 %v12383_v3  ;;  %v12423_v20 = vsub.f32 %v92_v5, %v12398_v10  ;;  %10819 = vmatpush3.msra.mxu1 %v12383_v3  ;;  %v12426_v21 = vand.u32 4294901760, %v101_v17  ;;  %v104_v22 = vsel %vm87_vm0, %v20_v13, 0  ;;  %v12431_v24 = vsub.f32 %v95_v11, %v12410_v15  ;;  %v25_v50 = vld [vmem:[%s18929_s0 + $0x50] sm:$0xff]  ;;  %v26_v55 = vld [vmem:[%s18929_s0 + $0x58] sm:$0xff]  ;;  %v27_v60 = vld [vmem:[%s18929_s0 + $0x60] sm:$0xff] }
   0x6   :  { %v12420_v19 = vsub.f32 %v89_v4, %v12396_v9  ;;  %v989_v23 = vand.u32 4294901760, %v12408_v14  ;;  %v12434_v25 = vsub.f32 %v98_v12, %v12412_v16  ;;  %v12436_v26 = vand.u32 4294901760, %v104_v22  ;;  %v28_v61 = vld [vmem:[%s18929_s0 + $0x68] sm:$0xff]  ;;  %v29_v13 = vld [vmem:[%s18929_s0 + $0x70] sm:$0xff] }
   0x7   :  { %19052 = vst [vmem:[#allocation6_spill] sm:$0xff] %v12423_v20  ;;  %19053 = vst [vmem:[#allocation7_spill] sm:$0xff] %v12431_v24  ;;  %v358_v28 = vand.u32 4294901760, %v12423_v20  ;;  %v12441_v29 = vsub.f32 %v101_v17, %v12426_v21  ;;  %v107_v30 = vsel %vm87_vm0, %v21_v18, 0  ;;  %v368_v32 = vand.u32 4294901760, %v12431_v24 }
   0x8   :  { %19051 = vst [vmem:[#allocation5_spill] sm:$0xff] %v12420_v19  ;;  %19054 = vst [vmem:[#allocation8_spill] sm:$0xff] %v12434_v25  ;;  %v348_v27 = vand.u32 4294901760, %v12420_v19  ;;  %v990_v31 = vsub.f32 %v12408_v14, %v989_v23  ;;  %v378_v33 = vand.u32 4294901760, %v12434_v25  ;;  %11210 = vmatprep.subr.mxu0 %v989_v23  ;;  %v12448_v34 = vsub.f32 %v104_v22, %v12436_v26 }
   0x9   :  { %19055 = vst [vmem:[#allocation9_spill] sm:$0xff] %v12441_v29  ;;  %v359_v36 = vsub.f32 %v12423_v20, %v358_v28  ;;  %v388_v37 = vand.u32 4294901760, %v12441_v29  ;;  %v12453_v38 = vand.u32 4294901760, %v107_v30  ;;  %v369_v41 = vsub.f32 %v12431_v24, %v368_v32 }
   0xa   :  { %19056 = vst [vmem:[#allocation10_spill] sm:$0xff] %v12448_v34  ;;  %11114 = vmatprep.mubr.f32.mxu0 %v348_v27  ;;  %v349_v35 = vsub.f32 %v12420_v19, %v348_v27  ;;  %v991_v40 = vand.u32 4294901760, %v990_v31  ;;  %v379_v42 = vsub.f32 %v12434_v25, %v378_v33  ;;  %v398_v43 = vand.u32 4294901760, %v12448_v34 }
   0xb   :  { %11115 = vmatmul.mubr.f32.vlgmr.msra.gmra.mrb[0].mxu0 %v358_v28  ;;  %v360_v46 = vand.u32 4294901760, %v359_v36  ;;  %v389_v47 = vsub.f32 %v12441_v29, %v388_v37  ;;  %v12466_v48 = vsub.f32 %v107_v30, %v12453_v38  ;;  %v370_v51 = vand.u32 4294901760, %v369_v41 }
   0xc   :  { %v350_v45 = vand.u32 4294901760, %v349_v35  ;;  %11117 = vmatprep.mubr.f32.mxu0 %v368_v32  ;;  %11211 = vmatpush3.msra.mxu0 %v989_v23  ;;  %v380_v52 = vand.u32 4294901760, %v379_v42  ;;  %v399_v53 = vsub.f32 %v12448_v34, %v398_v43  ;;  %v110_v54 = vsel %vm87_vm0, %v22_v39, 0  ;;  %v30_v42 = vld [vmem:[%s18929_s0 + $0x78] sm:$0xff] }
   0xd   :  { %19057 = vst [vmem:[#allocation11_spill] sm:$0xff] %v12466_v48  ;;  %10916 = vmatprep.subr.mxu1 %v991_v40  ;;  %11308 = vmatprep.subr.mxu0 %v12383_v3  ;;  %v390_v56 = vand.u32 4294901760, %v389_v47  ;;  %v408_v57 = vand.u32 4294901760, %v12466_v48  ;;  %v12481_v58 = vand.u32 4294901760, %v110_v54  ;;  %v113_v59 = vsel %vm87_vm0, %v23_v44, 0 }
   0xe   :  { %10820 = vmatprep.mubr.f32.mxu1 %v350_v45  ;;  %v400_v62 = vand.u32 4294901760, %v399_v53  ;;  %v12490_v63 = vand.u32 4294901760, %v113_v59  ;;  %v116_v0 = vsel %vm87_vm0, %v24_v49, 0  ;;  %v119_v1 = vsel %vm87_vm0, %v25_v50, 0  ;;  %v31_v50 = vld [vmem:[%s18929_s0 + $0x80] sm:$0xff] }
   0xf   :  { %10821 = vmatmul.mubr.f32.vlgmr.msra.gmra.mrb[0].mxu1 %v360_v46  ;;  %11118 = vmatmul.mubr.f32.gmra.mrb[2].mxu0 %v378_v33  ;;  %v12495_v2 = vsub.f32 %v110_v54, %v12481_v58  ;;  %v409_v4 = vsub.f32 %v12466_v48, %v408_v57  ;;  %v12498_v5 = vand.u32 4294901760, %v116_v0  ;;  %v12500_v6 = vand.u32 4294901760, %v119_v1 }
  0x10   :  { %10917 = vmatpush3.msra.mxu1 %v991_v40  ;;  %10823 = vmatprep.mubr.f32.mxu1 %v370_v51  ;;  %v12503_v7 = vsub.f32 %v113_v59, %v12490_v63  ;;  %v122_v8 = vsel %vm87_vm0, %v26_v55, 0  ;;  %v125_v11 = vsel %vm87_vm0, %v27_v60, 0  ;;  %v128_v12 = vsel %vm87_vm0, %v28_v61, 0  ;;  %v32_v51 = vld [vmem:[%s18929_s0 + $0x88] sm:$0xff] }
  0x11   :  { %19058 = vst [vmem:[#allocation12_spill] sm:$0xff] %v12495_v2  ;;  %11120 = vmatprep.mubr.f32.mxu0 %v388_v37  ;;  %11014 = vmatprep.subr.mxu1 %v12408_v14  ;;  %v418_v17 = vand.u32 4294901760, %v12495_v2  ;;  %v410_v18 = vand.u32 4294901760, %v409_v4  ;;  %v12514_v22 = vsub.f32 %v116_v0, %v12498_v5  ;;  %v12517_v23 = vsub.f32 %v119_v1, %v12500_v6 }
  0x12   :  { %19059 = vst [vmem:[#allocation13_spill] sm:$0xff] %v12503_v7  ;;  %v428_v27 = vand.u32 4294901760, %v12503_v7  ;;  %v12520_v28 = vand.u32 4294901760, %v122_v8  ;;  %v12522_v30 = vand.u32 4294901760, %v125_v11  ;;  %v12524_v31 = vand.u32 4294901760, %v128_v12 }
  0x13   :  { %19060 = vst [vmem:[#allocation14_spill] sm:$0xff] %v12514_v22  ;;  %19061 = vst [vmem:[#allocation15_spill] sm:$0xff] %v12517_v23  ;;  %10824 = vmatmul.mubr.f32.gmra.mrb[2].mxu1 %v380_v52  ;;  %11121 = vmatmul.mubr.f32.gmra.mrb[4].mxu0 %v398_v43  ;;  %v419_v32 = vsub.f32 %v12495_v2, %v418_v17  ;;  %v438_v33 = vand.u32 4294901760, %v12514_v22  ;;  %v448_v35 = vand.u32 4294901760, %v12517_v23  ;;  %v131_v36 = vsel %vm87_vm0, %v29_v13, 0  ;;  %v33_v52 = vld [vmem:[%s18929_s0 + $0x90] sm:$0xff] }
  0x14   :  { %10826 = vmatprep.mubr.f32.mxu1 %v390_v56  ;;  %11123 = vmatprep.mubr.f32.mxu0 %v408_v57  ;;  %v429_v37 = vsub.f32 %v12503_v7, %v428_v27  ;;  %v12532_v39 = vsub.f32 %v122_v8, %v12520_v28  ;;  %v12535_v40 = vsub.f32 %v125_v11, %v12522_v30  ;;  %v12543_v44 = vand.u32 4294901760, %v131_v36 }
  0x15   :  { %v12538_v41 = vsub.f32 %v128_v12, %v12524_v31  ;;  %v420_v43 = vand.u32 4294901760, %v419_v32  ;;  %v439_v45 = vsub.f32 %v12514_v22, %v438_v33  ;;  %v449_v47 = vsub.f32 %v12517_v23, %v448_v35 }
  0x16   :  { %19062 = vst [vmem:[#allocation16_spill] sm:$0xff] %v12532_v39  ;;  %19063 = vst [vmem:[#allocation17_spill] sm:$0xff] %v12535_v40  ;;  %v458_v46 = vand.u32 4294901760, %v12532_v39  ;;  %v468_v49 = vand.u32 4294901760, %v12535_v40  ;;  %v430_v53 = vand.u32 4294901760, %v429_v37  ;;  %v12559_v54 = vsub.f32 %v131_v36, %v12543_v44 }
  0x17   :  { %19064 = vst [vmem:[#allocation18_spill] sm:$0xff] %v12538_v41  ;;  %10827 = vmatmul.mubr.f32.gmra.mrb[4].mxu1 %v400_v62  ;;  %11124 = vmatmul.mubr.f32.gmra.mrb[6].mxu0 %v418_v17  ;;  %v134_v55 = vsel %vm87_vm0, %v30_v42, 0  ;;  %v478_v56 = vand.u32 4294901760, %v12538_v41 }
  0x18   :  { %10829 = vmatprep.mubr.f32.mxu1 %v410_v18  ;;  %11126 = vmatprep.mubr.f32.mxu0 %v428_v27  ;;  %19065 = vst [vmem:[#allocation19_spill] sm:$0xff] %v12559_v54  ;;  %v12563_v57 = vand.u32 4294901760, %v134_v55 }
  0x19   :  { %8 = vsyncpa [#allocation3], 0  ;;  %v459_v59 = vsub.f32 %v12532_v39, %v458_v46  ;;  %v137_v60 = vsel %vm87_vm0, %v31_v50, 0  ;;  %v140_v61 = vsel %vm87_vm0, %v32_v51, 0  ;;  %v143_v62 = vsel %vm87_vm0, %v33_v52, 0  ;;  %v34_v0 = vld [vmem:[%s18929_s0 + $0x98] sm:$0xff] }
  0x1a   :  { %v35_v1 = vld [vmem:[%s18929_s0 + $0xa0] sm:$0xff]  ;;  %v440_v4 = vand.u32 4294901760, %v439_v45  ;;  %v450_v8 = vand.u32 4294901760, %v449_v47  ;;  %v469_v11 = vsub.f32 %v12535_v40, %v468_v49  ;;  %v12577_v12 = vsub.f32 %v134_v55, %v12563_v57  ;;  %v36_v32 = vld [vmem:[%s18929_s0 + $0xa8] sm:$0xff] }
  0x1b   :  { %10830 = vmatmul.mubr.f32.gmra.mrb[6].mxu1 %v420_v43  ;;  %11127 = vmatmul.mubr.f32.gmra.mrb[8].mxu0 %v438_v33  ;;  %v488_v13 = vand.u32 4294901760, %v12559_v54  ;;  %v12580_v17 = vand.u32 4294901760, %v137_v60  ;;  %v12582_v18 = vand.u32 4294901760, %v140_v61  ;;  %v12584_v27 = vand.u32 4294901760, %v143_v62 }
  0x1c   :  { %19066 = vst [vmem:[#allocation20_spill] sm:$0xff] %v12577_v12  ;;  %10832 = vmatprep.mubr.f32.mxu1 %v430_v53  ;;  %11129 = vmatprep.mubr.f32.mxu0 %v448_v35  ;;  %v498_v33 = vand.u32 4294901760, %v12577_v12  ;;  %v146_v36 = vsel %vm87_vm0, %v34_v0, 0  ;;  %v149_v37 = vsel %vm87_vm0, %v35_v1, 0  ;;  %v37_v35 = vld [vmem:[%s18929_s0 + $0xb0] sm:$0xff]  ;;  %v460_v42 = vand.u32 4294901760, %v459_v59 }
  0x1d   :  { %v479_v43 = vsub.f32 %v12538_v41, %v478_v56  ;;  %v12597_v45 = vsub.f32 %v137_v60, %v12580_v17  ;;  %v12600_v47 = vsub.f32 %v140_v61, %v12582_v18  ;;  %v470_v50 = vand.u32 4294901760, %v469_v11 }
  0x1e   :  { %v12603_v51 = vsub.f32 %v143_v62, %v12584_v27  ;;  %v12605_v52 = vand.u32 4294901760, %v146_v36  ;;  %v152_v53 = vsel %vm87_vm0, %v36_v32, 0  ;;  %v489_v55 = vsub.f32 %v12559_v54, %v488_v13 }
  0x1f   :  { %19067 = vst [vmem:[#allocation21_spill] sm:$0xff] %v12597_v45  ;;  %19068 = vst [vmem:[#allocation22_spill] sm:$0xff] %v12600_v47  ;;  %10833 = vmatmul.mubr.f32.gmra.mrb[8].mxu1 %v440_v4  ;;  %11130 = vmatmul.mubr.f32.gmra.mrb[10].mxu0 %v458_v46  ;;  %v508_v59 = vand.u32 4294901760, %v12597_v45  ;;  %v12610_v60 = vand.u32 4294901760, %v149_v37  ;;  %v155_v61 = vsel %vm87_vm0, %v37_v35, 0  ;;  %v38_v46 = vld [vmem:[%s18929_s0 + $0xb8] sm:$0xff]  ;;  %v499_v62 = vsub.f32 %v12577_v12, %v498_v33 }
  0x20   :  { %19069 = vst [vmem:[#allocation23_spill] sm:$0xff] %v12603_v51  ;;  %10835 = vmatprep.mubr.f32.mxu1 %v450_v8  ;;  %11132 = vmatprep.mubr.f32.mxu0 %v468_v49  ;;  %v480_v0 = vand.u32 4294901760, %v479_v43  ;;  %v518_v1 = vand.u32 4294901760, %v12600_v47  ;;  %v12618_v4 = vand.u32 4294901760, %v152_v53  ;;  %v528_v49 = vand.u32 4294901760, %v12603_v51  ;;  %v39_v35 = vld [vmem:[%s18929_s0 + $0xc0] sm:$0xff] }
  0x21   :  { %v12622_v8 = vsub.f32 %v146_v36, %v12605_v52  ;;  %v12624_v11 = vand.u32 4294901760, %v155_v61  ;;  %v158_v32 = vsel %vm87_vm0, %v38_v46, 0  ;;  %v490_v43 = vand.u32 4294901760, %v489_v55  ;;  %v40_v36 = vld [vmem:[%s18929_s0 + $0xc8] sm:$0xff]  ;;  %v41_v46 = vld [vmem:[%s18929_s0 + $0xd0] sm:$0xff] }
  0x22   :  { %v509_v12 = vsub.f32 %v12597_v45, %v508_v59  ;;  %v519_v54 = vsub.f32 %v12600_v47, %v518_v1  ;;  %v161_v55 = vsel %vm87_vm0, %v39_v35, 0  ;;  %v529_v45 = vsub.f32 %v12603_v51, %v528_v49 }
  0x23   :  { %10836 = vmatmul.mubr.f32.gmra.mrb[10].mxu1 %v460_v42  ;;  %11133 = vmatmul.mubr.f32.gmra.mrb[12].mxu0 %v478_v56  ;;  %19070 = vst [vmem:[#allocation24_spill] sm:$0xff] %v12622_v8  ;;  %v12632_v56 = vsub.f32 %v149_v37, %v12610_v60  ;;  %v500_v42 = vand.u32 4294901760, %v499_v62  ;;  %v538_v37 = vand.u32 4294901760, %v12622_v8  ;;  %v12650_v62 = vsub.f32 %v155_v61, %v12624_v11 }
  0x24   :  { %10838 = vmatprep.mubr.f32.mxu1 %v470_v50  ;;  %11135 = vmatprep.mubr.f32.mxu0 %v488_v13  ;;  %v12642_v50 = vsub.f32 %v152_v53, %v12618_v4  ;;  %v12644_v13 = vand.u32 4294901760, %v158_v32  ;;  %v164_v41 = vsel %vm87_vm0, %v40_v36, 0  ;;  %v510_v47 = vand.u32 4294901760, %v509_v12  ;;  %v43_v12 = vld [vmem:[%s18929_s0 + $0xe0] sm:$0xff] }
  0x25   :  { %19071 = vst [vmem:[#allocation25_spill] sm:$0xff] %v12632_v56  ;;  %19073 = vst [vmem:[#allocation27_spill] sm:$0xff] %v12650_v62  ;;  %v548_v53 = vand.u32 4294901760, %v12632_v56  ;;  %v12654_v40 = vand.u32 4294901760, %v161_v55  ;;  %v167_v35 = vsel %vm87_vm0, %v41_v46, 0  ;;  %v12664_v36 = vand.u32 4294901760, %v164_v41 }
  0x26   :  { %19072 = vst [vmem:[#allocation26_spill] sm:$0xff] %v12642_v50  ;;  %v558_v51 = vand.u32 4294901760, %v12642_v50  ;;  %v12662_v61 = vsub.f32 %v158_v32, %v12644_v13  ;;  %v12671_v46 = vand.u32 4294901760, %v167_v35  ;;  %v44_v32 = vld [vmem:[%s18929_s0 + $0xe8] sm:$0xff]  ;;  %v530_v39 = vand.u32 4294901760, %v529_v45  ;;  %v45_v45 = vld [vmem:[%s18929_s0 + $0xf0] sm:$0xff] }
  0x27   :  { %10839 = vmatmul.mubr.f32.gmra.mrb[12].mxu1 %v480_v0  ;;  %11136 = vmatmul.mubr.f32.gmra.mrb[14].mxu0 %v498_v33  ;;  %v42_v33 = vld [vmem:[%s18929_s0 + $0xd8] sm:$0xff]  ;;  %v520_v0 = vand.u32 4294901760, %v519_v54  ;;  %v549_v23 = vsub.f32 %v12632_v56, %v548_v53  ;;  %v12684_v22 = vsub.f32 %v164_v41, %v12664_v36  ;;  %v176_v7 = vsel %vm87_vm0, %v44_v32, 0 }
  0x28   :  { %10841 = vmatprep.mubr.f32.mxu1 %v490_v43  ;;  %11138 = vmatprep.mubr.f32.mxu0 %v508_v59  ;;  %19074 = vst [vmem:[#allocation28_spill] sm:$0xff] %v12662_v61  ;;  %v539_v59 = vsub.f32 %v12622_v8, %v538_v37  ;;  %v568_v43 = vand.u32 4294901760, %v12650_v62  ;;  %v170_v54 = vsel %vm87_vm0, %v42_v33, 0  ;;  %v578_v8 = vand.u32 4294901760, %v12662_v61 }
  0x29   :  { %19076 = vst [vmem:[#allocation30_spill] sm:$0xff] %v12684_v22  ;;  %v12686_v33 = vand.u32 4294901760, %v170_v54  ;;  %v550_v41 = vand.u32 4294901760, %v549_v23  ;;  %v598_v23 = vand.u32 4294901760, %v12684_v22 }
  0x2b   :  { %10842 = vmatmul.mubr.f32.gmra.mrb[14].mxu1 %v500_v42  ;;  %11139 = vmatmul.mubr.f32.gmra.mrb[16].mxu0 %v518_v1  ;;  %v12679_v42 = vsub.f32 %v161_v55, %v12654_v40  ;;  %v173_v1 = vsel %vm87_vm0, %v43_v12, 0  ;;  %v569_v55 = vsub.f32 %v12650_v62, %v568_v43  ;;  %v12695_v12 = vsub.f32 %v167_v35, %v12671_v46  ;;  %v47_v35 = vld [vmem:[%s18929_s0 + $0x100] sm:$0xff] }
  0x2c   :  { %10844 = vmatprep.mubr.f32.mxu1 %v510_v47  ;;  %11141 = vmatprep.mubr.f32.mxu0 %v528_v49  ;;  %v540_v47 = vand.u32 4294901760, %v539_v59  ;;  %v559_v49 = vsub.f32 %v12642_v50, %v558_v51  ;;  %v12698_v32 = vand.u32 4294901760, %v173_v1  ;;  %v179_v59 = vsel %vm87_vm0, %v45_v45, 0 }
  0x2d   :  { %19075 = vst [vmem:[#allocation29_spill] sm:$0xff] %v12679_v42  ;;  %19077 = vst [vmem:[#allocation31_spill] sm:$0xff] %v12695_v12  ;;  %v588_v56 = vand.u32 4294901760, %v12679_v42  ;;  %v570_v50 = vand.u32 4294901760, %v569_v55  ;;  %v608_v2 = vand.u32 4294901760, %v12695_v12  ;;  %v599_v55 = vsub.f32 %v12684_v22, %v598_v23 }
  0x2e   :  { %v560_v62 = vand.u32 4294901760, %v559_v49  ;;  %v12718_v34 = vsub.f32 %v173_v1, %v12698_v32 }
  0x2f   :  { %10845 = vmatmul.mubr.f32.gmra.mrb[16].mxu1 %v520_v0  ;;  %11142 = vmatmul.mubr.f32.gmra.mrb[18].mxu0 %v538_v37  ;;  %v46_v0 = vld [vmem:[%s18929_s0 + $0xf8] sm:$0xff]  ;;  %v12703_v37 = vand.u32 4294901760, %v176_v7  ;;  %v589_v45 = vsub.f32 %v12679_v42, %v588_v56 }
  0x30   :  { %10847 = vmatprep.mubr.f32.mxu1 %v530_v39  ;;  %11144 = vmatprep.mubr.f32.mxu0 %v548_v53  ;;  %v579_v39 = vsub.f32 %v12662_v61, %v578_v8  ;;  %v12712_v53 = vsub.f32 %v170_v54, %v12686_v33  ;;  %v182_v48 = vsel %vm87_vm0, %v46_v0, 0  ;;  %19079 = vst [vmem:[#allocation33_spill] sm:$0xff] %v12718_v34  ;;  %v12720_v61 = vand.u32 4294901760, %v179_v59 }
  0x31   :  { %v185_v54 = vsel %vm87_vm0, %v47_v35, 0  ;;  %v12730_v49 = vsub.f32 %v176_v7, %v12703_v37  ;;  %v609_v0 = vsub.f32 %v12695_v12, %v608_v2  ;;  %v590_v7 = vand.u32 4294901760, %v589_v45 }
  0x32   :  { %19078 = vst [vmem:[#allocation32_spill] sm:$0xff] %v12712_v53  ;;  %v618_v1 = vand.u32 4294901760, %v12712_v53  ;;  %v12737_v35 = vand.u32 4294901760, %v185_v54  ;;  %v12743_v22 = vsub.f32 %v179_v59, %v12720_v61  ;;  %v600_v59 = vand.u32 4294901760, %v599_v55 }
  0x33   :  { %10848 = vmatmul.mubr.f32.gmra.mrb[18].mxu1 %v540_v47  ;;  %11145 = vmatmul.mubr.f32.gmra.mrb[20].mxu0 %v558_v51  ;;  %v48_v51 = vld [vmem:[%s18929_s0 + $0x108] sm:$0xff]  ;;  %v49_v47 = vld [vmem:[%s18929_s0 + $0x110] sm:$0xff]  ;;  %19080 = vst [vmem:[#allocation34_spill] sm:$0xff] %v12730_v49  ;;  %v638_v25 = vand.u32 4294901760, %v12730_v49 }
  0x34   :  { %10850 = vmatprep.mubr.f32.mxu1 %v550_v41  ;;  %11147 = vmatprep.mubr.f32.mxu0 %v568_v43  ;;  %v580_v43 = vand.u32 4294901760, %v579_v39  ;;  %v12734_v41 = vand.u32 4294901760, %v182_v48  ;;  %19081 = vst [vmem:[#allocation35_spill] sm:$0xff] %v12737_v35  ;;  %v188_v42 = vsel %vm87_vm0, %v48_v51, 0  ;;  %v191_v29 = vsel %vm87_vm0, %v49_v47, 0  ;;  %19082 = vst [vmem:[#allocation36_spill] sm:$0xff] %v12743_v22 }
  0x35   :  { %v628_v39 = vand.u32 4294901760, %v12718_v34  ;;  %v619_v51 = vsub.f32 %v12712_v53, %v618_v1  ;;  %v12758_v45 = vand.u32 4294901760, %v191_v29  ;;  %v610_v47 = vand.u32 4294901760, %v609_v0 }
  0x36   :  { %v12761_v12 = vsub.f32 %v185_v54, %v12737_v35  ;;  %v648_v53 = vand.u32 4294901760, %v12743_v22 }
  0x37   :  { %10851 = vmatmul.mubr.f32.gmra.mrb[20].mxu1 %v560_v62  ;;  %11148 = vmatmul.mubr.f32.gmra.mrb[22].mxu0 %v578_v8  ;;  %v50_v8 = vld [vmem:[%s18929_s0 + $0x118] sm:$0xff]  ;;  %v51_v62 = vld [vmem:[%s18929_s0 + $0x120] sm:$0xff]  ;;  %19085 = vst [vmem:[#allocation39_spill] sm:$0xff] %v12758_v45  ;;  %v629_v24 = vsub.f32 %v12718_v34, %v628_v39  ;;  %v620_v55 = vand.u32 4294901760, %v619_v51 }
  0x38   :  { %10853 = vmatprep.mubr.f32.mxu1 %v570_v50  ;;  %11150 = vmatprep.mubr.f32.mxu0 %v588_v56  ;;  %v12754_v56 = vsub.f32 %v182_v48, %v12734_v41  ;;  %v12756_v50 = vand.u32 4294901760, %v188_v42  ;;  %19086 = vst [vmem:[#allocation40_spill] sm:$0xff] %v12761_v12  ;;  %v194_v48 = vsel %vm87_vm0, %v50_v8, 0  ;;  %v197_v20 = vsel %vm87_vm0, %v51_v62, 0  ;;  %v54_v34 = vld [vmem:[%s18929_s0 + $0x138] sm:$0xff] }
  0x39   :  { %v668_v8 = vand.u32 4294901760, %v12761_v12  ;;  %v12782_v62 = vand.u32 4294901760, %v194_v48 }
  0x3a   :  { %19083 = vst [vmem:[#allocation37_spill] sm:$0xff] %v12754_v56  ;;  %19084 = vst [vmem:[#allocation38_spill] sm:$0xff] %v12756_v50  ;;  %v658_v54 = vand.u32 4294901760, %v12754_v56  ;;  %v12773_v0 = vsub.f32 %v188_v42, %v12756_v50  ;;  %v630_v42 = vand.u32 4294901760, %v629_v24  ;;  %v55_v24 = vld [vmem:[%s18929_s0 + $0x140] sm:$0xff] }
  0x3b   :  { %10854 = vmatmul.mubr.f32.gmra.mrb[22].mxu1 %v580_v43  ;;  %11151 = vmatmul.mubr.f32.gmra.mrb[24].mxu0 %v598_v23  ;;  %v52_v43 = vld [vmem:[%s18929_s0 + $0x128] sm:$0xff]  ;;  %v639_v23 = vsub.f32 %v12730_v49, %v638_v25  ;;  %19089 = vst [vmem:[#allocation43_spill] sm:$0xff] %v12782_v62  ;;  %v12784_v49 = vand.u32 4294901760, %v197_v20 }
  0x3c   :  { %10856 = vmatprep.mubr.f32.mxu1 %v590_v7  ;;  %11153 = vmatprep.mubr.f32.mxu0 %v608_v2  ;;  %19087 = vst [vmem:[#allocation41_spill] sm:$0xff] %v12773_v0  ;;  %v12776_v2 = vsub.f32 %v191_v29, %v12758_v45  ;;  %v53_v7 = vld [vmem:[%s18929_s0 + $0x130] sm:$0xff]  ;;  %v200_v51 = vsel %vm87_vm0, %v52_v43, 0  ;;  %v649_v29 = vsub.f32 %v12743_v22, %v648_v53  ;;  %v678_v45 = vand.u32 4294901760, %v12773_v0 }
  0x3d   :  { %19090 = vst [vmem:[#allocation44_spill] sm:$0xff] %v12784_v49  ;;  %v640_v19 = vand.u32 4294901760, %v639_v23  ;;  %v12795_v35 = vand.u32 4294901760, %v200_v51  ;;  %v12805_v43 = vsub.f32 %v197_v20, %v12784_v49  ;;  %v206_v23 = vsel %vm87_vm0, %v54_v34, 0 }
  0x3e   :  { %19088 = vst [vmem:[#allocation42_spill] sm:$0xff] %v12776_v2  ;;  %v688_v50 = vand.u32 4294901760, %v12776_v2  ;;  %v209_v22 = vsel %vm87_vm0, %v55_v24, 0  ;;  %v679_v20 = vsub.f32 %v12773_v0, %v678_v45 }
  0x3f   :  { %10857 = vmatmul.mubr.f32.gmra.mrb[24].mxu1 %v600_v59  ;;  %11154 = vmatmul.mubr.f32.gmra.mrb[26].mxu0 %v618_v1  ;;  %v203_v1 = vsel %vm87_vm0, %v53_v7, 0  ;;  %v659_v59 = vsub.f32 %v12754_v56, %v658_v54  ;;  %19091 = vst [vmem:[#allocation45_spill] sm:$0xff] %v12795_v35  ;;  %19093 = vst [vmem:[#allocation47_spill] sm:$0xff] %v12805_v43  ;;  %v650_v7 = vand.u32 4294901760, %v649_v29  ;;  %v12829_v0 = vand.u32 4294901760, %v209_v22 }
  0x40   :  { %10859 = vmatprep.mubr.f32.mxu1 %v610_v47  ;;  %11156 = vmatprep.mubr.f32.mxu0 %v628_v39  ;;  %v669_v39 = vsub.f32 %v12761_v12, %v668_v8  ;;  %v12802_v47 = vsub.f32 %v194_v48, %v12782_v62  ;;  %v12808_v56 = vand.u32 4294901760, %v203_v1  ;;  %v57_v48 = vld [vmem:[%s18929_s0 + $0x150] sm:$0xff]  ;;  %v12820_v34 = vsub.f32 %v200_v51, %v12795_v35 }
  0x41   :  { %v708_v12 = vand.u32 4294901760, %v12805_v43  ;;  %19098 = vst [vmem:[#allocation52_spill] sm:$0xff] %v12829_v0 }
  0x42   :  { %19092 = vst [vmem:[#allocation46_spill] sm:$0xff] %v12802_v47  ;;  %19094 = vst [vmem:[#allocation48_spill] sm:$0xff] %v12808_v56  ;;  %v670_v29 = vand.u32 4294901760, %v669_v39  ;;  %v698_v24 = vand.u32 4294901760, %v12802_v47  ;;  %v12827_v49 = vsub.f32 %v203_v1, %v12808_v56 }
  0x43   :  { %10860 = vmatmul.mubr.f32.gmra.mrb[26].mxu1 %v620_v55  ;;  %11157 = vmatmul.mubr.f32.gmra.mrb[28].mxu0 %v638_v25  ;;  %v56_v25 = vld [vmem:[%s18929_s0 + $0x148] sm:$0xff]  ;;  %v689_v55 = vsub.f32 %v12776_v2, %v688_v50  ;;  %19095 = vst [vmem:[#allocation49_spill] sm:$0xff] %v12820_v34  ;;  %v215_v2 = vsel %vm87_vm0, %v57_v48, 0 }
  0x44   :  { %10862 = vmatprep.mubr.f32.mxu1 %v630_v42  ;;  %11159 = vmatprep.mubr.f32.mxu0 %v648_v53  ;;  %v12822_v53 = vand.u32 4294901760, %v206_v23  ;;  %v660_v42 = vand.u32 4294901760, %v659_v59  ;;  %19097 = vst [vmem:[#allocation51_spill] sm:$0xff] %v12827_v49  ;;  %v212_v51 = vsel %vm87_vm0, %v56_v25, 0  ;;  %v680_v59 = vand.u32 4294901760, %v679_v20  ;;  %v60_v20 = vld [vmem:[%s18929_s0 + $0x168] sm:$0xff] }
  0x45   :  { %v690_v39 = vand.u32 4294901760, %v689_v55  ;;  %v12844_v25 = vand.u32 4294901760, %v212_v51  ;;  %v12846_v48 = vand.u32 4294901760, %v215_v2  ;;  %v709_v55 = vsub.f32 %v12805_v43, %v708_v12 }
  0x46   :  { %19096 = vst [vmem:[#allocation50_spill] sm:$0xff] %v12822_v53  ;;  %v12841_v1 = vsub.f32 %v206_v23, %v12822_v53  ;;  %v728_v23 = vand.u32 4294901760, %v12827_v49  ;;  %v224_v35 = vsel %vm87_vm0, %v60_v20, 0 }
  0x47   :  { %10863 = vmatmul.mubr.f32.gmra.mrb[28].mxu1 %v640_v19  ;;  %11160 = vmatmul.mubr.f32.gmra.mrb[30].mxu0 %v658_v54  ;;  %v58_v19 = vld [vmem:[%s18929_s0 + $0x158] sm:$0xff]  ;;  %v59_v54 = vld [vmem:[%s18929_s0 + $0x160] sm:$0xff]  ;;  %19100 = vst [vmem:[#allocation54_spill] sm:$0xff] %v12844_v25  ;;  %19101 = vst [vmem:[#allocation55_spill] sm:$0xff] %v12846_v48  ;;  %v710_v43 = vand.u32 4294901760, %v709_v55 }
  0x48   :  { %10865 = vmatprep.mubr.f32.mxu1 %v650_v7  ;;  %11162 = vmatprep.mubr.f32.mxu0 %v668_v8  ;;  %v718_v8 = vand.u32 4294901760, %v12820_v34  ;;  %19099 = vst [vmem:[#allocation53_spill] sm:$0xff] %v12841_v1  ;;  %v699_v7 = vsub.f32 %v12802_v47, %v698_v24  ;;  %v218_v56 = vsel %vm87_vm0, %v58_v19, 0  ;;  %v738_v53 = vand.u32 4294901760, %v12841_v1 }
  0x49   :  { %v12860_v19 = vand.u32 4294901760, %v218_v56  ;;  %v729_v20 = vsub.f32 %v12827_v49, %v728_v23 }
  0x4a   :  { %v719_v47 = vsub.f32 %v12820_v34, %v718_v8 }
  0x4b   :  { %10866 = vmatmul.mubr.f32.gmra.mrb[30].mxu1 %v660_v42  ;;  %11163 = vmatmul.mubr.f32.gmra.mrb[32].mxu0 %v678_v45  ;;  %v12855_v45 = vsub.f32 %v209_v22, %v12829_v0  ;;  %v221_v42 = vsel %vm87_vm0, %v59_v54, 0  ;;  %19103 = vst [vmem:[#allocation57_spill] sm:$0xff] %v12860_v19  ;;  %v12867_v22 = vsub.f32 %v212_v51, %v12844_v25 }
  0x4c   :  { %10868 = vmatprep.mubr.f32.mxu1 %v670_v29  ;;  %11165 = vmatprep.mubr.f32.mxu0 %v688_v50  ;;  %v61_v50 = vld [vmem:[%s18929_s0 + $0x170] sm:$0xff]  ;;  %v700_v29 = vand.u32 4294901760, %v699_v7  ;;  %v12870_v54 = vsub.f32 %v215_v2, %v12846_v48  ;;  %v12872_v34 = vand.u32 4294901760, %v221_v42  ;;  %v720_v7 = vand.u32 4294901760, %v719_v47 }
  0x4d   :  { %19102 = vst [vmem:[#allocation56_spill] sm:$0xff] %v12855_v45  ;;  %19104 = vst [vmem:[#allocation58_spill] sm:$0xff] %v12867_v22  ;;  %v748_v0 = vand.u32 4294901760, %v12855_v45  ;;  %v227_v51 = vsel %vm87_vm0, %v61_v50, 0  ;;  %v739_v2 = vsub.f32 %v12841_v1, %v738_v53  ;;  %v12884_v48 = vsub.f32 %v218_v56, %v12860_v19 }
  0x4e   :  { %19105 = vst [vmem:[#allocation59_spill] sm:$0xff] %v12870_v54  ;;  %19106 = vst [vmem:[#allocation60_spill] sm:$0xff] %v12872_v34  ;;  %v768_v55 = vand.u32 4294901760, %v12870_v54  ;;  %v12892_v49 = vsub.f32 %v221_v42, %v12872_v34  ;;  %v730_v50 = vand.u32 4294901760, %v729_v20  ;;  %v12896_v1 = vand.u32 4294901760, %v227_v51  ;;  %v65_v42 = vld [vmem:[%s18929_s0 + $0x190] sm:$0xff] }
  0x4f   :  { %10869 = vmatmul.mubr.f32.gmra.mrb[32].mxu1 %v680_v59  ;;  %11166 = vmatmul.mubr.f32.gmra.mrb[34].mxu0 %v698_v24  ;;  %v62_v24 = vld [vmem:[%s18929_s0 + $0x178] sm:$0xff]  ;;  %v12879_v59 = vand.u32 4294901760, %v224_v35  ;;  %19108 = vst [vmem:[#allocation62_spill] sm:$0xff] %v12884_v48  ;;  %v749_v56 = vsub.f32 %v12855_v45, %v748_v0  ;;  %v239_v25 = vsel %vm87_vm0, %v65_v42, 0 }
  0x50   :  { %10871 = vmatprep.mubr.f32.mxu1 %v690_v39  ;;  %11168 = vmatprep.mubr.f32.mxu0 %v708_v12  ;;  %v63_v12 = vld [vmem:[%s18929_s0 + $0x180] sm:$0xff]  ;;  %v758_v39 = vand.u32 4294901760, %v12867_v22  ;;  %19109 = vst [vmem:[#allocation63_spill] sm:$0xff] %v12892_v49  ;;  %v230_v47 = vsel %vm87_vm0, %v62_v24, 0  ;;  %19110 = vst [vmem:[#allocation64_spill] sm:$0xff] %v12896_v1  ;;  %v769_v45 = vsub.f32 %v12870_v54, %v768_v55 }
  0x51   :  { %19107 = vst [vmem:[#allocation61_spill] sm:$0xff] %v12879_v59  ;;  %v233_v19 = vsel %vm87_vm0, %v63_v12, 0  ;;  %v12909_v20 = vand.u32 4294901760, %v230_v47  ;;  %v750_v12 = vand.u32 4294901760, %v749_v56  ;;  %v12916_v34 = vsub.f32 %v227_v51, %v12896_v1  ;;  %v68_v1 = vld [vmem:[%s18929_s0 + $0x1a8] sm:$0xff] }
  0x52   :  { %v759_v24 = vsub.f32 %v12867_v22, %v758_v39  ;;  %v770_v42 = vand.u32 4294901760, %v769_v45  ;;  %v12935_v22 = vand.u32 4294901760, %v239_v25  ;;  %v69_v45 = vld [vmem:[%s18929_s0 + $0x1b0] sm:$0xff] }
  0x53   :  { %10872 = vmatmul.mubr.f32.gmra.mrb[34].mxu1 %v700_v29  ;;  %11169 = vmatmul.mubr.f32.gmra.mrb[36].mxu0 %v718_v8  ;;  %v64_v8 = vld [vmem:[%s18929_s0 + $0x188] sm:$0xff]  ;;  %v12902_v29 = vsub.f32 %v224_v35, %v12879_v59  ;;  %19112 = vst [vmem:[#allocation66_spill] sm:$0xff] %v12909_v20  ;;  %v788_v35 = vand.u32 4294901760, %v12892_v49  ;;  %19113 = vst [vmem:[#allocation67_spill] sm:$0xff] %v12916_v34 }
  0x54   :  { %10874 = vmatprep.mubr.f32.mxu1 %v710_v43  ;;  %11171 = vmatprep.mubr.f32.mxu0 %v728_v23  ;;  %v740_v43 = vand.u32 4294901760, %v739_v2  ;;  %v778_v23 = vand.u32 4294901760, %v12884_v48  ;;  %v236_v59 = vsel %vm87_vm0, %v64_v8, 0  ;;  %v12918_v2 = vand.u32 4294901760, %v233_v19  ;;  %v67_v8 = vld [vmem:[%s18929_s0 + $0x1a0] sm:$0xff]  ;;  %19117 = vst [vmem:[#allocation71_spill] sm:$0xff] %v12935_v22 }
  0x55   :  { %19111 = vst [vmem:[#allocation65_spill] sm:$0xff] %v12902_v29  ;;  %v12932_v51 = vand.u32 4294901760, %v236_v59  ;;  %v760_v56 = vand.u32 4294901760, %v759_v24  ;;  %v789_v54 = vsub.f32 %v12892_v49, %v788_v35 }
  0x56   :  { %19114 = vst [vmem:[#allocation68_spill] sm:$0xff] %v12918_v2 }
  0x57   :  { %10875 = vmatmul.mubr.f32.gmra.mrb[36].mxu1 %v720_v7  ;;  %11172 = vmatmul.mubr.f32.gmra.mrb[38].mxu0 %v738_v53  ;;  %v798_v53 = vand.u32 4294901760, %v12902_v29  ;;  %v66_v7 = vld [vmem:[%s18929_s0 + $0x198] sm:$0xff]  ;;  %19116 = vst [vmem:[#allocation70_spill] sm:$0xff] %v12932_v51 }
  0x58   :  { %10877 = vmatprep.mubr.f32.mxu1 %v730_v50  ;;  %11174 = vmatprep.mubr.f32.mxu0 %v748_v0  ;;  %v779_v0 = vsub.f32 %v12884_v48, %v778_v23  ;;  %v12930_v50 = vsub.f32 %v230_v47, %v12909_v20  ;;  %v808_v48 = vand.u32 4294901760, %v12916_v34  ;;  %v12942_v47 = vsub.f32 %v233_v19, %v12918_v2 }
  0x59   :  { %v799_v24 = vsub.f32 %v12902_v29, %v798_v53  ;;  %v12956_v19 = vsub.f32 %v239_v25, %v12935_v22  ;;  %v251_v2 = vsel %vm87_vm0, %v69_v45, 0 }
  0x5a   :  { %19115 = vst [vmem:[#allocation69_spill] sm:$0xff] %v12930_v50  ;;  %19118 = vst [vmem:[#allocation72_spill] sm:$0xff] %v12942_v47  ;;  %v780_v49 = vand.u32 4294901760, %v779_v0  ;;  %v818_v20 = vand.u32 4294901760, %v12930_v50  ;;  %v790_v0 = vand.u32 4294901760, %v789_v54  ;;  %v809_v29 = vsub.f32 %v12916_v34, %v808_v48  ;;  %v71_v54 = vld [vmem:[%s18929_s0 + $0x1c0] sm:$0xff] }
  0x5b   :  { %10878 = vmatmul.mubr.f32.gmra.mrb[38].mxu1 %v740_v43  ;;  %11175 = vmatmul.mubr.f32.gmra.mrb[40].mxu0 %v758_v39  ;;  %v242_v43 = vsel %vm87_vm0, %v66_v7, 0  ;;  %v245_v39 = vsel %vm87_vm0, %v67_v8, 0  ;;  %19120 = vst [vmem:[#allocation74_spill] sm:$0xff] %v12956_v19  ;;  %v257_v62 = vsel %vm87_vm0, %v71_v54, 0 }
  0x5c   :  { %10880 = vmatprep.mubr.f32.mxu1 %v750_v12  ;;  %11177 = vmatprep.mubr.f32.mxu0 %v768_v55  ;;  %v12952_v55 = vsub.f32 %v236_v59, %v12932_v51  ;;  %v248_v12 = vsel %vm87_vm0, %v68_v1, 0  ;;  %v12958_v7 = vand.u32 4294901760, %v242_v43  ;;  %v12960_v8 = vand.u32 4294901760, %v245_v39  ;;  %v70_v1 = vld [vmem:[%s18929_s0 + $0x1b8] sm:$0xff] }
  0x5d   :  { %v828_v59 = vand.u32 4294901760, %v12942_v47  ;;  %v819_v25 = vsub.f32 %v12930_v50, %v818_v20  ;;  %v12970_v22 = vand.u32 4294901760, %v248_v12  ;;  %v12972_v51 = vand.u32 4294901760, %v251_v2 }
  0x5e   :  { %19119 = vst [vmem:[#allocation73_spill] sm:$0xff] %v12952_v55  ;;  %19121 = vst [vmem:[#allocation75_spill] sm:$0xff] %v12960_v8  ;;  %v12982_v45 = vsub.f32 %v245_v39, %v12960_v8  ;;  %v810_v50 = vand.u32 4294901760, %v809_v29 }
  0x5f   :  { %10881 = vmatmul.mubr.f32.gmra.mrb[40].mxu1 %v760_v56  ;;  %11178 = vmatmul.mubr.f32.gmra.mrb[42].mxu0 %v778_v23  ;;  %v800_v23 = vand.u32 4294901760, %v799_v24  ;;  %v838_v56 = vand.u32 4294901760, %v12952_v55  ;;  %19122 = vst [vmem:[#allocation76_spill] sm:$0xff] %v12970_v22  ;;  %19123 = vst [vmem:[#allocation77_spill] sm:$0xff] %v12972_v51  ;;  %v254_v24 = vsel %vm87_vm0, %v70_v1, 0  ;;  %v829_v34 = vsub.f32 %v12942_v47, %v828_v59 }
  0x60   :  { %10883 = vmatprep.mubr.f32.mxu1 %v770_v42  ;;  %11180 = vmatprep.mubr.f32.mxu0 %v788_v35  ;;  %v848_v35 = vand.u32 4294901760, %v12956_v19  ;;  %v12979_v42 = vsub.f32 %v242_v43, %v12958_v7  ;;  %19125 = vst [vmem:[#allocation79_spill] sm:$0xff] %v12982_v45  ;;  %v820_v43 = vand.u32 4294901760, %v819_v25  ;;  %v12994_v39 = vsub.f32 %v248_v12, %v12970_v22 }
  0x61   :  { %v839_v29 = vsub.f32 %v12952_v55, %v838_v56  ;;  %v868_v47 = vand.u32 4294901760, %v12982_v45  ;;  %v830_v25 = vand.u32 4294901760, %v829_v34  ;;  %v13005_v12 = vand.u32 4294901760, %v257_v62  ;;  %v75_v34 = vld [vmem:[%s18929_s0 + $0x1e0] sm:$0xff] }
  0x62   :  { %19124 = vst [vmem:[#allocation78_spill] sm:$0xff] %v12979_v42  ;;  %19126 = vst [vmem:[#allocation80_spill] sm:$0xff] %v12994_v39  ;;  %v858_v1 = vand.u32 4294901760, %v12979_v42  ;;  %v849_v54 = vsub.f32 %v12956_v19, %v848_v35 }
  0x63   :  { %10884 = vmatmul.mubr.f32.gmra.mrb[42].mxu1 %v780_v49  ;;  %11181 = vmatmul.mubr.f32.gmra.mrb[44].mxu0 %v798_v53  ;;  %v72_v49 = vld [vmem:[%s18929_s0 + $0x1c8] sm:$0xff]  ;;  %v73_v53 = vld [vmem:[%s18929_s0 + $0x1d0] sm:$0xff]  ;;  %19129 = vst [vmem:[#allocation83_spill] sm:$0xff] %v13005_v12  ;;  %v869_v8 = vsub.f32 %v12982_v45, %v868_v47 }
  0x64   :  { %10886 = vmatprep.mubr.f32.mxu1 %v790_v0  ;;  %11183 = vmatprep.mubr.f32.mxu0 %v808_v48  ;;  %v12997_v0 = vsub.f32 %v251_v2, %v12972_v51  ;;  %v12999_v48 = vand.u32 4294901760, %v254_v24  ;;  %v260_v2 = vsel %vm87_vm0, %v72_v49, 0  ;;  %v263_v51 = vsel %vm87_vm0, %v73_v53, 0 }
  0x65   :  { %v13021_v49 = vand.u32 4294901760, %v260_v2  ;;  %v13023_v53 = vand.u32 4294901760, %v263_v51  ;;  %v850_v22 = vand.u32 4294901760, %v849_v54  ;;  %v77_v54 = vld [vmem:[%s18929_s0 + $0x1f0] sm:$0xff] }
  0x66   :  { %19127 = vst [vmem:[#allocation81_spill] sm:$0xff] %v12997_v0  ;;  %19128 = vst [vmem:[#allocation82_spill] sm:$0xff] %v12999_v48  ;;  %v888_v55 = vand.u32 4294901760, %v12997_v0  ;;  %v13015_v19 = vsub.f32 %v254_v24, %v12999_v48  ;;  %v13027_v24 = vsub.f32 %v257_v62, %v13005_v12 }
  0x67   :  { %10887 = vmatmul.mubr.f32.gmra.mrb[44].mxu1 %v800_v23  ;;  %11184 = vmatmul.mubr.f32.gmra.mrb[46].mxu0 %v818_v20  ;;  %v74_v20 = vld [vmem:[%s18929_s0 + $0x1d8] sm:$0xff]  ;;  %v878_v23 = vand.u32 4294901760, %v12994_v39  ;;  %19131 = vst [vmem:[#allocation85_spill] sm:$0xff] %v13023_v53 }
  0x68   :  { %10889 = vmatprep.mubr.f32.mxu1 %v810_v50  ;;  %11186 = vmatprep.mubr.f32.mxu0 %v828_v59  ;;  %19130 = vst [vmem:[#allocation84_spill] sm:$0xff] %v13015_v19  ;;  %v840_v50 = vand.u32 4294901760, %v839_v29  ;;  %v859_v59 = vsub.f32 %v12979_v42, %v858_v1  ;;  %19132 = vst [vmem:[#allocation86_spill] sm:$0xff] %v13027_v24  ;;  %v266_v48 = vsel %vm87_vm0, %v74_v20, 0  ;;  %v898_v42 = vand.u32 4294901760, %v13015_v19 }
  0x69   :  { %v879_v29 = vsub.f32 %v12994_v39, %v878_v23  ;;  %v13044_v20 = vsub.f32 %v263_v51, %v13023_v53  ;;  %v870_v39 = vand.u32 4294901760, %v869_v8 }
  0x6a   :  { %v860_v62 = vand.u32 4294901760, %v859_v59  ;;  %v899_v59 = vsub.f32 %v13015_v19, %v898_v42 }
  0x6b   :  { %10890 = vmatmul.mubr.f32.gmra.mrb[46].mxu1 %v820_v43  ;;  %11187 = vmatmul.mubr.f32.gmra.mrb[48].mxu0 %v838_v56  ;;  %v269_v43 = vsel %vm87_vm0, %v75_v34, 0  ;;  %v76_v56 = vld [vmem:[%s18929_s0 + $0x1e8] sm:$0xff]  ;;  %19134 = vst [vmem:[#allocation88_spill] sm:$0xff] %v13044_v20  ;;  %v13046_v34 = vand.u32 4294901760, %v266_v48 }
  0x6c   :  { %10892 = vmatprep.mubr.f32.mxu1 %v830_v25  ;;  %11189 = vmatprep.mubr.f32.mxu0 %v848_v35  ;;  %v889_v35 = vsub.f32 %v12997_v0, %v888_v55  ;;  %v13041_v25 = vsub.f32 %v260_v2, %v13021_v49  ;;  %v908_v0 = vand.u32 4294901760, %v13027_v24  ;;  %v13049_v45 = vand.u32 4294901760, %v269_v43  ;;  %v78_v2 = vld [vmem:[%s18929_s0 + $0x1f8] sm:$0xff] }
  0x6d   :  { %19135 = vst [vmem:[#allocation89_spill] sm:$0xff] %v13046_v34  ;;  %v272_v12 = vsel %vm87_vm0, %v76_v56, 0  ;;  %v13060_v8 = vsub.f32 %v266_v48, %v13046_v34 }
  0x6e   :  { %19133 = vst [vmem:[#allocation87_spill] sm:$0xff] %v13041_v25  ;;  %19136 = vst [vmem:[#allocation90_spill] sm:$0xff] %v13049_v45  ;;  %v890_v51 = vand.u32 4294901760, %v889_v35  ;;  %v13062_v56 = vand.u32 4294901760, %v272_v12 }
  0x6f   :  { %10893 = vmatmul.mubr.f32.gmra.mrb[48].mxu1 %v840_v50  ;;  %11190 = vmatmul.mubr.f32.gmra.mrb[50].mxu0 %v858_v1  ;;  %v275_v1 = vsel %vm87_vm0, %v77_v54, 0  ;;  %v880_v50 = vand.u32 4294901760, %v879_v29  ;;  %19137 = vst [vmem:[#allocation91_spill] sm:$0xff] %v13060_v8  ;;  %v909_v54 = vsub.f32 %v13027_v24, %v908_v0  ;;  %v13066_v29 = vsub.f32 %v269_v43, %v13049_v45 }
  0x70   :  { %10895 = vmatprep.mubr.f32.mxu1 %v850_v22  ;;  %11192 = vmatprep.mubr.f32.mxu0 %v868_v47  ;;  %v918_v22 = vand.u32 4294901760, %v13041_v25  ;;  %v928_v47 = vand.u32 4294901760, %v13044_v20  ;;  %19138 = vst [vmem:[#allocation92_spill] sm:$0xff] %v13062_v56  ;;  %v13068_v35 = vand.u32 4294901760, %v275_v1  ;;  %v938_v48 = vand.u32 4294901760, %v13060_v8 }
  0x71   :  { %19139 = vst [vmem:[#allocation93_spill] sm:$0xff] %v13066_v29  ;;  %v13074_v34 = vsub.f32 %v272_v12, %v13062_v56  ;;  %v948_v24 = vand.u32 4294901760, %v13066_v29 }
  0x72   :  { %v919_v19 = vsub.f32 %v13041_v25, %v918_v22  ;;  %v929_v43 = vsub.f32 %v13044_v20, %v928_v47  ;;  %v19166_v20 = vld [vmem:[#allocation83_spill] sm:$0xff] }
  0x73   :  { %10896 = vmatmul.mubr.f32.gmra.mrb[50].mxu1 %v860_v62  ;;  %11193 = vmatmul.mubr.f32.gmra.mrb[52].mxu0 %v878_v23  ;;  %v278_v23 = vsel %vm87_vm0, %v78_v2, 0  ;;  %v900_v62 = vand.u32 4294901760, %v899_v59  ;;  %19140 = vst [vmem:[#allocation94_spill] sm:$0xff] %v13074_v34  ;;  %v13081_v2 = vsub.f32 %v275_v1, %v13068_v35  ;;  %v958_v12 = vand.u32 4294901760, %v13074_v34 }
  0x74   :  { %10898 = vmatprep.mubr.f32.mxu1 %v870_v39  ;;  %11195 = vmatprep.mubr.f32.mxu0 %v888_v55  ;;  %v13076_v55 = vand.u32 4294901760, %v278_v23  ;;  %v910_v39 = vand.u32 4294901760, %v909_v54  ;;  %v19167_v25 = vld [vmem:[#allocation89_spill] sm:$0xff] }
  0x75   :  { %19141 = vst [vmem:[#allocation95_spill] sm:$0xff] %v13081_v2  ;;  %v968_v54 = vand.u32 4294901760, %v13081_v2 }
  0x76   :  { %v13086_v59 = vsub.f32 %v278_v23, %v13076_v55 }
  0x77   :  { %10899 = vmatmul.mubr.f32.gmra.mrb[52].mxu1 %v880_v50  ;;  %11196 = vmatmul.mubr.f32.gmra.mrb[54].mxu0 %v898_v42  ;;  %v920_v42 = vand.u32 4294901760, %v919_v19  ;;  %v939_v50 = vsub.f32 %v13060_v8, %v938_v48  ;;  %v969_v23 = vsub.f32 %v13081_v2, %v968_v54  ;;  %v19162_v2 = vld [vmem:[#allocation75_spill] sm:$0xff]  ;;  %v19165_v8 = vld [vmem:[#allocation82_spill] sm:$0xff] }
  0x78   :  { %10901 = vmatprep.mubr.f32.mxu1 %v890_v51  ;;  %11198 = vmatprep.mubr.f32.mxu0 %v908_v0  ;;  %19142 = vst [vmem:[#allocation96_spill] sm:$0xff] %v13086_v59  ;;  %v930_v0 = vand.u32 4294901760, %v929_v43  ;;  %v949_v51 = vsub.f32 %v13066_v29, %v948_v24  ;;  %v978_v19 = vand.u32 4294901760, %v13086_v59  ;;  %v19164_v29 = vld [vmem:[#allocation77_spill] sm:$0xff] }
  0x79   :  { %v940_v1 = vand.u32 4294901760, %v939_v50  ;;  %v970_v43 = vand.u32 4294901760, %v969_v23  ;;  %v19147_v50 = vld [vmem:[#allocation44_spill] sm:$0xff]  ;;  %v19156_v23 = vld [vmem:[#allocation61_spill] sm:$0xff] }
  0x7b   :  { %10902 = vmatmul.mubr.f32.gmra.mrb[54].mxu1 %v900_v62  ;;  %11199 = vmatmul.mubr.f32.gmra.mrb[56].mxu0 %v918_v22  ;;  %v959_v22 = vsub.f32 %v13074_v34, %v958_v12  ;;  %v950_v62 = vand.u32 4294901760, %v949_v51  ;;  %v19150_v51 = vld [vmem:[#allocation50_spill] sm:$0xff]  ;;  %v19163_v34 = vld [vmem:[#allocation76_spill] sm:$0xff] }
  0x7c   :  { %10904 = vmatprep.mubr.f32.mxu1 %v910_v39  ;;  %11201 = vmatprep.mubr.f32.mxu0 %v928_v47  ;;  %v979_v39 = vsub.f32 %v13086_v59, %v978_v19  ;;  %v19161_v59 = vld [vmem:[#allocation71_spill] sm:$0xff] }
  0x7d   :  { %v960_v47 = vand.u32 4294901760, %v959_v22  ;;  %v19153_v22 = vld [vmem:[#allocation55_spill] sm:$0xff] }
  0x7f   :  { %10905 = vmatmul.mubr.f32.gmra.mrb[56].mxu1 %v920_v42  ;;  %11202 = vmatmul.mubr.f32.gmra.mrb[58].mxu0 %v938_v48  ;;  %v980_v48 = vand.u32 4294901760, %v979_v39  ;;  %v19146_v42 = vld [vmem:[#allocation43_spill] sm:$0xff]  ;;  %v19158_v39 = vld [vmem:[#allocation66_spill] sm:$0xff] }
  0x80   :  { %10907 = vmatprep.mubr.f32.mxu1 %v930_v0  ;;  %11204 = vmatprep.mubr.f32.mxu0 %v948_v24  ;;  %v19145_v24 = vld [vmem:[#allocation39_spill] sm:$0xff]  ;;  %v19149_v0 = vld [vmem:[#allocation48_spill] sm:$0xff] }
  0x83   :  { %10908 = vmatmul.mubr.f32.gmra.mrb[58].mxu1 %v940_v1  ;;  %11205 = vmatmul.mubr.f32.gmra.mrb[60].mxu0 %v958_v12  ;;  %v19148_v12 = vld [vmem:[#allocation45_spill] sm:$0xff]  ;;  %v19152_v1 = vld [vmem:[#allocation54_spill] sm:$0xff] }
  0x84   :  { %10910 = vmatprep.mubr.f32.mxu1 %v950_v62  ;;  %11207 = vmatprep.mubr.f32.mxu0 %v968_v54  ;;  %v19151_v54 = vld [vmem:[#allocation52_spill] sm:$0xff] }
  0x85   :  { %v19155_v62 = vld [vmem:[#allocation60_spill] sm:$0xff] }
  0x87   :  { %10911 = vmatmul.mubr.f32.gmra.mrb[60].mxu1 %v960_v47  ;;  %11208 = vmatmul.mubr.f32.gmra.mrb[62].mxu0 %v978_v19  ;;  %v19154_v19 = vld [vmem:[#allocation57_spill] sm:$0xff]  ;;  %v19157_v47 = vld [vmem:[#allocation64_spill] sm:$0xff] }
  0x88   :  { %10913 = vmatprep.mubr.f32.mxu1 %v970_v43  ;;  %11212 = vmatprep.mubr.f32.mxu0 %v12396_v9  ;;  %v19159_v43 = vld [vmem:[#allocation68_spill] sm:$0xff] }
  0x8b   :  { %10914 = vmatmul.mubr.f32.gmra.mrb[62].mxu1 %v980_v48  ;;  %11213 = vmatmul.mubr.f32.vlgmr.msra.gmra.mrb[0].mxu0 %v12398_v10  ;;  %v19160_v48 = vld [vmem:[#allocation70_spill] sm:$0xff] }
  0x8c   :  { %10918 = vmatprep.mubr.f32.mxu1 %v12396_v9  ;;  %11215 = vmatprep.mubr.f32.mxu0 %v12410_v15 }
  0x8d   :  { %11309 = vmatpush3.msra.mxu0 %v12383_v3  ;;  %v19143_v3 = vld [vmem:[#allocation35_spill] sm:$0xff] }
  0x8f   :  { %10919 = vmatmul.mubr.f32.vlgmr.msra.gmra.mrb[0].mxu1 %v12398_v10  ;;  %11216 = vmatmul.mubr.f32.gmra.mrb[2].mxu0 %v12412_v16 }
  0x90   :  { %11015 = vmatpush3.msra.mxu1 %v12408_v14  ;;  %10921 = vmatprep.mubr.f32.mxu1 %v12410_v15  ;;  %v19144_v14 = vld [vmem:[#allocation38_spill] sm:$0xff] }
  0x91   :  { %11218 = vmatprep.mubr.f32.mxu0 %v12426_v21 }
  0x93   :  { %10922 = vmatmul.mubr.f32.gmra.mrb[2].mxu1 %v12412_v16  ;;  %11219 = vmatmul.mubr.f32.gmra.mrb[4].mxu0 %v12436_v26 }
  0x94   :  { %10924 = vmatprep.mubr.f32.mxu1 %v12426_v21  ;;  %11221 = vmatprep.mubr.f32.mxu0 %v12453_v38 }
  0x97   :  { %10925 = vmatmul.mubr.f32.gmra.mrb[4].mxu1 %v12436_v26  ;;  %11222 = vmatmul.mubr.f32.gmra.mrb[6].mxu0 %v12481_v58 }
  0x98   :  { %10927 = vmatprep.mubr.f32.mxu1 %v12453_v38  ;;  %11224 = vmatprep.mubr.f32.mxu0 %v12490_v63 }
  0x9b   :  { %10928 = vmatmul.mubr.f32.gmra.mrb[6].mxu1 %v12481_v58  ;;  %11225 = vmatmul.mubr.f32.gmra.mrb[8].mxu0 %v12498_v5 }
  0x9c   :  { %10930 = vmatprep.mubr.f32.mxu1 %v12490_v63  ;;  %11227 = vmatprep.mubr.f32.mxu0 %v12500_v6 }
  0x9f   :  { %10931 = vmatmul.mubr.f32.gmra.mrb[8].mxu1 %v12498_v5  ;;  %11228 = vmatmul.mubr.f32.gmra.mrb[10].mxu0 %v12520_v28 }
  0xa0   :  { %10933 = vmatprep.mubr.f32.mxu1 %v12500_v6  ;;  %11230 = vmatprep.mubr.f32.mxu0 %v12522_v30 }
  0xa3   :  { %10934 = vmatmul.mubr.f32.gmra.mrb[10].mxu1 %v12520_v28  ;;  %11231 = vmatmul.mubr.f32.gmra.mrb[12].mxu0 %v12524_v31 }
  0xa4   :  { %10936 = vmatprep.mubr.f32.mxu1 %v12522_v30  ;;  %11233 = vmatprep.mubr.f32.mxu0 %v12543_v44 }
  0xa7   :  { %10937 = vmatmul.mubr.f32.gmra.mrb[12].mxu1 %v12524_v31  ;;  %11234 = vmatmul.mubr.f32.gmra.mrb[14].mxu0 %v12563_v57 }
  0xa8   :  { %10939 = vmatprep.mubr.f32.mxu1 %v12543_v44  ;;  %11236 = vmatprep.mubr.f32.mxu0 %v12580_v17 }
  0xab   :  { %10940 = vmatmul.mubr.f32.gmra.mrb[14].mxu1 %v12563_v57  ;;  %11237 = vmatmul.mubr.f32.gmra.mrb[16].mxu0 %v12582_v18 }
  0xac   :  { %10942 = vmatprep.mubr.f32.mxu1 %v12580_v17  ;;  %11239 = vmatprep.mubr.f32.mxu0 %v12584_v27 }
  0xaf   :  { %10943 = vmatmul.mubr.f32.gmra.mrb[16].mxu1 %v12582_v18  ;;  %11240 = vmatmul.mubr.f32.gmra.mrb[18].mxu0 %v12605_v52 }
  0xb0   :  { %10945 = vmatprep.mubr.f32.mxu1 %v12584_v27  ;;  %11242 = vmatprep.mubr.f32.mxu0 %v12610_v60 }
  0xb3   :  { %10946 = vmatmul.mubr.f32.gmra.mrb[18].mxu1 %v12605_v52  ;;  %11243 = vmatmul.mubr.f32.gmra.mrb[20].mxu0 %v12618_v4 }
  0xb4   :  { %10948 = vmatprep.mubr.f32.mxu1 %v12610_v60  ;;  %11245 = vmatprep.mubr.f32.mxu0 %v12624_v11 }
  0xb7   :  { %10949 = vmatmul.mubr.f32.gmra.mrb[20].mxu1 %v12618_v4  ;;  %11246 = vmatmul.mubr.f32.gmra.mrb[22].mxu0 %v12644_v13 }
  0xb8   :  { %10951 = vmatprep.mubr.f32.mxu1 %v12624_v11  ;;  %11248 = vmatprep.mubr.f32.mxu0 %v12654_v40 }
  0xbb   :  { %10952 = vmatmul.mubr.f32.gmra.mrb[22].mxu1 %v12644_v13  ;;  %11249 = vmatmul.mubr.f32.gmra.mrb[24].mxu0 %v12664_v36 }
  0xbc   :  { %10954 = vmatprep.mubr.f32.mxu1 %v12654_v40  ;;  %11251 = vmatprep.mubr.f32.mxu0 %v12671_v46 }
  0xbf   :  { %10955 = vmatmul.mubr.f32.gmra.mrb[24].mxu1 %v12664_v36  ;;  %11252 = vmatmul.mubr.f32.gmra.mrb[26].mxu0 %v12686_v33 }
  0xc0   :  { %10957 = vmatprep.mubr.f32.mxu1 %v12671_v46  ;;  %11254 = vmatprep.mubr.f32.mxu0 %v12698_v32 }
  0xc3   :  { %10958 = vmatmul.mubr.f32.gmra.mrb[26].mxu1 %v12686_v33  ;;  %11255 = vmatmul.mubr.f32.gmra.mrb[28].mxu0 %v12703_v37 }
  0xc4   :  { %10960 = vmatprep.mubr.f32.mxu1 %v12698_v32  ;;  %11257 = vmatprep.mubr.f32.mxu0 %v12720_v61 }
  0xc7   :  { %10961 = vmatmul.mubr.f32.gmra.mrb[28].mxu1 %v12703_v37  ;;  %11258 = vmatmul.mubr.f32.gmra.mrb[30].mxu0 %v12734_v41 }
  0xc8   :  { %10963 = vmatprep.mubr.f32.mxu1 %v12720_v61  ;;  %11260 = vmatprep.mubr.f32.mxu0 %v19143_v3 }
  0xcb   :  { %10964 = vmatmul.mubr.f32.gmra.mrb[30].mxu1 %v12734_v41  ;;  %11261 = vmatmul.mubr.f32.gmra.mrb[32].mxu0 %v19144_v14 }
  0xcc   :  { %10966 = vmatprep.mubr.f32.mxu1 %v19143_v3  ;;  %11263 = vmatprep.mubr.f32.mxu0 %v19145_v24 }
  0xcf   :  { %10967 = vmatmul.mubr.f32.gmra.mrb[32].mxu1 %v19144_v14  ;;  %11264 = vmatmul.mubr.f32.gmra.mrb[34].mxu0 %v19146_v42 }
  0xd0   :  { %10969 = vmatprep.mubr.f32.mxu1 %v19145_v24  ;;  %11266 = vmatprep.mubr.f32.mxu0 %v19147_v50 }
  0xd3   :  { %10970 = vmatmul.mubr.f32.gmra.mrb[34].mxu1 %v19146_v42  ;;  %11267 = vmatmul.mubr.f32.gmra.mrb[36].mxu0 %v19148_v12 }
  0xd4   :  { %10972 = vmatprep.mubr.f32.mxu1 %v19147_v50  ;;  %11269 = vmatprep.mubr.f32.mxu0 %v19149_v0 }
  0xd7   :  { %10973 = vmatmul.mubr.f32.gmra.mrb[36].mxu1 %v19148_v12  ;;  %11270 = vmatmul.mubr.f32.gmra.mrb[38].mxu0 %v19150_v51 }
  0xd8   :  { %10975 = vmatprep.mubr.f32.mxu1 %v19149_v0  ;;  %11272 = vmatprep.mubr.f32.mxu0 %v19151_v54 }
  0xdb   :  { %10976 = vmatmul.mubr.f32.gmra.mrb[38].mxu1 %v19150_v51  ;;  %11273 = vmatmul.mubr.f32.gmra.mrb[40].mxu0 %v19152_v1 }
  0xdc   :  { %10978 = vmatprep.mubr.f32.mxu1 %v19151_v54  ;;  %11275 = vmatprep.mubr.f32.mxu0 %v19153_v22 }
  0xdf   :  { %10979 = vmatmul.mubr.f32.gmra.mrb[40].mxu1 %v19152_v1  ;;  %11276 = vmatmul.mubr.f32.gmra.mrb[42].mxu0 %v19154_v19 }
  0xe0   :  { %10981 = vmatprep.mubr.f32.mxu1 %v19153_v22  ;;  %11278 = vmatprep.mubr.f32.mxu0 %v19155_v62 }
  0xe3   :  { %10982 = vmatmul.mubr.f32.gmra.mrb[42].mxu1 %v19154_v19  ;;  %11279 = vmatmul.mubr.f32.gmra.mrb[44].mxu0 %v19156_v23 }
  0xe4   :  { %10984 = vmatprep.mubr.f32.mxu1 %v19155_v62  ;;  %11281 = vmatprep.mubr.f32.mxu0 %v19157_v47 }
  0xe7   :  { %10985 = vmatmul.mubr.f32.gmra.mrb[44].mxu1 %v19156_v23  ;;  %11282 = vmatmul.mubr.f32.gmra.mrb[46].mxu0 %v19158_v39 }
  0xe8   :  { %10987 = vmatprep.mubr.f32.mxu1 %v19157_v47  ;;  %11284 = vmatprep.mubr.f32.mxu0 %v19159_v43 }
  0xeb   :  { %10988 = vmatmul.mubr.f32.gmra.mrb[46].mxu1 %v19158_v39  ;;  %11285 = vmatmul.mubr.f32.gmra.mrb[48].mxu0 %v19160_v48 }
  0xec   :  { %10990 = vmatprep.mubr.f32.mxu1 %v19159_v43  ;;  %11287 = vmatprep.mubr.f32.mxu0 %v19161_v59 }
  0xef   :  { %10991 = vmatmul.mubr.f32.gmra.mrb[48].mxu1 %v19160_v48  ;;  %11288 = vmatmul.mubr.f32.gmra.mrb[50].mxu0 %v12958_v7 }
  0xf0   :  { %10993 = vmatprep.mubr.f32.mxu1 %v19161_v59  ;;  %11290 = vmatprep.mubr.f32.mxu0 %v19162_v2 }
  0xf3   :  { %10994 = vmatmul.mubr.f32.gmra.mrb[50].mxu1 %v12958_v7  ;;  %11291 = vmatmul.mubr.f32.gmra.mrb[52].mxu0 %v19163_v34 }
  0xf4   :  { %10996 = vmatprep.mubr.f32.mxu1 %v19162_v2  ;;  %11293 = vmatprep.mubr.f32.mxu0 %v19164_v29 }
  0xf7   :  { %10997 = vmatmul.mubr.f32.gmra.mrb[52].mxu1 %v19163_v34  ;;  %11294 = vmatmul.mubr.f32.gmra.mrb[54].mxu0 %v19165_v8 }
  0xf8   :  { %10999 = vmatprep.mubr.f32.mxu1 %v19164_v29  ;;  %11296 = vmatprep.mubr.f32.mxu0 %v19166_v20 }
  0xfb   :  { %11000 = vmatmul.mubr.f32.gmra.mrb[54].mxu1 %v19165_v8  ;;  %11297 = vmatmul.mubr.f32.gmra.mrb[56].mxu0 %v13021_v49 }
  0xfc   :  { %11002 = vmatprep.mubr.f32.mxu1 %v19166_v20  ;;  %11299 = vmatprep.mubr.f32.mxu0 %v13023_v53 }
  0xff   :  { %11003 = vmatmul.mubr.f32.gmra.mrb[56].mxu1 %v13021_v49  ;;  %11300 = vmatmul.mubr.f32.gmra.mrb[58].mxu0 %v19167_v25 }
 0x100   :  { %11005 = vmatprep.mubr.f32.mxu1 %v13023_v53  ;;  %11302 = vmatprep.mubr.f32.mxu0 %v13049_v45  ;;  %v19168_v53 = vld [vmem:[#allocation5_spill] sm:$0xff] }
 0x103   :  { %11006 = vmatmul.mubr.f32.gmra.mrb[58].mxu1 %v19167_v25  ;;  %11303 = vmatmul.mubr.f32.gmra.mrb[60].mxu0 %v13062_v56  ;;  %v19169_v25 = vld [vmem:[#allocation6_spill] sm:$0xff] }
 0x104   :  { %11008 = vmatprep.mubr.f32.mxu1 %v13049_v45  ;;  %11305 = vmatprep.mubr.f32.mxu0 %v13068_v35  ;;  %v19170_v45 = vld [vmem:[#allocation7_spill] sm:$0xff] }
 0x107   :  { %11009 = vmatmul.mubr.f32.gmra.mrb[60].mxu1 %v13062_v56  ;;  %11306 = vmatmul.mubr.f32.gmra.mrb[62].mxu0 %v13076_v55  ;;  %v19171_v56 = vld [vmem:[#allocation8_spill] sm:$0xff] }
 0x108   :  { %11011 = vmatprep.mubr.f32.mxu1 %v13068_v35  ;;  %11310 = vmatprep.mubr.f32.mxu0 %v12396_v9  ;;  %v19172_v9 = vld [vmem:[#allocation9_spill] sm:$0xff] }
 0x10b   :  { %11012 = vmatmul.mubr.f32.gmra.mrb[62].mxu1 %v13076_v55  ;;  %11311 = vmatmul.mubr.f32.vlgmr.msra.gmra.mrb[0].mxu0 %v12398_v10  ;;  %v19173_v10 = vld [vmem:[#allocation10_spill] sm:$0xff] }
 0x10c   :  { %11016 = vmatprep.mubr.f32.mxu1 %v19168_v53  ;;  %11313 = vmatprep.mubr.f32.mxu0 %v12410_v15  ;;  %v19174_v15 = vld [vmem:[#allocation11_spill] sm:$0xff]  ;;  %v19205_v53 = vld [vmem:[#allocation49_spill] sm:$0xff] }
 0x10f   :  { %11017 = vmatmul.mubr.f32.vlgmr.msra.gmra.mrb[0].mxu1 %v19169_v25  ;;  %11314 = vmatmul.mubr.f32.gmra.mrb[2].mxu0 %v12412_v16  ;;  %v19175_v16 = vld [vmem:[#allocation12_spill] sm:$0xff]  ;;  %v19206_v25 = vld [vmem:[#allocation51_spill] sm:$0xff] }
 0x110   :  { %11019 = vmatprep.mubr.f32.mxu1 %v19170_v45  ;;  %11316 = vmatprep.mubr.f32.mxu0 %v12426_v21  ;;  %v19176_v21 = vld [vmem:[#allocation13_spill] sm:$0xff]  ;;  %v19204_v45 = vld [vmem:[#allocation47_spill] sm:$0xff] }
 0x113   :  { %11020 = vmatmul.mubr.f32.gmra.mrb[2].mxu1 %v19171_v56  ;;  %11317 = vmatmul.mubr.f32.gmra.mrb[4].mxu0 %v12436_v26  ;;  %v19177_v26 = vld [vmem:[#allocation14_spill] sm:$0xff]  ;;  %v19207_v56 = vld [vmem:[#allocation53_spill] sm:$0xff] }
 0x114   :  { %11022 = vmatprep.mubr.f32.mxu1 %v19172_v9  ;;  %11319 = vmatprep.mubr.f32.mxu0 %v12453_v38  ;;  %v19178_v38 = vld [vmem:[#allocation15_spill] sm:$0xff] }
 0x115   :  { %v19234_v9 = vld [vmem:[#allocation95_spill] sm:$0xff] }
 0x117   :  { %11023 = vmatmul.mubr.f32.gmra.mrb[4].mxu1 %v19173_v10  ;;  %11320 = vmatmul.mubr.f32.gmra.mrb[6].mxu0 %v12481_v58  ;;  %v19179_v58 = vld [vmem:[#allocation16_spill] sm:$0xff] }
 0x118   :  { %11025 = vmatprep.mubr.f32.mxu1 %v19174_v15  ;;  %11322 = vmatprep.mubr.f32.mxu0 %v12490_v63  ;;  %v19180_v63 = vld [vmem:[#allocation17_spill] sm:$0xff]  ;;  %v19235_v10 = vld [vmem:[#allocation96_spill] sm:$0xff] }
 0x11b   :  { %11026 = vmatmul.mubr.f32.gmra.mrb[6].mxu1 %v19175_v16  ;;  %11323 = vmatmul.mubr.f32.gmra.mrb[8].mxu0 %v12498_v5  ;;  %v19181_v5 = vld [vmem:[#allocation18_spill] sm:$0xff] }
 0x11c   :  { %11028 = vmatprep.mubr.f32.mxu1 %v19176_v21  ;;  %11325 = vmatprep.mubr.f32.mxu0 %v12500_v6  ;;  %v19182_v6 = vld [vmem:[#allocation19_spill] sm:$0xff]  ;;  %v13355_v21 = vld [vmem:[%s18931_s2] ss:$0 sm:$0xff] }
 0x11f   :  { %11029 = vmatmul.mubr.f32.gmra.mrb[8].mxu1 %v19177_v26  ;;  %11326 = vmatmul.mubr.f32.gmra.mrb[10].mxu0 %v12520_v28  ;;  %v19183_v28 = vld [vmem:[#allocation20_spill] sm:$0xff] }
 0x120   :  { %11031 = vmatprep.mubr.f32.mxu1 %v19178_v38  ;;  %11328 = vmatprep.mubr.f32.mxu0 %v12522_v30  ;;  %v19184_v30 = vld [vmem:[#allocation21_spill] sm:$0xff] }
 0x123   :  { %11032 = vmatmul.mubr.f32.gmra.mrb[10].mxu1 %v19179_v58  ;;  %11329 = vmatmul.mubr.f32.gmra.mrb[12].mxu0 %v12524_v31  ;;  %v19185_v31 = vld [vmem:[#allocation22_spill] sm:$0xff] }
 0x124   :  { %11034 = vmatprep.mubr.f32.mxu1 %v19180_v63  ;;  %11331 = vmatprep.mubr.f32.mxu0 %v12543_v44  ;;  %v19186_v44 = vld [vmem:[#allocation23_spill] sm:$0xff] }
 0x127   :  { %11035 = vmatmul.mubr.f32.gmra.mrb[12].mxu1 %v19181_v5  ;;  %11332 = vmatmul.mubr.f32.gmra.mrb[14].mxu0 %v12563_v57  ;;  %v19187_v57 = vld [vmem:[#allocation24_spill] sm:$0xff] }
 0x128   :  { %11037 = vmatprep.mubr.f32.mxu1 %v19182_v6  ;;  %11334 = vmatprep.mubr.f32.mxu0 %v12580_v17  ;;  %v19188_v17 = vld [vmem:[#allocation25_spill] sm:$0xff] }
 0x12b   :  { %11038 = vmatmul.mubr.f32.gmra.mrb[14].mxu1 %v19183_v28  ;;  %11335 = vmatmul.mubr.f32.gmra.mrb[16].mxu0 %v12582_v18  ;;  %v19189_v18 = vld [vmem:[#allocation26_spill] sm:$0xff] }
 0x12c   :  { %11040 = vmatprep.mubr.f32.mxu1 %v19184_v30  ;;  %11337 = vmatprep.mubr.f32.mxu0 %v12584_v27  ;;  %v19190_v27 = vld [vmem:[#allocation27_spill] sm:$0xff] }
 0x12f   :  { %11041 = vmatmul.mubr.f32.gmra.mrb[16].mxu1 %v19185_v31  ;;  %11338 = vmatmul.mubr.f32.gmra.mrb[18].mxu0 %v12605_v52  ;;  %v19191_v52 = vld [vmem:[#allocation28_spill] sm:$0xff] }
 0x130   :  { %11043 = vmatprep.mubr.f32.mxu1 %v19186_v44  ;;  %11340 = vmatprep.mubr.f32.mxu0 %v12610_v60  ;;  %v19192_v60 = vld [vmem:[#allocation29_spill] sm:$0xff] }
 0x133   :  { %11044 = vmatmul.mubr.f32.gmra.mrb[18].mxu1 %v19187_v57  ;;  %11341 = vmatmul.mubr.f32.gmra.mrb[20].mxu0 %v12618_v4  ;;  %v19193_v4 = vld [vmem:[#allocation30_spill] sm:$0xff] }
 0x134   :  { %11046 = vmatprep.mubr.f32.mxu1 %v19188_v17  ;;  %11343 = vmatprep.mubr.f32.mxu0 %v12624_v11  ;;  %v19194_v11 = vld [vmem:[#allocation31_spill] sm:$0xff] }
 0x137   :  { %11047 = vmatmul.mubr.f32.gmra.mrb[20].mxu1 %v19189_v18  ;;  %11344 = vmatmul.mubr.f32.gmra.mrb[22].mxu0 %v12644_v13  ;;  %v19195_v13 = vld [vmem:[#allocation32_spill] sm:$0xff] }
 0x138   :  { %11049 = vmatprep.mubr.f32.mxu1 %v19190_v27  ;;  %11346 = vmatprep.mubr.f32.mxu0 %v12654_v40  ;;  %v19196_v40 = vld [vmem:[#allocation33_spill] sm:$0xff] }
 0x13b   :  { %11050 = vmatmul.mubr.f32.gmra.mrb[22].mxu1 %v19191_v52  ;;  %11347 = vmatmul.mubr.f32.gmra.mrb[24].mxu0 %v12664_v36  ;;  %v19197_v36 = vld [vmem:[#allocation34_spill] sm:$0xff] }
 0x13c   :  { %11052 = vmatprep.mubr.f32.mxu1 %v19192_v60  ;;  %11349 = vmatprep.mubr.f32.mxu0 %v12671_v46  ;;  %v19198_v46 = vld [vmem:[#allocation36_spill] sm:$0xff] }
 0x13f   :  { %11053 = vmatmul.mubr.f32.gmra.mrb[24].mxu1 %v19193_v4  ;;  %11350 = vmatmul.mubr.f32.gmra.mrb[26].mxu0 %v12686_v33  ;;  %v19199_v33 = vld [vmem:[#allocation37_spill] sm:$0xff] }
 0x140   :  { %11055 = vmatprep.mubr.f32.mxu1 %v19194_v11  ;;  %11352 = vmatprep.mubr.f32.mxu0 %v12698_v32  ;;  %v19200_v32 = vld [vmem:[#allocation40_spill] sm:$0xff] }
 0x143   :  { %11056 = vmatmul.mubr.f32.gmra.mrb[26].mxu1 %v19195_v13  ;;  %11353 = vmatmul.mubr.f32.gmra.mrb[28].mxu0 %v12703_v37  ;;  %v19201_v37 = vld [vmem:[#allocation41_spill] sm:$0xff] }
 0x144   :  { %11058 = vmatprep.mubr.f32.mxu1 %v19196_v40  ;;  %11355 = vmatprep.mubr.f32.mxu0 %v12720_v61  ;;  %v19202_v61 = vld [vmem:[#allocation42_spill] sm:$0xff] }
 0x147   :  { %11059 = vmatmul.mubr.f32.gmra.mrb[28].mxu1 %v19197_v36  ;;  %11356 = vmatmul.mubr.f32.gmra.mrb[30].mxu0 %v12734_v41  ;;  %v19203_v41 = vld [vmem:[#allocation46_spill] sm:$0xff] }
 0x148   :  { %11061 = vmatprep.mubr.f32.mxu1 %v19198_v46  ;;  %11358 = vmatprep.mubr.f32.mxu0 %v19143_v3  ;;  %v19208_v3 = vld [vmem:[#allocation56_spill] sm:$0xff] }
 0x14b   :  { %11062 = vmatmul.mubr.f32.gmra.mrb[30].mxu1 %v19199_v33  ;;  %11359 = vmatmul.mubr.f32.gmra.mrb[32].mxu0 %v19144_v14  ;;  %v19209_v14 = vld [vmem:[#allocation58_spill] sm:$0xff] }
 0x14c   :  { %11064 = vmatprep.mubr.f32.mxu1 %v19200_v32  ;;  %11361 = vmatprep.mubr.f32.mxu0 %v19145_v24  ;;  %v19210_v24 = vld [vmem:[#allocation59_spill] sm:$0xff] }
 0x14f   :  { %11065 = vmatmul.mubr.f32.gmra.mrb[32].mxu1 %v19201_v37  ;;  %11362 = vmatmul.mubr.f32.gmra.mrb[34].mxu0 %v19146_v42  ;;  %v19211_v42 = vld [vmem:[#allocation62_spill] sm:$0xff] }
 0x150   :  { %11067 = vmatprep.mubr.f32.mxu1 %v19202_v61  ;;  %11364 = vmatprep.mubr.f32.mxu0 %v19147_v50  ;;  %v19212_v50 = vld [vmem:[#allocation63_spill] sm:$0xff] }
 0x153   :  { %11068 = vmatmul.mubr.f32.gmra.mrb[34].mxu1 %v19203_v41  ;;  %11365 = vmatmul.mubr.f32.gmra.mrb[36].mxu0 %v19148_v12  ;;  %v19213_v12 = vld [vmem:[#allocation65_spill] sm:$0xff] }
 0x154   :  { %11070 = vmatprep.mubr.f32.mxu1 %v19204_v45  ;;  %11367 = vmatprep.mubr.f32.mxu0 %v19149_v0  ;;  %v19214_v0 = vld [vmem:[#allocation67_spill] sm:$0xff] }
 0x157   :  { %11071 = vmatmul.mubr.f32.gmra.mrb[36].mxu1 %v19205_v53  ;;  %11368 = vmatmul.mubr.f32.gmra.mrb[38].mxu0 %v19150_v51  ;;  %v19215_v51 = vld [vmem:[#allocation69_spill] sm:$0xff] }
 0x158   :  { %11073 = vmatprep.mubr.f32.mxu1 %v19206_v25  ;;  %11370 = vmatprep.mubr.f32.mxu0 %v19151_v54  ;;  %v19216_v54 = vld [vmem:[#allocation72_spill] sm:$0xff] }
 0x15b   :  { %11074 = vmatmul.mubr.f32.gmra.mrb[38].mxu1 %v19207_v56  ;;  %11371 = vmatmul.mubr.f32.gmra.mrb[40].mxu0 %v19152_v1  ;;  %v19217_v1 = vld [vmem:[#allocation73_spill] sm:$0xff] }
 0x15c   :  { %11076 = vmatprep.mubr.f32.mxu1 %v19208_v3  ;;  %11373 = vmatprep.mubr.f32.mxu0 %v19153_v22  ;;  %v19218_v22 = vld [vmem:[#allocation74_spill] sm:$0xff] }
 0x15f   :  { %11077 = vmatmul.mubr.f32.gmra.mrb[40].mxu1 %v19209_v14  ;;  %11374 = vmatmul.mubr.f32.gmra.mrb[42].mxu0 %v19154_v19  ;;  %v19219_v19 = vld [vmem:[#allocation78_spill] sm:$0xff] }
 0x160   :  { %11079 = vmatprep.mubr.f32.mxu1 %v19210_v24  ;;  %11376 = vmatprep.mubr.f32.mxu0 %v19155_v62  ;;  %v19220_v62 = vld [vmem:[#allocation79_spill] sm:$0xff] }
 0x163   :  { %11080 = vmatmul.mubr.f32.gmra.mrb[42].mxu1 %v19211_v42  ;;  %11377 = vmatmul.mubr.f32.gmra.mrb[44].mxu0 %v19156_v23  ;;  %v19221_v23 = vld [vmem:[#allocation80_spill] sm:$0xff] }
 0x164   :  { %11082 = vmatprep.mubr.f32.mxu1 %v19212_v50  ;;  %11379 = vmatprep.mubr.f32.mxu0 %v19157_v47  ;;  %v19225_v47 = vld [vmem:[#allocation85_spill] sm:$0xff] }
 0x167   :  { %11083 = vmatmul.mubr.f32.gmra.mrb[44].mxu1 %v19213_v12  ;;  %11380 = vmatmul.mubr.f32.gmra.mrb[46].mxu0 %v19158_v39  ;;  %v19227_v39 = vld [vmem:[#allocation89_spill] sm:$0xff] }
 0x168   :  { %11085 = vmatprep.mubr.f32.mxu1 %v19214_v0  ;;  %11382 = vmatprep.mubr.f32.mxu0 %v19159_v43  ;;  %v19229_v43 = vld [vmem:[#allocation90_spill] sm:$0xff] }
 0x16b   :  { %11086 = vmatmul.mubr.f32.gmra.mrb[46].mxu1 %v19215_v51  ;;  %11383 = vmatmul.mubr.f32.gmra.mrb[48].mxu0 %v19160_v48  ;;  %v19231_v48 = vld [vmem:[#allocation92_spill] sm:$0xff] }
 0x16c   :  { %11088 = vmatprep.mubr.f32.mxu1 %v19216_v54  ;;  %11385 = vmatprep.mubr.f32.mxu0 %v19161_v59  ;;  %v19222_v59 = vld [vmem:[#allocation81_spill] sm:$0xff] }
 0x16f   :  { %11089 = vmatmul.mubr.f32.gmra.mrb[48].mxu1 %v19217_v1  ;;  %11386 = vmatmul.mubr.f32.gmra.mrb[50].mxu0 %v12958_v7  ;;  %v19223_v7 = vld [vmem:[#allocation84_spill] sm:$0xff] }
 0x170   :  { %11091 = vmatprep.mubr.f32.mxu1 %v19218_v22  ;;  %11388 = vmatprep.mubr.f32.mxu0 %v19162_v2  ;;  %v19224_v2 = vld [vmem:[#allocation86_spill] sm:$0xff] }
 0x173   :  { %11092 = vmatmul.mubr.f32.gmra.mrb[50].mxu1 %v19219_v19  ;;  %11389 = vmatmul.mubr.f32.gmra.mrb[52].mxu0 %v19163_v34  ;;  %v19226_v34 = vld [vmem:[#allocation87_spill] sm:$0xff] }
 0x174   :  { %11094 = vmatprep.mubr.f32.mxu1 %v19220_v62  ;;  %11391 = vmatprep.mubr.f32.mxu0 %v19164_v29  ;;  %v19228_v29 = vld [vmem:[#allocation88_spill] sm:$0xff] }
 0x177   :  { %11095 = vmatmul.mubr.f32.gmra.mrb[52].mxu1 %v19221_v23  ;;  %11392 = vmatmul.mubr.f32.gmra.mrb[54].mxu0 %v19165_v8  ;;  %v19230_v8 = vld [vmem:[#allocation91_spill] sm:$0xff] }
 0x178   :  { %11097 = vmatprep.mubr.f32.mxu1 %v19222_v59  ;;  %11394 = vmatprep.mubr.f32.mxu0 %v19166_v20  ;;  %v19232_v20 = vld [vmem:[#allocation93_spill] sm:$0xff] }
 0x17b   :  { %11098 = vmatmul.mubr.f32.gmra.mrb[54].mxu1 %v19223_v7  ;;  %11395 = vmatmul.mubr.f32.gmra.mrb[56].mxu0 %v13021_v49  ;;  %v19233_v49 = vld [vmem:[#allocation94_spill] sm:$0xff]  ;;  %v12345_v7 = vmov 683565275  }
 0x17c   :  { %11100 = vmatprep.mubr.f32.mxu1 %v19224_v2  ;;  %11397 = vmatprep.mubr.f32.mxu0 %v19225_v47 }
 0x17f   :  { %11101 = vmatmul.mubr.f32.gmra.mrb[56].mxu1 %v19226_v34  ;;  %11398 = vmatmul.mubr.f32.gmra.mrb[58].mxu0 %v19227_v39  ;;  %v12346_v39 = vmov 2475754826  }
 0x180   :  { %11103 = vmatprep.mubr.f32.mxu1 %v19228_v29  ;;  %11400 = vmatprep.mubr.f32.mxu0 %v19229_v43  ;;  %v12347_v43 = vmov 2131351028  }
 0x183   :  { %11104 = vmatmul.mubr.f32.gmra.mrb[58].mxu1 %v19230_v8  ;;  %11401 = vmatmul.mubr.f32.gmra.mrb[60].mxu0 %v19231_v48  ;;  %v12348_v48 = vmov 2102212464  }
 0x184   :  { %11106 = vmatprep.mubr.f32.mxu1 %v19232_v20  ;;  %11403 = vmatprep.mubr.f32.mxu0 %v13068_v35 }
 0x187   :  { %11107 = vmatmul.mubr.f32.gmra.mrb[60].mxu1 %v19233_v49  ;;  %11404 = vmatmul.mubr.f32.gmra.mrb[62].mxu0 %v13076_v55  ;;  %v12349_v49 = vmov 920167782  }
 0x188   :  { %11109 = vmatprep.mubr.f32.mxu1 %v19234_v9 }
 0x18b   :  { %11110 = vmatmul.mubr.f32.gmra.mrb[62].mxu1 %v19235_v10 }
 0x1de   :  { %v11312_v15 = vpop.f32.mrb[0].mxu0 }
 0x1df   :  { %v3053_v16 = vpop.f32.mrb[1].mxu0 }
 0x1e2   :  { %v11018_v26 = vpop.f32.mrb[0].mxu1  ;;  %v11315_v38 = vpop.f32.mrb[2].mxu0 }
 0x1e3   :  { %v11406_v58 = vadd.f32 %v11018_v26, %v13355_v21  ;;  %v1510_v35 = vpop.f32.mrb[1].mxu1  ;;  %v3065_v63 = vpop.f32.mrb[3].mxu0 }
 0x1e4   :  { %v11408_v5 = vadd.f32 %v13355_v21, %v1510_v35 }
 0x1e5   :  { %v13359_v55 = vadd.f32 %v11406_v58, %v11312_v15  ;;  %v12350_v58 = vmov 1326507024  }
 0x1e6   :  { %v13361_v6 = vadd.f32 %v11408_v5, %v3053_v16  ;;  %v11021_v28 = vpop.f32.mrb[2].mxu1  ;;  %v13363_v30 = vpop.f32.mrb[4].mxu0 }
 0x1e7   :  { %v3539_v31 = vand.u32 2147483647, %v13359_v55  ;;  %v3542_v44 = vand.u32 2139095040, %v13359_v55  ;;  %v1524_v57 = vpop.f32.mrb[3].mxu1  ;;  %v13367_v17 = vpop.f32.mrb[5].mxu0  ;;  %v11410_v60 = vadd.f32 %v11021_v28, %v13355_v21  ;;  %vm3541_vm14 = vcmp.lt.s32.totalorder %v13359_v55, 0 }
 0x1e8   :  { %v3435_v18 = vand.u32 2147483647, %v13361_v6  ;;  %v3438_v27 = vand.u32 2139095040, %v13361_v6  ;;  %v11412_v40 = vadd.f32 %v13355_v21, %v1524_v57  ;;  %vm3437_vm0 = vcmp.lt.s32.totalorder %v13361_v6, 0 }
 0x1e9   :  { %v3543_v52 = vshrl.u32 %v3542_v44, 23  ;;  %v3546_v4 = vand.u32 8388607, %v3539_v31  ;;  %v13379_v33 = vadd.f32 %v11410_v60, %v11315_v38  ;;  %vm13482_vm15 = vcmp.le.f32.partialorder %v3539_v31, 0.7853982 }
 0x1ea   :  { %v3439_v11 = vshrl.u32 %v3438_v27, 23  ;;  %v3442_v13 = vand.u32 8388607, %v3435_v18  ;;  %v13377_v36 = vpop.f32.mrb[4].mxu1  ;;  %v13381_v32 = vpop.f32.mrb[6].mxu0  ;;  %v13385_v41 = vadd.f32 %v11412_v40, %v3065_v63 }
 0x1eb   :  { %v10176_v46 = vadd.s32 4294967169, %v3543_v52  ;;  %v13383_v37 = vpop.f32.mrb[5].mxu1  ;;  %v13387_v45 = vpop.f32.mrb[7].mxu0  ;;  %v3547_v25 = vor.u32 8388608, %v3546_v4  ;;  %v3750_v14 = vand.u32 2139095040, %v13379_v33 }
 0x1ec   :  { %v10172_v61 = vadd.s32 4294967169, %v3439_v11  ;;  %v3443_v56 = vor.u32 8388608, %v3442_v13  ;;  %v3747_v23 = vand.u32 2147483647, %v13379_v33 }
 0x1ed   :  { %v3549_v53 = vadd.s32 1, %v10176_v46  ;;  %v3751_v12 = vshrl.u32 %v3750_v14, 23  ;;  %v13396_v22 = vshll.u32 %v3547_v25, 8 }
 0x1ee   :  { %v3445_v3 = vadd.s32 1, %v10172_v61  ;;  %v13390_v24 = vpop.f32.mrb[6].mxu1  ;;  %v13392_v42 = vpop.f32.mrb[8].mxu0  ;;  %v13400_v62 = vshll.u32 %v3443_v56, 8 }
 0x1ef   :  { %vm3550_vm1 = vcmp.gt.s32.totalorder %v3549_v53, 0  ;;  %v13394_v0 = vpop.f32.mrb[7].mxu1  ;;  %v13404_v34 = vadd.s32 4294967169, %v3751_v12 }
 0x1f0   :  { %v3551_v50 = vsel %vm3550_vm1, %v3549_v53, 0  ;;  %vm3446_vm2 = vcmp.gt.s32.totalorder %v3445_v3, 0 }
 0x1f1   :  { %v3552_v51 = vshrl.u32 %v3551_v50, 5  ;;  %v3553_v54 = vand.u32 31, %v3551_v50  ;;  %v3447_v1 = vsel %vm3446_vm2, %v3445_v3, 0 }
 0x1f2   :  { %v13398_v19 = vshrl.u32 %v3447_v1, 5  ;;  %v3449_v47 = vand.u32 31, %v3447_v1 }
 0x1f3   :  { %v3554_v59 = vsub.s32 32, %v3553_v54  ;;  %v3556_v2 = vshll.u32 %v12345_v7, %v3553_v54  ;;  %v3559_v29 = vshll.u32 %v12346_v39, %v3553_v54  ;;  %v3562_v8 = vshll.u32 %v12347_v43, %v3553_v54 }
 0x1f4   :  { %v3565_v20 = vshll.u32 %v12348_v48, %v3553_v54  ;;  %v3568_v9 = vshll.u32 %v12349_v49, %v3553_v54  ;;  %vm3571_vm3 = vcmp.lt.s32.totalorder %v3552_v51, 1  ;;  %vm3572_vm4 = vcmp.lt.s32.totalorder %v3552_v51, 2 }
 0x1f5   :  { %v3557_v10 = vshrl.u32 %v12346_v39, %v3554_v59  ;;  %v3560_v15 = vshrl.u32 %v12347_v43, %v3554_v59  ;;  %v3563_v16 = vshrl.u32 %v12348_v48, %v3554_v59  ;;  %v3555_v26 = vshrl.u32 %v12345_v7, %v3554_v59 }
 0x1f6   :  { %v3566_v38 = vshrl.u32 %v12349_v49, %v3554_v59  ;;  %v3569_v35 = vshrl.u32 %v12350_v58, %v3554_v59  ;;  %v3450_v44 = vsub.s32 32, %v3449_v47  ;;  %vm3573_vm5 = vcmp.lt.s32.totalorder %v3552_v51, 3 }
 0x1f7   :  { %v3558_v63 = vor.u32 %v3557_v10, %v3556_v2  ;;  %v3561_v5 = vor.u32 %v3560_v15, %v3559_v29  ;;  %v3564_v28 = vor.u32 %v3563_v16, %v3562_v8  ;;  %vm3574_vm6 = vcmp.lt.s32.totalorder %v3552_v51, 4 }
 0x1f8   :  { %v3567_v57 = vor.u32 %v3566_v38, %v3565_v20  ;;  %v3570_v27 = vor.u32 %v3569_v35, %v3568_v9  ;;  %v3452_v61 = vshll.u32 %v12345_v7, %v3449_v47  ;;  %v3453_v56 = vshrl.u32 %v12346_v39, %v3450_v44 }
 0x1f9   :  { %v3575_v52 = vsel %vm3571_vm3, %v3555_v26, %v3558_v63  ;;  %v3576_v60 = vsel %vm3574_vm6, %v3564_v28, 2102212464  ;;  %v3579_v4 = vsel %vm3571_vm3, %v3558_v63, %v3561_v5  ;;  %v3583_v11 = vsel %vm3571_vm3, %v3561_v5, %v3564_v28 }
 0x1fa   :  { %v3577_v13 = vsel %vm3573_vm5, %v3561_v5, %v3576_v60  ;;  %v3580_v40 = vsel %vm3574_vm6, %v3567_v57, 920167782  ;;  %v3584_v46 = vsel %vm3574_vm6, %v3570_v27, 1326507024  ;;  %v3455_v3 = vshll.u32 %v12346_v39, %v3449_v47 }
 0x1fb   :  { %v3581_v53 = vsel %vm3573_vm5, %v3564_v28, %v3580_v40  ;;  %v3585_v25 = vsel %vm3573_vm5, %v3567_v57, %v3584_v46  ;;  %v3578_v14 = vsel %vm3572_vm4, %v3575_v52, %v3577_v13  ;;  %v3456_v54 = vshrl.u32 %v12347_v43, %v3450_v44 }
 0x1fc   :  { %v3582_v50 = vsel %vm3572_vm4, %v3579_v4, %v3581_v53  ;;  %v3586_v12 = vsel %vm3572_vm4, %v3583_v11, %v3585_v25  ;;  %v3454_v8 = vor.u32 %v3453_v56, %v3452_v61  ;;  %v3458_v9 = vshll.u32 %v12347_v43, %v3449_v47 }
 0x1fd   :  { %v13427_v1 = vmul.u32.u64.low %v13396_v22, %v3586_v12  ;;  %v13428_v59 = vmul.u32.u64.high %v13396_v22, %v3586_v12, %v13427_v1  ;;  %v13431_v2 = vmul.u32.u64.low %v13396_v22, %v3582_v50  ;;  %v13432_v29 = vmul.u32.u64.high %v13396_v22, %v3582_v50, %v13431_v2  ;;  %v13460_v50 = vpop.f32.mrb[9].mxu0 }
 0x1fe   :  { %v3457_v20 = vor.u32 %v3456_v54, %v3455_v3  ;;  %v3459_v10 = vshrl.u32 %v12348_v48, %v3450_v44  ;;  %v3451_v51 = vshrl.u32 %v12345_v7, %v3450_v44  ;;  %v3461_v15 = vshll.u32 %v12348_v48, %v3449_v47 }
 0x1ff   :  { %v3462_v16 = vshrl.u32 %v12349_v49, %v3450_v44  ;;  %v3465_v26 = vshrl.u32 %v12350_v58, %v3450_v44  ;;  %v3594_v38 = vmul.u32 %v13396_v22, %v3578_v14  ;;  %v3464_v63 = vshll.u32 %v12349_v49, %v3449_v47 }
 0x200   :  { %v3460_v35 = vor.u32 %v3459_v10, %v3458_v9  ;;  %vm3467_vm7 = vcmp.lt.s32.totalorder %v13398_v19, 1  ;;  %vm3596_vm8 = vc.u32 %v13428_v59, %v13431_v2  ;;  %v3597_v5 = vadd.s32 1, %v13432_v29  ;;  %v13470_v9 = vpop.f32.mrb[8].mxu1 }
 0x201   :  { %v3463_v28 = vor.u32 %v3462_v16, %v3461_v15  ;;  %vm3468_vm9 = vcmp.lt.s32.totalorder %v13398_v19, 2  ;;  %v3466_v57 = vor.u32 %v3465_v26, %v3464_v63  ;;  %vm3469_vm10 = vcmp.lt.s32.totalorder %v13398_v19, 3 }
 0x202   :  { %vm3470_vm11 = vcmp.lt.s32.totalorder %v13398_v19, 4  ;;  %v3475_v44 = vsel %vm3467_vm7, %v3454_v8, %v3457_v20  ;;  %v3598_v22 = vsel %vm3596_vm8, %v3597_v5, %v13432_v29  ;;  %v3479_v52 = vsel %vm3467_vm7, %v3457_v20, %v3460_v35 }
 0x203   :  { %v3472_v27 = vsel %vm3470_vm11, %v3460_v35, 2102212464  ;;  %v3476_v47 = vsel %vm3470_vm11, %v3463_v28, 920167782  ;;  %v3599_v60 = vadd.s32 %v3598_v22, %v3594_v38  ;;  %v3471_v4 = vsel %vm3467_vm7, %v3451_v51, %v3454_v8 }
 0x204   :  { %v3477_v11 = vsel %vm3469_vm10, %v3460_v35, %v3476_v47  ;;  %v3480_v13 = vsel %vm3470_vm11, %v3466_v57, 1326507024  ;;  %v3473_v40 = vsel %vm3469_vm10, %v3457_v20, %v3472_v27  ;;  %v3757_v53 = vadd.s32 1, %v13404_v34 }
 0x205   :  { %v3478_v46 = vsel %vm3468_vm9, %v3475_v44, %v3477_v11  ;;  %v3481_v61 = vsel %vm3469_vm10, %v3463_v28, %v3480_v13  ;;  %v3600_v25 = vadd.s32 536870912, %v3599_v60  ;;  %v3754_v1 = vand.u32 8388607, %v3747_v23 }
 0x206   :  { %v3482_v56 = vsel %vm3468_vm9, %v3479_v52, %v3481_v61  ;;  %v13457_v3 = vmul.u32.u64.low %v13400_v62, %v3478_v46  ;;  %v13458_v14 = vmul.u32.u64.high %v13400_v62, %v3478_v46, %v13457_v3  ;;  %vm3758_vm12 = vcmp.gt.s32.totalorder %v3757_v53, 0 }
 0x207   :  { %v13463_v12 = vmul.u32.u64.low %v13400_v62, %v3482_v56  ;;  %v13464_v54 = vmul.u32.u64.high %v13400_v62, %v3482_v56, %v13463_v12  ;;  %v3601_v29 = vshrl.u32 %v3600_v25, 30  ;;  %v3474_v34 = vsel %vm3468_vm9, %v3471_v4, %v3473_v40 }
 0x208   :  { %v3759_v8 = vsel %vm3758_vm12, %v3757_v53, 0  ;;  %v3493_v51 = vadd.s32 1, %v13458_v14  ;;  %v3490_v15 = vmul.u32 %v13400_v62, %v3474_v34  ;;  %v3755_v16 = vor.u32 8388608, %v3754_v1 }
 0x209   :  { %v3761_v20 = vand.u32 31, %v3759_v8  ;;  %v3602_v10 = vshll.u32 %v3601_v29, 30  ;;  %vm3492_vm13 = vc.u32 %v13464_v54, %v13457_v3  ;;  %v3646_v35 = vand.u32 2139095040, %v13385_v41 }
 0x20a   :  { %v3494_v19 = vsel %vm3492_vm13, %v3493_v51, %v13458_v14  ;;  %v3625_v5 = vsub.s32 4, %v3601_v29  ;;  %v13488_v28 = vadd.f32 %v13377_v36, %v13355_v21  ;;  %v3595_v57 = vadd.s32 %v13431_v2, %v13428_v59 }
 0x20b   :  { %v3762_v26 = vsub.s32 32, %v3761_v20  ;;  %v13476_v38 = vsub.s32 %v3599_v60, %v3602_v10  ;;  %v3495_v62 = vadd.s32 %v3494_v19, %v3490_v15  ;;  %v3643_v22 = vand.u32 2147483647, %v13385_v41 }
 0x20c   :  { %v13496_v27 = vadd.f32 %v13355_v21, %v13383_v37  ;;  %v13498_v47 = vshrl.u32 %v3759_v8, 5  ;;  %v13501_v60 = vshll.u32 %v3755_v16, 8  ;;  %v3647_v2 = vshrl.u32 %v3646_v35, 23 }
 0x20d   :  { %v3605_v44 = vsub.s32 0, %v13476_v38  ;;  %v3496_v31 = vadd.s32 536870912, %v3495_v62  ;;  %v3765_v52 = vshrl.u32 %v12346_v39, %v3762_v26  ;;  %v3768_v4 = vshrl.u32 %v12347_v43, %v3762_v26 }
 0x20e   :  { %v3771_v59 = vshrl.u32 %v12348_v48, %v3762_v26  ;;  %v13508_v11 = vsel %vm3541_vm14, %v3625_v5, %v3601_v29  ;;  %v3764_v13 = vshll.u32 %v12345_v7, %v3761_v20  ;;  %v3774_v40 = vshrl.u32 %v12349_v49, %v3762_v26 }
 0x20f   :  { %v10177_v36 = vmin.u32 %v3605_v44, %v13476_v38  ;;  %v3497_v37 = vshrl.u32 %v3496_v31, 30  ;;  %v3767_v61 = vshll.u32 %v12346_v39, %v3761_v20  ;;  %v3770_v53 = vshll.u32 %v12347_v43, %v3761_v20 }
 0x210   :  { %v3777_v25 = vshrl.u32 %v12350_v58, %v3762_v26  ;;  %v13516_v56 = vadd.s32 %v13457_v3, %v13464_v54  ;;  %v3766_v12 = vor.u32 %v3765_v52, %v3764_v13  ;;  %v3773_v1 = vshll.u32 %v12348_v48, %v3761_v20 }
 0x211   :  { %v3607_v46 = vclz %v10177_v36  ;;  %v3498_v14 = vshll.u32 %v3497_v37, 30  ;;  %v3769_v34 = vor.u32 %v3768_v4, %v3767_v61  ;;  %v3772_v8 = vor.u32 %v3771_v59, %v3770_v53 }
 0x212   :  { %v3776_v10 = vshll.u32 %v12349_v49, %v3761_v20  ;;  %v3628_v51 = vsel %vm13482_vm15, 0, %v13508_v11  ;;  %v3763_v3 = vshrl.u32 %v12345_v7, %v3762_v26  ;;  %v3775_v54 = vor.u32 %v3774_v40, %v3773_v1 }
 0x213   :  { %v10178_v29 = vadd.s32 4294967294, %v3607_v46  ;;  %v13524_v15 = vsub.s32 %v3495_v62, %v3498_v14  ;;  %v3521_v16 = vsub.s32 4, %v3497_v37  ;;  %vm3779_vm2 = vcmp.lt.s32.totalorder %v13498_v47, 1 }
 0x214   :  { %v3778_v19 = vor.u32 %v3777_v25, %v3776_v10  ;;  %vm3781_vm3 = vcmp.lt.s32.totalorder %v13498_v47, 3  ;;  %vm3782_vm4 = vcmp.lt.s32.totalorder %v13498_v47, 4  ;;  %vm13533_vm5 = vcmp.le.f32.partialorder %v3435_v18, 0.7853982 }
 0x215   :  { %vm10179_vm1 = vcmp.lt.s32.totalorder %v10178_v29, 0  ;;  %v3501_v5 = vsub.s32 0, %v13524_v15  ;;  %v3784_v26 = vsel %vm3782_vm4, %v3772_v8, 2102212464  ;;  %v3787_v31 = vsel %vm3779_vm2, %v3766_v12, %v3769_v34 }
 0x216   :  { %v3610_v35 = vsel %vm10179_vm1, 0, %v10178_v29  ;;  %v3788_v4 = vsel %vm3782_vm4, %v3775_v54, 920167782  ;;  %v3791_v59 = vsel %vm3779_vm2, %v3769_v34, %v3772_v8  ;;  %v3792_v46 = vsel %vm3782_vm4, %v3778_v19, 1326507024 }
 0x217   :  { %v3611_v20 = vsub.s32 32, %v3610_v35  ;;  %v3615_v44 = vsub.s32 4294967266, %v3610_v35  ;;  %v3612_v52 = vshll.u32 %v13476_v38, %v3610_v35  ;;  %v10173_v36 = vmin.u32 %v3501_v5, %v13524_v15 }
 0x218   :  { %v3789_v18 = vsel %vm3781_vm3, %v3772_v8, %v3788_v4  ;;  %vm3780_vm6 = vcmp.lt.s32.totalorder %v13498_v47, 2  ;;  %v3783_v53 = vsel %vm3779_vm2, %v3763_v3, %v3766_v12  ;;  %v3785_v38 = vsel %vm3781_vm3, %v3769_v34, %v3784_v26 }
 0x219   :  { %v3613_v13 = vshrl.u32 %v3595_v57, %v3611_v20  ;;  %v3616_v40 = vadd.s32 127, %v3615_v44  ;;  %v3503_v61 = vclz %v10173_v36  ;;  %v3790_v1 = vsel %vm3780_vm6, %v3787_v31, %v3789_v18 }
 0x21a   :  { %v3793_v57 = vsel %vm3781_vm3, %v3775_v54, %v3792_v46  ;;  %v13553_v8 = vmul.u32.u64.low %v13501_v60, %v3790_v1  ;;  %v13554_v19 = vmul.u32.u64.high %v13501_v60, %v3790_v1, %v13553_v8  ;;  %v3522_v5 = vsel %vm3437_vm0, %v3521_v16, %v3497_v37 }
 0x21b   :  { %v3614_v25 = vor.u32 %v3613_v13, %v3612_v52  ;;  %v3617_v14 = vshll.u32 %v3616_v40, 23  ;;  %v10174_v29 = vadd.s32 4294967294, %v3503_v61  ;;  %v3794_v10 = vsel %vm3780_vm6, %v3791_v59, %v3793_v57  ;;  %v13570_v52 = vpop.f32.mrb[10].mxu0 }
 0x21c   :  { %v13559_v12 = vmul.u32.u64.low %v13501_v60, %v3794_v10  ;;  %v13560_v3 = vmul.u32.u64.high %v13501_v60, %v3794_v10, %v13559_v12  ;;  %v3786_v20 = vsel %vm3780_vm6, %v3783_v53, %v3785_v38  ;;  %v10180_v44 = vadd.s32 4294967169, %v3647_v2  ;;  %v13575_v2 = vpop.f32.mrb[9].mxu1 }
 0x21d   :  { %v3618_v35 = vor.u32 4788187, %v3617_v14  ;;  %v3621_v34 = vcvt.s32.f32 %v3614_v25  ;;  %vm10175_vm7 = vcmp.lt.s32.totalorder %v10174_v29, 0  ;;  %v13564_v26 = vadd.f32 %v13488_v28, %v13363_v30 }
 0x21e   :  { %v3506_v54 = vsel %vm10175_vm7, 0, %v10174_v29  ;;  %v13568_v31 = vadd.f32 %v13496_v27, %v13367_v17  ;;  %v3524_v36 = vsel %vm13533_vm5, 0, %v3522_v5  ;;  %v3805_v4 = vadd.s32 1, %v13554_v19 }
 0x21f   :  { %v3619_v47 = vand.u32 2147483647, %v3618_v35  ;;  %v3507_v37 = vsub.s32 32, %v3506_v54  ;;  %v3511_v16 = vsub.s32 4294967266, %v3506_v54  ;;  %v3802_v13 = vmul.u32 %v13501_v60, %v3786_v20 }
 0x220   :  { %vm3804_vm8 = vc.u32 %v13560_v3, %v13553_v8  ;;  %v3653_v30 = vadd.s32 1, %v10180_v44  ;;  %v3508_v17 = vshll.u32 %v13524_v15, %v3506_v54  ;;  %v3632_v46 = vadd.s32 3, %v3628_v51 }
 0x221   :  { %v3622_v59 = vmul.f32 %v3621_v34, %v3619_v47  ;;  %v3509_v28 = vshrl.u32 %v13516_v56, %v3507_v37  ;;  %v3512_v27 = vadd.s32 127, %v3511_v16  ;;  %v3806_v40 = vsel %vm3804_vm8, %v3805_v4, %v13554_v19 }
 0x222   :  { %v3807_v61 = vadd.s32 %v3806_v40, %v3802_v13  ;;  %vm3654_vm9 = vcmp.gt.s32.totalorder %v3653_v30, 0  ;;  %v3650_v38 = vand.u32 8388607, %v3643_v22  ;;  %v3528_v15 = vadd.s32 3, %v3524_v36 }
 0x223   :  { %v3623_v18 = vxor.u32 2147483648, %v3622_v59  ;;  %v3510_v53 = vor.u32 %v3509_v28, %v3508_v17  ;;  %v3513_v60 = vshll.u32 %v3512_v27, 23  ;;  %v3655_v25 = vsel %vm3654_vm9, %v3653_v30, 0 }
 0x224   :  { %v3808_v14 = vadd.s32 536870912, %v3807_v61  ;;  %v3657_v1 = vand.u32 31, %v3655_v25  ;;  %v13593_v51 = vand.u32 3, %v3632_v46  ;;  %vm3749_vm10 = vcmp.lt.s32.totalorder %v13379_v33, 0 }
 0x225   :  { %v3624_v56 = vsel %vm3541_vm14, %v3623_v18, %v3622_v59  ;;  %v3514_v11 = vor.u32 4788187, %v3513_v60  ;;  %v3517_v35 = vcvt.s32.f32 %v3510_v53  ;;  %v13596_v5 = vand.u32 3, %v3528_v15 }
 0x226   :  { %v3627_v57 = vsel %vm13482_vm15, %v13359_v55, %v3624_v56  ;;  %v3809_v29 = vshrl.u32 %v3808_v14, 30  ;;  %v3658_v10 = vsub.s32 32, %v3657_v1  ;;  %v3651_v34 = vor.u32 8388608, %v3650_v38 }
 0x227   :  { %12055 = vcosq.f32 %v3627_v57  ;;  %v3515_v19 = vand.u32 2147483647, %v3514_v11  ;;  %v13600_v63 = vadd.s32 %v13553_v8, %v13560_v3  ;;  %vm3638_vm11 = vcmp.eq.s32.totalorder %v13593_v51, 2 }
 0x228   :  { %12057 = vsinq.f32 %v3627_v57  ;;  %v3810_v12 = vshll.u32 %v3809_v29, 30  ;;  %v3661_v20 = vshrl.u32 %v12346_v39, %v3658_v10  ;;  %v3664_v47 = vshrl.u32 %v12347_v43, %v3658_v10 }
 0x229   :  { %v3518_v44 = vmul.f32 %v3517_v35, %v3515_v19  ;;  %v3667_v54 = vshrl.u32 %v12348_v48, %v3658_v10  ;;  %v13607_v16 = vshrl.u32 %v3655_v25, 5  ;;  %v3660_v36 = vshll.u32 %v12345_v7, %v3657_v1 }
 0x22a   :  { %v13605_v37 = vsub.s32 %v3807_v61, %v3810_v12  ;;  %v3670_v4 = vshrl.u32 %v12349_v49, %v3658_v10  ;;  %vm3635_vm12 = vcmp.eq.s32.totalorder %v13593_v51, 0  ;;  %v3833_v13 = vsub.s32 4, %v3809_v29 }
 0x22b   :  { %v3519_v59 = vxor.u32 2147483648, %v3518_v44  ;;  %v3663_v8 = vshll.u32 %v12346_v39, %v3657_v1  ;;  %v3666_v3 = vshll.u32 %v12347_v43, %v3657_v1  ;;  %vm3634_vm13 = vcmp.lt.s32.totalorder %v13593_v51, 2 }
 0x22c   :  { %v3813_v30 = vsub.s32 0, %v13605_v37  ;;  %v3662_v17 = vor.u32 %v3661_v20, %v3660_v36  ;;  %v3669_v28 = vshll.u32 %v12348_v48, %v3657_v1  ;;  %v13617_v27 = vshll.u32 %v3651_v34, 8 }
 0x22d   :  { %vm3631_vm14 = vweird.f32 %v13359_v55  ;;  %v3520_v40 = vsel %vm3437_vm0, %v3519_v59, %v3518_v44  ;;  %v3665_v18 = vor.u32 %v3664_v47, %v3663_v8  ;;  %v3668_v46 = vor.u32 %v3667_v54, %v3666_v3 }
 0x22e   :  { %v3673_v61 = vshrl.u32 %v12350_v58, %v3658_v10  ;;  %v3523_v53 = vsel %vm13533_vm5, %v13361_v6, %v3520_v40  ;;  %v10185_v60 = vmin.u32 %v3813_v30, %v13605_v37  ;;  %v3671_v38 = vor.u32 %v3670_v4, %v3669_v28  ;;  %v13663_v30 = vpop.f32.mrb[11].mxu0 }
 0x22f   :  { %v3672_v25 = vshll.u32 %v12349_v49, %v3657_v1  ;;  %12059 = vcosq.f32 %v3523_v53  ;;  %v13630_v56 = vsel %vm3749_vm10, %v3833_v13, %v3809_v29  ;;  %v3659_v15 = vshrl.u32 %v12345_v7, %v3658_v10 }
 0x230   :  { %vm3675_vm15 = vcmp.lt.s32.totalorder %v13607_v16, 1  ;;  %12061 = vsinq.f32 %v3523_v53  ;;  %vm13636_vm0 = vcmp.le.f32.partialorder %v3747_v23, 0.7853982  ;;  %v3815_v57 = vclz %v10185_v60 }
 0x231   :  { %v12056_v14 = vpop.eup %12055  ;;  %v3674_v11 = vor.u32 %v3673_v61, %v3672_v25  ;;  %vm3676_vm1 = vcmp.lt.s32.totalorder %v13607_v16, 2  ;;  %vm3677_vm2 = vcmp.lt.s32.totalorder %v13607_v16, 3  ;;  %vm3678_vm3 = vcmp.lt.s32.totalorder %v13607_v16, 4 }
 0x232   :  { %v12058_v1 = vpop.eup %12057  ;;  %v3639_v19 = vxor.u32 2147483648, %v12056_v14  ;;  %v3683_v29 = vsel %vm3675_vm15, %v3662_v17, %v3665_v18  ;;  %v10186_v35 = vadd.s32 4294967294, %v3815_v57  ;;  %v3680_v12 = vsel %vm3678_vm3, %v3668_v46, 2102212464 }
 0x233   :  { %v3636_v10 = vxor.u32 2147483648, %v12058_v1  ;;  %v3684_v23 = vsel %vm3678_vm3, %v3671_v38, 920167782  ;;  %v3679_v20 = vsel %vm3675_vm15, %v3659_v15, %v3662_v17  ;;  %v3687_v47 = vsel %vm3675_vm15, %v3665_v18, %v3668_v46 }
 0x234   :  { %v3640_v34 = vsel %vm3638_vm11, %v3639_v19, %v12058_v1  ;;  %v3685_v44 = vsel %vm3677_vm2, %v3668_v46, %v3684_v23  ;;  %vm10187_vm4 = vcmp.lt.s32.totalorder %v10186_v35, 0  ;;  %v3688_v4 = vsel %vm3678_vm3, %v3674_v11, 1326507024 }
 0x235   :  { %v3637_v54 = vsel %vm3635_vm12, %v12056_v14, %v3636_v10  ;;  %v3686_v36 = vsel %vm3676_vm1, %v3683_v29, %v3685_v44  ;;  %v3818_v13 = vsel %vm10187_vm4, 0, %v10186_v35  ;;  %v3681_v8 = vsel %vm3677_vm2, %v3665_v18, %v3680_v12 }
 0x236   :  { %v3641_v59 = vsel %vm3634_vm13, %v3637_v54, %v3640_v34  ;;  %v3689_v3 = vsel %vm3677_vm2, %v3671_v38, %v3688_v4  ;;  %vm3527_vm5 = vweird.f32 %v13361_v6  ;;  %v3819_v28 = vsub.s32 32, %v3818_v13 }
 0x237   :  { %v3642_v17 = vsel %vm3631_vm14, nan, %v3641_v59  ;;  %v3820_v40 = vshll.u32 %v13605_v37, %v3818_v13  ;;  %v3823_v46 = vsub.s32 4294967266, %v3818_v13  ;;  %v3690_v51 = vsel %vm3676_vm1, %v3687_v47, %v3689_v3  ;;  %v13682_v37 = vpop.f32.mrb[10].mxu1 }
 0x238   :  { %10092 = vst [vmem:[#allocation2 + $0x8] sm:$0xff] %v3642_v17  ;;  %v13672_v18 = vmul.u32.u64.low %v13617_v27, %v3686_v36  ;;  %v13673_v61 = vmul.u32.u64.high %v13617_v27, %v3686_v36, %v13672_v18  ;;  %v3958_v53 = vand.u32 2139095040, %v13564_v26  ;;  %v3821_v55 = vshrl.u32 %v13600_v63, %v3819_v28 }
 0x239   :  { %v3824_v60 = vadd.s32 127, %v3823_v46  ;;  %v13679_v38 = vmul.u32.u64.low %v13617_v27, %v3690_v51  ;;  %v13680_v25 = vmul.u32.u64.high %v13617_v27, %v3690_v51, %v13679_v38  ;;  %v12060_v15 = vpop.eup %12059  ;;  %vm3530_vm6 = vcmp.lt.s32.totalorder %v13596_v5, 2 }
 0x23a   :  { %vm3534_vm7 = vcmp.eq.s32.totalorder %v13596_v5, 2  ;;  %v3836_v14 = vsel %vm13636_vm0, 0, %v13630_v56  ;;  %v3959_v57 = vshrl.u32 %v3958_v53, 23  ;;  %v12062_v11 = vpop.eup %12061  ;;  %v3535_v1 = vxor.u32 2147483648, %v12060_v15 }
 0x23b   :  { %v3822_v63 = vor.u32 %v3821_v55, %v3820_v40  ;;  %v3825_v19 = vshll.u32 %v3824_v60, 23  ;;  %v3682_v29 = vsel %vm3676_vm1, %v3679_v20, %v3681_v8  ;;  %v3532_v10 = vxor.u32 2147483648, %v12062_v11 }
 0x23c   :  { %v3701_v35 = vadd.s32 1, %v13673_v61  ;;  %v3955_v12 = vand.u32 2147483647, %v13564_v26  ;;  %v10192_v23 = vadd.s32 4294967169, %v3959_v57  ;;  %vm3531_vm8 = vcmp.eq.s32.totalorder %v13596_v5, 0 }
 0x23d   :  { %v3536_v34 = vsel %vm3534_vm7, %v3535_v1, %v12062_v11  ;;  %v3826_v44 = vor.u32 4788187, %v3825_v19  ;;  %v3840_v47 = vadd.s32 3, %v3836_v14  ;;  %v3533_v56 = vsel %vm3531_vm8, %v12060_v15, %v3532_v10 }
 0x23e   :  { %v3698_v54 = vmul.u32 %v13617_v27, %v3682_v29  ;;  %vm3700_vm9 = vc.u32 %v13680_v25, %v13672_v18  ;;  %v3965_v36 = vadd.s32 1, %v10192_v23  ;;  %v3537_v16 = vsel %vm3530_vm6, %v3533_v56, %v3536_v34 }
 0x23f   :  { %v3827_v20 = vand.u32 2147483647, %v3826_v44  ;;  %v3829_v4 = vcvt.s32.f32 %v3822_v63  ;;  %v3702_v59 = vsel %vm3700_vm9, %v3701_v35, %v13673_v61  ;;  %v3538_v13 = vsel %vm3527_vm5, nan, %v3537_v16 }
 0x240   :  { %v3703_v8 = vadd.s32 %v3702_v59, %v3698_v54  ;;  %v3962_v3 = vand.u32 8388607, %v3955_v12  ;;  %vm3966_vm11 = vcmp.gt.s32.totalorder %v3965_v36, 0  ;;  %10091 = vst [vmem:[#allocation2] sm:$0xff] %v3538_v13  ;;  %v13704_v5 = vand.u32 3, %v3840_v47 }
 0x241   :  { %v3830_v27 = vmul.f32 %v3829_v4, %v3827_v20  ;;  %v3967_v17 = vsel %vm3966_vm11, %v3965_v36, 0  ;;  %v3851_v6 = vand.u32 2147483647, %v13568_v31  ;;  %v3854_v15 = vand.u32 2139095040, %v13568_v31 }
 0x242   :  { %v3704_v28 = vadd.s32 536870912, %v3703_v8  ;;  %v3969_v40 = vand.u32 31, %v3967_v17  ;;  %v3963_v53 = vor.u32 8388608, %v3962_v3  ;;  %v13711_v60 = vshrl.u32 %v3967_v17, 5 }
 0x243   :  { %v3831_v46 = vxor.u32 2147483648, %v3830_v27  ;;  %v13730_v23 = vadd.s32 %v13672_v18, %v13680_v25  ;;  %vm3846_vm12 = vcmp.eq.s32.totalorder %v13704_v5, 2  ;;  %v3855_v4 = vshrl.u32 %v3854_v15, 23 }
 0x244   :  { %v13706_v51 = vshrl.u32 %v3704_v28, 30  ;;  %v3970_v61 = vsub.s32 32, %v3969_v40  ;;  %v3972_v38 = vshll.u32 %v12345_v7, %v3969_v40  ;;  %v3975_v11 = vshll.u32 %v12346_v39, %v3969_v40 }
 0x245   :  { %v3832_v55 = vsel %vm3749_vm10, %v3831_v46, %v3830_v27  ;;  %v3978_v1 = vshll.u32 %v12347_v43, %v3969_v40  ;;  %v3981_v35 = vshll.u32 %v12348_v48, %v3969_v40  ;;  %v3984_v47 = vshll.u32 %v12349_v49, %v3969_v40 }
 0x246   :  { %v3835_v14 = vsel %vm13636_vm0, %v13379_v33, %v3832_v55  ;;  %v3706_v57 = vshll.u32 %v13706_v51, 30  ;;  %v3973_v63 = vshrl.u32 %v12346_v39, %v3970_v61  ;;  %v3976_v19 = vshrl.u32 %v12347_v43, %v3970_v61 }
 0x247   :  { %12063 = vcosq.f32 %v3835_v14  ;;  %v3979_v29 = vshrl.u32 %v12348_v48, %v3970_v61  ;;  %v3982_v62 = vshrl.u32 %v12349_v49, %v3970_v61  ;;  %vm3645_vm10 = vcmp.lt.s32.totalorder %v13385_v41, 0 }
 0x248   :  { %12065 = vsinq.f32 %v3835_v14  ;;  %v13724_v10 = vsub.s32 %v3703_v8, %v3706_v57  ;;  %v3974_v34 = vor.u32 %v3973_v63, %v3972_v38  ;;  %v3977_v44 = vor.u32 %v3976_v19, %v3975_v11  ;;  %v13759_v38 = vpop.f32.mrb[12].mxu0  ;;  %v13765_v11 = vpop.f32.mrb[11].mxu1 }
 0x249   :  { %v3980_v54 = vor.u32 %v3979_v29, %v3978_v1  ;;  %v3983_v36 = vor.u32 %v3982_v62, %v3981_v35  ;;  %v3985_v16 = vshrl.u32 %v12350_v58, %v3970_v61  ;;  %v13737_v20 = vshll.u32 %v3963_v53, 8 }
 0x24a   :  { %v3709_v56 = vsub.s32 0, %v13724_v10  ;;  %v13741_v18 = vand.u32 8388607, %v3851_v6  ;;  %v11418_v25 = vadd.f32 %v13390_v24, %v13355_v21  ;;  %vm3843_vm13 = vcmp.eq.s32.totalorder %v13704_v5, 0 }
 0x24b   :  { %v3986_v13 = vor.u32 %v3985_v16, %v3984_v47  ;;  %vm3987_vm14 = vcmp.lt.s32.totalorder %v13711_v60, 1  ;;  %vm3990_vm15 = vcmp.lt.s32.totalorder %v13711_v60, 4  ;;  %vm3842_vm0 = vcmp.lt.s32.totalorder %v13704_v5, 2 }
 0x24c   :  { %v10181_v59 = vmin.u32 %v3709_v56, %v13724_v10  ;;  %v3729_v8 = vsub.s32 4, %v13706_v51  ;;  %v3971_v3 = vshrl.u32 %v12345_v7, %v3970_v61  ;;  %v3995_v27 = vsel %vm3987_vm14, %v3974_v34, %v3977_v44 }
 0x24d   :  { %v3996_v17 = vsel %vm3990_vm15, %v3983_v36, 920167782  ;;  %vm3839_vm1 = vweird.f32 %v13379_v33  ;;  %vm3989_vm2 = vcmp.lt.s32.totalorder %v13711_v60, 3  ;;  %v3992_v28 = vsel %vm3990_vm15, %v3980_v54, 2102212464 }
 0x24e   :  { %v3711_v24 = vclz %v10181_v59  ;;  %v3999_v40 = vsel %vm3987_vm14, %v3977_v44, %v3980_v54  ;;  %vm3988_vm3 = vcmp.lt.s32.totalorder %v13711_v60, 2  ;;  %v3997_v46 = vsel %vm3989_vm2, %v3980_v54, %v3996_v17 }
 0x24f   :  { %v4000_v53 = vsel %vm3990_vm15, %v3986_v13, 1326507024  ;;  %v10188_v55 = vadd.s32 4294967169, %v3855_v4  ;;  %v3991_v15 = vsel %vm3987_vm14, %v3971_v3, %v3974_v34  ;;  %v3998_v14 = vsel %vm3988_vm3, %v3995_v27, %v3997_v46 }
 0x250   :  { %v10182_v61 = vadd.s32 4294967294, %v3711_v24  ;;  %v4001_v57 = vsel %vm3989_vm2, %v3983_v36, %v4000_v53  ;;  %v3993_v63 = vsel %vm3989_vm2, %v3977_v44, %v3992_v28  ;;  %v3730_v44 = vsel %vm3645_vm10, %v3729_v8, %v13706_v51 }
 0x251   :  { %v12064_v1 = vpop.eup %12063  ;;  %v4002_v19 = vsel %vm3988_vm3, %v3999_v40, %v4001_v57  ;;  %v13770_v29 = vmul.u32.u64.low %v13737_v20, %v3998_v14  ;;  %v13771_v35 = vmul.u32.u64.high %v13737_v20, %v3998_v14, %v13770_v29  ;;  %v3861_v16 = vadd.s32 1, %v10188_v55 }
 0x252   :  { %v12066_v62 = vpop.eup %12065  ;;  %v3847_v47 = vxor.u32 2147483648, %v12064_v1  ;;  %vm10183_vm4 = vcmp.lt.s32.totalorder %v10182_v61, 0  ;;  %v13775_v34 = vmul.u32.u64.low %v13737_v20, %v4002_v19  ;;  %v13776_v56 = vmul.u32.u64.high %v13737_v20, %v4002_v19, %v13775_v34 }
 0x253   :  { %v3844_v54 = vxor.u32 2147483648, %v12066_v62  ;;  %v3714_v36 = vsel %vm10183_vm4, 0, %v10182_v61  ;;  %v3994_v3 = vsel %vm3988_vm3, %v3991_v15, %v3993_v63  ;;  %v4013_v17 = vadd.s32 1, %v13771_v35 }
 0x254   :  { %v3848_v4 = vsel %vm3846_vm12, %v3847_v47, %v12066_v62  ;;  %v3715_v59 = vsub.s32 32, %v3714_v36  ;;  %v3719_v13 = vsub.s32 4294967266, %v3714_v36  ;;  %vm3862_vm5 = vcmp.gt.s32.totalorder %v3861_v16, 0 }
 0x255   :  { %v3845_v27 = vsel %vm3843_vm13, %v12064_v1, %v3844_v54  ;;  %v13789_v24 = vadd.f32 %v11418_v25, %v13381_v32  ;;  %v3716_v8 = vshll.u32 %v13724_v10, %v3714_v36  ;;  %v4010_v46 = vmul.u32 %v13737_v20, %v3994_v3  ;;  %v13842_v10 = vpop.f32.mrb[13].mxu0 }
 0x256   :  { %v3849_v51 = vsel %vm3842_vm0, %v3845_v27, %v3848_v4  ;;  %v3717_v28 = vshrl.u32 %v13730_v23, %v3715_v59  ;;  %v3720_v40 = vadd.s32 127, %v3719_v13  ;;  %vm4012_vm6 = vc.u32 %v13776_v56, %v13770_v29 }
 0x257   :  { %v3850_v60 = vsel %vm3839_vm1, nan, %v3849_v51  ;;  %v3863_v53 = vsel %vm3862_vm5, %v3861_v16, 0  ;;  %v4014_v5 = vsel %vm4012_vm6, %v4013_v17, %v13771_v35  ;;  %vm13803_vm7 = vcmp.le.f32.partialorder %v3643_v22, 0.7853982 }
 0x258   :  { %10094 = vst [vmem:[#allocation2 + $0x18] sm:$0xff] %v3850_v60  ;;  %v3718_v32 = vor.u32 %v3717_v28, %v3716_v8  ;;  %v3721_v25 = vshll.u32 %v3720_v40, 23  ;;  %v4015_v23 = vadd.s32 %v4014_v5, %v4010_v46  ;;  %v3865_v33 = vand.u32 31, %v3863_v53 }
 0x259   :  { %v3732_v20 = vsel %vm13803_vm7, 0, %v3730_v44  ;;  %v3859_v61 = vor.u32 8388608, %v13741_v18  ;;  %v13812_v15 = vadd.f32 %v13355_v21, %v13394_v0  ;;  %v3864_v1 = vshrl.u32 %v3863_v53, 5 }
 0x25a   :  { %v3722_v55 = vor.u32 4788187, %v3721_v25  ;;  %v3725_v14 = vcvt.s32.f32 %v3718_v32  ;;  %v4016_v57 = vadd.s32 536870912, %v4015_v23  ;;  %v3866_v63 = vsub.s32 32, %v3865_v33 }
 0x25b   :  { %v3868_v19 = vshll.u32 %v12345_v7, %v3865_v33  ;;  %v3871_v35 = vshll.u32 %v12346_v39, %v3865_v33  ;;  %v3874_v62 = vshll.u32 %v12347_v43, %v3865_v33  ;;  %v3877_v54 = vshll.u32 %v12348_v48, %v3865_v33 }
 0x25c   :  { %v3723_v22 = vand.u32 2147483647, %v3722_v55  ;;  %v4017_v47 = vshrl.u32 %v4016_v57, 30  ;;  %v3869_v34 = vshrl.u32 %v12346_v39, %v3866_v63  ;;  %v3872_v18 = vshrl.u32 %v12347_v43, %v3866_v63 }
 0x25d   :  { %v3875_v0 = vshrl.u32 %v12348_v48, %v3866_v63  ;;  %v3878_v36 = vshrl.u32 %v12349_v49, %v3866_v63  ;;  %v3881_v44 = vshrl.u32 %v12350_v58, %v3866_v63  ;;  %v3736_v16 = vadd.s32 3, %v3732_v20 }
 0x25e   :  { %v3726_v21 = vmul.f32 %v3725_v14, %v3723_v22  ;;  %v4018_v4 = vshll.u32 %v4017_v47, 30  ;;  %v3870_v59 = vor.u32 %v3869_v34, %v3868_v19  ;;  %v3880_v13 = vshll.u32 %v12349_v49, %v3865_v33 }
 0x25f   :  { %vm3957_vm8 = vcmp.lt.s32.totalorder %v13564_v26, 0  ;;  %v3873_v27 = vor.u32 %v3872_v18, %v3871_v35  ;;  %v3876_v17 = vor.u32 %v3875_v0, %v3874_v62  ;;  %v3879_v51 = vor.u32 %v3878_v36, %v3877_v54  ;;  %v13862_v36 = vpop.f32.mrb[12].mxu1 }
 0x260   :  { %v3727_v3 = vxor.u32 2147483648, %v3726_v21  ;;  %v13825_v8 = vsub.s32 %v4015_v23, %v4018_v4  ;;  %vm3883_vm9 = vcmp.lt.s32.totalorder %v3864_v1, 1  ;;  %vm3884_vm11 = vcmp.lt.s32.totalorder %v3864_v1, 2 }
 0x261   :  { %v13827_v28 = vshll.u32 %v3859_v61, 8  ;;  %v3867_v60 = vshrl.u32 %v12345_v7, %v3866_v63  ;;  %v3882_v46 = vor.u32 %v3881_v44, %v3880_v13  ;;  %vm3886_vm12 = vcmp.lt.s32.totalorder %v3864_v1, 4 }
 0x262   :  { %v3728_v40 = vsel %vm3645_vm10, %v3727_v3, %v3726_v21  ;;  %v4021_v32 = vsub.s32 0, %v13825_v8  ;;  %v4041_v25 = vsub.s32 4, %v4017_v47  ;;  %v3888_v5 = vsel %vm3886_vm12, %v3876_v17, 2102212464 }
 0x263   :  { %v3731_v53 = vsel %vm13803_vm7, %v13385_v41, %v3728_v40  ;;  %vm3885_vm13 = vcmp.lt.s32.totalorder %v3864_v1, 3  ;;  %v3891_v23 = vsel %vm3883_vm9, %v3870_v59, %v3873_v27  ;;  %v3892_v33 = vsel %vm3886_vm12, %v3879_v51, 920167782 }
 0x264   :  { %12067 = vcosq.f32 %v3731_v53  ;;  %v10193_v55 = vmin.u32 %v4021_v32, %v13825_v8  ;;  %v3887_v20 = vsel %vm3883_vm9, %v3867_v60, %v3870_v59  ;;  %v3893_v61 = vsel %vm3885_vm13, %v3876_v17, %v3892_v33 }
 0x265   :  { %12069 = vsinq.f32 %v3731_v53  ;;  %v3889_v14 = vsel %vm3885_vm13, %v3873_v27, %v3888_v5  ;;  %v3894_v57 = vsel %vm3884_vm11, %v3891_v23, %v3893_v61  ;;  %v3895_v63 = vsel %vm3883_vm9, %v3873_v27, %v3876_v17 }
 0x266   :  { %v3896_v22 = vsel %vm3886_vm12, %v3882_v46, 1326507024  ;;  %v3737_v19 = vand.u32 3, %v3736_v16  ;;  %vm13850_vm10 = vcmp.le.f32.partialorder %v3955_v12, 0.7853982  ;;  %v4023_v62 = vclz %v10193_v55 }
 0x267   :  { %v4163_v34 = vand.u32 2147483647, %v13789_v24  ;;  %v3897_v18 = vsel %vm3885_vm13, %v3879_v51, %v3896_v22  ;;  %v13857_v54 = vmul.u32.u64.low %v13827_v28, %v3894_v57  ;;  %v13858_v21 = vmul.u32.u64.high %v13827_v28, %v3894_v57, %v13857_v54 }
 0x268   :  { %v4166_v0 = vand.u32 2139095040, %v13789_v24  ;;  %v10194_v44 = vadd.s32 4294967294, %v4023_v62  ;;  %v4042_v12 = vsel %vm3957_vm8, %v4041_v25, %v4017_v47  ;;  %v3890_v16 = vsel %vm3884_vm11, %v3887_v20, %v3889_v14 }
 0x269   :  { %v3898_v4 = vsel %vm3884_vm11, %v3895_v63, %v3897_v18  ;;  %v13874_v27 = vadd.f32 %v13812_v15, %v13387_v45  ;;  %vm3738_vm14 = vcmp.lt.s32.totalorder %v3737_v19, 2  ;;  %vm3739_vm15 = vcmp.eq.s32.totalorder %v3737_v19, 0 }
 0x26a   :  { %v13869_v59 = vmul.u32.u64.low %v13827_v28, %v3898_v4  ;;  %v13870_v13 = vmul.u32.u64.high %v13827_v28, %v3898_v4, %v13869_v59  ;;  %v4167_v3 = vshrl.u32 %v4166_v0, 23  ;;  %vm3742_vm0 = vcmp.eq.s32.totalorder %v3737_v19, 2 }
 0x26b   :  { %vm10195_vm1 = vcmp.lt.s32.totalorder %v10194_v44, 0  ;;  %v4011_v47 = vadd.s32 %v13770_v29, %v13776_v56  ;;  %v3909_v1 = vadd.s32 1, %v13858_v21  ;;  %v4044_v46 = vsel %vm13850_vm10, 0, %v4042_v12 }
 0x26c   :  { %v4026_v17 = vsel %vm10195_vm1, 0, %v10194_v44  ;;  %v10200_v51 = vadd.s32 4294967169, %v4167_v3  ;;  %v3906_v53 = vmul.u32 %v13827_v28, %v3890_v16  ;;  %vm3908_vm2 = vc.u32 %v13870_v13, %v13857_v54 }
 0x26d   :  { %v4027_v40 = vsub.s32 32, %v4026_v17  ;;  %v4031_v60 = vsub.s32 4294967266, %v4026_v17  ;;  %v4028_v15 = vshll.u32 %v13825_v8, %v4026_v17  ;;  %v4170_v29 = vand.u32 8388607, %v4163_v34 }
 0x26e   :  { %v12068_v45 = vpop.eup %12067  ;;  %v4173_v56 = vadd.s32 1, %v10200_v51  ;;  %v3910_v33 = vsel %vm3908_vm2, %v3909_v1, %v13858_v21  ;;  %v4048_v20 = vadd.s32 3, %v4044_v46  ;;  %vm3735_vm4 = vweird.f32 %v13385_v41 }
 0x26f   :  { %v12070_v32 = vpop.eup %12069  ;;  %v3743_v25 = vxor.u32 2147483648, %v12068_v45  ;;  %v4029_v5 = vshrl.u32 %v4011_v47, %v4027_v40  ;;  %v4032_v23 = vadd.s32 127, %v4031_v60  ;;  %v3911_v61 = vadd.s32 %v3910_v33, %v3906_v53  ;;  %v13899_v47 = vld [vmem:[%s18931_s2] ss:$0 sm:$0xff] }
 0x270   :  { %v3740_v55 = vxor.u32 2147483648, %v12070_v32  ;;  %vm4174_vm3 = vcmp.gt.s32.totalorder %v4173_v56, 0  ;;  %v4171_v62 = vor.u32 8388608, %v4170_v29  ;;  %v13892_v12 = vand.u32 3, %v4048_v20 }
 0x271   :  { %v3744_v28 = vsel %vm3742_vm0, %v3743_v25, %v12070_v32  ;;  %v4030_v8 = vor.u32 %v4029_v5, %v4028_v15  ;;  %v4033_v14 = vshll.u32 %v4032_v23, 23  ;;  %v4175_v57 = vsel %vm4174_vm3, %v4173_v56, 0 }
 0x272   :  { %v3741_v63 = vsel %vm3739_vm15, %v12068_v45, %v3740_v55  ;;  %v3912_v22 = vadd.s32 536870912, %v3911_v61  ;;  %v4177_v18 = vand.u32 31, %v4175_v57  ;;  %v13903_v41 = vadd.f32 %v13899_v47, %v13470_v9 }
 0x273   :  { %v3745_v0 = vsel %vm3738_vm14, %v3741_v63, %v3744_v28  ;;  %v4034_v44 = vor.u32 4788187, %v4033_v14  ;;  %v4037_v3 = vcvt.s32.f32 %v4030_v8  ;;  %v13907_v19 = vadd.f32 %v13899_v47, %v13575_v2 }
 0x274   :  { %v3746_v21 = vsel %vm3735_vm4, nan, %v3745_v0  ;;  %v13894_v16 = vshrl.u32 %v3912_v22, 30  ;;  %v4178_v4 = vsub.s32 32, %v4177_v18  ;;  %v4180_v1 = vshll.u32 %v12345_v7, %v4177_v18 }
 0x275   :  { %10093 = vst [vmem:[#allocation2 + $0x10] sm:$0xff] %v3746_v21  ;;  %v4035_v59 = vand.u32 2147483647, %v4034_v44  ;;  %v13912_v40 = vshll.u32 %v4171_v62, 8  ;;  %v3907_v45 = vadd.s32 %v13857_v54, %v13870_v13  ;;  %v4176_v15 = vshrl.u32 %v4175_v57, 5 }
 0x276   :  { %v3914_v17 = vshll.u32 %v13894_v16, 30  ;;  %v4181_v51 = vshrl.u32 %v12346_v39, %v4178_v4  ;;  %v4184_v46 = vshrl.u32 %v12347_v43, %v4178_v4  ;;  %v4187_v53 = vshrl.u32 %v12348_v48, %v4178_v4 }
 0x277   :  { %v4038_v60 = vmul.f32 %v4037_v3, %v4035_v59  ;;  %v4190_v9 = vshrl.u32 %v12349_v49, %v4178_v4  ;;  %v4183_v29 = vshll.u32 %v12346_v39, %v4177_v18  ;;  %v4186_v25 = vshll.u32 %v12347_v43, %v4177_v18 }
 0x278   :  { %v13919_v2 = vsub.s32 %v3911_v61, %v3914_v17  ;;  %v4182_v32 = vor.u32 %v4181_v51, %v4180_v1  ;;  %v4189_v5 = vshll.u32 %v12348_v48, %v4177_v18  ;;  %vm3853_vm5 = vcmp.lt.s32.totalorder %v13568_v31, 0 }
 0x279   :  { %v4039_v56 = vxor.u32 2147483648, %v4038_v60  ;;  %v4185_v33 = vor.u32 %v4184_v46, %v4183_v29  ;;  %v4192_v55 = vshll.u32 %v12349_v49, %v4177_v18  ;;  %v4193_v54 = vshrl.u32 %v12350_v58, %v4178_v4 }
 0x27a   :  { %v3917_v23 = vsub.s32 0, %v13919_v2  ;;  %v4188_v20 = vor.u32 %v4187_v53, %v4186_v25  ;;  %v4191_v61 = vor.u32 %v4190_v9, %v4189_v5  ;;  %v4062_v28 = vand.u32 2139095040, %v13874_v27  ;;  %v13958_v5 = vpop.f32.mrb[14].mxu0 }
 0x27b   :  { %v4040_v13 = vsel %vm3957_vm8, %v4039_v56, %v4038_v60  ;;  %v3937_v57 = vsub.s32 4, %v13894_v16  ;;  %v4194_v63 = vor.u32 %v4193_v54, %v4192_v55  ;;  %v4179_v22 = vshrl.u32 %v12345_v7, %v4178_v4 }
 0x27c   :  { %v4043_v8 = vsel %vm13850_vm10, %v13564_v26, %v4040_v13  ;;  %v10189_v14 = vmin.u32 %v3917_v23, %v13919_v2  ;;  %vm4195_vm6 = vcmp.lt.s32.totalorder %v4176_v15, 1  ;;  %vm4196_vm7 = vcmp.lt.s32.totalorder %v4176_v15, 2  ;;  %v13961_v13 = vpop.f32.mrb[13].mxu1 }
 0x27d   :  { %12071 = vcosq.f32 %v4043_v8  ;;  %vm13939_vm8 = vcmp.le.f32.partialorder %v3851_v6, 0.7853982  ;;  %vm4198_vm9 = vcmp.lt.s32.totalorder %v4176_v15, 4  ;;  %v4203_v35 = vsel %vm4195_vm6, %v4182_v32, %v4185_v33 }
 0x27e   :  { %12073 = vsinq.f32 %v4043_v8  ;;  %v3919_v18 = vclz %v10189_v14  ;;  %vm4197_vm11 = vcmp.lt.s32.totalorder %v4176_v15, 3  ;;  %v4200_v0 = vsel %vm4198_vm9, %v4188_v20, 2102212464 }
 0x27f   :  { %v4204_v44 = vsel %vm4198_vm9, %v4191_v61, 920167782  ;;  %v4207_v21 = vsel %vm4195_vm6, %v4185_v33, %v4188_v20  ;;  %v4199_v3 = vsel %vm4195_vm6, %v4179_v22, %v4182_v32  ;;  %v4208_v4 = vsel %vm4198_vm9, %v4194_v63, 1326507024 }
 0x280   :  { %v10190_v59 = vadd.s32 4294967294, %v3919_v18  ;;  %v4205_v17 = vsel %vm4197_vm11, %v4188_v20, %v4204_v44  ;;  %v4201_v1 = vsel %vm4197_vm11, %v4185_v33, %v4200_v0  ;;  %v4209_v60 = vsel %vm4197_vm11, %v4191_v61, %v4208_v4 }
 0x281   :  { %v4206_v51 = vsel %vm4196_vm7, %v4203_v35, %v4205_v17  ;;  %v4063_v46 = vshrl.u32 %v4062_v28, 23  ;;  %vm4051_vm12 = vcmp.eq.s32.totalorder %v13892_v12, 0  ;;  %v4210_v6 = vsel %vm4196_vm7, %v4207_v21, %v4209_v60 }
 0x282   :  { %vm10191_vm13 = vcmp.lt.s32.totalorder %v10190_v59, 0  ;;  %v13947_v53 = vmul.u32.u64.low %v13912_v40, %v4206_v51  ;;  %v13948_v9 = vmul.u32.u64.high %v13912_v40, %v4206_v51, %v13947_v53  ;;  %v3938_v56 = vsel %vm3853_vm5, %v3937_v57, %v13894_v16 }
 0x283   :  { %v3922_v29 = vsel %vm10191_vm13, 0, %v10190_v59  ;;  %v13955_v32 = vmul.u32.u64.low %v13912_v40, %v4210_v6  ;;  %v13956_v25 = vmul.u32.u64.high %v13912_v40, %v4210_v6, %v13955_v32  ;;  %v4202_v55 = vsel %vm4196_vm7, %v4199_v3, %v4201_v1 }
 0x284   :  { %v3923_v23 = vsub.s32 32, %v3922_v29  ;;  %v3927_v33 = vsub.s32 4294967266, %v3922_v29  ;;  %v10196_v54 = vadd.s32 4294967169, %v4063_v46  ;;  %v3924_v20 = vshll.u32 %v13919_v2, %v3922_v29 }
 0x285   :  { %v4059_v61 = vand.u32 2147483647, %v13874_v27  ;;  %v13967_v16 = vadd.f32 %v13903_v41, %v13392_v42  ;;  %v13971_v28 = vadd.f32 %v13907_v19, %v13460_v50  ;;  %v4221_v15 = vadd.s32 1, %v13948_v9 }
 0x286   :  { %v3925_v8 = vshrl.u32 %v3907_v45, %v3923_v23  ;;  %v3928_v14 = vadd.s32 127, %v3927_v33  ;;  %v4069_v57 = vadd.s32 1, %v10196_v54  ;;  %vm4054_vm10 = vcmp.eq.s32.totalorder %v13892_v12, 2 }
 0x287   :  { %v12072_v63 = vpop.eup %12071  ;;  %v3940_v2 = vsel %vm13939_vm8, 0, %v3938_v56  ;;  %v4218_v22 = vmul.u32 %v13912_v40, %v4202_v55  ;;  %vm4220_vm14 = vc.u32 %v13956_v25, %v13947_v53  ;;  %v4066_v0 = vand.u32 8388607, %v4059_v61 }
 0x288   :  { %v12074_v42 = vpop.eup %12073  ;;  %v4055_v41 = vxor.u32 2147483648, %v12072_v63  ;;  %v3926_v50 = vor.u32 %v3925_v8, %v3924_v20  ;;  %v3929_v19 = vshll.u32 %v3928_v14, 23  ;;  %v4222_v45 = vsel %vm4220_vm14, %v4221_v15, %v13948_v9 }
 0x289   :  { %v4052_v18 = vxor.u32 2147483648, %v12074_v42  ;;  %v4223_v35 = vadd.s32 %v4222_v45, %v4218_v22  ;;  %vm4070_vm15 = vcmp.gt.s32.totalorder %v4069_v57, 0  ;;  %v3944_v59 = vadd.s32 3, %v3940_v2 }
 0x28a   :  { %v4056_v44 = vsel %vm4054_vm10, %v4055_v41, %v12074_v42  ;;  %v3930_v21 = vor.u32 4788187, %v3929_v19  ;;  %v4071_v3 = vsel %vm4070_vm15, %v4069_v57, 0  ;;  %vm4050_vm0 = vcmp.lt.s32.totalorder %v13892_v12, 2 }
 0x28b   :  { %v4053_v40 = vsel %vm4051_vm12, %v12072_v63, %v4052_v18  ;;  %v4224_v17 = vadd.s32 536870912, %v4223_v35  ;;  %v4073_v4 = vand.u32 31, %v4071_v3  ;;  %vm4047_vm1 = vweird.f32 %v13564_v26 }
 0x28c   :  { %v4057_v1 = vsel %vm4050_vm0, %v4053_v40, %v4056_v44  ;;  %v3931_v51 = vand.u32 2147483647, %v3930_v21  ;;  %v3933_v60 = vcvt.s32.f32 %v3926_v50  ;;  %v4067_v9 = vor.u32 8388608, %v4066_v0 }
 0x28d   :  { %v4058_v46 = vsel %vm4047_vm1, nan, %v4057_v1  ;;  %v4225_v6 = vshrl.u32 %v4224_v17, 30  ;;  %v4074_v29 = vsub.s32 32, %v4073_v4  ;;  %v13987_v32 = vand.u32 3, %v3944_v59 }
 0x28e   :  { %10096 = vst [vmem:[#allocation2 + $0x28] sm:$0xff] %v4058_v46  ;;  %v3934_v56 = vmul.f32 %v3933_v60, %v3931_v51  ;;  %v4076_v33 = vshll.u32 %v12345_v7, %v4073_v4  ;;  %v4371_v55 = vand.u32 2147483647, %v13967_v16  ;;  %vm4165_vm2 = vcmp.lt.s32.totalorder %v13789_v24, 0 }
 0x28f   :  { %v4226_v23 = vshll.u32 %v4225_v6, 30  ;;  %v4077_v12 = vshrl.u32 %v12346_v39, %v4074_v29  ;;  %v4080_v26 = vshrl.u32 %v12347_v43, %v4074_v29  ;;  %v4083_v20 = vshrl.u32 %v12348_v48, %v4074_v29 }
 0x290   :  { %v3935_v54 = vxor.u32 2147483648, %v3934_v56  ;;  %v4086_v8 = vshrl.u32 %v12349_v49, %v4074_v29  ;;  %v4072_v15 = vshrl.u32 %v4071_v3, 5  ;;  %v4079_v57 = vshll.u32 %v12346_v39, %v4073_v4 }
 0x291   :  { %v13996_v14 = vsub.s32 %v4223_v35, %v4226_v23  ;;  %v13999_v63 = vshll.u32 %v4067_v9, 8  ;;  %v4078_v22 = vor.u32 %v4077_v12, %v4076_v33  ;;  %v4082_v42 = vshll.u32 %v12347_v43, %v4073_v4 }
 0x292   :  { %v3936_v2 = vsel %vm3853_vm5, %v3935_v54, %v3934_v56  ;;  %v4085_v41 = vshll.u32 %v12348_v48, %v4073_v4  ;;  %v4081_v45 = vor.u32 %v4080_v26, %v4079_v57  ;;  %v4088_v18 = vshll.u32 %v12349_v49, %v4073_v4 }
 0x293   :  { %v3939_v50 = vsel %vm13939_vm8, %v13568_v31, %v3936_v2  ;;  %v4229_v19 = vsub.s32 0, %v13996_v14  ;;  %v4084_v35 = vor.u32 %v4083_v20, %v4082_v42  ;;  %v4089_v44 = vshrl.u32 %v12350_v58, %v4074_v29  ;;  %v14024_v20 = vpop.f32.mrb[15].mxu0 }
 0x294   :  { %12075 = vcosq.f32 %v3939_v50  ;;  %v4087_v0 = vor.u32 %v4086_v8, %v4085_v41  ;;  %vm14013_vm3 = vcmp.le.f32.partialorder %v4163_v34, 0.7853982  ;;  %v4249_v59 = vsub.s32 4, %v4225_v6 }
 0x295   :  { %12077 = vsinq.f32 %v3939_v50  ;;  %v10201_v62 = vmin.u32 %v4229_v19, %v13996_v14  ;;  %v4075_v3 = vshrl.u32 %v12345_v7, %v4074_v29  ;;  %v4090_v40 = vor.u32 %v4089_v44, %v4088_v18  ;;  %v14038_v18 = vpop.f32.mrb[14].mxu1 }
 0x296   :  { %vm4091_vm4 = vcmp.lt.s32.totalorder %v4072_v15, 1  ;;  %vm4092_vm5 = vcmp.lt.s32.totalorder %v4072_v15, 2  ;;  %vm4093_vm6 = vcmp.lt.s32.totalorder %v4072_v15, 3  ;;  %vm4094_vm7 = vcmp.lt.s32.totalorder %v4072_v15, 4 }
 0x297   :  { %v4231_v17 = vclz %v10201_v62  ;;  %v4095_v4 = vsel %vm4091_vm4, %v4075_v3, %v4078_v22  ;;  %v4099_v1 = vsel %vm4091_vm4, %v4078_v22, %v4081_v45  ;;  %v4096_v51 = vsel %vm4094_vm7, %v4084_v35, 2102212464 }
 0x298   :  { %v4100_v60 = vsel %vm4094_vm7, %v4087_v0, 920167782  ;;  %v4103_v46 = vsel %vm4091_vm4, %v4081_v45, %v4084_v35  ;;  %v4104_v34 = vsel %vm4094_vm7, %v4090_v40, 1326507024  ;;  %v4097_v56 = vsel %vm4093_vm6, %v4081_v45, %v4096_v51 }
 0x299   :  { %v10202_v9 = vadd.s32 4294967294, %v4231_v17  ;;  %v4101_v23 = vsel %vm4093_vm6, %v4084_v35, %v4100_v60  ;;  %v4105_v33 = vsel %vm4093_vm6, %v4087_v0, %v4104_v34  ;;  %v4250_v12 = vsel %vm4165_vm2, %v4249_v59, %v4225_v6 }
 0x29a   :  { %v4102_v29 = vsel %vm4092_vm5, %v4099_v1, %v4101_v23  ;;  %v4106_v54 = vsel %vm4092_vm5, %v4103_v46, %v4105_v33  ;;  %v4374_v26 = vand.u32 2139095040, %v13967_v16  ;;  %v4098_v8 = vsel %vm4092_vm5, %v4095_v4, %v4097_v56 }
 0x29b   :  { %vm10203_vm8 = vcmp.lt.s32.totalorder %v10202_v9, 0  ;;  %v14028_v57 = vmul.u32.u64.low %v13999_v63, %v4106_v54  ;;  %v14029_v2 = vmul.u32.u64.high %v13999_v63, %v4106_v54, %v14028_v57  ;;  %vm3947_vm9 = vcmp.eq.s32.totalorder %v13987_v32, 0 }
 0x29c   :  { %v4234_v22 = vsel %vm10203_vm8, 0, %v10202_v9  ;;  %v14032_v42 = vmul.u32.u64.low %v13999_v63, %v4102_v29  ;;  %v14033_v41 = vmul.u32.u64.high %v13999_v63, %v4102_v29, %v14032_v42  ;;  %v4375_v6 = vshrl.u32 %v4374_v26, 23 }
 0x29d   :  { %v4219_v50 = vadd.s32 %v13947_v53, %v13956_v25  ;;  %v4235_v19 = vsub.s32 32, %v4234_v22  ;;  %v4239_v45 = vsub.s32 4294967266, %v4234_v22  ;;  %vm3950_vm11 = vcmp.eq.s32.totalorder %v13987_v32, 2 }
 0x29e   :  { %v12076_v15 = vpop.eup %12075  ;;  %v4252_v35 = vsel %vm14013_vm3, 0, %v4250_v12  ;;  %v4114_v0 = vmul.u32 %v13999_v63, %v4098_v8  ;;  %v10208_v44 = vadd.s32 4294967169, %v4375_v6  ;;  %v4236_v3 = vshll.u32 %v13996_v14, %v4234_v22 }
 0x29f   :  { %v12078_v62 = vpop.eup %12077  ;;  %v3951_v59 = vxor.u32 2147483648, %v12076_v15  ;;  %v4237_v40 = vshrl.u32 %v4219_v50, %v4235_v19  ;;  %v4240_v17 = vadd.s32 127, %v4239_v45  ;;  %vm4116_vm12 = vc.u32 %v14029_v2, %v14032_v42 }
 0x2a0   :  { %v3948_v53 = vxor.u32 2147483648, %v12078_v62  ;;  %v4117_v25 = vadd.s32 1, %v14033_v41  ;;  %v4378_v4 = vand.u32 8388607, %v4371_v55  ;;  %v4381_v46 = vadd.s32 1, %v10208_v44 }
 0x2a1   :  { %v3952_v1 = vsel %vm3950_vm11, %v3951_v59, %v12078_v62  ;;  %v4238_v51 = vor.u32 %v4237_v40, %v4236_v3  ;;  %v4241_v60 = vshll.u32 %v4240_v17, 23  ;;  %vm3943_vm13 = vweird.f32 %v13568_v31 }
 0x2a2   :  { %vm3946_vm10 = vcmp.lt.s32.totalorder %v13987_v32, 2  ;;  %v3949_v14 = vsel %vm3947_vm9, %v12076_v15, %v3948_v53  ;;  %v4118_v63 = vsel %vm4116_vm12, %v4117_v25, %v14033_v41  ;;  %v4256_v56 = vadd.s32 3, %v4252_v35 }
 0x2a3   :  { %v3953_v34 = vsel %vm3946_vm10, %v3949_v14, %v3952_v1  ;;  %v4242_v9 = vor.u32 4788187, %v4241_v60  ;;  %v4119_v23 = vadd.s32 %v4118_v63, %v4114_v0  ;;  %v4379_v12 = vor.u32 8388608, %v4378_v4 }
 0x2a4   :  { %v3954_v33 = vsel %vm3943_vm13, nan, %v3953_v34  ;;  %vm4382_vm14 = vcmp.gt.s32.totalorder %v4381_v46, 0  ;;  %v4245_v54 = vcvt.s32.f32 %v4238_v51  ;;  %v14054_v22 = vand.u32 3, %v4256_v56 }
 0x2a5   :  { %10095 = vst [vmem:[#allocation2 + $0x20] sm:$0xff] %v3954_v33  ;;  %v4243_v29 = vand.u32 2147483647, %v4242_v9  ;;  %v4120_v26 = vadd.s32 536870912, %v4119_v23  ;;  %v4383_v8 = vsel %vm4382_vm14, %v4381_v46, 0  ;;  %v14059_v41 = vadd.s32 %v14032_v42, %v14029_v2 }
 0x2a6   :  { %v4385_v31 = vand.u32 31, %v4383_v8  ;;  %v14061_v50 = vshll.u32 %v4379_v12, 8  ;;  %v4267_v19 = vand.u32 2147483647, %v13971_v28  ;;  %v4270_v0 = vand.u32 2139095040, %v13971_v28 }
 0x2a7   :  { %v4246_v57 = vmul.f32 %v4245_v54, %v4243_v29  ;;  %v14056_v32 = vshrl.u32 %v4120_v26, 30  ;;  %v4384_v25 = vshrl.u32 %v4383_v8, 5  ;;  %vm4061_vm15 = vcmp.lt.s32.totalorder %v13874_v27, 0 }
 0x2a8   :  { %v4386_v6 = vsub.s32 32, %v4385_v31  ;;  %v4388_v35 = vshll.u32 %v12345_v7, %v4385_v31  ;;  %v4391_v62 = vshll.u32 %v12346_v39, %v4385_v31  ;;  %v4394_v40 = vshll.u32 %v12347_v43, %v4385_v31 }
 0x2a9   :  { %v4247_v45 = vxor.u32 2147483648, %v4246_v57  ;;  %v4122_v15 = vshll.u32 %v14056_v32, 30  ;;  %v4397_v1 = vshll.u32 %v12348_v48, %v4385_v31  ;;  %v4400_v63 = vshll.u32 %v12349_v49, %v4385_v31 }
 0x2aa   :  { %v4389_v44 = vshrl.u32 %v12346_v39, %v4386_v6  ;;  %v4392_v59 = vshrl.u32 %v12347_v43, %v4386_v6  ;;  %v4395_v2 = vshrl.u32 %v12348_v48, %v4386_v6  ;;  %v4398_v17 = vshrl.u32 %v12349_v49, %v4386_v6 }
 0x2ab   :  { %v4248_v42 = vsel %vm4165_vm2, %v4247_v45, %v4246_v57  ;;  %v14073_v3 = vsub.s32 %v4119_v23, %v4122_v15  ;;  %v4401_v34 = vshrl.u32 %v12350_v58, %v4386_v6  ;;  %v4271_v9 = vshrl.u32 %v4270_v0, 23 }
 0x2ac   :  { %v4251_v53 = vsel %vm14013_vm3, %v13789_v24, %v4248_v42  ;;  %v4390_v4 = vor.u32 %v4389_v44, %v4388_v35  ;;  %v4393_v60 = vor.u32 %v4392_v59, %v4391_v62  ;;  %v4396_v46 = vor.u32 %v4395_v2, %v4394_v40 }
 0x2ad   :  { %12079 = vcosq.f32 %v4251_v53  ;;  %v4125_v51 = vsub.s32 0, %v14073_v3  ;;  %v4399_v14 = vor.u32 %v4398_v17, %v4397_v1  ;;  %v11426_v56 = vadd.f32 %v13899_v47, %v13682_v37 }
 0x2ae   :  { %12081 = vsinq.f32 %v4251_v53  ;;  %v11428_v23 = vadd.f32 %v13899_v47, %v13765_v11  ;;  %v4145_v33 = vsub.s32 4, %v14056_v32  ;;  %v4387_v12 = vshrl.u32 %v12345_v7, %v4386_v6 }
 0x2af   :  { %v10197_v21 = vmin.u32 %v4125_v51, %v14073_v3  ;;  %v4402_v29 = vor.u32 %v4401_v34, %v4400_v63  ;;  %vm4403_vm0 = vcmp.lt.s32.totalorder %v4384_v25, 1  ;;  %vm4262_vm1 = vcmp.eq.s32.totalorder %v14054_v22, 2  ;;  %v14113_v63 = vpop.f32.mrb[15].mxu1 }
 0x2b0   :  { %vm4404_vm2 = vcmp.lt.s32.totalorder %v4384_v25, 2  ;;  %vm4405_vm3 = vcmp.lt.s32.totalorder %v4384_v25, 3  ;;  %vm4406_vm4 = vcmp.lt.s32.totalorder %v4384_v25, 4  ;;  %vm4259_vm5 = vcmp.eq.s32.totalorder %v14054_v22, 0 }
 0x2b1   :  { %v4127_v54 = vclz %v10197_v21  ;;  %v4408_v26 = vsel %vm4406_vm4, %v4396_v46, 2102212464  ;;  %v4411_v8 = vsel %vm4403_vm0, %v4390_v4, %v4393_v60  ;;  %v4412_v37 = vsel %vm4406_vm4, %v4399_v14, 920167782 }
 0x2b2   :  { %v4415_v31 = vsel %vm4403_vm0, %v4393_v60, %v4396_v46  ;;  %vm4258_vm6 = vcmp.lt.s32.totalorder %v14054_v22, 2  ;;  %v4407_v57 = vsel %vm4403_vm0, %v4387_v12, %v4390_v4  ;;  %v4413_v45 = vsel %vm4405_vm3, %v4396_v46, %v4412_v37  ;;  %v14110_v4 = vpop.f32.mrb[16].mxu0 }
 0x2b3   :  { %v10198_v11 = vadd.s32 4294967294, %v4127_v54  ;;  %v4416_v6 = vsel %vm4406_vm4, %v4402_v29, 1326507024  ;;  %vm4255_vm7 = vweird.f32 %v13789_v24  ;;  %v4409_v15 = vsel %vm4405_vm3, %v4393_v60, %v4408_v26 }
 0x2b4   :  { %v4414_v35 = vsel %vm4404_vm2, %v4411_v8, %v4413_v45  ;;  %v4417_v0 = vsel %vm4405_vm3, %v4399_v14, %v4416_v6  ;;  %v10204_v44 = vadd.s32 4294967169, %v4271_v9  ;;  %v4146_v40 = vsel %vm4061_vm15, %v4145_v33, %v14056_v32 }
 0x2b5   :  { %vm10199_vm8 = vcmp.lt.s32.totalorder %v10198_v11, 0  ;;  %v4418_v62 = vsel %vm4404_vm2, %v4415_v31, %v4417_v0  ;;  %v14099_v59 = vmul.u32.u64.low %v14061_v50, %v4414_v35  ;;  %v14100_v2 = vmul.u32.u64.high %v14061_v50, %v4414_v35, %v14099_v59 }
 0x2b6   :  { %v4130_v42 = vsel %vm10199_vm8, 0, %v10198_v11  ;;  %v14107_v17 = vmul.u32.u64.low %v14061_v50, %v4418_v62  ;;  %v14108_v53 = vmul.u32.u64.high %v14061_v50, %v4418_v62, %v14107_v17  ;;  %v4410_v46 = vsel %vm4404_vm2, %v4407_v57, %v4409_v15 }
 0x2b7   :  { %v12080_v1 = vpop.eup %12079  ;;  %v4131_v51 = vsub.s32 32, %v4130_v42  ;;  %v4135_v60 = vsub.s32 4294967266, %v4130_v42  ;;  %v4277_v14 = vadd.s32 1, %v10204_v44  ;;  %v4132_v9 = vshll.u32 %v14073_v3, %v4130_v42 }
 0x2b8   :  { %v12082_v34 = vpop.eup %12081  ;;  %v4263_v21 = vxor.u32 2147483648, %v12080_v1  ;;  %v14117_v32 = vadd.f32 %v11426_v56, %v13570_v52  ;;  %v14120_v33 = vadd.f32 %v11428_v23, %v13663_v30  ;;  %v4429_v25 = vadd.s32 1, %v14100_v2 }
 0x2b9   :  { %v4260_v12 = vxor.u32 2147483648, %v12082_v34  ;;  %v4133_v29 = vshrl.u32 %v14059_v41, %v4131_v51  ;;  %v4136_v54 = vadd.s32 127, %v4135_v60  ;;  %v4426_v8 = vmul.u32 %v14061_v50, %v4410_v46 }
 0x2ba   :  { %v4264_v26 = vsel %vm4262_vm1, %v4263_v21, %v12082_v34  ;;  %vm4428_vm9 = vc.u32 %v14108_v53, %v14099_v59  ;;  %vm4278_vm11 = vcmp.gt.s32.totalorder %v4277_v14, 0  ;;  %v4274_v37 = vand.u32 8388607, %v4267_v19 }
 0x2bb   :  { %v4261_v52 = vsel %vm4259_vm5, %v12080_v1, %v4260_v12  ;;  %v4134_v30 = vor.u32 %v4133_v29, %v4132_v9  ;;  %v4137_v3 = vshll.u32 %v4136_v54, 23  ;;  %v4430_v56 = vsel %vm4428_vm9, %v4429_v25, %v14100_v2 }
 0x2bc   :  { %v4265_v41 = vsel %vm4258_vm6, %v4261_v52, %v4264_v26  ;;  %v4431_v23 = vadd.s32 %v4430_v56, %v4426_v8  ;;  %v4279_v31 = vsel %vm4278_vm11, %v4277_v14, 0  ;;  %vm14140_vm12 = vcmp.le.f32.partialorder %v4059_v61, 0.7853982 }
 0x2bd   :  { %v4266_v50 = vsel %vm4255_vm7, nan, %v4265_v41  ;;  %v4138_v57 = vor.u32 4788187, %v4137_v3  ;;  %v4148_v22 = vsel %vm14140_vm12, 0, %v4146_v40  ;;  %v4281_v6 = vand.u32 31, %v4279_v31 }
 0x2be   :  { %10098 = vst [vmem:[#allocation2 + $0x38] sm:$0xff] %v4266_v50  ;;  %v4432_v45 = vadd.s32 536870912, %v4431_v23  ;;  %v4141_v35 = vcvt.s32.f32 %v4134_v30  ;;  %v4275_v44 = vor.u32 8388608, %v4274_v37  ;;  %v4152_v2 = vadd.s32 3, %v4148_v22 }
 0x2bf   :  { %v4139_v15 = vand.u32 2147483647, %v4138_v57  ;;  %v4282_v62 = vsub.s32 32, %v4281_v6  ;;  %v14146_v42 = vshrl.u32 %v4279_v31, 5  ;;  %v4284_v61 = vshll.u32 %v12345_v7, %v4281_v6 }
 0x2c0   :  { %v4433_v0 = vshrl.u32 %v4432_v45, 30  ;;  %v4287_v51 = vshll.u32 %v12346_v39, %v4281_v6  ;;  %v4290_v40 = vshll.u32 %v12347_v43, %v4281_v6  ;;  %v4293_v9 = vshll.u32 %v12348_v48, %v4281_v6 }
 0x2c1   :  { %v4142_v24 = vmul.f32 %v4141_v35, %v4139_v15  ;;  %v4285_v1 = vshrl.u32 %v12346_v39, %v4282_v62  ;;  %v4288_v46 = vshrl.u32 %v12347_v43, %v4282_v62  ;;  %v4291_v14 = vshrl.u32 %v12348_v48, %v4282_v62 }
 0x2c2   :  { %v4434_v17 = vshll.u32 %v4433_v0, 30  ;;  %v4294_v34 = vshrl.u32 %v12349_v49, %v4282_v62  ;;  %v4296_v12 = vshll.u32 %v12349_v49, %v4281_v6  ;;  %v4297_v29 = vshrl.u32 %v12350_v58, %v4282_v62 }
 0x2c3   :  { %v4143_v60 = vxor.u32 2147483648, %v4142_v24  ;;  %vm4373_vm13 = vcmp.lt.s32.totalorder %v13967_v16, 0  ;;  %v4286_v25 = vor.u32 %v4285_v1, %v4284_v61  ;;  %v4289_v26 = vor.u32 %v4288_v46, %v4287_v51 }
 0x2c4   :  { %v14155_v21 = vsub.s32 %v4431_v23, %v4434_v17  ;;  %v4292_v8 = vor.u32 %v4291_v14, %v4290_v40  ;;  %v14166_v30 = vand.u32 3, %v4152_v2  ;;  %v4295_v56 = vor.u32 %v4294_v34, %v4293_v9 }
 0x2c5   :  { %v4144_v54 = vsel %vm4061_vm15, %v4143_v60, %v4142_v24  ;;  %v4298_v41 = vor.u32 %v4297_v29, %v4296_v12  ;;  %vm4299_vm10 = vcmp.lt.s32.totalorder %v14146_v42, 1  ;;  %v4315_v23 = vshll.u32 %v4275_v44, 8 }
 0x2c6   :  { %v4147_v52 = vsel %vm14140_vm12, %v13874_v27, %v4144_v54  ;;  %v4437_v3 = vsub.s32 0, %v14155_v21  ;;  %vm14172_vm14 = vcmp.le.f32.partialorder %v4371_v55, 0.7853982  ;;  %vm4300_vm15 = vcmp.lt.s32.totalorder %v14146_v42, 2  ;;  %v14200_v54 = vpop.f32.mrb[16].mxu1 }
 0x2c7   :  { %12083 = vcosq.f32 %v4147_v52  ;;  %vm4302_vm0 = vcmp.lt.s32.totalorder %v14146_v42, 4  ;;  %v4283_v50 = vshrl.u32 %v12345_v7, %v4282_v62  ;;  %v4307_v57 = vsel %vm4299_vm10, %v4286_v25, %v4289_v26  ;;  %v14184_v62 = vpop.f32.mrb[17].mxu0 }
 0x2c8   :  { %12085 = vsinq.f32 %v4147_v52  ;;  %v10209_v31 = vmin.u32 %v4437_v3, %v14155_v21  ;;  %v4304_v11 = vsel %vm4302_vm0, %v4292_v8, 2102212464  ;;  %v4308_v22 = vsel %vm4302_vm0, %v4295_v56, 920167782 }
 0x2c9   :  { %v4457_v6 = vsub.s32 4, %v4433_v0  ;;  %vm4301_vm1 = vcmp.lt.s32.totalorder %v14146_v42, 3  ;;  %v4311_v15 = vsel %vm4299_vm10, %v4289_v26, %v4292_v8  ;;  %v4303_v55 = vsel %vm4299_vm10, %v4283_v50, %v4286_v25 }
 0x2ca   :  { %v4439_v45 = vclz %v10209_v31  ;;  %v4309_v35 = vsel %vm4301_vm1, %v4292_v8, %v4308_v22  ;;  %v4312_v44 = vsel %vm4302_vm0, %v4298_v41, 1326507024  ;;  %v4582_v24 = vand.u32 2139095040, %v14117_v32 }
 0x2cb   :  { %v4305_v61 = vsel %vm4301_vm1, %v4289_v26, %v4304_v11  ;;  %v4310_v17 = vsel %vm4300_vm15, %v4307_v57, %v4309_v35  ;;  %v4313_v1 = vsel %vm4301_vm1, %v4295_v56, %v4312_v44  ;;  %vm4154_vm2 = vcmp.lt.s32.totalorder %v14166_v30, 2 }
 0x2cc   :  { %v10210_v2 = vadd.s32 4294967294, %v4439_v45  ;;  %v4314_v51 = vsel %vm4300_vm15, %v4311_v15, %v4313_v1  ;;  %v14189_v40 = vmul.u32.u64.low %v4315_v23, %v4310_v17  ;;  %v14190_v60 = vmul.u32.u64.high %v4315_v23, %v4310_v17, %v14189_v40 }
 0x2cd   :  { %v4583_v46 = vshrl.u32 %v4582_v24, 23  ;;  %v4458_v14 = vsel %vm4373_vm13, %v4457_v6, %v4433_v0  ;;  %v14195_v34 = vmul.u32.u64.low %v4315_v23, %v4314_v51  ;;  %v14196_v9 = vmul.u32.u64.high %v4315_v23, %v4314_v51, %v14195_v34 }
 0x2ce   :  { %vm10211_vm3 = vcmp.lt.s32.totalorder %v10210_v2, 0  ;;  %vm4155_vm4 = vcmp.eq.s32.totalorder %v14166_v30, 0  ;;  %vm4158_vm5 = vcmp.eq.s32.totalorder %v14166_v30, 2  ;;  %v4427_v25 = vadd.s32 %v14099_v59, %v14108_v53 }
 0x2cf   :  { %v4442_v12 = vsel %vm10211_vm3, 0, %v10210_v2  ;;  %v10216_v29 = vadd.s32 4294967169, %v4583_v46  ;;  %v4306_v52 = vsel %vm4300_vm15, %v4303_v55, %v4305_v61  ;;  %v4460_v3 = vsel %vm14172_vm14, 0, %v4458_v14 }
 0x2d0   :  { %v4443_v26 = vsub.s32 32, %v4442_v12  ;;  %v4447_v8 = vsub.s32 4294967266, %v4442_v12  ;;  %v4325_v56 = vadd.s32 1, %v14190_v60  ;;  %v4579_v41 = vand.u32 2147483647, %v14117_v32 }
 0x2d1   :  { %v12084_v0 = vpop.eup %12083  ;;  %v4589_v31 = vadd.s32 1, %v10216_v29  ;;  %v4444_v57 = vshll.u32 %v14155_v21, %v4442_v12  ;;  %v4322_v45 = vmul.u32 %v4315_v23, %v4306_v52  ;;  %vm4324_vm6 = vc.u32 %v14196_v9, %v14189_v40 }
 0x2d2   :  { %v12086_v50 = vpop.eup %12085  ;;  %v4159_v11 = vxor.u32 2147483648, %v12084_v0  ;;  %v4445_v22 = vshrl.u32 %v4427_v25, %v4443_v26  ;;  %v4448_v59 = vadd.s32 127, %v4447_v8  ;;  %v4326_v55 = vsel %vm4324_vm6, %v4325_v56, %v14190_v60 }
 0x2d3   :  { %v4156_v53 = vxor.u32 2147483648, %v12086_v50  ;;  %vm4590_vm7 = vcmp.gt.s32.totalorder %v4589_v31, 0  ;;  %v4464_v44 = vadd.s32 3, %v4460_v3  ;;  %v4327_v21 = vadd.s32 %v4326_v55, %v4322_v45 }
 0x2d4   :  { %v4160_v42 = vsel %vm4158_vm5, %v4159_v11, %v12086_v50  ;;  %v4446_v6 = vor.u32 %v4445_v22, %v4444_v57  ;;  %v4449_v15 = vshll.u32 %v4448_v59, 23  ;;  %v4591_v24 = vsel %vm4590_vm7, %v4589_v31, 0 }
 0x2d5   :  { %v4157_v35 = vsel %vm4155_vm4, %v12084_v0, %v4156_v53  ;;  %vm4151_vm8 = vweird.f32 %v13874_v27  ;;  %v4586_v61 = vand.u32 8388607, %v4579_v41  ;;  %v4328_v1 = vadd.s32 536870912, %v4327_v21 }
 0x2d6   :  { %v4161_v23 = vsel %vm4154_vm2, %v4157_v35, %v4160_v42  ;;  %v4450_v2 = vor.u32 4788187, %v4449_v15  ;;  %v4593_v51 = vand.u32 31, %v4591_v24  ;;  %v4453_v46 = vcvt.s32.f32 %v4446_v6 }
 0x2d7   :  { %v4162_v17 = vsel %vm4151_vm8, nan, %v4161_v23  ;;  %v14223_v14 = vand.u32 3, %v4464_v44  ;;  %v14225_v34 = vshrl.u32 %v4328_v1, 30  ;;  %v4587_v27 = vor.u32 8388608, %v4586_v61 }
 0x2d8   :  { %10097 = vst [vmem:[#allocation2 + $0x30] sm:$0xff] %v4162_v17  ;;  %v4451_v60 = vand.u32 2147483647, %v4450_v2  ;;  %v4594_v12 = vsub.s32 32, %v4593_v51  ;;  %v14227_v25 = vshrl.u32 %v4591_v24, 5  ;;  %v4478_v30 = vand.u32 2139095040, %v14120_v33 }
 0x2d9   :  { %v4330_v26 = vshll.u32 %v14225_v34, 30  ;;  %v4596_v8 = vshll.u32 %v12345_v7, %v4593_v51  ;;  %v4599_v0 = vshll.u32 %v12346_v39, %v4593_v51  ;;  %v4602_v57 = vshll.u32 %v12347_v43, %v4593_v51 }
 0x2da   :  { %v4454_v29 = vmul.f32 %v4453_v46, %v4451_v60  ;;  %v4597_v52 = vshrl.u32 %v12346_v39, %v4594_v12  ;;  %v4600_v56 = vshrl.u32 %v12347_v43, %v4594_v12  ;;  %v4603_v31 = vshrl.u32 %v12348_v48, %v4594_v12 }
 0x2db   :  { %v4606_v50 = vshrl.u32 %v12349_v49, %v4594_v12  ;;  %v14237_v11 = vsub.s32 %v4327_v21, %v4330_v26  ;;  %v4605_v22 = vshll.u32 %v12348_v48, %v4593_v51  ;;  %v4609_v59 = vshrl.u32 %v12350_v58, %v4594_v12  ;;  %v14266_v26 = vpop.f32.mrb[18].mxu0 }
 0x2dc   :  { %v4455_v3 = vxor.u32 2147483648, %v4454_v29  ;;  %v4598_v45 = vor.u32 %v4597_v52, %v4596_v8  ;;  %v4601_v42 = vor.u32 %v4600_v56, %v4599_v0  ;;  %v4608_v6 = vshll.u32 %v12349_v49, %v4593_v51 }
 0x2dd   :  { %v4333_v55 = vsub.s32 0, %v14237_v11  ;;  %v4604_v35 = vor.u32 %v4603_v31, %v4602_v57  ;;  %v4607_v44 = vor.u32 %v4606_v50, %v4605_v22  ;;  %v14249_v24 = vshll.u32 %v4587_v27, 8 }
 0x2de   :  { %v4456_v53 = vsel %vm4373_vm13, %v4455_v3, %v4454_v29  ;;  %v4610_v21 = vor.u32 %v4609_v59, %v4608_v6  ;;  %v4479_v23 = vshrl.u32 %v4478_v30, 23  ;;  %vm4269_vm9 = vcmp.lt.s32.totalorder %v13971_v28, 0  ;;  %v14275_v3 = vpop.f32.mrb[17].mxu1 }
 0x2df   :  { %v4459_v15 = vsel %vm14172_vm14, %v13967_v16, %v4456_v53  ;;  %v10205_v2 = vmin.u32 %v4333_v55, %v14237_v11  ;;  %vm4611_vm11 = vcmp.lt.s32.totalorder %v14227_v25, 1  ;;  %vm4614_vm12 = vcmp.lt.s32.totalorder %v14227_v25, 4 }
 0x2e0   :  { %12087 = vcosq.f32 %v4459_v15  ;;  %vm4612_vm13 = vcmp.lt.s32.totalorder %v14227_v25, 2  ;;  %vm4613_vm10 = vcmp.lt.s32.totalorder %v14227_v25, 3  ;;  %v4619_v37 = vsel %vm4611_vm11, %v4598_v45, %v4601_v42 }
 0x2e1   :  { %12089 = vsinq.f32 %v4459_v15  ;;  %v4620_v61 = vsel %vm4614_vm12, %v4607_v44, 920167782  ;;  %v4335_v17 = vclz %v10205_v2  ;;  %v4595_v1 = vshrl.u32 %v12345_v7, %v4594_v12 }
 0x2e2   :  { %v4616_v51 = vsel %vm4614_vm12, %v4604_v35, 2102212464  ;;  %v4623_v60 = vsel %vm4611_vm11, %v4601_v42, %v4604_v35  ;;  %vm4470_vm14 = vcmp.eq.s32.totalorder %v14223_v14, 2  ;;  %v4353_v46 = vsub.s32 4, %v14225_v34 }
 0x2e3   :  { %v4621_v29 = vsel %vm4613_vm10, %v4604_v35, %v4620_v61  ;;  %v4624_v27 = vsel %vm4614_vm12, %v4610_v21, 1326507024  ;;  %v10212_v30 = vadd.s32 4294967169, %v4479_v23  ;;  %vm4467_vm15 = vcmp.eq.s32.totalorder %v14223_v14, 0 }
 0x2e4   :  { %v10206_v8 = vadd.s32 4294967294, %v4335_v17  ;;  %v4615_v12 = vsel %vm4611_vm11, %v4595_v1, %v4598_v45  ;;  %v4622_v52 = vsel %vm4612_vm13, %v4619_v37, %v4621_v29  ;;  %v4625_v0 = vsel %vm4613_vm10, %v4607_v44, %v4624_v27 }
 0x2e5   :  { %vm14279_vm0 = vcmp.le.f32.partialorder %v4267_v19, 0.7853982  ;;  %v4617_v31 = vsel %vm4613_vm10, %v4601_v42, %v4616_v51  ;;  %v4626_v50 = vsel %vm4612_vm13, %v4623_v60, %v4625_v0  ;;  %v4485_v19 = vadd.s32 1, %v10212_v30 }
 0x2e6   :  { %v14288_v57 = vmul.u32.u64.low %v14249_v24, %v4622_v52  ;;  %v14289_v22 = vmul.u32.u64.high %v14249_v24, %v4622_v52, %v14288_v57  ;;  %vm10207_vm1 = vcmp.lt.s32.totalorder %v10206_v8, 0  ;;  %v4323_v45 = vadd.s32 %v14189_v40, %v14196_v9 }
 0x2e7   :  { %v14293_v59 = vmul.u32.u64.low %v14249_v24, %v4626_v50  ;;  %v14294_v53 = vmul.u32.u64.high %v14249_v24, %v4626_v50, %v14293_v59  ;;  %v4338_v6 = vsel %vm10207_vm1, 0, %v10206_v8  ;;  %v4475_v42 = vand.u32 2147483647, %v14120_v33 }
 0x2e8   :  { %v11430_v15 = vadd.f32 %v13899_v47, %v13862_v36  ;;  %v4339_v55 = vsub.s32 32, %v4338_v6  ;;  %v4343_v35 = vsub.s32 4294967266, %v4338_v6  ;;  %v4618_v44 = vsel %vm4612_vm13, %v4615_v12, %v4617_v31 }
 0x2e9   :  { %vm4486_vm2 = vcmp.gt.s32.totalorder %v4485_v19, 0  ;;  %v4354_v23 = vsel %vm4269_vm9, %v4353_v46, %v14225_v34  ;;  %v4637_v2 = vadd.s32 1, %v14289_v22  ;;  %v4340_v36 = vshll.u32 %v14237_v11, %v4338_v6 }
 0x2ea   :  { %v12088_v21 = vpop.eup %12087  ;;  %v4487_v40 = vsel %vm4486_vm2, %v4485_v19, 0  ;;  %v14308_v9 = vadd.f32 %v11430_v15, %v13759_v38  ;;  %v4341_v47 = vshrl.u32 %v4323_v45, %v4339_v55  ;;  %v4344_v17 = vadd.s32 127, %v4343_v35 }
 0x2eb   :  { %v12090_v37 = vpop.eup %12089  ;;  %v4471_v61 = vxor.u32 2147483648, %v12088_v21  ;;  %v4634_v1 = vmul.u32 %v14249_v24, %v4618_v44  ;;  %vm4636_vm3 = vc.u32 %v14294_v53, %v14288_v57  ;;  %v4489_v51 = vand.u32 31, %v4487_v40 }
 0x2ec   :  { %v4468_v25 = vxor.u32 2147483648, %v12090_v37  ;;  %v4342_v60 = vor.u32 %v4341_v47, %v4340_v36  ;;  %v4345_v46 = vshll.u32 %v4344_v17, 23  ;;  %v4638_v38 = vsel %vm4636_vm3, %v4637_v2, %v14289_v22 }
 0x2ed   :  { %v4472_v34 = vsel %vm4470_vm14, %v4471_v61, %v12090_v37  ;;  %vm4466_vm4 = vcmp.lt.s32.totalorder %v14223_v14, 2  ;;  %v4639_v29 = vadd.s32 %v4638_v38, %v4634_v1  ;;  %v4490_v27 = vsub.s32 32, %v4489_v51 }
 0x2ee   :  { %v4469_v11 = vsel %vm4467_vm15, %v12088_v21, %v4468_v25  ;;  %vm4463_vm5 = vweird.f32 %v13967_v16  ;;  %v4346_v30 = vor.u32 4788187, %v4345_v46  ;;  %v4356_v8 = vsel %vm14279_vm0, 0, %v4354_v23 }
 0x2ef   :  { %v4473_v24 = vsel %vm4466_vm4, %v4469_v11, %v4472_v34  ;;  %v4640_v52 = vadd.s32 536870912, %v4639_v29  ;;  %v4482_v0 = vand.u32 8388607, %v4475_v42  ;;  %v4493_v31 = vshrl.u32 %v12346_v39, %v4490_v27 }
 0x2f0   :  { %v4474_v12 = vsel %vm4463_vm5, nan, %v4473_v24  ;;  %v4347_v50 = vand.u32 2147483647, %v4346_v30  ;;  %v4349_v14 = vcvt.s32.f32 %v4342_v60  ;;  %v4496_v22 = vshrl.u32 %v12347_v43, %v4490_v27 }
 0x2f1   :  { %10100 = vst [vmem:[#allocation2 + $0x48] sm:$0xff] %v4474_v12  ;;  %v4499_v59 = vshrl.u32 %v12348_v48, %v4490_v27  ;;  %v4641_v16 = vshrl.u32 %v4640_v52, 30  ;;  %v4492_v19 = vshll.u32 %v12345_v7, %v4489_v51  ;;  %v4495_v45 = vshll.u32 %v12346_v39, %v4489_v51 }
 0x2f2   :  { %v4502_v6 = vshrl.u32 %v12349_v49, %v4490_v27  ;;  %v4350_v15 = vmul.f32 %v4349_v14, %v4347_v50  ;;  %v4488_v55 = vshrl.u32 %v4487_v40, 5  ;;  %v4498_v35 = vshll.u32 %v12347_v43, %v4489_v51 }
 0x2f3   :  { %v4501_v44 = vshll.u32 %v12348_v48, %v4489_v51  ;;  %v4642_v21 = vshll.u32 %v4641_v16, 30  ;;  %v4494_v23 = vor.u32 %v4493_v31, %v4492_v19  ;;  %v4497_v2 = vor.u32 %v4496_v22, %v4495_v45 }
 0x2f4   :  { %v4505_v37 = vshrl.u32 %v12350_v58, %v4490_v27  ;;  %v4351_v61 = vxor.u32 2147483648, %v4350_v15  ;;  %v4500_v36 = vor.u32 %v4499_v59, %v4498_v35  ;;  %v4504_v17 = vshll.u32 %v12349_v49, %v4489_v51 }
 0x2f5   :  { %v4503_v47 = vor.u32 %v4502_v6, %v4501_v44  ;;  %v4360_v25 = vadd.s32 3, %v4356_v8  ;;  %v14335_v1 = vsub.s32 %v4639_v29, %v4642_v21  ;;  %v4483_v34 = vor.u32 8388608, %v4482_v0 }
 0x2f6   :  { %v4491_v40 = vshrl.u32 %v12345_v7, %v4490_v27  ;;  %v4352_v60 = vsel %vm4269_vm9, %v4351_v61, %v4350_v15  ;;  %v4665_v46 = vsub.s32 4, %v4641_v16  ;;  %v4506_v38 = vor.u32 %v4505_v37, %v4504_v17  ;;  %v14375_v61 = vld [vmem:[%s18931_s2] ss:$0 sm:$0xff] }
 0x2f7   :  { %vm4507_vm6 = vcmp.lt.s32.totalorder %v4488_v55, 1  ;;  %v4355_v11 = vsel %vm14279_vm0, %v13971_v28, %v4352_v60  ;;  %v4645_v24 = vsub.s32 0, %v14335_v1  ;;  %vm4509_vm7 = vcmp.lt.s32.totalorder %v4488_v55, 3 }
 0x2f8   :  { %vm4510_vm8 = vcmp.lt.s32.totalorder %v4488_v55, 4  ;;  %12091 = vcosq.f32 %v4355_v11  ;;  %v4515_v29 = vsel %vm4507_vm6, %v4494_v23, %v4497_v2  ;;  %vm4508_vm9 = vcmp.lt.s32.totalorder %v4488_v55, 2 }
 0x2f9   :  { %v4512_v51 = vsel %vm4510_vm8, %v4500_v36, 2102212464  ;;  %v4516_v30 = vsel %vm4510_vm8, %v4503_v47, 920167782  ;;  %12093 = vsinq.f32 %v4355_v11  ;;  %v10217_v27 = vmin.u32 %v4645_v24, %v14335_v1 }
 0x2fa   :  { %v4517_v8 = vsel %vm4509_vm7, %v4500_v36, %v4516_v30  ;;  %v4519_v56 = vsel %vm4507_vm6, %v4497_v2, %v4500_v36  ;;  %v4520_v52 = vsel %vm4510_vm8, %v4506_v38, 1326507024  ;;  %v4523_v0 = vshll.u32 %v4483_v34, 8 }
 0x2fb   :  { %v4518_v12 = vsel %vm4508_vm9, %v4515_v29, %v4517_v8  ;;  %v4361_v31 = vand.u32 3, %v4360_v25  ;;  %v4647_v50 = vclz %v10217_v27  ;;  %v4511_v14 = vsel %vm4507_vm6, %v4491_v40, %v4494_v23  ;;  %v14384_v25 = vpop.f32.mrb[19].mxu0  ;;  %v14394_v27 = vpop.f32.mrb[18].mxu1 }
 0x2fc   :  { %v4513_v22 = vsel %vm4509_vm7, %v4497_v2, %v4512_v51  ;;  %vm4581_vm11 = vcmp.lt.s32.totalorder %v14117_v32, 0  ;;  %v4521_v59 = vsel %vm4509_vm7, %v4503_v47, %v4520_v52  ;;  %v4790_v44 = vand.u32 2139095040, %v14308_v9 }
 0x2fd   :  { %v14353_v19 = vmul.u32.u64.low %v4523_v0, %v4518_v12  ;;  %v14354_v45 = vmul.u32.u64.high %v4523_v0, %v4518_v12, %v14353_v19  ;;  %v10218_v6 = vadd.s32 4294967294, %v4647_v50  ;;  %v4666_v15 = vsel %vm4581_vm11, %v4665_v46, %v4641_v16 }
 0x2fe   :  { %v4522_v35 = vsel %vm4508_vm9, %v4519_v56, %v4521_v59  ;;  %vm14363_vm12 = vcmp.le.f32.partialorder %v4579_v41, 0.7853982  ;;  %v4514_v23 = vsel %vm4508_vm9, %v4511_v14, %v4513_v22  ;;  %vm4359_vm13 = vweird.f32 %v13971_v28 }
 0x2ff   :  { %v14368_v2 = vmul.u32.u64.low %v4523_v0, %v4522_v35  ;;  %v14369_v37 = vmul.u32.u64.high %v4523_v0, %v4522_v35, %v14368_v2  ;;  %vm4362_vm10 = vcmp.lt.s32.totalorder %v4361_v31, 2  ;;  %vm10219_vm14 = vcmp.lt.s32.totalorder %v10218_v6, 0 }
 0x300   :  { %v4791_v16 = vshrl.u32 %v4790_v44, 23  ;;  %v11432_v41 = vadd.f32 %v14375_v61, %v13961_v13  ;;  %v4635_v55 = vadd.s32 %v14288_v57, %v14294_v53  ;;  %v4650_v36 = vsel %vm10219_vm14, 0, %v10218_v6 }
 0x301   :  { %v4668_v47 = vsel %vm14363_vm12, 0, %v4666_v15  ;;  %v4533_v17 = vadd.s32 1, %v14354_v45  ;;  %v4651_v34 = vsub.s32 32, %v4650_v36  ;;  %v4655_v40 = vsub.s32 4294967266, %v4650_v36 }
 0x302   :  { %v4530_v60 = vmul.u32 %v4523_v0, %v4514_v23  ;;  %v10224_v46 = vadd.s32 4294967169, %v4791_v16  ;;  %v12092_v38 = vpop.eup %12091  ;;  %v4652_v11 = vshll.u32 %v14335_v1, %v4650_v36  ;;  %vm4532_vm15 = vc.u32 %v14369_v37, %v14353_v19 }
 0x303   :  { %v4787_v13 = vand.u32 2147483647, %v14308_v9  ;;  %v14391_v57 = vadd.f32 %v11432_v41, %v13842_v10  ;;  %v12094_v53 = vpop.eup %12093  ;;  %v4367_v24 = vxor.u32 2147483648, %v12092_v38  ;;  %v4653_v51 = vshrl.u32 %v4635_v55, %v4651_v34 }
 0x304   :  { %v4656_v29 = vadd.s32 127, %v4655_v40  ;;  %v4534_v30 = vsel %vm4532_vm15, %v4533_v17, %v14354_v45  ;;  %v4364_v8 = vxor.u32 2147483648, %v12094_v53  ;;  %vm4366_vm0 = vcmp.eq.s32.totalorder %v4361_v31, 2 }
 0x305   :  { %v4535_v12 = vadd.s32 %v4534_v30, %v4530_v60  ;;  %v4797_v1 = vadd.s32 1, %v10224_v46  ;;  %vm4363_vm1 = vcmp.eq.s32.totalorder %v4361_v31, 0  ;;  %v4368_v56 = vsel %vm4366_vm0, %v4367_v24, %v12094_v53 }
 0x306   :  { %v4654_v52 = vor.u32 %v4653_v51, %v4652_v11  ;;  %v4657_v0 = vshll.u32 %v4656_v29, 23  ;;  %v4365_v50 = vsel %vm4363_vm1, %v12092_v38, %v4364_v8  ;;  %v4672_v14 = vadd.s32 3, %v4668_v47 }
 0x307   :  { %v4536_v10 = vadd.s32 536870912, %v4535_v12  ;;  %vm4798_vm2 = vcmp.gt.s32.totalorder %v4797_v1, 0  ;;  %v4369_v22 = vsel %vm4362_vm10, %v4365_v50, %v4368_v56  ;;  %v4794_v45 = vand.u32 8388607, %v4787_v13 }
 0x308   :  { %v4658_v59 = vor.u32 4788187, %v4657_v0  ;;  %v4799_v6 = vsel %vm4798_vm2, %v4797_v1, 0  ;;  %v4370_v15 = vsel %vm4359_vm13, nan, %v4369_v22  ;;  %v4661_v2 = vcvt.s32.f32 %v4654_v52 }
 0x309   :  { %v4537_v35 = vshrl.u32 %v4536_v10, 30  ;;  %v4801_v44 = vand.u32 31, %v4799_v6  ;;  %10099 = vst [vmem:[#allocation2 + $0x40] sm:$0xff] %v4370_v15  ;;  %vm4477_vm3 = vcmp.lt.s32.totalorder %v14120_v33, 0  ;;  %v14402_v31 = vand.u32 3, %v4672_v14 }
 0x30a   :  { %v4659_v23 = vand.u32 2147483647, %v4658_v59  ;;  %v4795_v36 = vor.u32 8388608, %v4794_v45  ;;  %v14406_v47 = vadd.f32 %v14375_v61, %v14038_v18  ;;  %v4531_v28 = vadd.s32 %v14353_v19, %v14369_v37 }
 0x30b   :  { %v4538_v16 = vshll.u32 %v4537_v35, 30  ;;  %v4802_v41 = vsub.s32 32, %v4801_v44  ;;  %v14412_v34 = vshrl.u32 %v4799_v6, 5  ;;  %v4804_v46 = vshll.u32 %v12345_v7, %v4801_v44 }
 0x30c   :  { %v4662_v55 = vmul.f32 %v4661_v2, %v4659_v23  ;;  %v4807_v18 = vshll.u32 %v12346_v39, %v4801_v44  ;;  %v4810_v24 = vshll.u32 %v12347_v43, %v4801_v44  ;;  %v4561_v51 = vsub.s32 4, %v4537_v35  ;;  %v14447_v23 = vpop.f32.mrb[20].mxu0 }
 0x30d   :  { %v14410_v17 = vsub.s32 %v4535_v12, %v4538_v16  ;;  %v4805_v40 = vshrl.u32 %v12346_v39, %v4802_v41  ;;  %v4808_v38 = vshrl.u32 %v12347_v43, %v4802_v41  ;;  %v4811_v11 = vshrl.u32 %v12348_v48, %v4802_v41 }
 0x30e   :  { %v4663_v60 = vxor.u32 2147483648, %v4662_v55  ;;  %v4814_v19 = vshrl.u32 %v12349_v49, %v4802_v41  ;;  %v4813_v30 = vshll.u32 %v12348_v48, %v4801_v44  ;;  %v4816_v0 = vshll.u32 %v12349_v49, %v4801_v44 }
 0x30f   :  { %v4541_v53 = vsub.s32 0, %v14410_v17  ;;  %v4806_v29 = vor.u32 %v4805_v40, %v4804_v46  ;;  %v4809_v1 = vor.u32 %v4808_v38, %v4807_v18  ;;  %v4812_v56 = vor.u32 %v4811_v11, %v4810_v24 }
 0x310   :  { %v4664_v37 = vsel %vm4581_vm11, %v4663_v60, %v4662_v55  ;;  %v4815_v52 = vor.u32 %v4814_v19, %v4813_v30  ;;  %v4817_v50 = vshrl.u32 %v12350_v58, %v4802_v41  ;;  %vm14433_vm4 = vcmp.le.f32.partialorder %v4475_v42, 0.7853982  ;;  %v14452_v55 = vpop.f32.mrb[19].mxu1 }
 0x311   :  { %v4667_v8 = vsel %vm14363_vm12, %v14117_v32, %v4664_v37  ;;  %v10213_v12 = vmin.u32 %v4541_v53, %v14410_v17  ;;  %v14437_v21 = vshll.u32 %v4795_v36, 8  ;;  %v4686_v22 = vand.u32 2139095040, %v14391_v57 }
 0x312   :  { %12095 = vcosq.f32 %v4667_v8  ;;  %v4562_v59 = vsel %vm4477_vm3, %v4561_v51, %v4537_v35  ;;  %v4818_v45 = vor.u32 %v4817_v50, %v4816_v0  ;;  %vm4819_vm5 = vcmp.lt.s32.totalorder %v14412_v34, 1 }
 0x313   :  { %12097 = vsinq.f32 %v4667_v8  ;;  %v4543_v10 = vclz %v10213_v12  ;;  %vm4822_vm6 = vcmp.lt.s32.totalorder %v14412_v34, 4  ;;  %v4803_v15 = vshrl.u32 %v12345_v7, %v4802_v41 }
 0x314   :  { %v4824_v42 = vsel %vm4822_vm6, %v4812_v56, 2102212464  ;;  %v4827_v44 = vsel %vm4819_vm5, %v4806_v29, %v4809_v1  ;;  %vm4821_vm7 = vcmp.lt.s32.totalorder %v14412_v34, 3  ;;  %v4828_v2 = vsel %vm4822_vm6, %v4815_v52, 920167782 }
 0x315   :  { %v10214_v6 = vadd.s32 4294967294, %v4543_v10  ;;  %v4831_v35 = vsel %vm4819_vm5, %v4809_v1, %v4812_v56  ;;  %v4832_v16 = vsel %vm4822_vm6, %v4818_v45, 1326507024  ;;  %vm4675_vm8 = vcmp.eq.s32.totalorder %v14402_v31, 0 }
 0x316   :  { %vm4820_vm11 = vcmp.lt.s32.totalorder %v14412_v34, 2  ;;  %v4829_v41 = vsel %vm4821_vm7, %v4812_v56, %v4828_v2  ;;  %v4833_v36 = vsel %vm4821_vm7, %v4815_v52, %v4832_v16  ;;  %vm4674_vm12 = vcmp.lt.s32.totalorder %v14402_v31, 2 }
 0x317   :  { %vm10215_vm9 = vcmp.lt.s32.totalorder %v10214_v6, 0  ;;  %v4823_v60 = vsel %vm4819_vm5, %v4803_v15, %v4806_v29  ;;  %v4830_v46 = vsel %vm4820_vm11, %v4827_v44, %v4829_v41  ;;  %v4834_v38 = vsel %vm4820_vm11, %v4831_v35, %v4833_v36 }
 0x318   :  { %v4546_v40 = vsel %vm10215_vm9, 0, %v10214_v6  ;;  %vm4671_vm13 = vweird.f32 %v14117_v32  ;;  %v4825_v18 = vsel %vm4821_vm7, %v4809_v1, %v4824_v42  ;;  %v4687_v24 = vshrl.u32 %v4686_v22, 23 }
 0x319   :  { %v4547_v11 = vsub.s32 32, %v4546_v40  ;;  %v4551_v53 = vsub.s32 4294967266, %v4546_v40  ;;  %v14471_v19 = vmul.u32.u64.low %v14437_v21, %v4834_v38  ;;  %v14472_v37 = vmul.u32.u64.high %v14437_v21, %v4834_v38, %v14471_v19 }
 0x31a   :  { %v14475_v51 = vmul.u32.u64.low %v14437_v21, %v4830_v46  ;;  %v14476_v29 = vmul.u32.u64.high %v14437_v21, %v4830_v46, %v14475_v51  ;;  %v4548_v30 = vshll.u32 %v14410_v17, %v4546_v40  ;;  %v10220_v56 = vadd.s32 4294967169, %v4687_v24 }
 0x31b   :  { %v4549_v8 = vshrl.u32 %v4531_v28, %v4547_v11  ;;  %v4552_v12 = vadd.s32 127, %v4551_v53  ;;  %vm4678_vm10 = vcmp.eq.s32.totalorder %v14402_v31, 2  ;;  %v4564_v1 = vsel %vm14433_vm4, 0, %v4562_v59 }
 0x31c   :  { %v12096_v52 = vpop.eup %12095  ;;  %v4826_v0 = vsel %vm4820_vm11, %v4823_v60, %v4825_v18  ;;  %v14487_v50 = vadd.f32 %v14406_v47, %v13958_v5  ;;  %v4693_v28 = vadd.s32 1, %v10220_v56  ;;  %vm4844_vm14 = vc.u32 %v14472_v37, %v14475_v51 }
 0x31d   :  { %v12098_v10 = vpop.eup %12097  ;;  %v4679_v22 = vxor.u32 2147483648, %v12096_v52  ;;  %v4550_v45 = vor.u32 %v4549_v8, %v4548_v30  ;;  %v4553_v17 = vshll.u32 %v4552_v12, 23  ;;  %v4845_v15 = vadd.s32 1, %v14476_v29 }
 0x31e   :  { %v4676_v6 = vxor.u32 2147483648, %v12098_v10  ;;  %v4683_v59 = vand.u32 2147483647, %v14391_v57  ;;  %v4842_v44 = vmul.u32 %v14437_v21, %v4826_v0  ;;  %vm4694_vm15 = vcmp.gt.s32.totalorder %v4693_v28, 0 }
 0x31f   :  { %v4680_v42 = vsel %vm4678_vm10, %v4679_v22, %v12098_v10  ;;  %v4554_v34 = vor.u32 4788187, %v4553_v17  ;;  %v4568_v47 = vadd.s32 3, %v4564_v1  ;;  %v4846_v2 = vsel %vm4844_vm14, %v4845_v15, %v14476_v29 }
 0x320   :  { %v4677_v5 = vsel %vm4675_vm8, %v12096_v52, %v4676_v6  ;;  %v4695_v35 = vsel %vm4694_vm15, %v4693_v28, 0  ;;  %v4557_v36 = vcvt.s32.f32 %v4550_v45  ;;  %v4847_v40 = vadd.s32 %v4846_v2, %v4842_v44 }
 0x321   :  { %v4681_v16 = vsel %vm4674_vm12, %v4677_v5, %v4680_v42  ;;  %v4555_v41 = vand.u32 2147483647, %v4554_v34  ;;  %v4697_v46 = vand.u32 31, %v4695_v35  ;;  %v14501_v11 = vand.u32 3, %v4568_v47 }
 0x322   :  { %v4682_v60 = vsel %vm4671_vm13, nan, %v4681_v16  ;;  %v4848_v38 = vadd.s32 536870912, %v4847_v40  ;;  %v4690_v53 = vand.u32 8388607, %v4683_v59  ;;  %v4696_v18 = vshrl.u32 %v4695_v35, 5 }
 0x323   :  { %10102 = vst [vmem:[#allocation2 + $0x58] sm:$0xff] %v4682_v60  ;;  %v4558_v21 = vmul.f32 %v4557_v36, %v4555_v41  ;;  %v4698_v24 = vsub.s32 32, %v4697_v46  ;;  %v4700_v29 = vshll.u32 %v12345_v7, %v4697_v46  ;;  %v4703_v30 = vshll.u32 %v12346_v39, %v4697_v46 }
 0x324   :  { %v14505_v31 = vshrl.u32 %v4848_v38, 30  ;;  %v4706_v12 = vshll.u32 %v12347_v43, %v4697_v46  ;;  %v4709_v0 = vshll.u32 %v12348_v48, %v4697_v46  ;;  %v4691_v15 = vor.u32 8388608, %v4690_v53 }
 0x325   :  { %v4559_v19 = vxor.u32 2147483648, %v4558_v21  ;;  %v4701_v32 = vshrl.u32 %v12346_v39, %v4698_v24  ;;  %v4704_v8 = vshrl.u32 %v12347_v43, %v4698_v24  ;;  %v4707_v56 = vshrl.u32 %v12348_v48, %v4698_v24 }
 0x326   :  { %v4850_v1 = vshll.u32 %v14505_v31, 30  ;;  %v4710_v10 = vshrl.u32 %v12349_v49, %v4698_v24  ;;  %v4712_v34 = vshll.u32 %v12349_v49, %v4697_v46  ;;  %v4713_v44 = vshrl.u32 %v12350_v58, %v4698_v24 }
 0x327   :  { %v4560_v52 = vsel %vm4477_vm3, %v4559_v19, %v4558_v21  ;;  %v4702_v45 = vor.u32 %v4701_v32, %v4700_v29  ;;  %v4705_v17 = vor.u32 %v4704_v8, %v4703_v30  ;;  %v4708_v28 = vor.u32 %v4707_v56, %v4706_v12 }
 0x328   :  { %v4563_v22 = vsel %vm14433_vm4, %v14120_v33, %v4560_v52  ;;  %v14521_v6 = vsub.s32 %v4847_v40, %v4850_v1  ;;  %v4711_v42 = vor.u32 %v4710_v10, %v4709_v0  ;;  %v11436_v5 = vadd.f32 %v14375_v61, %v14113_v63 }
 0x329   :  { %12099 = vcosq.f32 %v4563_v22  ;;  %vm4789_vm0 = vcmp.lt.s32.totalorder %v14308_v9, 0  ;;  %vm4715_vm1 = vcmp.lt.s32.totalorder %v4696_v18, 1  ;;  %vm4717_vm2 = vcmp.lt.s32.totalorder %v4696_v18, 3 }
 0x32a   :  { %12101 = vsinq.f32 %v4563_v22  ;;  %v4853_v14 = vsub.s32 0, %v14521_v6  ;;  %vm4718_vm3 = vcmp.lt.s32.totalorder %v4696_v18, 4  ;;  %v4714_v47 = vor.u32 %v4713_v44, %v4712_v34  ;;  %v14573_v44 = vpop.f32.mrb[21].mxu0 }
 0x32b   :  { %v4720_v2 = vsel %vm4718_vm3, %v4708_v28, 2102212464  ;;  %v4723_v35 = vsel %vm4715_vm1, %v4702_v45, %v4705_v17  ;;  %v4724_v16 = vsel %vm4718_vm3, %v4711_v42, 920167782  ;;  %vm4574_vm4 = vcmp.eq.s32.totalorder %v14501_v11, 2 }
 0x32c   :  { %v10225_v41 = vmin.u32 %v4853_v14, %v14521_v6  ;;  %v4699_v36 = vshrl.u32 %v12345_v7, %v4698_v24  ;;  %vm4716_vm5 = vcmp.lt.s32.totalorder %v4696_v18, 2  ;;  %v4725_v63 = vsel %vm4717_vm2, %v4708_v28, %v4724_v16 }
 0x32d   :  { %vm4571_vm6 = vcmp.eq.s32.totalorder %v14501_v11, 0  ;;  %v4726_v40 = vsel %vm4716_vm5, %v4723_v35, %v4725_v63  ;;  %v4727_v60 = vsel %vm4715_vm1, %v4705_v17, %v4708_v28  ;;  %v4728_v46 = vsel %vm4718_vm3, %v4714_v47, 1326507024  ;;  %v14582_v63 = vpop.f32.mrb[20].mxu1 }
 0x32e   :  { %v4731_v21 = vshll.u32 %v4691_v15, 8  ;;  %vm4570_vm7 = vcmp.lt.s32.totalorder %v14501_v11, 2  ;;  %vm14540_vm8 = vcmp.le.f32.partialorder %v4787_v13, 0.7853982  ;;  %v4855_v53 = vclz %v10225_v41 }
 0x32f   :  { %v4719_v24 = vsel %vm4715_vm1, %v4699_v36, %v4702_v45  ;;  %v4721_v19 = vsel %vm4717_vm2, %v4705_v17, %v4720_v2  ;;  %v11438_v29 = vadd.f32 %v14375_v61, %v14200_v54  ;;  %vm4567_vm9 = vweird.f32 %v14120_v33 }
 0x330   :  { %v4873_v30 = vsub.s32 4, %v14505_v31  ;;  %v4729_v32 = vsel %vm4717_vm2, %v4711_v42, %v4728_v46  ;;  %v14551_v8 = vmul.u32.u64.low %v4731_v21, %v4726_v40  ;;  %v14552_v12 = vmul.u32.u64.high %v4731_v21, %v4726_v40, %v14551_v8 }
 0x331   :  { %v4843_v13 = vadd.s32 %v14475_v51, %v14472_v37  ;;  %v10226_v56 = vadd.s32 4294967294, %v4855_v53  ;;  %v4730_v52 = vsel %vm4716_vm5, %v4727_v60, %v4729_v32  ;;  %v4998_v1 = vand.u32 2139095040, %v14487_v50 }
 0x332   :  { %v4722_v0 = vsel %vm4716_vm5, %v4719_v24, %v4721_v19  ;;  %v14559_v54 = vmul.u32.u64.low %v4731_v21, %v4730_v52  ;;  %v14560_v10 = vmul.u32.u64.high %v4731_v21, %v4730_v52, %v14559_v54  ;;  %v4995_v22 = vand.u32 2147483647, %v14487_v50 }
 0x333   :  { %v12100_v45 = vpop.eup %12099  ;;  %vm10227_vm11 = vcmp.lt.s32.totalorder %v10226_v56, 0  ;;  %v4999_v17 = vshrl.u32 %v4998_v1, 23  ;;  %v14564_v28 = vadd.f32 %v11436_v5, %v14024_v20  ;;  %v14567_v37 = vadd.f32 %v11438_v29, %v14110_v4 }
 0x334   :  { %v12102_v51 = vpop.eup %12101  ;;  %v4575_v15 = vxor.u32 2147483648, %v12100_v45  ;;  %v4858_v42 = vsel %vm10227_vm11, 0, %v10226_v56  ;;  %v4874_v18 = vsel %vm4789_vm0, %v4873_v30, %v14505_v31  ;;  %v4741_v34 = vadd.s32 1, %v14552_v12 }
 0x335   :  { %v4572_v14 = vxor.u32 2147483648, %v12102_v51  ;;  %v4859_v47 = vsub.s32 32, %v4858_v42  ;;  %v4863_v2 = vsub.s32 4294967266, %v4858_v42  ;;  %v4738_v35 = vmul.u32 %v4731_v21, %v4722_v0 }
 0x336   :  { %v4576_v20 = vsel %vm4574_vm4, %v4575_v15, %v12102_v51  ;;  %v4860_v4 = vshll.u32 %v14521_v6, %v4858_v42  ;;  %vm4740_vm12 = vc.u32 %v14560_v10, %v14551_v8  ;;  %v10232_v5 = vadd.s32 4294967169, %v4999_v17 }
 0x337   :  { %v4573_v16 = vsel %vm4571_vm6, %v12100_v45, %v4572_v14  ;;  %v4861_v31 = vshrl.u32 %v4843_v13, %v4859_v47  ;;  %v4864_v41 = vadd.s32 127, %v4863_v2  ;;  %v4742_v36 = vsel %vm4740_vm12, %v4741_v34, %v14552_v12 }
 0x338   :  { %v4577_v40 = vsel %vm4570_vm7, %v4573_v16, %v4576_v20  ;;  %v4876_v60 = vsel %vm14540_vm8, 0, %v4874_v18  ;;  %v4743_v46 = vadd.s32 %v4742_v36, %v4738_v35  ;;  %v5005_v6 = vadd.s32 1, %v10232_v5 }
 0x339   :  { %v4578_v21 = vsel %vm4567_vm9, nan, %v4577_v40  ;;  %v4862_v53 = vor.u32 %v4861_v31, %v4860_v4  ;;  %v4865_v24 = vshll.u32 %v4864_v41, 23  ;;  %v4880_v30 = vadd.s32 3, %v4876_v60 }
 0x33a   :  { %10101 = vst [vmem:[#allocation2 + $0x50] sm:$0xff] %v4578_v21  ;;  %v4744_v19 = vadd.s32 536870912, %v4743_v46  ;;  %vm5006_vm13 = vcmp.gt.s32.totalorder %v5005_v6, 0  ;;  %v5002_v32 = vand.u32 8388607, %v4995_v22  ;;  %v4739_v17 = vadd.s32 %v14551_v8, %v14560_v10 }
 0x33b   :  { %v4866_v29 = vor.u32 4788187, %v4865_v24  ;;  %v5007_v11 = vsel %vm5006_vm13, %v5005_v6, 0  ;;  %v4869_v52 = vcvt.s32.f32 %v4862_v53  ;;  %v14595_v54 = vand.u32 3, %v4880_v30  ;;  %v14623_v30 = vpop.f32.mrb[22].mxu0 }
 0x33c   :  { %v14592_v12 = vshrl.u32 %v4744_v19, 30  ;;  %v5009_v13 = vand.u32 31, %v5007_v11  ;;  %v5003_v45 = vor.u32 8388608, %v5002_v32  ;;  %v4894_v42 = vand.u32 2139095040, %v14564_v28 }
 0x33d   :  { %v4867_v56 = vand.u32 2147483647, %v4866_v29  ;;  %v5008_v4 = vshrl.u32 %v5007_v11, 5  ;;  %vm4685_vm10 = vcmp.lt.s32.totalorder %v14391_v57, 0  ;;  %vm14631_vm1 = vcmp.le.f32.partialorder %v4683_v59, 0.7853982 }
 0x33e   :  { %v4746_v1 = vshll.u32 %v14592_v12, 30  ;;  %v5010_v33 = vsub.s32 32, %v5009_v13  ;;  %v5012_v34 = vshll.u32 %v12345_v7, %v5009_v13  ;;  %v5015_v35 = vshll.u32 %v12346_v39, %v5009_v13 }
 0x33f   :  { %v4870_v0 = vmul.f32 %v4869_v52, %v4867_v56  ;;  %v5018_v20 = vshll.u32 %v12347_v43, %v5009_v13  ;;  %v5021_v16 = vshll.u32 %v12348_v48, %v5009_v13  ;;  %v14619_v53 = vshll.u32 %v5003_v45, 8 }
 0x340   :  { %v14598_v51 = vsub.s32 %v4743_v46, %v4746_v1  ;;  %v5013_v15 = vshrl.u32 %v12346_v39, %v5010_v33  ;;  %v5016_v14 = vshrl.u32 %v12347_v43, %v5010_v33  ;;  %v5019_v47 = vshrl.u32 %v12348_v48, %v5010_v33 }
 0x341   :  { %v4871_v18 = vxor.u32 2147483648, %v4870_v0  ;;  %v5022_v8 = vshrl.u32 %v12349_v49, %v5010_v33  ;;  %v5024_v46 = vshll.u32 %v12349_v49, %v5009_v13  ;;  %v5025_v6 = vshrl.u32 %v12350_v58, %v5010_v33  ;;  %v14626_v13 = vpop.f32.mrb[21].mxu1 }
 0x342   :  { %v4749_v2 = vsub.s32 0, %v14598_v51  ;;  %v5014_v5 = vor.u32 %v5013_v15, %v5012_v34  ;;  %v5017_v36 = vor.u32 %v5016_v14, %v5015_v35  ;;  %v5020_v40 = vor.u32 %v5019_v47, %v5018_v20 }
 0x343   :  { %v4872_v10 = vsel %vm4789_vm0, %v4871_v18, %v4870_v0  ;;  %v5023_v60 = vor.u32 %v5022_v8, %v5021_v16  ;;  %v4895_v24 = vshrl.u32 %v4894_v42, 23  ;;  %v4769_v38 = vsub.s32 4, %v14592_v12 }
 0x344   :  { %v4875_v31 = vsel %vm14540_vm8, %v14308_v9, %v4872_v10  ;;  %v10221_v41 = vmin.u32 %v4749_v2, %v14598_v51  ;;  %v5011_v19 = vshrl.u32 %v12345_v7, %v5010_v33  ;;  %v5026_v29 = vor.u32 %v5025_v6, %v5024_v46 }
 0x345   :  { %12103 = vcosq.f32 %v4875_v31  ;;  %vm5027_vm14 = vcmp.lt.s32.totalorder %v5008_v4, 1  ;;  %vm5029_vm15 = vcmp.lt.s32.totalorder %v5008_v4, 3  ;;  %vm5030_vm0 = vcmp.lt.s32.totalorder %v5008_v4, 4 }
 0x346   :  { %12105 = vsinq.f32 %v4875_v31  ;;  %v4751_v21 = vclz %v10221_v41  ;;  %v5035_v11 = vsel %vm5027_vm14, %v5014_v5, %v5017_v36  ;;  %v5032_v56 = vsel %vm5030_vm0, %v5020_v40, 2102212464 }
 0x347   :  { %v5036_v52 = vsel %vm5030_vm0, %v5023_v60, 920167782  ;;  %v5039_v1 = vsel %vm5027_vm14, %v5017_v36, %v5020_v40  ;;  %v5040_v0 = vsel %vm5030_vm0, %v5026_v29, 1326507024  ;;  %vm5028_vm3 = vcmp.lt.s32.totalorder %v5008_v4, 2 }
 0x348   :  { %v10222_v32 = vadd.s32 4294967294, %v4751_v21  ;;  %v5037_v45 = vsel %vm5029_vm15, %v5020_v40, %v5036_v52  ;;  %v5041_v15 = vsel %vm5029_vm15, %v5023_v60, %v5040_v0  ;;  %vm4882_vm4 = vcmp.lt.s32.totalorder %v14595_v54, 2 }
 0x349   :  { %v5031_v18 = vsel %vm5027_vm14, %v5011_v19, %v5014_v5  ;;  %v5038_v34 = vsel %vm5028_vm3, %v5035_v11, %v5037_v45  ;;  %v5042_v14 = vsel %vm5028_vm3, %v5039_v1, %v5041_v15  ;;  %vm4879_vm5 = vweird.f32 %v14308_v9 }
 0x34a   :  { %vm10223_vm2 = vcmp.lt.s32.totalorder %v10222_v32, 0  ;;  %v5033_v2 = vsel %vm5029_vm15, %v5017_v36, %v5032_v56  ;;  %v10228_v35 = vadd.s32 4294967169, %v4895_v24  ;;  %vm4883_vm6 = vcmp.eq.s32.totalorder %v14595_v54, 0 }
 0x34b   :  { %v4754_v42 = vsel %vm10223_vm2, 0, %v10222_v32  ;;  %v14644_v20 = vmul.u32.u64.low %v14619_v53, %v5042_v14  ;;  %v14645_v8 = vmul.u32.u64.high %v14619_v53, %v5042_v14, %v14644_v20  ;;  %vm4886_vm7 = vcmp.eq.s32.totalorder %v14595_v54, 2 }
 0x34c   :  { %v4755_v59 = vsub.s32 32, %v4754_v42  ;;  %v4759_v47 = vsub.s32 4294967266, %v4754_v42  ;;  %v14648_v10 = vmul.u32.u64.low %v14619_v53, %v5038_v34  ;;  %v14649_v16 = vmul.u32.u64.high %v14619_v53, %v5038_v34, %v14648_v10 }
 0x34d   :  { %v4756_v5 = vshll.u32 %v14598_v51, %v4754_v42  ;;  %v4901_v40 = vadd.s32 1, %v10228_v35  ;;  %v4770_v36 = vsel %vm4685_vm10, %v4769_v38, %v14592_v12  ;;  %v5034_v46 = vsel %vm5028_vm3, %v5031_v18, %v5033_v2 }
 0x34e   :  { %v4757_v31 = vshrl.u32 %v4739_v17, %v4755_v59  ;;  %v4760_v41 = vadd.s32 127, %v4759_v47  ;;  %vm5052_vm9 = vc.u32 %v14645_v8, %v14648_v10  ;;  %v5053_v17 = vadd.s32 1, %v14649_v16 }
 0x34f   :  { %v12104_v60 = vpop.eup %12103  ;;  %vm4902_vm8 = vcmp.gt.s32.totalorder %v4901_v40, 0  ;;  %v4891_v29 = vand.u32 2147483647, %v14564_v28  ;;  %v5050_v56 = vmul.u32 %v14619_v53, %v5034_v46  ;;  %v4772_v38 = vsel %vm14631_vm1, 0, %v4770_v36 }
 0x350   :  { %v12106_v6 = vpop.eup %12105  ;;  %v4887_v21 = vxor.u32 2147483648, %v12104_v60  ;;  %v4758_v24 = vor.u32 %v4757_v31, %v4756_v5  ;;  %v4761_v19 = vshll.u32 %v4760_v41, 23  ;;  %v4903_v12 = vsel %vm4902_vm8, %v4901_v40, 0 }
 0x351   :  { %v4884_v51 = vxor.u32 2147483648, %v12106_v6  ;;  %v5054_v52 = vsel %vm5052_vm9, %v5053_v17, %v14649_v16  ;;  %v4905_v1 = vand.u32 31, %v4903_v12  ;;  %v4898_v53 = vand.u32 8388607, %v4891_v29 }
 0x352   :  { %v4888_v32 = vsel %vm4886_vm7, %v4887_v21, %v12106_v6  ;;  %v4762_v11 = vor.u32 4788187, %v4761_v19  ;;  %v4765_v15 = vcvt.s32.f32 %v4758_v24  ;;  %v5055_v42 = vadd.s32 %v5054_v52, %v5050_v56 }
 0x353   :  { %v4885_v4 = vsel %vm4883_vm6, %v12104_v60, %v4884_v51  ;;  %v4906_v34 = vsub.s32 32, %v4905_v1  ;;  %v14677_v14 = vadd.f32 %v14375_v61, %v14275_v3  ;;  %v4776_v47 = vadd.s32 3, %v4772_v38 }
 0x354   :  { %v4889_v0 = vsel %vm4882_vm4, %v4885_v4, %v4888_v32  ;;  %v4763_v45 = vand.u32 2147483647, %v4762_v11  ;;  %v5056_v2 = vadd.s32 536870912, %v5055_v42  ;;  %v4904_v54 = vshrl.u32 %v4903_v12, 5 }
 0x355   :  { %v4890_v18 = vsel %vm4879_vm5, nan, %v4889_v0  ;;  %v4908_v35 = vshll.u32 %v12345_v7, %v4905_v1  ;;  %v4909_v20 = vshrl.u32 %v12346_v39, %v4906_v34  ;;  %v4912_v9 = vshrl.u32 %v12347_v43, %v4906_v34 }
 0x356   :  { %10104 = vst [vmem:[#allocation2 + $0x68] sm:$0xff] %v4890_v18  ;;  %v4766_v59 = vmul.f32 %v4765_v15, %v4763_v45  ;;  %v4915_v16 = vshrl.u32 %v12348_v48, %v4906_v34  ;;  %v14683_v31 = vshrl.u32 %v5056_v2, 30  ;;  %v4911_v41 = vshll.u32 %v12346_v39, %v4905_v1 }
 0x357   :  { %v4918_v3 = vshrl.u32 %v12349_v49, %v4906_v34  ;;  %v4914_v40 = vshll.u32 %v12347_v43, %v4905_v1  ;;  %v4917_v60 = vshll.u32 %v12348_v48, %v4905_v1  ;;  %v4920_v36 = vshll.u32 %v12349_v49, %v4905_v1 }
 0x358   :  { %v4767_v5 = vxor.u32 2147483648, %v4766_v59  ;;  %v4921_v46 = vshrl.u32 %v12350_v58, %v4906_v34  ;;  %v5058_v21 = vshll.u32 %v14683_v31, 30  ;;  %v4910_v24 = vor.u32 %v4909_v20, %v4908_v35 }
 0x359   :  { %v4913_v19 = vor.u32 %v4912_v9, %v4911_v41  ;;  %v4916_v17 = vor.u32 %v4915_v16, %v4914_v40  ;;  %v4919_v32 = vor.u32 %v4918_v3, %v4917_v60  ;;  %v14697_v56 = vand.u32 3, %v4776_v47 }
 0x35a   :  { %v4768_v6 = vsel %vm4685_vm10, %v4767_v5, %v4766_v59  ;;  %v4922_v11 = vor.u32 %v4921_v46, %v4920_v36  ;;  %v14699_v12 = vsub.s32 %v5055_v42, %v5058_v21  ;;  %v5203_v4 = vand.u32 2147483647, %v14567_v37 }
 0x35b   :  { %v4771_v51 = vsel %vm14631_vm1, %v14391_v57, %v4768_v6  ;;  %v4899_v38 = vor.u32 8388608, %v4898_v53  ;;  %vm4923_vm11 = vcmp.lt.s32.totalorder %v4904_v54, 1  ;;  %v5206_v52 = vand.u32 2139095040, %v14567_v37 }
 0x35c   :  { %12107 = vcosq.f32 %v4771_v51  ;;  %v5061_v1 = vsub.s32 0, %v14699_v12  ;;  %vm4925_vm12 = vcmp.lt.s32.totalorder %v4904_v54, 3  ;;  %vm4926_vm13 = vcmp.lt.s32.totalorder %v4904_v54, 4 }
 0x35d   :  { %12109 = vsinq.f32 %v4771_v51  ;;  %v4931_v33 = vsel %vm4923_vm11, %v4910_v24, %v4913_v19  ;;  %v4907_v0 = vshrl.u32 %v12345_v7, %v4906_v34  ;;  %v4928_v45 = vsel %vm4926_vm13, %v4916_v17, 2102212464 }
 0x35e   :  { %v4932_v15 = vsel %vm4926_vm13, %v4919_v32, 920167782  ;;  %v4936_v18 = vsel %vm4926_vm13, %v4922_v11, 1326507024  ;;  %v10233_v42 = vmin.u32 %v5061_v1, %v14699_v12  ;;  %vm4924_vm10 = vcmp.lt.s32.totalorder %v4904_v54, 2  ;;  %v14736_v11 = vpop.f32.mrb[23].mxu0 }
 0x35f   :  { %v4933_v59 = vsel %vm4925_vm12, %v4916_v17, %v4932_v15  ;;  %v4935_v53 = vsel %vm4923_vm11, %v4913_v19, %v4916_v17  ;;  %v4937_v2 = vsel %vm4925_vm12, %v4919_v32, %v4936_v18  ;;  %v4939_v35 = vshll.u32 %v4899_v38, 8  ;;  %v14744_v15 = vpop.f32.mrb[22].mxu1 }
 0x360   :  { %v4934_v47 = vsel %vm4924_vm10, %v4931_v33, %v4933_v59  ;;  %v5207_v20 = vshrl.u32 %v5206_v52, 23  ;;  %vm4778_vm14 = vcmp.lt.s32.totalorder %v14697_v56, 2  ;;  %vm4997_vm15 = vcmp.lt.s32.totalorder %v14487_v50, 0 }
 0x361   :  { %v5063_v34 = vclz %v10233_v42  ;;  %v4927_v9 = vsel %vm4923_vm11, %v4907_v0, %v4910_v24  ;;  %v4929_v16 = vsel %vm4925_vm12, %v4913_v19, %v4928_v45  ;;  %vm4775_vm0 = vweird.f32 %v14391_v57 }
 0x362   :  { %v4938_v5 = vsel %vm4924_vm10, %v4935_v53, %v4937_v2  ;;  %v14717_v41 = vmul.u32.u64.low %v4939_v35, %v4934_v47  ;;  %v14718_v3 = vmul.u32.u64.high %v4939_v35, %v4934_v47, %v14717_v41  ;;  %v10240_v40 = vadd.s32 4294967169, %v5207_v20 }
 0x363   :  { %vm4779_vm1 = vcmp.eq.s32.totalorder %v14697_v56, 0  ;;  %v10234_v60 = vadd.s32 4294967294, %v5063_v34  ;;  %v14722_v36 = vmul.u32.u64.low %v4939_v35, %v4938_v5  ;;  %v14723_v46 = vmul.u32.u64.high %v4939_v35, %v4938_v5, %v14722_v36 }
 0x364   :  { %vm4782_vm2 = vcmp.eq.s32.totalorder %v14697_v56, 2  ;;  %v4930_v6 = vsel %vm4924_vm10, %v4927_v9, %v4929_v16  ;;  %v5213_v21 = vadd.s32 1, %v10240_v40  ;;  %v14729_v24 = vadd.f32 %v14677_v14, %v14184_v62  ;;  %v14798_v16 = vpop.f32.mrb[24].mxu0 }
 0x365   :  { %v5051_v51 = vadd.s32 %v14648_v10, %v14645_v8  ;;  %vm10235_vm3 = vcmp.lt.s32.totalorder %v10234_v60, 0  ;;  %v5081_v17 = vsub.s32 4, %v14683_v31  ;;  %v5210_v32 = vand.u32 8388607, %v5203_v4 }
 0x366   :  { %v12108_v19 = vpop.eup %12107  ;;  %v5066_v52 = vsel %vm10235_vm3, 0, %v10234_v60  ;;  %v4949_v1 = vadd.s32 1, %v14718_v3  ;;  %vm5214_vm4 = vcmp.gt.s32.totalorder %v5213_v21, 0  ;;  %v4946_v0 = vmul.u32 %v4939_v35, %v4930_v6 }
 0x367   :  { %v12110_v38 = vpop.eup %12109  ;;  %v4783_v54 = vxor.u32 2147483648, %v12108_v19  ;;  %v5067_v14 = vsub.s32 32, %v5066_v52  ;;  %v5071_v33 = vsub.s32 4294967266, %v5066_v52  ;;  %v5068_v10 = vshll.u32 %v14699_v12, %v5066_v52 }
 0x368   :  { %v4780_v62 = vxor.u32 2147483648, %v12110_v38  ;;  %vm4948_vm5 = vc.u32 %v14723_v46, %v14717_v41  ;;  %v5215_v45 = vsel %vm5214_vm4, %v5213_v21, 0  ;;  %v5082_v12 = vsel %vm4997_vm15, %v5081_v17, %v14683_v31 }
 0x369   :  { %v4784_v8 = vsel %vm4782_vm2, %v4783_v54, %v12110_v38  ;;  %v5069_v42 = vshrl.u32 %v5051_v51, %v5067_v14  ;;  %v5072_v59 = vadd.s32 127, %v5071_v33  ;;  %v4950_v53 = vsel %vm4948_vm5, %v4949_v1, %v14718_v3 }
 0x36a   :  { %v4781_v18 = vsel %vm4779_vm1, %v12108_v19, %v4780_v62  ;;  %v4951_v2 = vadd.s32 %v4950_v53, %v4946_v0  ;;  %v5217_v35 = vand.u32 31, %v5215_v45  ;;  %vm14758_vm6 = vcmp.le.f32.partialorder %v4995_v22, 0.7853982 }
 0x36b   :  { %v4785_v47 = vsel %vm4778_vm14, %v4781_v18, %v4784_v8  ;;  %v5070_v34 = vor.u32 %v5069_v42, %v5068_v10  ;;  %v5073_v9 = vshll.u32 %v5072_v59, 23  ;;  %v5084_v31 = vsel %vm14758_vm6, 0, %v5082_v12 }
 0x36c   :  { %v4786_v20 = vsel %vm4775_vm0, nan, %v4785_v47  ;;  %v4952_v56 = vadd.s32 536870912, %v4951_v2  ;;  %v5218_v5 = vsub.s32 32, %v5217_v35  ;;  %v5211_v40 = vor.u32 8388608, %v5210_v32 }
 0x36d   :  { %10103 = vst [vmem:[#allocation2 + $0x60] sm:$0xff] %v4786_v20  ;;  %v5074_v3 = vor.u32 4788187, %v5073_v9  ;;  %v5216_v60 = vshrl.u32 %v5215_v45, 5  ;;  %v5077_v36 = vcvt.s32.f32 %v5070_v34  ;;  %v5229_v51 = vshll.u32 %v12348_v48, %v5217_v35 }
 0x36e   :  { %v14764_v57 = vshrl.u32 %v4952_v56, 30  ;;  %v5221_v6 = vshrl.u32 %v12346_v39, %v5218_v5  ;;  %v5224_v21 = vshrl.u32 %v12347_v43, %v5218_v5  ;;  %v5227_v22 = vshrl.u32 %v12348_v48, %v5218_v5 }
 0x36f   :  { %v5075_v19 = vand.u32 2147483647, %v5074_v3  ;;  %v5230_v17 = vshrl.u32 %v12349_v49, %v5218_v5  ;;  %v5220_v54 = vshll.u32 %v12345_v7, %v5217_v35  ;;  %v5223_v32 = vshll.u32 %v12346_v39, %v5217_v35 }
 0x370   :  { %v4954_v38 = vshll.u32 %v14764_v57, 30  ;;  %v5226_v52 = vshll.u32 %v12347_v43, %v5217_v35  ;;  %v5233_v14 = vshrl.u32 %v12350_v58, %v5218_v5  ;;  %v5088_v18 = vadd.s32 3, %v5084_v31 }
 0x371   :  { %v5078_v1 = vmul.f32 %v5077_v36, %v5075_v19  ;;  %v5231_v62 = vor.u32 %v5230_v17, %v5229_v51  ;;  %v5222_v0 = vor.u32 %v5221_v6, %v5220_v54  ;;  %v5225_v8 = vor.u32 %v5224_v21, %v5223_v32 }
 0x372   :  { %v14776_v33 = vsub.s32 %v4951_v2, %v4954_v38  ;;  %v5228_v10 = vor.u32 %v5227_v22, %v5226_v52  ;;  %v5232_v42 = vshll.u32 %v12349_v49, %v5217_v35  ;;  %v11442_v59 = vadd.f32 %v14375_v61, %v14394_v27  ;;  %v14804_v22 = vpop.f32.mrb[23].mxu1 }
 0x373   :  { %v5079_v45 = vxor.u32 2147483648, %v5078_v1  ;;  %vm5235_vm7 = vcmp.lt.s32.totalorder %v5216_v60, 1  ;;  %vm5238_vm8 = vcmp.lt.s32.totalorder %v5216_v60, 4  ;;  %v14782_v47 = vshll.u32 %v5211_v40, 8 }
 0x374   :  { %v4957_v53 = vsub.s32 0, %v14776_v33  ;;  %vm4893_vm9 = vcmp.lt.s32.totalorder %v14564_v28, 0  ;;  %v5234_v2 = vor.u32 %v5233_v14, %v5232_v42  ;;  %vm5237_vm11 = vcmp.lt.s32.totalorder %v5216_v60, 3 }
 0x375   :  { %v5080_v12 = vsel %vm4997_vm15, %v5079_v45, %v5078_v1  ;;  %v5244_v20 = vsel %vm5238_vm8, %v5231_v62, 920167782  ;;  %v5240_v27 = vsel %vm5238_vm8, %v5228_v10, 2102212464  ;;  %v5243_v34 = vsel %vm5235_vm7, %v5222_v0, %v5225_v8 }
 0x376   :  { %v5083_v35 = vsel %vm14758_vm6, %v14487_v50, %v5080_v12  ;;  %v10229_v61 = vmin.u32 %v4957_v53, %v14776_v33  ;;  %v4977_v9 = vsub.s32 4, %v14764_v57  ;;  %v5219_v56 = vshrl.u32 %v12345_v7, %v5218_v5 }
 0x377   :  { %12111 = vcosq.f32 %v5083_v35  ;;  %v5245_v3 = vsel %vm5237_vm11, %v5228_v10, %v5244_v20  ;;  %vm5236_vm12 = vcmp.lt.s32.totalorder %v5216_v60, 2  ;;  %v5247_v40 = vsel %vm5235_vm7, %v5225_v8, %v5228_v10 }
 0x378   :  { %12113 = vsinq.f32 %v5083_v35  ;;  %v4959_v31 = vclz %v10229_v61  ;;  %v5239_v36 = vsel %vm5235_vm7, %v5219_v56, %v5222_v0  ;;  %v5241_v6 = vsel %vm5237_vm11, %v5225_v8, %v5240_v27 }
 0x379   :  { %v5246_v21 = vsel %vm5236_vm12, %v5243_v34, %v5245_v3  ;;  %v5248_v19 = vsel %vm5238_vm8, %v5234_v2, 1326507024  ;;  %v5089_v54 = vand.u32 3, %v5088_v18  ;;  %v4947_v32 = vadd.s32 %v14717_v41, %v14723_v46 }
 0x37a   :  { %v10230_v5 = vadd.s32 4294967294, %v4959_v31  ;;  %v5249_v51 = vsel %vm5237_vm11, %v5231_v62, %v5248_v19  ;;  %v14808_v17 = vmul.u32.u64.low %v14782_v47, %v5246_v21  ;;  %v14809_v38 = vmul.u32.u64.high %v14782_v47, %v5246_v21, %v14808_v17 }
 0x37b   :  { %v5250_v52 = vsel %vm5236_vm12, %v5247_v40, %v5249_v51  ;;  %v5102_v1 = vand.u32 2139095040, %v14729_v24  ;;  %v5242_v14 = vsel %vm5236_vm12, %v5239_v36, %v5241_v6  ;;  %v5099_v10 = vand.u32 2147483647, %v14729_v24 }
 0x37c   :  { %vm10231_vm13 = vcmp.lt.s32.totalorder %v10230_v5, 0  ;;  %v14817_v0 = vmul.u32.u64.low %v14782_v47, %v5250_v52  ;;  %v14818_v8 = vmul.u32.u64.high %v14782_v47, %v5250_v52, %v14817_v0  ;;  %v14822_v18 = vadd.f32 %v11442_v59, %v14266_v26 }
 0x37d   :  { %v4962_v62 = vsel %vm10231_vm13, 0, %v10230_v5  ;;  %v5103_v45 = vshrl.u32 %v5102_v1, 23  ;;  %vm5087_vm10 = vweird.f32 %v14487_v50  ;;  %v4978_v60 = vsel %vm4893_vm9, %v4977_v9, %v14764_v57 }
 0x37e   :  { %v4963_v41 = vsub.s32 32, %v4962_v62  ;;  %v4967_v46 = vsub.s32 4294967266, %v4962_v62  ;;  %v5261_v42 = vadd.s32 1, %v14809_v38  ;;  %vm5090_vm14 = vcmp.lt.s32.totalorder %v5089_v54, 2 }
 0x37f   :  { %vm14831_vm15 = vcmp.le.f32.partialorder %v4891_v29, 0.7853982  ;;  %v5258_v26 = vmul.u32 %v14782_v47, %v5242_v14  ;;  %v10236_v59 = vadd.s32 4294967169, %v5103_v45  ;;  %v4964_v12 = vshll.u32 %v14776_v33, %v4962_v62  ;;  %v14852_v62 = vld [vmem:[%s18931_s2] ss:$0 sm:$0xff] }
 0x380   :  { %v4965_v2 = vshrl.u32 %v4947_v32, %v4963_v41  ;;  %v4968_v20 = vadd.s32 127, %v4967_v46  ;;  %vm5260_vm0 = vc.u32 %v14818_v8, %v14808_v17  ;;  %v4980_v57 = vsel %vm14831_vm15, 0, %v4978_v60 }
 0x381   :  { %v12112_v35 = vpop.eup %12111  ;;  %v5262_v61 = vsel %vm5260_vm0, %v5261_v42, %v14809_v38  ;;  %v5106_v29 = vand.u32 8388607, %v5099_v10  ;;  %v5109_v27 = vadd.s32 1, %v10236_v59  ;;  %vm5091_vm1 = vcmp.eq.s32.totalorder %v5089_v54, 0 }
 0x382   :  { %v12114_v34 = vpop.eup %12113  ;;  %v5095_v9 = vxor.u32 2147483648, %v12112_v35  ;;  %v4966_v47 = vor.u32 %v4965_v2, %v4964_v12  ;;  %v4969_v56 = vshll.u32 %v4968_v20, 23  ;;  %v5263_v3 = vadd.s32 %v5262_v61, %v5258_v26 }
 0x383   :  { %v5092_v33 = vxor.u32 2147483648, %v12114_v34  ;;  %vm5094_vm2 = vcmp.eq.s32.totalorder %v5089_v54, 2  ;;  %vm5110_vm3 = vcmp.gt.s32.totalorder %v5109_v27, 0  ;;  %v4984_v36 = vadd.s32 3, %v4980_v57 }
 0x384   :  { %v5096_v31 = vsel %vm5094_vm2, %v5095_v9, %v12114_v34  ;;  %v4970_v40 = vor.u32 4788187, %v4969_v56  ;;  %v5264_v6 = vadd.s32 536870912, %v5263_v3  ;;  %v5107_v19 = vor.u32 8388608, %v5106_v29 }
 0x385   :  { %v5093_v21 = vsel %vm5091_vm1, %v12112_v35, %v5092_v33  ;;  %v5111_v5 = vsel %vm5110_vm3, %v5109_v27, 0  ;;  %v5414_v51 = vand.u32 2139095040, %v14822_v18  ;;  %v4973_v52 = vcvt.s32.f32 %v4966_v47 }
 0x386   :  { %v5097_v38 = vsel %vm5090_vm14, %v5093_v21, %v5096_v31  ;;  %v4971_v32 = vand.u32 2147483647, %v4970_v40  ;;  %v14845_v1 = vshrl.u32 %v5264_v6, 30  ;;  %v5113_v0 = vand.u32 31, %v5111_v5 }
 0x387   :  { %v5098_v14 = vsel %vm5087_vm10, nan, %v5097_v38  ;;  %v14856_v45 = vadd.f32 %v14852_v62, %v14452_v55  ;;  %v14858_v41 = vand.u32 3, %v4984_v36  ;;  %v14863_v50 = vadd.f32 %v14852_v62, %v14582_v63 }
 0x388   :  { %10106 = vst [vmem:[#allocation2 + $0x78] sm:$0xff] %v5098_v14  ;;  %v4974_v54 = vmul.f32 %v4973_v52, %v4971_v32  ;;  %v5266_v46 = vshll.u32 %v14845_v1, 30  ;;  %v14866_v60 = vadd.s32 %v14808_v17, %v14818_v8  ;;  %v5114_v42 = vsub.s32 32, %v5113_v0 }
 0x389   :  { %v14868_v26 = vshll.u32 %v5107_v19, 8  ;;  %v5411_v59 = vand.u32 2147483647, %v14822_v18  ;;  %v5112_v2 = vshrl.u32 %v5111_v5, 5  ;;  %v5415_v20 = vshrl.u32 %v5414_v51, 23 }
 0x38a   :  { %v4975_v55 = vxor.u32 2147483648, %v4974_v54  ;;  %v14871_v12 = vsub.s32 %v5263_v3, %v5266_v46  ;;  %v5116_v35 = vshll.u32 %v12345_v7, %v5113_v0  ;;  %v5117_v57 = vshrl.u32 %v12346_v39, %v5114_v42 }
 0x38b   :  { %v5119_v63 = vshll.u32 %v12346_v39, %v5113_v0  ;;  %v5120_v61 = vshrl.u32 %v12347_v43, %v5114_v42  ;;  %v5122_v29 = vshll.u32 %v12347_v43, %v5113_v0  ;;  %v5123_v27 = vshrl.u32 %v12348_v48, %v5114_v42 }
 0x38c   :  { %v4976_v17 = vsel %vm4893_vm9, %v4975_v55, %v4974_v54  ;;  %v5269_v8 = vsub.s32 0, %v14871_v12  ;;  %v5118_v9 = vor.u32 %v5117_v57, %v5116_v35  ;;  %v5125_v47 = vshll.u32 %v12348_v48, %v5113_v0 }
 0x38d   :  { %v4979_v34 = vsel %vm14831_vm15, %v14564_v28, %v4976_v17  ;;  %v5126_v56 = vshrl.u32 %v12349_v49, %v5114_v42  ;;  %v5121_v33 = vor.u32 %v5120_v61, %v5119_v63  ;;  %v5124_v31 = vor.u32 %v5123_v27, %v5122_v29 }
 0x38e   :  { %12115 = vcosq.f32 %v4979_v34  ;;  %v10241_v3 = vmin.u32 %v5269_v8, %v14871_v12  ;;  %v5128_v36 = vshll.u32 %v12349_v49, %v5113_v0  ;;  %v5129_v6 = vshrl.u32 %v12350_v58, %v5114_v42 }
 0x38f   :  { %12117 = vsinq.f32 %v4979_v34  ;;  %v5127_v40 = vor.u32 %v5126_v56, %v5125_v47  ;;  %v5115_v53 = vshrl.u32 %v12345_v7, %v5114_v42  ;;  %v10248_v19 = vadd.s32 4294967169, %v5415_v20 }
 0x390   :  { %v5271_v21 = vclz %v10241_v3  ;;  %v14893_v5 = vand.u32 8388607, %v5411_v59  ;;  %v5130_v51 = vor.u32 %v5129_v6, %v5128_v36  ;;  %vm5131_vm4 = vcmp.lt.s32.totalorder %v5112_v2, 1  ;;  %v14918_v3 = vpop.f32.mrb[25].mxu0 }
 0x391   :  { %vm5133_vm5 = vcmp.lt.s32.totalorder %v5112_v2, 3  ;;  %vm5134_vm6 = vcmp.lt.s32.totalorder %v5112_v2, 4  ;;  %vm5205_vm7 = vcmp.lt.s32.totalorder %v14567_v37, 0  ;;  %v5135_v32 = vsel %vm5131_vm4, %v5115_v53, %v5118_v9 }
 0x392   :  { %v10242_v38 = vadd.s32 4294967294, %v5271_v21  ;;  %v5136_v52 = vsel %vm5134_vm6, %v5124_v31, 2102212464  ;;  %v5139_v14 = vsel %vm5131_vm4, %v5118_v9, %v5121_v33  ;;  %vm4987_vm8 = vcmp.eq.s32.totalorder %v14858_v41, 0 }
 0x393   :  { %v5137_v0 = vsel %vm5133_vm5, %v5121_v33, %v5136_v52  ;;  %v5140_v54 = vsel %vm5134_vm6, %v5127_v40, 920167782  ;;  %v5143_v46 = vsel %vm5131_vm4, %v5121_v33, %v5124_v31  ;;  %v5144_v42 = vsel %vm5134_vm6, %v5130_v51, 1326507024 }
 0x394   :  { %vm4986_vm9 = vcmp.lt.s32.totalorder %v14858_v41, 2  ;;  %vm10243_vm11 = vcmp.lt.s32.totalorder %v10242_v38, 0  ;;  %vm5132_vm12 = vcmp.lt.s32.totalorder %v5112_v2, 2  ;;  %v5141_v55 = vsel %vm5133_vm5, %v5124_v31, %v5140_v54 }
 0x395   :  { %v5145_v20 = vsel %vm5133_vm5, %v5127_v40, %v5144_v42  ;;  %vm4983_vm13 = vweird.f32 %v14564_v28  ;;  %v5274_v35 = vsel %vm10243_vm11, 0, %v10242_v38  ;;  %v5289_v57 = vsub.s32 4, %v14845_v1 }
 0x396   :  { %v5142_v63 = vsel %vm5132_vm12, %v5139_v14, %v5141_v55  ;;  %v5146_v61 = vsel %vm5132_vm12, %v5143_v46, %v5145_v20  ;;  %vm14905_vm10 = vcmp.le.f32.partialorder %v5203_v4, 0.7853982  ;;  %v5275_v8 = vsub.s32 32, %v5274_v35 }
 0x397   :  { %v5279_v29 = vsub.s32 4294967266, %v5274_v35  ;;  %v5138_v27 = vsel %vm5132_vm12, %v5135_v32, %v5137_v0  ;;  %v5421_v34 = vadd.s32 1, %v10248_v19  ;;  %v5276_v4 = vshll.u32 %v14871_v12, %v5274_v35  ;;  %v14931_v32 = vpop.f32.mrb[24].mxu1 }
 0x398   :  { %v14910_v2 = vmul.u32.u64.low %v14868_v26, %v5146_v61  ;;  %v14911_v9 = vmul.u32.u64.high %v14868_v26, %v5146_v61, %v14910_v2  ;;  %v14914_v47 = vmul.u32.u64.low %v14868_v26, %v5142_v63  ;;  %v14915_v56 = vmul.u32.u64.high %v14868_v26, %v5142_v63, %v14914_v47  ;;  %v12116_v33 = vpop.eup %12115 }
 0x399   :  { %v5277_v31 = vshrl.u32 %v14866_v60, %v5275_v8  ;;  %v5280_v40 = vadd.s32 127, %v5279_v29  ;;  %vm5422_vm14 = vcmp.gt.s32.totalorder %v5421_v34, 0  ;;  %v12118_v36 = vpop.eup %12117  ;;  %v4991_v6 = vxor.u32 2147483648, %v12116_v33 }
 0x39a   :  { %v5423_v21 = vsel %vm5422_vm14, %v5421_v34, 0  ;;  %v14924_v53 = vadd.f32 %v14856_v45, %v14384_v25  ;;  %v14928_v19 = vadd.f32 %v14863_v50, %v14447_v23  ;;  %v4988_v51 = vxor.u32 2147483648, %v12118_v36 }
 0x39b   :  { %vm4990_vm15 = vcmp.eq.s32.totalorder %v14858_v41, 2  ;;  %v5278_v38 = vor.u32 %v5277_v31, %v5276_v4  ;;  %v5281_v12 = vshll.u32 %v5280_v40, 23  ;;  %v5290_v52 = vsel %vm5205_vm7, %v5289_v57, %v14845_v1 }
 0x39c   :  { %v4992_v60 = vsel %vm4990_vm15, %v4991_v6, %v12118_v36  ;;  %vm5156_vm0 = vc.u32 %v14911_v9, %v14914_v47  ;;  %v5157_v25 = vadd.s32 1, %v14915_v56  ;;  %v4989_v23 = vsel %vm4987_vm8, %v12116_v33, %v4988_v51 }
 0x39d   :  { %v5282_v45 = vor.u32 4788187, %v5281_v12  ;;  %v5154_v50 = vmul.u32 %v14868_v26, %v5138_v27  ;;  %v5425_v14 = vand.u32 31, %v5423_v21  ;;  %v4993_v0 = vsel %vm4986_vm9, %v4989_v23, %v4992_v60 }
 0x39e   :  { %v5285_v54 = vcvt.s32.f32 %v5278_v38  ;;  %v5158_v46 = vsel %vm5156_vm0, %v5157_v25, %v14915_v56  ;;  %v5419_v1 = vor.u32 8388608, %v14893_v5  ;;  %v4994_v42 = vsel %vm4983_vm13, nan, %v4993_v0 }
 0x39f   :  { %v5283_v55 = vand.u32 2147483647, %v5282_v45  ;;  %v5159_v20 = vadd.s32 %v5158_v46, %v5154_v50  ;;  %v5426_v35 = vsub.s32 32, %v5425_v14  ;;  %10105 = vst [vmem:[#allocation2 + $0x70] sm:$0xff] %v4994_v42  ;;  %v5292_v57 = vsel %vm14905_vm10, 0, %v5290_v52 }
 0x3a0   :  { %v5424_v26 = vshrl.u32 %v5423_v21, 5  ;;  %v5428_v63 = vshll.u32 %v12345_v7, %v5425_v14  ;;  %v5431_v41 = vshll.u32 %v12346_v39, %v5425_v14  ;;  %v5434_v5 = vshll.u32 %v12347_v43, %v5425_v14 }
 0x3a1   :  { %v5286_v61 = vmul.f32 %v5285_v54, %v5283_v55  ;;  %v5160_v8 = vadd.s32 536870912, %v5159_v20  ;;  %v5429_v29 = vshrl.u32 %v12346_v39, %v5426_v35  ;;  %v5432_v28 = vshrl.u32 %v12347_v43, %v5426_v35 }
 0x3a2   :  { %v5435_v27 = vshrl.u32 %v12348_v48, %v5426_v35  ;;  %v5437_v34 = vshll.u32 %v12348_v48, %v5425_v14  ;;  %v5438_v2 = vshrl.u32 %v12349_v49, %v5426_v35  ;;  %v5441_v31 = vshrl.u32 %v12350_v58, %v5426_v35 }
 0x3a3   :  { %v5287_v56 = vxor.u32 2147483648, %v5286_v61  ;;  %v5161_v33 = vshrl.u32 %v5160_v8, 30  ;;  %v5430_v4 = vor.u32 %v5429_v29, %v5428_v63  ;;  %v5433_v40 = vor.u32 %v5432_v28, %v5431_v41 }
 0x3a4   :  { %v5436_v36 = vor.u32 %v5435_v27, %v5434_v5  ;;  %v5439_v6 = vor.u32 %v5438_v2, %v5437_v34  ;;  %v5440_v21 = vshll.u32 %v12349_v49, %v5425_v14  ;;  %v5296_v38 = vadd.s32 3, %v5292_v57 }
 0x3a5   :  { %v5288_v51 = vsel %vm5205_vm7, %v5287_v56, %v5286_v61  ;;  %v5162_v12 = vshll.u32 %v5161_v33, 30  ;;  %v14962_v60 = vshll.u32 %v5419_v1, 8  ;;  %vm5443_vm1 = vcmp.lt.s32.totalorder %v5424_v26, 1 }
 0x3a6   :  { %v5291_v52 = vsel %vm14905_vm10, %v14567_v37, %v5288_v51  ;;  %v5442_v25 = vor.u32 %v5441_v31, %v5440_v21  ;;  %vm5444_vm2 = vcmp.lt.s32.totalorder %v5424_v26, 2  ;;  %vm5446_vm3 = vcmp.lt.s32.totalorder %v5424_v26, 4  ;;  %v14997_v31 = vpop.f32.mrb[26].mxu0 }
 0x3a7   :  { %12119 = vcosq.f32 %v5291_v52  ;;  %v14967_v23 = vsub.s32 %v5159_v20, %v5162_v12  ;;  %v5451_v45 = vsel %vm5443_vm1, %v5430_v4, %v5433_v40  ;;  %vm5445_vm4 = vcmp.lt.s32.totalorder %v5424_v26, 3 }
 0x3a8   :  { %12121 = vsinq.f32 %v5291_v52  ;;  %v5448_v50 = vsel %vm5446_vm3, %v5436_v36, 2102212464  ;;  %v5452_v14 = vsel %vm5446_vm3, %v5439_v6, 920167782  ;;  %v5185_v54 = vsub.s32 4, %v5161_v33 }
 0x3a9   :  { %v5165_v0 = vsub.s32 0, %v14967_v23  ;;  %v5427_v46 = vshrl.u32 %v12345_v7, %v5426_v35  ;;  %v5453_v17 = vsel %vm5445_vm4, %v5436_v36, %v5452_v14  ;;  %v5297_v1 = vand.u32 3, %v5296_v38 }
 0x3aa   :  { %v5454_v42 = vsel %vm5444_vm2, %v5451_v45, %v5453_v17  ;;  %v5455_v55 = vsel %vm5443_vm1, %v5433_v40, %v5436_v36  ;;  %v5456_v20 = vsel %vm5446_vm3, %v5442_v25, 1326507024  ;;  %v5449_v41 = vsel %vm5445_vm4, %v5433_v40, %v5448_v50  ;;  %v15001_v36 = vpop.f32.mrb[25].mxu1 }
 0x3ab   :  { %v10237_v57 = vmin.u32 %v5165_v0, %v14967_v23  ;;  %v5447_v63 = vsel %vm5443_vm1, %v5427_v46, %v5430_v4  ;;  %v5457_v61 = vsel %vm5445_vm4, %v5439_v6, %v5456_v20  ;;  %vm5101_vm5 = vcmp.lt.s32.totalorder %v14729_v24, 0 }
 0x3ac   :  { %v5458_v8 = vsel %vm5444_vm2, %v5455_v55, %v5457_v61  ;;  %v14979_v29 = vmul.u32.u64.low %v14962_v60, %v5454_v42  ;;  %v14980_v35 = vmul.u32.u64.high %v14962_v60, %v5454_v42, %v14979_v29  ;;  %vm14985_vm6 = vcmp.le.f32.partialorder %v5099_v10, 0.7853982 }
 0x3ad   :  { %v5167_v28 = vclz %v10237_v57  ;;  %v5186_v27 = vsel %vm5101_vm5, %v5185_v54, %v5161_v33  ;;  %v5450_v34 = vsel %vm5444_vm2, %v5447_v63, %v5449_v41  ;;  %v5310_v4 = vand.u32 2139095040, %v14924_v53 }
 0x3ae   :  { %v14993_v2 = vmul.u32.u64.low %v14962_v60, %v5458_v8  ;;  %v14994_v56 = vmul.u32.u64.high %v14962_v60, %v5458_v8, %v14993_v2  ;;  %vm5295_vm7 = vweird.f32 %v14567_v37  ;;  %vm5298_vm8 = vcmp.lt.s32.totalorder %v5297_v1, 2 }
 0x3af   :  { %v10238_v10 = vadd.s32 4294967294, %v5167_v28  ;;  %v5307_v40 = vand.u32 2147483647, %v14924_v53  ;;  %vm5299_vm9 = vcmp.eq.s32.totalorder %v5297_v1, 0  ;;  %vm5302_vm11 = vcmp.eq.s32.totalorder %v5297_v1, 2 }
 0x3b0   :  { %v5469_v26 = vadd.s32 1, %v14980_v35  ;;  %v5311_v33 = vshrl.u32 %v5310_v4, 23  ;;  %v5155_v21 = vadd.s32 %v14914_v47, %v14911_v9  ;;  %v5188_v51 = vsel %vm14985_vm6, 0, %v5186_v27 }
 0x3b1   :  { %v12120_v6 = vpop.eup %12119  ;;  %vm10239_vm12 = vcmp.lt.s32.totalorder %v10238_v10, 0  ;;  %v5466_v38 = vmul.u32 %v14962_v60, %v5450_v34  ;;  %vm5468_vm13 = vc.u32 %v14994_v56, %v14979_v29  ;;  %v5622_v45 = vand.u32 2139095040, %v14928_v19 }
 0x3b2   :  { %v12122_v12 = vpop.eup %12121  ;;  %v5303_v52 = vxor.u32 2147483648, %v12120_v6  ;;  %v5170_v25 = vsel %vm10239_vm12, 0, %v10238_v10  ;;  %v5314_v9 = vand.u32 8388607, %v5307_v40  ;;  %v5470_v60 = vsel %vm5468_vm13, %v5469_v26, %v14980_v35 }
 0x3b3   :  { %v5300_v50 = vxor.u32 2147483648, %v12122_v12  ;;  %v5171_v14 = vsub.s32 32, %v5170_v25  ;;  %v5175_v0 = vsub.s32 4294967266, %v5170_v25  ;;  %v5172_v54 = vshll.u32 %v14967_v23, %v5170_v25 }
 0x3b4   :  { %v5304_v47 = vsel %vm5302_vm11, %v5303_v52, %v12122_v12  ;;  %v10244_v46 = vadd.s32 4294967169, %v5311_v33  ;;  %v5471_v20 = vadd.s32 %v5470_v60, %v5466_v38  ;;  %v5192_v63 = vadd.s32 3, %v5188_v51 }
 0x3b5   :  { %v5301_v17 = vsel %vm5299_vm9, %v12120_v6, %v5300_v50  ;;  %v5173_v42 = vshrl.u32 %v5155_v21, %v5171_v14  ;;  %v5176_v55 = vadd.s32 127, %v5175_v0  ;;  %v5623_v61 = vshrl.u32 %v5622_v45, 23 }
 0x3b6   :  { %v5305_v57 = vsel %vm5298_vm8, %v5301_v17, %v5304_v47  ;;  %v5317_v41 = vadd.s32 1, %v10244_v46  ;;  %v5472_v34 = vadd.s32 536870912, %v5471_v20  ;;  %v5315_v23 = vor.u32 8388608, %v5314_v9 }
 0x3b7   :  { %v5306_v8 = vsel %vm5295_vm7, nan, %v5305_v57  ;;  %v5174_v28 = vor.u32 %v5173_v42, %v5172_v54  ;;  %v5177_v27 = vshll.u32 %v5176_v55, 23  ;;  %v5619_v35 = vand.u32 2147483647, %v14928_v19 }
 0x3b8   :  { %10108 = vst [vmem:[#allocation2 + $0x88] sm:$0xff] %v5306_v8  ;;  %vm5318_vm10 = vcmp.gt.s32.totalorder %v5317_v41, 0  ;;  %v5473_v4 = vshrl.u32 %v5472_v34, 30  ;;  %v10256_v26 = vadd.s32 4294967169, %v5623_v61  ;;  %v15022_v21 = vand.u32 3, %v5192_v63 }
 0x3b9   :  { %v5178_v2 = vor.u32 4788187, %v5177_v27  ;;  %v5319_v10 = vsel %vm5318_vm10, %v5317_v41, 0  ;;  %v5181_v6 = vcvt.s32.f32 %v5174_v28  ;;  %vm5413_vm14 = vcmp.lt.s32.totalorder %v14822_v18, 0 }
 0x3ba   :  { %v5321_v1 = vand.u32 31, %v5319_v10  ;;  %v5474_v37 = vshll.u32 %v5473_v4, 30  ;;  %v15027_v51 = vadd.s32 %v14979_v29, %v14994_v56  ;;  %v15029_v12 = vshll.u32 %v5315_v23, 8 }
 0x3bb   :  { %v5179_v33 = vand.u32 2147483647, %v5178_v2  ;;  %v15033_v52 = vand.u32 8388607, %v5619_v35  ;;  %v15037_v50 = vshrl.u32 %v5319_v10, 5  ;;  %v15039_v14 = vadd.s32 1, %v10256_v26 }
 0x3bc   :  { %v5322_v38 = vsub.s32 32, %v5321_v1  ;;  %v15035_v45 = vsub.s32 %v5471_v20, %v5474_v37  ;;  %v5497_v0 = vsub.s32 4, %v5473_v4  ;;  %v5324_v9 = vshll.u32 %v12345_v7, %v5321_v1 }
 0x3bd   :  { %v5182_v25 = vmul.f32 %v5181_v6, %v5179_v33  ;;  %v5327_v60 = vshll.u32 %v12346_v39, %v5321_v1  ;;  %v5330_v42 = vshll.u32 %v12347_v43, %v5321_v1  ;;  %v5333_v55 = vshll.u32 %v12348_v48, %v5321_v1  ;;  %v15071_v6 = vpop.f32.mrb[27].mxu0 }
 0x3be   :  { %v5325_v29 = vshrl.u32 %v12346_v39, %v5322_v38  ;;  %v5328_v56 = vshrl.u32 %v12347_v43, %v5322_v38  ;;  %v5477_v54 = vsub.s32 0, %v15035_v45  ;;  %v5331_v46 = vshrl.u32 %v12348_v48, %v5322_v38 }
 0x3bf   :  { %v5183_v47 = vxor.u32 2147483648, %v5182_v25  ;;  %v5334_v20 = vshrl.u32 %v12349_v49, %v5322_v38  ;;  %v5336_v61 = vshll.u32 %v12349_v49, %v5321_v1  ;;  %v5337_v34 = vshrl.u32 %v12350_v58, %v5322_v38 }
 0x3c0   :  { %v5326_v17 = vor.u32 %v5325_v29, %v5324_v9  ;;  %v10249_v63 = vmin.u32 %v5477_v54, %v15035_v45  ;;  %v5329_v41 = vor.u32 %v5328_v56, %v5327_v60  ;;  %v5332_v28 = vor.u32 %v5331_v46, %v5330_v42 }
 0x3c1   :  { %v5184_v57 = vsel %vm5101_vm5, %v5183_v47, %v5182_v25  ;;  %v5335_v27 = vor.u32 %v5334_v20, %v5333_v55  ;;  %v11448_v2 = vadd.f32 %v14852_v62, %v14626_v13  ;;  %v11450_v10 = vadd.f32 %v14852_v62, %v14744_v15 }
 0x3c2   :  { %v5187_v8 = vsel %vm14985_vm6, %v14729_v24, %v5184_v57  ;;  %v5479_v23 = vclz %v10249_v63  ;;  %vm15064_vm15 = vcmp.le.f32.partialorder %v5411_v59, 0.7853982  ;;  %v5498_v5 = vsel %vm5413_vm14, %v5497_v0, %v5473_v4  ;;  %v15079_v0 = vpop.f32.mrb[26].mxu1 }
 0x3c3   :  { %12123 = vcosq.f32 %v5187_v8  ;;  %v5323_v1 = vshrl.u32 %v12345_v7, %v5322_v38  ;;  %v5338_v33 = vor.u32 %v5337_v34, %v5336_v61  ;;  %vm5339_vm0 = vcmp.lt.s32.totalorder %v15037_v50, 1 }
 0x3c4   :  { %12125 = vsinq.f32 %v5187_v8  ;;  %v10250_v37 = vadd.s32 4294967294, %v5479_v23  ;;  %vm5341_vm1 = vcmp.lt.s32.totalorder %v15037_v50, 3  ;;  %vm5342_vm2 = vcmp.lt.s32.totalorder %v15037_v50, 4 }
 0x3c5   :  { %v5344_v13 = vsel %vm5342_vm2, %v5332_v28, 2102212464  ;;  %v5347_v15 = vsel %vm5339_vm0, %v5326_v17, %v5329_v41  ;;  %v5348_v59 = vsel %vm5342_vm2, %v5335_v27, 920167782  ;;  %v5351_v25 = vsel %vm5339_vm0, %v5329_v41, %v5332_v28 }
 0x3c6   :  { %vm10251_vm3 = vcmp.lt.s32.totalorder %v10250_v37, 0  ;;  %vm5340_vm4 = vcmp.lt.s32.totalorder %v15037_v50, 2  ;;  %v5349_v4 = vsel %vm5341_vm1, %v5332_v28, %v5348_v59  ;;  %v5352_v38 = vsel %vm5342_vm2, %v5338_v33, 1326507024 }
 0x3c7   :  { %vm5195_vm5 = vcmp.eq.s32.totalorder %v15022_v21, 0  ;;  %v5482_v9 = vsel %vm10251_vm3, 0, %v10250_v37  ;;  %v5343_v29 = vsel %vm5339_vm0, %v5323_v1, %v5326_v17  ;;  %v5350_v56 = vsel %vm5340_vm4, %v5347_v15, %v5349_v4 }
 0x3c8   :  { %v5353_v47 = vsel %vm5341_vm1, %v5335_v27, %v5352_v38  ;;  %vm5194_vm6 = vcmp.lt.s32.totalorder %v15022_v21, 2  ;;  %v5483_v54 = vsub.s32 32, %v5482_v9  ;;  %v5487_v60 = vsub.s32 4294967266, %v5482_v9 }
 0x3c9   :  { %v5345_v46 = vsel %vm5341_vm1, %v5329_v41, %v5344_v13  ;;  %v5354_v42 = vsel %vm5340_vm4, %v5351_v25, %v5353_v47  ;;  %vm5191_vm7 = vweird.f32 %v14729_v24  ;;  %v5484_v63 = vshll.u32 %v15035_v45, %v5482_v9 }
 0x3ca   :  { %v15093_v17 = vmul.u32.u64.low %v15029_v12, %v5354_v42  ;;  %v15094_v55 = vmul.u32.u64.high %v15029_v12, %v5354_v42, %v15093_v17  ;;  %v15097_v20 = vmul.u32.u64.low %v15029_v12, %v5350_v56  ;;  %v15098_v57 = vmul.u32.u64.high %v15029_v12, %v5350_v56, %v15097_v20 }
 0x3cb   :  { %v5485_v61 = vshrl.u32 %v15027_v51, %v5483_v54  ;;  %v5488_v8 = vadd.s32 127, %v5487_v60  ;;  %vm5630_vm8 = vcmp.gt.s32.totalorder %v15039_v14, 0  ;;  %v5346_v41 = vsel %vm5340_vm4, %v5343_v29, %v5345_v46 }
 0x3cc   :  { %v5631_v28 = vsel %vm5630_vm8, %v15039_v14, 0  ;;  %v15108_v27 = vadd.f32 %v11448_v2, %v14573_v44  ;;  %v15111_v34 = vadd.f32 %v11450_v10, %v14623_v30  ;;  %v5500_v51 = vsel %vm15064_vm15, 0, %v5498_v5 }
 0x3cd   :  { %v12124_v23 = vpop.eup %12123  ;;  %v5486_v1 = vor.u32 %v5485_v61, %v5484_v63  ;;  %v5489_v33 = vshll.u32 %v5488_v8, 23  ;;  %v5633_v45 = vand.u32 31, %v5631_v28  ;;  %vm5198_vm9 = vcmp.eq.s32.totalorder %v15022_v21, 2 }
 0x3ce   :  { %v12126_v37 = vpop.eup %12125  ;;  %v5199_v50 = vxor.u32 2147483648, %v12124_v23  ;;  %vm5364_vm11 = vc.u32 %v15094_v55, %v15097_v20  ;;  %v5365_v44 = vadd.s32 1, %v15098_v57  ;;  %v5362_v30 = vmul.u32 %v15029_v12, %v5346_v41 }
 0x3cf   :  { %v5196_v14 = vxor.u32 2147483648, %v12126_v37  ;;  %v5490_v2 = vor.u32 4788187, %v5489_v33  ;;  %v5634_v10 = vsub.s32 32, %v5633_v45  ;;  %v5504_v15 = vadd.s32 3, %v5500_v51 }
 0x3d0   :  { %v5200_v13 = vsel %vm5198_vm9, %v5199_v50, %v12126_v37  ;;  %v5366_v59 = vsel %vm5364_vm11, %v5365_v44, %v15098_v57  ;;  %v5627_v5 = vor.u32 8388608, %v15033_v52  ;;  %v5493_v38 = vcvt.s32.f32 %v5486_v1 }
 0x3d1   :  { %v5197_v25 = vsel %vm5195_vm5, %v12124_v23, %v5196_v14  ;;  %v5491_v4 = vand.u32 2147483647, %v5490_v2  ;;  %v5367_v9 = vadd.s32 %v5366_v59, %v5362_v30  ;;  %v5636_v56 = vshll.u32 %v12345_v7, %v5633_v45 }
 0x3d2   :  { %v5201_v29 = vsel %vm5194_vm6, %v5197_v25, %v5200_v13  ;;  %v5637_v12 = vshrl.u32 %v12346_v39, %v5634_v10  ;;  %v5640_v47 = vshrl.u32 %v12347_v43, %v5634_v10  ;;  %v5643_v46 = vshrl.u32 %v12348_v48, %v5634_v10 }
 0x3d3   :  { %v5202_v54 = vsel %vm5191_vm7, nan, %v5201_v29  ;;  %v5494_v60 = vmul.f32 %v5493_v38, %v5491_v4  ;;  %v5368_v52 = vadd.s32 536870912, %v5367_v9  ;;  %v5632_v42 = vshrl.u32 %v5631_v28, 5 }
 0x3d4   :  { %10107 = vst [vmem:[#allocation2 + $0x80] sm:$0xff] %v5202_v54  ;;  %v5639_v17 = vshll.u32 %v12346_v39, %v5633_v45  ;;  %v5642_v21 = vshll.u32 %v12347_v43, %v5633_v45  ;;  %v5646_v57 = vshrl.u32 %v12349_v49, %v5634_v10  ;;  %v5638_v8 = vor.u32 %v5637_v12, %v5636_v56 }
 0x3d5   :  { %v5495_v63 = vxor.u32 2147483648, %v5494_v60  ;;  %v5369_v61 = vshrl.u32 %v5368_v52, 30  ;;  %v5645_v41 = vshll.u32 %v12348_v48, %v5633_v45  ;;  %v5648_v1 = vshll.u32 %v12349_v49, %v5633_v45 }
 0x3d6   :  { %v5641_v23 = vor.u32 %v5640_v47, %v5639_v17  ;;  %v5644_v24 = vor.u32 %v5643_v46, %v5642_v21  ;;  %v5649_v33 = vshrl.u32 %v12350_v58, %v5634_v10  ;;  %v15140_v50 = vshll.u32 %v5627_v5, 8  ;;  %v15166_v17 = vpop.f32.mrb[28].mxu0 }
 0x3d7   :  { %v5496_v28 = vsel %vm5413_vm14, %v5495_v63, %v5494_v60  ;;  %v5370_v51 = vshll.u32 %v5369_v61, 30  ;;  %v5647_v37 = vor.u32 %v5646_v57, %v5645_v41  ;;  %v15145_v14 = vand.u32 3, %v5504_v15  ;;  %v15175_v41 = vpop.f32.mrb[27].mxu1 }
 0x3d8   :  { %v5499_v44 = vsel %vm15064_vm15, %v14822_v18, %v5496_v28  ;;  %v5635_v2 = vshrl.u32 %v12345_v7, %v5634_v10  ;;  %v5650_v30 = vor.u32 %v5649_v33, %v5648_v1  ;;  %vm5651_vm12 = vcmp.lt.s32.totalorder %v5632_v42, 1 }
 0x3d9   :  { %12127 = vcosq.f32 %v5499_v44  ;;  %v15148_v45 = vsub.s32 %v5367_v9, %v5370_v51  ;;  %vm5654_vm13 = vcmp.lt.s32.totalorder %v5632_v42, 4  ;;  %vm5652_vm10 = vcmp.lt.s32.totalorder %v5632_v42, 2 }
 0x3da   :  { %12129 = vsinq.f32 %v5499_v44  ;;  %v5656_v13 = vsel %vm5654_vm13, %v5644_v24, 2102212464  ;;  %v5659_v59 = vsel %vm5651_vm12, %v5638_v8, %v5641_v23  ;;  %v5393_v25 = vsub.s32 4, %v5369_v61 }
 0x3db   :  { %v5373_v5 = vsub.s32 0, %v15148_v45  ;;  %vm5653_vm14 = vcmp.lt.s32.totalorder %v5632_v42, 3  ;;  %v5660_v26 = vsel %vm5654_vm13, %v5647_v37, 920167782  ;;  %v5655_v4 = vsel %vm5651_vm12, %v5635_v2, %v5638_v8 }
 0x3dc   :  { %v5661_v15 = vsel %vm5653_vm14, %v5644_v24, %v5660_v26  ;;  %v5663_v38 = vsel %vm5651_vm12, %v5641_v23, %v5644_v24  ;;  %v5664_v29 = vsel %vm5654_vm13, %v5650_v30, 1326507024  ;;  %v5657_v56 = vsel %vm5653_vm14, %v5641_v23, %v5656_v13 }
 0x3dd   :  { %v10245_v10 = vmin.u32 %v5373_v5, %v15148_v45  ;;  %v5662_v9 = vsel %vm5652_vm10, %v5659_v59, %v5661_v15  ;;  %v5665_v12 = vsel %vm5653_vm14, %v5647_v37, %v5664_v29  ;;  %vm15161_vm15 = vcmp.le.f32.partialorder %v5307_v40, 0.7853982 }
 0x3de   :  { %v5666_v47 = vsel %vm5652_vm10, %v5663_v38, %v5665_v12  ;;  %v15155_v54 = vmul.u32.u64.low %v15140_v50, %v5662_v9  ;;  %v15156_v60 = vmul.u32.u64.high %v15140_v50, %v5662_v9, %v15155_v54  ;;  %vm5309_vm0 = vcmp.lt.s32.totalorder %v14924_v53, 0 }
 0x3df   :  { %v5375_v46 = vclz %v10245_v10  ;;  %v5394_v21 = vsel %vm5309_vm0, %v5393_v25, %v5369_v61  ;;  %v5658_v57 = vsel %vm5652_vm10, %v5655_v4, %v5657_v56  ;;  %vm5506_vm1 = vcmp.lt.s32.totalorder %v15145_v14, 2 }
 0x3e0   :  { %v15172_v63 = vmul.u32.u64.low %v15140_v50, %v5666_v47  ;;  %v15173_v8 = vmul.u32.u64.high %v15140_v50, %v5666_v47, %v15172_v63  ;;  %vm5507_vm2 = vcmp.eq.s32.totalorder %v15145_v14, 0  ;;  %v5518_v23 = vand.u32 2139095040, %v15108_v27 }
 0x3e1   :  { %v10246_v40 = vadd.s32 4294967294, %v5375_v46  ;;  %vm5510_vm3 = vcmp.eq.s32.totalorder %v15145_v14, 2  ;;  %v5363_v61 = vadd.s32 %v15097_v20, %v15094_v55  ;;  %v5677_v42 = vadd.s32 1, %v15156_v60 }
 0x3e2   :  { %v11452_v24 = vadd.f32 %v14852_v62, %v14804_v22  ;;  %v5396_v33 = vsel %vm15161_vm15, 0, %v5394_v21  ;;  %v5674_v28 = vmul.u32 %v15140_v50, %v5658_v57  ;;  %v5519_v51 = vshrl.u32 %v5518_v23, 23 }
 0x3e3   :  { %v12128_v1 = vpop.eup %12127  ;;  %vm10247_vm4 = vcmp.lt.s32.totalorder %v10246_v40, 0  ;;  %vm5676_vm5 = vc.u32 %v15173_v8, %v15155_v54  ;;  %v5515_v55 = vand.u32 2147483647, %v15108_v27  ;;  %v5830_v22 = vand.u32 2139095040, %v15111_v34 }
 0x3e4   :  { %v12130_v37 = vpop.eup %12129  ;;  %v5511_v44 = vxor.u32 2147483648, %v12128_v1  ;;  %v5378_v2 = vsel %vm10247_vm4, 0, %v10246_v40  ;;  %v5678_v50 = vsel %vm5676_vm5, %v5677_v42, %v15156_v60  ;;  %v10252_v5 = vadd.s32 4294967169, %v5519_v51 }
 0x3e5   :  { %v5508_v20 = vxor.u32 2147483648, %v12130_v37  ;;  %v5379_v30 = vsub.s32 32, %v5378_v2  ;;  %v5383_v13 = vsub.s32 4294967266, %v5378_v2  ;;  %v5380_v59 = vshll.u32 %v15148_v45, %v5378_v2 }
 0x3e6   :  { %v5512_v62 = vsel %vm5510_vm3, %v5511_v44, %v12130_v37  ;;  %v5679_v15 = vadd.s32 %v5678_v50, %v5674_v28  ;;  %vm5503_vm6 = vweird.f32 %v14822_v18  ;;  %v5400_v29 = vadd.s32 3, %v5396_v33 }
 0x3e7   :  { %v5509_v25 = vsel %vm5507_vm2, %v12128_v1, %v5508_v20  ;;  %v5381_v26 = vshrl.u32 %v5363_v61, %v5379_v30  ;;  %v5384_v4 = vadd.s32 127, %v5383_v13  ;;  %v5525_v10 = vadd.s32 1, %v10252_v5 }
 0x3e8   :  { %v5513_v38 = vsel %vm5506_vm1, %v5509_v25, %v5512_v62  ;;  %v5680_v45 = vadd.s32 536870912, %v5679_v15  ;;  %v5522_v47 = vand.u32 8388607, %v5515_v55  ;;  %v15205_v60 = vadd.f32 %v11452_v24, %v14736_v11 }
 0x3e9   :  { %v5514_v56 = vsel %vm5503_vm6, nan, %v5513_v38  ;;  %v5382_v9 = vor.u32 %v5381_v26, %v5380_v59  ;;  %v5385_v12 = vshll.u32 %v5384_v4, 23  ;;  %vm5526_vm7 = vcmp.gt.s32.totalorder %v5525_v10, 0 }
 0x3ea   :  { %10110 = vst [vmem:[#allocation2 + $0x98] sm:$0xff] %v5514_v56  ;;  %v5681_v21 = vshrl.u32 %v5680_v45, 30  ;;  %v5527_v18 = vsel %vm5526_vm7, %v5525_v10, 0  ;;  %v5831_v57 = vshrl.u32 %v5830_v22, 23  ;;  %v15207_v23 = vand.u32 3, %v5400_v29 }
 0x3eb   :  { %v5386_v46 = vor.u32 4788187, %v5385_v12  ;;  %v5529_v14 = vand.u32 31, %v5527_v18  ;;  %v5389_v40 = vcvt.s32.f32 %v5382_v9  ;;  %vm5621_vm8 = vcmp.lt.s32.totalorder %v14928_v19, 0 }
 0x3ec   :  { %v5682_v61 = vshll.u32 %v5681_v21, 30  ;;  %v15212_v42 = vadd.s32 %v15155_v54, %v15173_v8  ;;  %v5523_v1 = vor.u32 8388608, %v5522_v47  ;;  %v5827_v11 = vand.u32 2147483647, %v15111_v34  ;;  %v15238_v47 = vpop.f32.mrb[29].mxu0 }
 0x3ed   :  { %v5387_v63 = vand.u32 2147483647, %v5386_v46  ;;  %v5530_v33 = vsub.s32 32, %v5529_v14  ;;  %v15217_v51 = vshrl.u32 %v5527_v18, 5  ;;  %v10264_v37 = vadd.s32 4294967169, %v5831_v57 }
 0x3ee   :  { %v15215_v28 = vsub.s32 %v5679_v15, %v5682_v61  ;;  %v5705_v44 = vsub.s32 4, %v5681_v21  ;;  %v5532_v2 = vshll.u32 %v12345_v7, %v5529_v14  ;;  %v5535_v8 = vshll.u32 %v12346_v39, %v5529_v14 }
 0x3ef   :  { %v5390_v24 = vmul.f32 %v5389_v40, %v5387_v63  ;;  %v5533_v20 = vshrl.u32 %v12346_v39, %v5530_v33  ;;  %v5536_v30 = vshrl.u32 %v12347_v43, %v5530_v33  ;;  %v5539_v22 = vshrl.u32 %v12348_v48, %v5530_v33 }
 0x3f0   :  { %v5685_v54 = vsub.s32 0, %v15215_v28  ;;  %v5538_v59 = vshll.u32 %v12347_v43, %v5529_v14  ;;  %v5541_v50 = vshll.u32 %v12348_v48, %v5529_v14  ;;  %v5542_v5 = vshrl.u32 %v12349_v49, %v5530_v33 }
 0x3f1   :  { %v5391_v13 = vxor.u32 2147483648, %v5390_v24  ;;  %v5534_v62 = vor.u32 %v5533_v20, %v5532_v2  ;;  %v5537_v4 = vor.u32 %v5536_v30, %v5535_v8  ;;  %v5544_v15 = vshll.u32 %v12349_v49, %v5529_v14 }
 0x3f2   :  { %v10257_v26 = vmin.u32 %v5685_v54, %v15215_v28  ;;  %v5540_v29 = vor.u32 %v5539_v22, %v5538_v59  ;;  %v5543_v10 = vor.u32 %v5542_v5, %v5541_v50  ;;  %v5545_v56 = vshrl.u32 %v12350_v58, %v5530_v33 }
 0x3f3   :  { %v5392_v25 = vsel %vm5309_vm0, %v5391_v13, %v5390_v24  ;;  %v15236_v12 = vshll.u32 %v5523_v1, 8  ;;  %v5837_v45 = vadd.s32 1, %v10264_v37  ;;  %vm15242_vm9 = vcmp.le.f32.partialorder %v5619_v35, 0.7853982  ;;  %v15252_v1 = vpop.f32.mrb[28].mxu1 }
 0x3f4   :  { %v5395_v38 = vsel %vm15161_vm15, %v14924_v53, %v5392_v25  ;;  %v5687_v9 = vclz %v10257_v26  ;;  %v5706_v52 = vsel %vm5621_vm8, %v5705_v44, %v5681_v21  ;;  %v5531_v18 = vshrl.u32 %v12345_v7, %v5530_v33 }
 0x3f5   :  { %12131 = vcosq.f32 %v5395_v38  ;;  %v5546_v57 = vor.u32 %v5545_v56, %v5544_v15  ;;  %vm5547_vm11 = vcmp.lt.s32.totalorder %v15217_v51, 1  ;;  %vm5549_vm12 = vcmp.lt.s32.totalorder %v15217_v51, 3 }
 0x3f6   :  { %12133 = vsinq.f32 %v5395_v38  ;;  %v10258_v14 = vadd.s32 4294967294, %v5687_v9  ;;  %vm5550_vm13 = vcmp.lt.s32.totalorder %v15217_v51, 4  ;;  %v5555_v40 = vsel %vm5547_vm11, %v5534_v62, %v5537_v4 }
 0x3f7   :  { %v5552_v63 = vsel %vm5550_vm13, %v5540_v29, 2102212464  ;;  %v5556_v61 = vsel %vm5550_vm13, %v5543_v10, 920167782  ;;  %v5559_v35 = vsel %vm5547_vm11, %v5537_v4, %v5540_v29  ;;  %vm5548_vm14 = vcmp.lt.s32.totalorder %v15217_v51, 2 }
 0x3f8   :  { %vm10259_vm10 = vcmp.lt.s32.totalorder %v10258_v14, 0  ;;  %v5557_v21 = vsel %vm5549_vm12, %v5540_v29, %v5556_v61  ;;  %v5560_v33 = vsel %vm5550_vm13, %v5546_v57, 1326507024  ;;  %v5551_v37 = vsel %vm5547_vm11, %v5531_v18, %v5534_v62 }
 0x3f9   :  { %v5690_v24 = vsel %vm10259_vm10, 0, %v10258_v14  ;;  %v5558_v44 = vsel %vm5548_vm14, %v5555_v40, %v5557_v21  ;;  %v5561_v2 = vsel %vm5549_vm12, %v5543_v10, %v5560_v33  ;;  %vm5402_vm15 = vcmp.lt.s32.totalorder %v15207_v23, 2 }
 0x3fa   :  { %v5691_v20 = vsub.s32 32, %v5690_v24  ;;  %v5695_v30 = vsub.s32 4294967266, %v5690_v24  ;;  %v5553_v13 = vsel %vm5549_vm12, %v5537_v4, %v5552_v63  ;;  %v5562_v54 = vsel %vm5548_vm14, %v5559_v35, %v5561_v2 }
 0x3fb   :  { %vm5399_vm0 = vweird.f32 %v14924_v53  ;;  %v15268_v8 = vmul.u32.u64.low %v15236_v12, %v5562_v54  ;;  %v15269_v22 = vmul.u32.u64.high %v15236_v12, %v5562_v54, %v15268_v8  ;;  %v5692_v50 = vshll.u32 %v15215_v28, %v5690_v24 }
 0x3fc   :  { %v15272_v62 = vmul.u32.u64.low %v15236_v12, %v5558_v44  ;;  %v15273_v59 = vmul.u32.u64.high %v15236_v12, %v5558_v44, %v15272_v62  ;;  %v5693_v5 = vshrl.u32 %v15212_v42, %v5691_v20  ;;  %v5696_v25 = vadd.s32 127, %v5695_v30 }
 0x3fd   :  { %vm5838_vm1 = vcmp.gt.s32.totalorder %v5837_v45, 0  ;;  %vm5403_vm2 = vcmp.eq.s32.totalorder %v15207_v23, 0  ;;  %v5554_v26 = vsel %vm5548_vm14, %v5551_v37, %v5553_v13  ;;  %v5834_v4 = vand.u32 8388607, %v5827_v11 }
 0x3fe   :  { %v5839_v15 = vsel %vm5838_vm1, %v5837_v45, 0  ;;  %v5694_v29 = vor.u32 %v5693_v5, %v5692_v50  ;;  %v5697_v10 = vshll.u32 %v5696_v25, 23  ;;  %v5708_v56 = vsel %vm15242_vm9, 0, %v5706_v52 }
 0x3ff   :  { %v12132_v38 = vpop.eup %12131  ;;  %v5841_v28 = vand.u32 31, %v5839_v15  ;;  %vm5406_vm3 = vcmp.eq.s32.totalorder %v15207_v23, 2  ;;  %vm5572_vm4 = vc.u32 %v15269_v22, %v15272_v62  ;;  %v5573_v51 = vadd.s32 1, %v15273_v59 }
 0x400   :  { %v12134_v9 = vpop.eup %12133  ;;  %v5407_v42 = vxor.u32 2147483648, %v12132_v38  ;;  %v5698_v57 = vor.u32 4788187, %v5697_v10  ;;  %v5570_v45 = vmul.u32 %v15236_v12, %v5554_v26  ;;  %v5712_v40 = vadd.s32 3, %v5708_v56 }
 0x401   :  { %v5404_v18 = vxor.u32 2147483648, %v12134_v9  ;;  %v5842_v14 = vsub.s32 32, %v5841_v28  ;;  %v5574_v61 = vsel %vm5572_vm4, %v5573_v51, %v15273_v59  ;;  %v5835_v52 = vor.u32 8388608, %v5834_v4 }
 0x402   :  { %v5408_v63 = vsel %vm5406_vm3, %v5407_v42, %v12134_v9  ;;  %v5699_v21 = vand.u32 2147483647, %v5698_v57  ;;  %v5701_v33 = vcvt.s32.f32 %v5694_v29  ;;  %v5575_v24 = vadd.s32 %v5574_v61, %v5570_v45 }
 0x403   :  { %v5405_v35 = vsel %vm5403_vm2, %v12132_v38, %v5404_v18  ;;  %v5844_v44 = vshll.u32 %v12345_v7, %v5841_v28  ;;  %v5845_v2 = vshrl.u32 %v12346_v39, %v5842_v14  ;;  %v5848_v12 = vshrl.u32 %v12347_v43, %v5842_v14 }
 0x404   :  { %v5409_v37 = vsel %vm5402_vm15, %v5405_v35, %v5408_v63  ;;  %v5702_v30 = vmul.f32 %v5701_v33, %v5699_v21  ;;  %v5576_v13 = vadd.s32 536870912, %v5575_v24  ;;  %v5851_v54 = vshrl.u32 %v12348_v48, %v5842_v14 }
 0x405   :  { %v5410_v20 = vsel %vm5399_vm0, nan, %v5409_v37  ;;  %v5840_v8 = vshrl.u32 %v5839_v15, 5  ;;  %v5847_v59 = vshll.u32 %v12346_v39, %v5841_v28  ;;  %v5850_v23 = vshll.u32 %v12347_v43, %v5841_v28 }
 0x406   :  { %10109 = vst [vmem:[#allocation2 + $0x90] sm:$0xff] %v5410_v20  ;;  %v5854_v50 = vshrl.u32 %v12349_v49, %v5842_v14  ;;  %v5703_v5 = vxor.u32 2147483648, %v5702_v30  ;;  %v5577_v25 = vshrl.u32 %v5576_v13, 30  ;;  %v5846_v26 = vor.u32 %v5845_v2, %v5844_v44 }
 0x407   :  { %v5853_v4 = vshll.u32 %v12348_v48, %v5841_v28  ;;  %v5849_v38 = vor.u32 %v5848_v12, %v5847_v59  ;;  %v5852_v53 = vor.u32 %v5851_v54, %v5850_v23  ;;  %v5856_v29 = vshll.u32 %v12349_v49, %v5841_v28 }
 0x408   :  { %v5857_v10 = vshrl.u32 %v12350_v58, %v5842_v14  ;;  %v5704_v15 = vsel %vm5621_vm8, %v5703_v5, %v5702_v30  ;;  %v15309_v56 = vand.u32 3, %v5712_v40  ;;  %vm5517_vm5 = vcmp.lt.s32.totalorder %v15108_v27, 0 }
 0x409   :  { %v5578_v9 = vshll.u32 %v5577_v25, 30  ;;  %v5855_v42 = vor.u32 %v5854_v50, %v5853_v4  ;;  %v5707_v51 = vsel %vm15242_vm9, %v14928_v19, %v5704_v15  ;;  %v5843_v18 = vshrl.u32 %v12345_v7, %v5842_v14 }
 0x40a   :  { %v5858_v57 = vor.u32 %v5857_v10, %v5856_v29  ;;  %v15316_v45 = vshll.u32 %v5835_v52, 8  ;;  %12135 = vcosq.f32 %v5707_v51  ;;  %vm5859_vm6 = vcmp.lt.s32.totalorder %v5840_v8, 1 }
 0x40b   :  { %v15318_v28 = vsub.s32 %v5575_v24, %v5578_v9  ;;  %vm5862_vm7 = vcmp.lt.s32.totalorder %v5840_v8, 4  ;;  %12137 = vsinq.f32 %v5707_v51  ;;  %vm15322_vm8 = vcmp.le.f32.partialorder %v5515_v55, 0.7853982  ;;  %v15358_v9 = vpop.f32.mrb[30].mxu0 }
 0x40c   :  { %vm5860_vm11 = vcmp.lt.s32.totalorder %v5840_v8, 2  ;;  %v5864_v46 = vsel %vm5862_vm7, %v5852_v53, 2102212464  ;;  %v5867_v40 = vsel %vm5859_vm6, %v5846_v26, %v5849_v38  ;;  %v5601_v61 = vsub.s32 4, %v5577_v25 }
 0x40d   :  { %v5581_v14 = vsub.s32 0, %v15318_v28  ;;  %vm5861_vm9 = vcmp.lt.s32.totalorder %v5840_v8, 3  ;;  %v5868_v52 = vsel %vm5862_vm7, %v5855_v42, 920167782  ;;  %v5863_v35 = vsel %vm5859_vm6, %v5843_v18, %v5846_v26  ;;  %v15368_v18 = vpop.f32.mrb[29].mxu1 }
 0x40e   :  { %v5869_v21 = vsel %vm5861_vm9, %v5852_v53, %v5868_v52  ;;  %v5871_v33 = vsel %vm5859_vm6, %v5849_v38, %v5852_v53  ;;  %v5872_v24 = vsel %vm5862_vm7, %v5858_v57, 1326507024  ;;  %v5865_v44 = vsel %vm5861_vm9, %v5849_v38, %v5864_v46  ;;  %v15348_v53 = vld [vmem:[%s18931_s2] ss:$0 sm:$0xff] }
 0x40f   :  { %v10253_v37 = vmin.u32 %v5581_v14, %v15318_v28  ;;  %v5870_v55 = vsel %vm5860_vm11, %v5867_v40, %v5869_v21  ;;  %v5873_v2 = vsel %vm5861_vm9, %v5855_v42, %v5872_v24  ;;  %v5726_v13 = vand.u32 2139095040, %v15205_v60 }
 0x410   :  { %v5874_v12 = vsel %vm5860_vm11, %v5871_v33, %v5873_v2  ;;  %v15331_v20 = vmul.u32.u64.low %v15316_v45, %v5870_v55  ;;  %v15332_v30 = vmul.u32.u64.high %v15316_v45, %v5870_v55, %v15331_v20  ;;  %vm5714_vm12 = vcmp.lt.s32.totalorder %v15309_v56, 2 }
 0x411   :  { %vm5715_vm13 = vcmp.eq.s32.totalorder %v15309_v56, 0  ;;  %v5583_v54 = vclz %v10253_v37  ;;  %v5723_v59 = vand.u32 2147483647, %v15205_v60  ;;  %v5602_v23 = vsel %vm5517_vm5, %v5601_v61, %v5577_v25 }
 0x412   :  { %v15341_v50 = vmul.u32.u64.low %v15316_v45, %v5874_v12  ;;  %v15342_v5 = vmul.u32.u64.high %v15316_v45, %v5874_v12, %v15341_v50  ;;  %v5727_v26 = vshrl.u32 %v5726_v13, 23  ;;  %v5866_v38 = vsel %vm5860_vm11, %v5863_v35, %v5865_v44 }
 0x413   :  { %v10254_v4 = vadd.s32 4294967294, %v5583_v54  ;;  %v11454_v29 = vadd.f32 %v15348_v53, %v14931_v32  ;;  %v11456_v10 = vadd.f32 %v15348_v53, %v15001_v36  ;;  %vm5718_vm10 = vcmp.eq.s32.totalorder %v15309_v56, 2 }
 0x414   :  { %v5571_v25 = vadd.s32 %v15272_v62, %v15269_v22  ;;  %v5885_v15 = vadd.s32 1, %v15332_v30  ;;  %v10260_v8 = vadd.s32 4294967169, %v5727_v26  ;;  %v12136_v42 = vpop.eup %12135  ;;  %v5604_v51 = vsel %vm15322_vm8, 0, %v5602_v23 }
 0x415   :  { %vm10255_vm14 = vcmp.lt.s32.totalorder %v10254_v4, 0  ;;  %v15363_v32 = vadd.f32 %v11454_v29, %v14798_v16  ;;  %v15366_v36 = vadd.f32 %v11456_v10, %v14918_v3  ;;  %v12138_v57 = vpop.eup %12137  ;;  %v5719_v22 = vxor.u32 2147483648, %v12136_v42 }
 0x416   :  { %v5586_v62 = vsel %vm10255_vm14, 0, %v10254_v4  ;;  %v5882_v46 = vmul.u32 %v15316_v45, %v5866_v38  ;;  %vm5884_vm15 = vc.u32 %v15342_v5, %v15331_v20  ;;  %v5716_v40 = vxor.u32 2147483648, %v12138_v57 }
 0x417   :  { %v5587_v14 = vsub.s32 32, %v5586_v62  ;;  %v5591_v61 = vsub.s32 4294967266, %v5586_v62  ;;  %v5730_v52 = vand.u32 8388607, %v5723_v59  ;;  %v5720_v16 = vsel %vm5718_vm10, %v5719_v22, %v12138_v57 }
 0x418   :  { %v5588_v3 = vshll.u32 %v15318_v28, %v5586_v62  ;;  %v5886_v35 = vsel %vm5884_vm15, %v5885_v15, %v15332_v30  ;;  %v5733_v21 = vadd.s32 1, %v10260_v8  ;;  %v5717_v33 = vsel %vm5715_vm13, %v12136_v42, %v5716_v40 }
 0x419   :  { %v5589_v45 = vshrl.u32 %v5571_v25, %v5587_v14  ;;  %v5592_v24 = vadd.s32 127, %v5591_v61  ;;  %v5887_v37 = vadd.s32 %v5886_v35, %v5882_v46  ;;  %vm5711_vm0 = vweird.f32 %v14928_v19 }
 0x41a   :  { %v5721_v44 = vsel %vm5714_vm12, %v5717_v33, %v5720_v16  ;;  %vm5734_vm1 = vcmp.gt.s32.totalorder %v5733_v21, 0  ;;  %v5608_v28 = vadd.s32 3, %v5604_v51  ;;  %v5731_v50 = vor.u32 8388608, %v5730_v52 }
 0x41b   :  { %v5722_v55 = vsel %vm5711_vm0, nan, %v5721_v44  ;;  %v5590_v2 = vor.u32 %v5589_v45, %v5588_v3  ;;  %v5593_v12 = vshll.u32 %v5592_v24, 23  ;;  %v5888_v13 = vadd.s32 536870912, %v5887_v37 }
 0x41c   :  { %10112 = vst [vmem:[#allocation2 + $0xa8] sm:$0xff] %v5722_v55  ;;  %v5735_v30 = vsel %vm5734_vm1, %v5733_v21, 0  ;;  %v15386_v29 = vand.u32 3, %v5608_v28  ;;  %v15389_v56 = vadd.s32 %v15331_v20, %v15342_v5  ;;  %v15393_v25 = vadd.f32 %v15348_v53, %v15079_v0 }
 0x41d   :  { %v5594_v54 = vor.u32 4788187, %v5593_v12  ;;  %v15383_v23 = vshrl.u32 %v5888_v13, 30  ;;  %v5737_v26 = vand.u32 31, %v5735_v30  ;;  %v5597_v38 = vcvt.s32.f32 %v5590_v2 }
 0x41e   :  { %v15397_v42 = vshll.u32 %v5731_v50, 8  ;;  %v6038_v51 = vand.u32 2139095040, %v15363_v32  ;;  %v15400_v57 = vshrl.u32 %v5735_v30, 5  ;;  %vm5829_vm2 = vcmp.lt.s32.totalorder %v15111_v34, 0 }
 0x41f   :  { %v5595_v4 = vand.u32 2147483647, %v5594_v54  ;;  %v5890_v19 = vshll.u32 %v15383_v23, 30  ;;  %v5738_v10 = vsub.s32 32, %v5737_v26  ;;  %v5740_v22 = vshll.u32 %v12345_v7, %v5737_v26 }
 0x420   :  { %v5743_v0 = vshll.u32 %v12346_v39, %v5737_v26  ;;  %v5746_v61 = vshll.u32 %v12347_v43, %v5737_v26  ;;  %v5749_v52 = vshll.u32 %v12348_v48, %v5737_v26  ;;  %v5752_v33 = vshll.u32 %v12349_v49, %v5737_v26 }
 0x421   :  { %v5598_v15 = vmul.f32 %v5597_v38, %v5595_v4  ;;  %v15395_v8 = vsub.s32 %v5887_v37, %v5890_v19  ;;  %v5741_v62 = vshrl.u32 %v12346_v39, %v5738_v10  ;;  %v5744_v20 = vshrl.u32 %v12347_v43, %v5738_v10 }
 0x422   :  { %v5747_v40 = vshrl.u32 %v12348_v48, %v5738_v10  ;;  %v5750_v16 = vshrl.u32 %v12349_v49, %v5738_v10  ;;  %v5753_v44 = vshrl.u32 %v12350_v58, %v5738_v10  ;;  %v6035_v2 = vand.u32 2147483647, %v15363_v32 }
 0x423   :  { %v5599_v5 = vxor.u32 2147483648, %v5598_v15  ;;  %v5893_v46 = vsub.s32 0, %v15395_v8  ;;  %v5742_v14 = vor.u32 %v5741_v62, %v5740_v22  ;;  %v5745_v21 = vor.u32 %v5744_v20, %v5743_v0 }
 0x424   :  { %v5748_v24 = vor.u32 %v5747_v40, %v5746_v61  ;;  %v5751_v37 = vor.u32 %v5750_v16, %v5749_v52  ;;  %v6039_v12 = vshrl.u32 %v6038_v51, 23  ;;  %v5739_v13 = vshrl.u32 %v12345_v7, %v5738_v10 }
 0x425   :  { %v5600_v3 = vsel %vm5517_vm5, %v5599_v5, %v5598_v15  ;;  %v10265_v35 = vmin.u32 %v5893_v46, %v15395_v8  ;;  %v5754_v28 = vor.u32 %v5753_v44, %v5752_v33  ;;  %vm5755_vm3 = vcmp.lt.s32.totalorder %v15400_v57, 1  ;;  %v15440_v15 = vpop.f32.mrb[31].mxu0 }
 0x426   :  { %v5603_v45 = vsel %vm15322_vm8, %v15108_v27, %v5600_v3  ;;  %vm5757_vm4 = vcmp.lt.s32.totalorder %v15400_v57, 3  ;;  %vm5758_vm5 = vcmp.lt.s32.totalorder %v15400_v57, 4  ;;  %v5763_v63 = vsel %vm5755_vm3, %v5742_v14, %v5745_v21  ;;  %v15461_v3 = vpop.f32.mrb[30].mxu1 }
 0x427   :  { %12139 = vcosq.f32 %v5603_v45  ;;  %v5895_v55 = vclz %v10265_v35  ;;  %v5760_v54 = vsel %vm5758_vm5, %v5748_v24, 2102212464  ;;  %v5764_v50 = vsel %vm5758_vm5, %v5751_v37, 920167782 }
 0x428   :  { %12141 = vsinq.f32 %v5603_v45  ;;  %v5767_v26 = vsel %vm5755_vm3, %v5745_v21, %v5748_v24  ;;  %v5768_v4 = vsel %vm5758_vm5, %v5754_v28, 1326507024  ;;  %vm15431_vm6 = vcmp.le.f32.partialorder %v5827_v11, 0.7853982 }
 0x429   :  { %v10266_v30 = vadd.s32 4294967294, %v5895_v55  ;;  %vm5756_vm8 = vcmp.lt.s32.totalorder %v15400_v57, 2  ;;  %v5765_v19 = vsel %vm5757_vm4, %v5748_v24, %v5764_v50  ;;  %v5769_v10 = vsel %vm5757_vm4, %v5751_v37, %v5768_v4 }
 0x42a   :  { %v5913_v22 = vsub.s32 4, %v15383_v23  ;;  %v5766_v11 = vsel %vm5756_vm8, %v5763_v63, %v5765_v19  ;;  %v5770_v62 = vsel %vm5756_vm8, %v5767_v26, %v5769_v10  ;;  %vm5610_vm11 = vcmp.lt.s32.totalorder %v15386_v29, 2 }
 0x42b   :  { %vm10267_vm7 = vcmp.lt.s32.totalorder %v10266_v30, 0  ;;  %v5759_v46 = vsel %vm5755_vm3, %v5739_v13, %v5742_v14  ;;  %v5761_v0 = vsel %vm5757_vm4, %v5745_v21, %v5760_v54  ;;  %v10272_v14 = vadd.s32 4294967169, %v6039_v12 }
 0x42c   :  { %v5898_v51 = vsel %vm10267_vm7, 0, %v10266_v30  ;;  %v15453_v40 = vmul.u32.u64.low %v15397_v42, %v5770_v62  ;;  %v15454_v61 = vmul.u32.u64.high %v15397_v42, %v5770_v62, %v15453_v40  ;;  %vm5611_vm9 = vcmp.eq.s32.totalorder %v15386_v29, 0 }
 0x42d   :  { %v5899_v20 = vsub.s32 32, %v5898_v51  ;;  %v5903_v5 = vsub.s32 4294967266, %v5898_v51  ;;  %v15457_v52 = vmul.u32.u64.low %v15397_v42, %v5766_v11  ;;  %v15458_v16 = vmul.u32.u64.high %v15397_v42, %v5766_v11, %v15457_v52 }
 0x42e   :  { %v5900_v35 = vshll.u32 %v15395_v8, %v5898_v51  ;;  %vm5614_vm12 = vcmp.eq.s32.totalorder %v15386_v29, 2  ;;  %v5914_v21 = vsel %vm5829_vm2, %v5913_v22, %v15383_v23  ;;  %v5762_v24 = vsel %vm5756_vm8, %v5759_v46, %v5761_v0 }
 0x42f   :  { %v5901_v33 = vshrl.u32 %v15389_v56, %v5899_v20  ;;  %v5904_v45 = vadd.s32 127, %v5903_v5  ;;  %v6045_v13 = vadd.s32 1, %v10272_v14  ;;  %v15474_v56 = vadd.f32 %v15393_v25, %v14997_v31 }
 0x430   :  { %vm5780_vm13 = vc.u32 %v15454_v61, %v15457_v52  ;;  %v5781_v28 = vadd.s32 1, %v15458_v16  ;;  %v6042_v23 = vand.u32 8388607, %v6035_v2  ;;  %v5778_v63 = vmul.u32 %v15397_v42, %v5762_v24 }
 0x431   :  { %v12140_v37 = vpop.eup %12139  ;;  %v5902_v44 = vor.u32 %v5901_v33, %v5900_v35  ;;  %v5905_v55 = vshll.u32 %v5904_v45, 23  ;;  %vm6046_vm10 = vcmp.gt.s32.totalorder %v6045_v13, 0  ;;  %v5916_v31 = vsel %vm15431_vm6, 0, %v5914_v21 }
 0x432   :  { %v12142_v8 = vpop.eup %12141  ;;  %v5615_v12 = vxor.u32 2147483648, %v12140_v37  ;;  %v5782_v25 = vsel %vm5780_vm13, %v5781_v28, %v15458_v16  ;;  %v6047_v50 = vsel %vm6046_vm10, %v6045_v13, 0  ;;  %vm5607_vm14 = vweird.f32 %v15108_v27 }
 0x433   :  { %v5612_v57 = vxor.u32 2147483648, %v12142_v8  ;;  %v5906_v30 = vor.u32 4788187, %v5905_v55  ;;  %v5909_v19 = vcvt.s32.f32 %v5902_v44  ;;  %v5783_v10 = vadd.s32 %v5782_v25, %v5778_v63 }
 0x434   :  { %v5616_v54 = vsel %vm5614_vm12, %v5615_v12, %v12142_v8  ;;  %v6049_v51 = vand.u32 31, %v6047_v50  ;;  %v6043_v20 = vor.u32 8388608, %v6042_v23  ;;  %v5920_v5 = vadd.s32 3, %v5916_v31 }
 0x435   :  { %v5613_v26 = vsel %vm5611_vm9, %v12140_v37, %v5612_v57  ;;  %v5907_v4 = vand.u32 2147483647, %v5906_v30  ;;  %v5784_v62 = vadd.s32 536870912, %v5783_v10  ;;  %v6048_v46 = vshrl.u32 %v6047_v50, 5 }
 0x436   :  { %v5617_v42 = vsel %vm5610_vm11, %v5613_v26, %v5616_v54  ;;  %v6050_v0 = vsub.s32 32, %v6049_v51  ;;  %v5934_v40 = vand.u32 2139095040, %v15366_v36  ;;  %v6052_v33 = vshll.u32 %v12345_v7, %v6049_v51 }
 0x437   :  { %v5618_v22 = vsel %vm5607_vm14, nan, %v5617_v42  ;;  %v5910_v11 = vmul.f32 %v5909_v19, %v5907_v4  ;;  %v15493_v35 = vshrl.u32 %v5784_v62, 30  ;;  %v6055_v27 = vshll.u32 %v12346_v39, %v6049_v51 }
 0x438   :  { %10111 = vst [vmem:[#allocation2 + $0xa0] sm:$0xff] %v5618_v22  ;;  %v6053_v29 = vshrl.u32 %v12346_v39, %v6050_v0  ;;  %v6056_v45 = vshrl.u32 %v12347_v43, %v6050_v0  ;;  %v6058_v14 = vshll.u32 %v12347_v43, %v6049_v51  ;;  %v6059_v21 = vshrl.u32 %v12348_v48, %v6050_v0 }
 0x439   :  { %v5911_v16 = vxor.u32 2147483648, %v5910_v11  ;;  %v5786_v37 = vshll.u32 %v15493_v35, 30  ;;  %v6061_v44 = vshll.u32 %v12348_v48, %v6049_v51  ;;  %v6062_v55 = vshrl.u32 %v12349_v49, %v6050_v0 }
 0x43a   :  { %v6054_v8 = vor.u32 %v6053_v29, %v6052_v33  ;;  %v6060_v12 = vor.u32 %v6059_v21, %v6058_v14  ;;  %v6057_v23 = vor.u32 %v6056_v45, %v6055_v27  ;;  %v15511_v30 = vand.u32 3, %v5920_v5  ;;  %v15522_v5 = vpop.f32.mrb[32].mxu0 }
 0x43b   :  { %v5912_v24 = vsel %vm5829_vm2, %v5911_v16, %v5910_v11  ;;  %v15509_v28 = vsub.s32 %v5783_v10, %v5786_v37  ;;  %v6063_v57 = vor.u32 %v6062_v55, %v6061_v44  ;;  %v6064_v63 = vshll.u32 %v12349_v49, %v6049_v51  ;;  %v15526_v16 = vpop.f32.mrb[31].mxu1 }
 0x43c   :  { %v5915_v13 = vsel %vm15431_vm6, %v15111_v34, %v5912_v24  ;;  %v6065_v54 = vshrl.u32 %v12350_v58, %v6050_v0  ;;  %vm6070_vm15 = vcmp.lt.s32.totalorder %v6048_v46, 4  ;;  %v15516_v25 = vshll.u32 %v6043_v20, 8 }
 0x43d   :  { %12143 = vcosq.f32 %v5915_v13  ;;  %v5789_v31 = vsub.s32 0, %v15509_v28  ;;  %v5935_v38 = vshrl.u32 %v5934_v40, 23  ;;  %v6051_v50 = vshrl.u32 %v12345_v7, %v6050_v0 }
 0x43e   :  { %12145 = vsinq.f32 %v5915_v13  ;;  %v6066_v26 = vor.u32 %v6065_v54, %v6064_v63  ;;  %vm6067_vm0 = vcmp.lt.s32.totalorder %v6048_v46, 1  ;;  %v6072_v4 = vsel %vm6070_vm15, %v6060_v12, 2102212464 }
 0x43f   :  { %v10261_v19 = vmin.u32 %v5789_v31, %v15509_v28  ;;  %vm6069_vm1 = vcmp.lt.s32.totalorder %v6048_v46, 3  ;;  %v6075_v10 = vsel %vm6067_vm0, %v6054_v8, %v6057_v23  ;;  %v6076_v42 = vsel %vm6070_vm15, %v6063_v57, 920167782 }
 0x440   :  { %v6077_v51 = vsel %vm6069_vm1, %v6060_v12, %v6076_v42  ;;  %v6079_v22 = vsel %vm6067_vm0, %v6057_v23, %v6060_v12  ;;  %v6080_v11 = vsel %vm6070_vm15, %v6066_v26, 1326507024  ;;  %v5931_v62 = vand.u32 2147483647, %v15366_v36 }
 0x441   :  { %vm5922_vm2 = vcmp.lt.s32.totalorder %v15511_v30, 2  ;;  %v5791_v20 = vclz %v10261_v19  ;;  %vm6068_vm3 = vcmp.lt.s32.totalorder %v6048_v46, 2  ;;  %v6071_v0 = vsel %vm6067_vm0, %v6051_v50, %v6054_v8 }
 0x442   :  { %v6073_v40 = vsel %vm6069_vm1, %v6057_v23, %v6072_v4  ;;  %vm5919_vm4 = vweird.f32 %v15111_v34  ;;  %vm5923_vm5 = vcmp.eq.s32.totalorder %v15511_v30, 0  ;;  %v6078_v33 = vsel %vm6068_vm3, %v6075_v10, %v6077_v51 }
 0x443   :  { %v6081_v27 = vsel %vm6069_vm1, %v6063_v57, %v6080_v11  ;;  %v10268_v29 = vadd.s32 4294967169, %v5935_v38  ;;  %v10262_v45 = vadd.s32 4294967294, %v5791_v20  ;;  %v6074_v37 = vsel %vm6068_vm3, %v6071_v0, %v6073_v40 }
 0x444   :  { %v6082_v14 = vsel %vm6068_vm3, %v6079_v22, %v6081_v27  ;;  %v15532_v21 = vmul.u32.u64.low %v15516_v25, %v6078_v33  ;;  %v15533_v24 = vmul.u32.u64.high %v15516_v25, %v6078_v33, %v15532_v21  ;;  %vm5926_vm6 = vcmp.eq.s32.totalorder %v15511_v30, 2 }
 0x445   :  { %v15537_v44 = vmul.u32.u64.low %v15516_v25, %v6082_v14  ;;  %v15538_v55 = vmul.u32.u64.high %v15516_v25, %v6082_v14, %v15537_v44  ;;  %v5941_v13 = vadd.s32 1, %v10268_v29  ;;  %v5779_v46 = vadd.s32 %v15457_v52, %v15454_v61 }
 0x446   :  { %vm10263_vm7 = vcmp.lt.s32.totalorder %v10262_v45, 0  ;;  %v5938_v12 = vand.u32 8388607, %v5931_v62  ;;  %v5809_v54 = vsub.s32 4, %v15493_v35  ;;  %v6090_v26 = vmul.u32 %v15516_v25, %v6074_v37 }
 0x447   :  { %v12144_v8 = vpop.eup %12143  ;;  %v5794_v63 = vsel %vm10263_vm7, 0, %v10262_v45  ;;  %vm5942_vm8 = vcmp.gt.s32.totalorder %v5941_v13, 0  ;;  %vm6092_vm11 = vc.u32 %v15538_v55, %v15532_v21  ;;  %v6093_v61 = vadd.s32 1, %v15533_v24 }
 0x448   :  { %v12146_v23 = vpop.eup %12145  ;;  %v5927_v57 = vxor.u32 2147483648, %v12144_v8  ;;  %v5795_v38 = vsub.s32 32, %v5794_v63  ;;  %v5799_v50 = vsub.s32 4294967266, %v5794_v63  ;;  %v5796_v19 = vshll.u32 %v15509_v28, %v5794_v63 }
 0x449   :  { %v5924_v31 = vxor.u32 2147483648, %v12146_v23  ;;  %v5943_v51 = vsel %vm5942_vm8, %v5941_v13, 0  ;;  %vm5725_vm9 = vcmp.lt.s32.totalorder %v15205_v60, 0  ;;  %v6094_v25 = vsel %vm6092_vm11, %v6093_v61, %v15533_v24 }
 0x44a   :  { %v5928_v4 = vsel %vm5926_vm6, %v5927_v57, %v12146_v23  ;;  %v5797_v10 = vshrl.u32 %v5779_v46, %v5795_v38  ;;  %v5800_v42 = vadd.s32 127, %v5799_v50  ;;  %v5945_v11 = vand.u32 31, %v5943_v51 }
 0x44b   :  { %v5925_v52 = vsel %vm5923_vm5, %v12144_v8, %v5924_v31  ;;  %v6095_v40 = vadd.s32 %v6094_v25, %v6090_v26  ;;  %vm15561_vm12 = vcmp.le.f32.partialorder %v5723_v59, 0.7853982  ;;  %v5810_v30 = vsel %vm5725_vm9, %v5809_v54, %v15493_v35 }
 0x44c   :  { %v5929_v22 = vsel %vm5922_vm2, %v5925_v52, %v5928_v4  ;;  %v5798_v20 = vor.u32 %v5797_v10, %v5796_v19  ;;  %v5801_v0 = vshll.u32 %v5800_v42, 23  ;;  %v5946_v27 = vsub.s32 32, %v5945_v11 }
 0x44d   :  { %v5930_v28 = vsel %vm5919_vm4, nan, %v5929_v22  ;;  %v15570_v29 = vadd.f32 %v15348_v53, %v15175_v41  ;;  %v6096_v45 = vadd.s32 536870912, %v6095_v40  ;;  %v5939_v14 = vor.u32 8388608, %v5938_v12 }
 0x44e   :  { %10114 = vst [vmem:[#allocation2 + $0xb8] sm:$0xff] %v5930_v28  ;;  %v5802_v34 = vor.u32 4788187, %v5801_v0  ;;  %v5948_v24 = vshll.u32 %v12345_v7, %v5945_v11  ;;  %v5805_v37 = vcvt.s32.f32 %v5798_v20  ;;  %v5949_v59 = vshrl.u32 %v12346_v39, %v5946_v27 }
 0x44f   :  { %v5951_v44 = vshll.u32 %v12346_v39, %v5945_v11  ;;  %v5952_v13 = vshrl.u32 %v12347_v43, %v5946_v27  ;;  %v6097_v46 = vshrl.u32 %v6096_v45, 30  ;;  %v5955_v35 = vshrl.u32 %v12348_v48, %v5946_v27 }
 0x450   :  { %v5803_v8 = vand.u32 2147483647, %v5802_v34  ;;  %v5958_v23 = vshrl.u32 %v12349_v49, %v5946_v27  ;;  %vm6037_vm13 = vcmp.lt.s32.totalorder %v15363_v32, 0  ;;  %v5944_v41 = vshrl.u32 %v5943_v51, 5 }
 0x451   :  { %v5954_v12 = vshll.u32 %v12347_v43, %v5945_v11  ;;  %v5957_v57 = vshll.u32 %v12348_v48, %v5945_v11  ;;  %v5961_v63 = vshrl.u32 %v12350_v58, %v5946_v27  ;;  %v6098_v31 = vshll.u32 %v6097_v46, 30 }
 0x452   :  { %v5806_v54 = vmul.f32 %v5805_v37, %v5803_v8  ;;  %v5950_v38 = vor.u32 %v5949_v59, %v5948_v24  ;;  %v5953_v50 = vor.u32 %v5952_v13, %v5951_v44  ;;  %v5812_v26 = vsel %vm15561_vm12, 0, %v5810_v30 }
 0x453   :  { %v5959_v4 = vor.u32 %v5958_v23, %v5957_v57  ;;  %v5960_v19 = vshll.u32 %v12349_v49, %v5945_v11  ;;  %v6246_v61 = vand.u32 2139095040, %v15474_v56  ;;  %vm15588_vm10 = vcmp.le.f32.partialorder %v6035_v2, 0.7853982  ;;  %v15615_v57 = vpop.f32.mrb[33].mxu0 }
 0x454   :  { %v5807_v52 = vxor.u32 2147483648, %v5806_v54  ;;  %v15592_v42 = vsub.s32 %v6095_v40, %v6098_v31  ;;  %v5956_v51 = vor.u32 %v5955_v35, %v5954_v12  ;;  %v15594_v22 = vshll.u32 %v5939_v14, 8 }
 0x455   :  { %v6121_v25 = vsub.s32 4, %v6097_v46  ;;  %v5947_v28 = vshrl.u32 %v12345_v7, %v5946_v27  ;;  %v5962_v20 = vor.u32 %v5961_v63, %v5960_v19  ;;  %vm5963_vm14 = vcmp.lt.s32.totalorder %v5944_v41, 1 }
 0x456   :  { %v5808_v11 = vsel %vm5725_vm9, %v5807_v52, %v5806_v54  ;;  %v6101_v0 = vsub.s32 0, %v15592_v42  ;;  %vm5966_vm15 = vcmp.lt.s32.totalorder %v5944_v41, 4  ;;  %v5971_v2 = vsel %vm5963_vm14, %v5950_v38, %v5953_v50 }
 0x457   :  { %v5811_v40 = vsel %vm15561_vm12, %v15205_v60, %v5808_v11  ;;  %vm5964_vm0 = vcmp.lt.s32.totalorder %v5944_v41, 2  ;;  %vm5965_vm1 = vcmp.lt.s32.totalorder %v5944_v41, 3  ;;  %v5972_v30 = vsel %vm5966_vm15, %v5959_v4, 920167782 }
 0x458   :  { %12147 = vcosq.f32 %v5811_v40  ;;  %v10273_v27 = vmin.u32 %v6101_v0, %v15592_v42  ;;  %v5968_v34 = vsel %vm5966_vm15, %v5956_v51, 2102212464  ;;  %v5973_v45 = vsel %vm5965_vm1, %v5956_v51, %v5972_v30 }
 0x459   :  { %12149 = vsinq.f32 %v5811_v40  ;;  %v5974_v14 = vsel %vm5964_vm0, %v5971_v2, %v5973_v45  ;;  %v5975_v24 = vsel %vm5963_vm14, %v5953_v50, %v5956_v51  ;;  %v5976_v37 = vsel %vm5966_vm15, %v5962_v20, 1326507024  ;;  %v15630_v51 = vpop.f32.mrb[32].mxu1 }
 0x45a   :  { %v5816_v59 = vadd.s32 3, %v5812_v26  ;;  %v6103_v44 = vclz %v10273_v27  ;;  %v6122_v33 = vsel %vm6037_vm13, %v6121_v25, %v6097_v46  ;;  %v5967_v13 = vsel %vm5963_vm14, %v5947_v28, %v5950_v38 }
 0x45b   :  { %v5969_v8 = vsel %vm5965_vm1, %v5953_v50, %v5968_v34  ;;  %v5977_v35 = vsel %vm5965_vm1, %v5959_v4, %v5976_v37  ;;  %v15611_v23 = vmul.u32.u64.low %v15594_v22, %v5974_v14  ;;  %v15612_v12 = vmul.u32.u64.high %v15594_v22, %v5974_v14, %v15611_v23 }
 0x45c   :  { %v10274_v63 = vadd.s32 4294967294, %v6103_v44  ;;  %v5978_v54 = vsel %vm5964_vm0, %v5975_v24, %v5977_v35  ;;  %v6243_v31 = vand.u32 2147483647, %v15474_v56  ;;  %v6247_v26 = vshrl.u32 %v6246_v61, 23 }
 0x45d   :  { %v6124_v46 = vsel %vm15588_vm10, 0, %v6122_v33  ;;  %v15622_v38 = vmul.u32.u64.low %v15594_v22, %v5978_v54  ;;  %v15623_v50 = vmul.u32.u64.high %v15594_v22, %v5978_v54, %v15622_v38  ;;  %v15627_v4 = vadd.f32 %v15570_v29, %v15071_v6 }
 0x45e   :  { %vm10275_vm2 = vcmp.lt.s32.totalorder %v10274_v63, 0  ;;  %v5970_v19 = vsel %vm5964_vm0, %v5967_v13, %v5969_v8  ;;  %v10280_v52 = vadd.s32 4294967169, %v6247_v26  ;;  %vm5815_vm3 = vweird.f32 %v15205_v60 }
 0x45f   :  { %v5817_v61 = vand.u32 3, %v5816_v59  ;;  %v6091_v25 = vadd.s32 %v15532_v21, %v15538_v55  ;;  %v6106_v28 = vsel %vm10275_vm2, 0, %v10274_v63  ;;  %v5989_v20 = vadd.s32 1, %v15612_v12 }
 0x460   :  { %v6107_v11 = vsub.s32 32, %v6106_v28  ;;  %v6111_v0 = vsub.s32 4294967266, %v6106_v28  ;;  %v6128_v2 = vadd.s32 3, %v6124_v46  ;;  %v6253_v6 = vadd.s32 1, %v10280_v52 }
 0x461   :  { %v6108_v29 = vshll.u32 %v15592_v42, %v6106_v28  ;;  %v5986_v41 = vmul.u32 %v15594_v22, %v5970_v19  ;;  %vm5988_vm4 = vc.u32 %v15623_v50, %v15611_v23  ;;  %v6250_v40 = vand.u32 8388607, %v6243_v31 }
 0x462   :  { %v12148_v30 = vpop.eup %12147  ;;  %v6109_v27 = vshrl.u32 %v6091_v25, %v6107_v11  ;;  %v6112_v21 = vadd.s32 127, %v6111_v0  ;;  %v5990_v55 = vsel %vm5988_vm4, %v5989_v20, %v15612_v12  ;;  %vm6254_vm5 = vcmp.gt.s32.totalorder %v6253_v6, 0 }
 0x463   :  { %v12150_v34 = vpop.eup %12149  ;;  %vm5818_vm6 = vcmp.lt.s32.totalorder %v5817_v61, 2  ;;  %v5823_v45 = vxor.u32 2147483648, %v12148_v30  ;;  %v5991_v14 = vadd.s32 %v5990_v55, %v5986_v41  ;;  %v6255_v24 = vsel %vm6254_vm5, %v6253_v6, 0 }
 0x464   :  { %v5820_v42 = vxor.u32 2147483648, %v12150_v34  ;;  %vm5822_vm7 = vcmp.eq.s32.totalorder %v5817_v61, 2  ;;  %v6110_v22 = vor.u32 %v6109_v27, %v6108_v29  ;;  %v6113_v37 = vshll.u32 %v6112_v21, 23 }
 0x465   :  { %vm5819_vm8 = vcmp.eq.s32.totalorder %v5817_v61, 0  ;;  %v5824_v59 = vsel %vm5822_vm7, %v5823_v45, %v12150_v34  ;;  %v5992_v44 = vadd.s32 536870912, %v5991_v14  ;;  %v6257_v33 = vand.u32 31, %v6255_v24 }
 0x466   :  { %v5821_v13 = vsel %vm5819_vm8, %v12148_v30, %v5820_v42  ;;  %v6114_v8 = vor.u32 4788187, %v6113_v37  ;;  %v15643_v35 = vand.u32 3, %v6128_v2  ;;  %v6251_v63 = vor.u32 8388608, %v6250_v40 }
 0x467   :  { %v5825_v12 = vsel %vm5818_vm6, %v5821_v13, %v5824_v59  ;;  %v5993_v54 = vshrl.u32 %v5992_v44, 30  ;;  %v6258_v26 = vsub.s32 32, %v6257_v33  ;;  %v15648_v46 = vadd.f32 %v15348_v53, %v15252_v1 }
 0x468   :  { %v5826_v38 = vsel %vm5815_vm3, nan, %v5825_v12  ;;  %v6115_v19 = vand.u32 2147483647, %v6114_v8  ;;  %v6117_v52 = vcvt.s32.f32 %v6110_v22  ;;  %vm5933_vm11 = vcmp.lt.s32.totalorder %v15366_v36, 0 }
 0x469   :  { %v6139_v25 = vand.u32 2147483647, %v15627_v4  ;;  %10113 = vst [vmem:[#allocation2 + $0xb0] sm:$0xff] %v5826_v38  ;;  %v5994_v28 = vshll.u32 %v5993_v54, 30  ;;  %v15654_v20 = vshrl.u32 %v6255_v24, 5  ;;  %v6261_v61 = vshrl.u32 %v12346_v39, %v6258_v26 }
 0x46a   :  { %v6142_v11 = vand.u32 2139095040, %v15627_v4  ;;  %v6118_v0 = vmul.f32 %v6117_v52, %v6115_v19  ;;  %v6260_v1 = vshll.u32 %v12345_v7, %v6257_v33  ;;  %v6264_v60 = vshrl.u32 %v12347_v43, %v6258_v26  ;;  %v15697_v52 = vpop.f32.mrb[34].mxu0 }
 0x46b   :  { %v6267_v2 = vshrl.u32 %v12348_v48, %v6258_v26  ;;  %v15661_v6 = vsub.s32 %v5991_v14, %v5994_v28  ;;  %v6263_v29 = vshll.u32 %v12346_v39, %v6257_v33  ;;  %v6266_v41 = vshll.u32 %v12347_v43, %v6257_v33 }
 0x46c   :  { %v6270_v40 = vshrl.u32 %v12349_v49, %v6258_v26  ;;  %v6119_v30 = vxor.u32 2147483648, %v6118_v0  ;;  %v6017_v27 = vsub.s32 4, %v5993_v54  ;;  %v6269_v21 = vshll.u32 %v12348_v48, %v6257_v33 }
 0x46d   :  { %v15667_v55 = vshll.u32 %v6251_v63, 8  ;;  %v5997_v34 = vsub.s32 0, %v15661_v6  ;;  %v6262_v45 = vor.u32 %v6261_v61, %v6260_v1  ;;  %v6265_v24 = vor.u32 %v6264_v60, %v6263_v29 }
 0x46e   :  { %v6268_v42 = vor.u32 %v6267_v2, %v6266_v41  ;;  %v6120_v14 = vsel %vm6037_vm13, %v6119_v30, %v6118_v0  ;;  %vm15674_vm9 = vcmp.le.f32.partialorder %v5931_v62, 0.7853982  ;;  %v6271_v37 = vor.u32 %v6270_v40, %v6269_v21  ;;  %v15703_v0 = vpop.f32.mrb[33].mxu1 }
 0x46f   :  { %v6272_v59 = vshll.u32 %v12349_v49, %v6257_v33  ;;  %v6273_v44 = vshrl.u32 %v12350_v58, %v6258_v26  ;;  %v6123_v13 = vsel %vm15588_vm10, %v15363_v32, %v6120_v14  ;;  %v10269_v8 = vmin.u32 %v5997_v34, %v15661_v6 }
 0x470   :  { %vm6275_vm12 = vcmp.lt.s32.totalorder %v15654_v20, 1  ;;  %v6143_v63 = vshrl.u32 %v6142_v11, 23  ;;  %12151 = vcosq.f32 %v6123_v13  ;;  %v6259_v62 = vshrl.u32 %v12345_v7, %v6258_v26 }
 0x471   :  { %v6274_v12 = vor.u32 %v6273_v44, %v6272_v59  ;;  %vm6278_vm13 = vcmp.lt.s32.totalorder %v15654_v20, 4  ;;  %12153 = vsinq.f32 %v6123_v13  ;;  %v5999_v38 = vclz %v10269_v8 }
 0x472   :  { %v6018_v33 = vsel %vm5933_vm11, %v6017_v27, %v5993_v54  ;;  %v6280_v10 = vsel %vm6278_vm13, %v6268_v42, 2102212464  ;;  %vm6276_vm10 = vcmp.lt.s32.totalorder %v15654_v20, 2  ;;  %vm6277_vm14 = vcmp.lt.s32.totalorder %v15654_v20, 3 }
 0x473   :  { %v6283_v19 = vsel %vm6275_vm12, %v6262_v45, %v6265_v24  ;;  %v6284_v26 = vsel %vm6278_vm13, %v6271_v37, 920167782  ;;  %v10270_v28 = vadd.s32 4294967294, %v5999_v38  ;;  %v6279_v61 = vsel %vm6275_vm12, %v6259_v62, %v6262_v45 }
 0x474   :  { %v6285_v54 = vsel %vm6277_vm14, %v6268_v42, %v6284_v26  ;;  %v6287_v11 = vsel %vm6275_vm12, %v6265_v24, %v6268_v42  ;;  %v6281_v1 = vsel %vm6277_vm14, %v6265_v24, %v6280_v10  ;;  %v6288_v2 = vsel %vm6278_vm13, %v6274_v12, 1326507024 }
 0x475   :  { %v6286_v60 = vsel %vm6276_vm10, %v6283_v19, %v6285_v54  ;;  %v10276_v29 = vadd.s32 4294967169, %v6143_v63  ;;  %vm10271_vm15 = vcmp.lt.s32.totalorder %v10270_v28, 0  ;;  %v6289_v41 = vsel %vm6277_vm14, %v6271_v37, %v6288_v2 }
 0x476   :  { %v15710_v40 = vmul.u32.u64.low %v15667_v55, %v6286_v60  ;;  %v15711_v30 = vmul.u32.u64.high %v15667_v55, %v6286_v60, %v15710_v40  ;;  %v5987_v27 = vadd.s32 %v15611_v23, %v15623_v50  ;;  %v6002_v21 = vsel %vm10271_vm15, 0, %v10270_v28 }
 0x477   :  { %v6290_v34 = vsel %vm6276_vm10, %v6287_v11, %v6289_v41  ;;  %v6149_v45 = vadd.s32 1, %v10276_v29  ;;  %vm6127_vm0 = vweird.f32 %v15363_v32  ;;  %v6003_v24 = vsub.s32 32, %v6002_v21 }
 0x478   :  { %v6007_v42 = vsub.s32 4294967266, %v6002_v21  ;;  %v6020_v14 = vsel %vm15674_vm9, 0, %v6018_v33  ;;  %v6282_v37 = vsel %vm6276_vm10, %v6279_v61, %v6281_v1  ;;  %v6004_v59 = vshll.u32 %v15661_v6, %v6002_v21 }
 0x479   :  { %v15725_v44 = vmul.u32.u64.low %v15667_v55, %v6290_v34  ;;  %v15726_v23 = vmul.u32.u64.high %v15667_v55, %v6290_v34, %v15725_v44  ;;  %vm6150_vm1 = vcmp.gt.s32.totalorder %v6149_v45, 0  ;;  %v6005_v50 = vshrl.u32 %v5987_v27, %v6003_v24 }
 0x47a   :  { %v6008_v13 = vadd.s32 127, %v6007_v42  ;;  %v6301_v8 = vadd.s32 1, %v15711_v30  ;;  %v6151_v63 = vsel %vm6150_vm1, %v6149_v45, 0  ;;  %v12152_v62 = vpop.eup %12151  ;;  %vm6134_vm2 = vcmp.eq.s32.totalorder %v15643_v35, 2 }
 0x47b   :  { %v6024_v12 = vadd.s32 3, %v6020_v14  ;;  %v6153_v38 = vand.u32 31, %v6151_v63  ;;  %v15732_v20 = vadd.f32 %v15648_v46, %v15166_v17  ;;  %v12154_v6 = vpop.eup %12153  ;;  %v6135_v33 = vxor.u32 2147483648, %v12152_v62 }
 0x47c   :  { %v6006_v10 = vor.u32 %v6005_v50, %v6004_v59  ;;  %v6009_v19 = vshll.u32 %v6008_v13, 23  ;;  %v6146_v26 = vand.u32 8388607, %v6139_v25  ;;  %v6132_v28 = vxor.u32 2147483648, %v12154_v6 }
 0x47d   :  { %v6298_v61 = vmul.u32 %v15667_v55, %v6282_v37  ;;  %vm6300_vm3 = vc.u32 %v15726_v23, %v15710_v40  ;;  %v6154_v54 = vsub.s32 32, %v6153_v38  ;;  %vm6131_vm4 = vcmp.eq.s32.totalorder %v15643_v35, 0 }
 0x47e   :  { %v6136_v11 = vsel %vm6134_vm2, %v6135_v33, %v12154_v6  ;;  %v6010_v1 = vor.u32 4788187, %v6009_v19  ;;  %v6302_v17 = vsel %vm6300_vm3, %v6301_v8, %v15711_v30  ;;  %vm6130_vm5 = vcmp.lt.s32.totalorder %v15643_v35, 2 }
 0x47f   :  { %v6133_v46 = vsel %vm6131_vm4, %v12152_v62, %v6132_v28  ;;  %v15742_v60 = vand.u32 3, %v6024_v12  ;;  %v6303_v2 = vadd.s32 %v6302_v17, %v6298_v61  ;;  %v6013_v27 = vcvt.s32.f32 %v6006_v10 }
 0x480   :  { %v6137_v29 = vsel %vm6130_vm5, %v6133_v46, %v6136_v11  ;;  %v6011_v41 = vand.u32 2147483647, %v6010_v1  ;;  %v6147_v55 = vor.u32 8388608, %v6146_v26  ;;  %v6157_v45 = vshrl.u32 %v12346_v39, %v6154_v54 }
 0x481   :  { %v6138_v21 = vsel %vm6127_vm0, nan, %v6137_v29  ;;  %v6304_v34 = vadd.s32 536870912, %v6303_v2  ;;  %v6160_v24 = vshrl.u32 %v12347_v43, %v6154_v54  ;;  %v6152_v42 = vshrl.u32 %v6151_v63, 5 }
 0x482   :  { %10116 = vst [vmem:[#allocation2 + $0xc8] sm:$0xff] %v6138_v21  ;;  %v6014_v30 = vmul.f32 %v6013_v27, %v6011_v41  ;;  %v6156_v35 = vshll.u32 %v12345_v7, %v6153_v38  ;;  %v6163_v14 = vshrl.u32 %v12348_v48, %v6154_v54  ;;  %v6159_v59 = vshll.u32 %v12346_v39, %v6153_v38 }
 0x483   :  { %v6305_v37 = vshrl.u32 %v6304_v34, 30  ;;  %v6162_v44 = vshll.u32 %v12347_v43, %v6153_v38  ;;  %v6166_v32 = vshrl.u32 %v12349_v49, %v6154_v54  ;;  %vm6245_vm6 = vcmp.lt.s32.totalorder %v15474_v56, 0 }
 0x484   :  { %v6015_v50 = vxor.u32 2147483648, %v6014_v30  ;;  %v6165_v13 = vshll.u32 %v12348_v48, %v6153_v38  ;;  %v6168_v8 = vshll.u32 %v12349_v49, %v6153_v38  ;;  %v6169_v63 = vshrl.u32 %v12350_v58, %v6154_v54 }
 0x485   :  { %v6306_v62 = vshll.u32 %v6305_v37, 30  ;;  %v6158_v12 = vor.u32 %v6157_v45, %v6156_v35  ;;  %v6161_v6 = vor.u32 %v6160_v24, %v6159_v59  ;;  %v6164_v33 = vor.u32 %v6163_v14, %v6162_v44 }
 0x486   :  { %v6016_v10 = vsel %vm5933_vm11, %v6015_v50, %v6014_v30  ;;  %v6167_v19 = vor.u32 %v6166_v32, %v6165_v13  ;;  %v6170_v26 = vor.u32 %v6169_v63, %v6168_v8  ;;  %v15759_v28 = vshll.u32 %v6147_v55, 8  ;;  %v15794_v8 = vpop.f32.mrb[35].mxu0 }
 0x487   :  { %v6019_v61 = vsel %vm15674_vm9, %v15366_v36, %v6016_v10  ;;  %v15764_v11 = vsub.s32 %v6303_v2, %v6306_v62  ;;  %v6155_v38 = vshrl.u32 %v12345_v7, %v6154_v54  ;;  %v11464_v1 = vadd.f32 %v15348_v53, %v15368_v18 }
 0x488   :  { %12155 = vcosq.f32 %v6019_v61  ;;  %v6329_v17 = vsub.s32 4, %v6305_v37  ;;  %vm6171_vm7 = vcmp.lt.s32.totalorder %v6152_v42, 1  ;;  %vm6174_vm8 = vcmp.lt.s32.totalorder %v6152_v42, 4 }
 0x489   :  { %12157 = vsinq.f32 %v6019_v61  ;;  %v6309_v46 = vsub.s32 0, %v15764_v11  ;;  %v6176_v29 = vsel %vm6174_vm8, %v6164_v33, 2102212464  ;;  %v6179_v41 = vsel %vm6171_vm7, %v6158_v12, %v6161_v6 }
 0x48a   :  { %vm6173_vm11 = vcmp.lt.s32.totalorder %v6152_v42, 3  ;;  %v6180_v27 = vsel %vm6174_vm8, %v6167_v19, 920167782  ;;  %v6183_v22 = vsel %vm6171_vm7, %v6161_v6, %v6164_v33  ;;  %v6184_v55 = vsel %vm6174_vm8, %v6170_v26, 1326507024 }
 0x48b   :  { %v10281_v2 = vmin.u32 %v6309_v46, %v15764_v11  ;;  %vm6172_vm9 = vcmp.lt.s32.totalorder %v6152_v42, 2  ;;  %v6181_v54 = vsel %vm6173_vm11, %v6164_v33, %v6180_v27  ;;  %v6185_v21 = vsel %vm6173_vm11, %v6167_v19, %v6184_v55 }
 0x48c   :  { %v6175_v34 = vsel %vm6171_vm7, %v6155_v38, %v6158_v12  ;;  %v6177_v53 = vsel %vm6173_vm11, %v6161_v6, %v6176_v29  ;;  %v6182_v18 = vsel %vm6172_vm9, %v6179_v41, %v6181_v54  ;;  %v6186_v45 = vsel %vm6172_vm9, %v6183_v22, %v6185_v21 }
 0x48d   :  { %v6311_v24 = vclz %v10281_v2  ;;  %v6330_v30 = vsel %vm6245_vm6, %v6329_v17, %v6305_v37  ;;  %v15774_v35 = vmul.u32.u64.low %v15759_v28, %v6186_v45  ;;  %v15775_v14 = vmul.u32.u64.high %v15759_v28, %v6186_v45, %v15774_v35 }
 0x48e   :  { %v15778_v59 = vmul.u32.u64.low %v15759_v28, %v6182_v18  ;;  %v15779_v44 = vmul.u32.u64.high %v15759_v28, %v6182_v18, %v15778_v59  ;;  %vm6023_vm12 = vweird.f32 %v15366_v36  ;;  %v6178_v32 = vsel %vm6172_vm9, %v6175_v34, %v6177_v53  ;;  %v15823_v36 = vld [vmem:[%s18931_s2] ss:$0 sm:$0xff] }
 0x48f   :  { %v10282_v42 = vadd.s32 4294967294, %v6311_v24  ;;  %v6454_v50 = vand.u32 2139095040, %v15732_v20  ;;  %vm6027_vm13 = vcmp.eq.s32.totalorder %v15742_v60, 0  ;;  %vm6030_vm10 = vcmp.eq.s32.totalorder %v15742_v60, 2 }
 0x490   :  { %vm15787_vm14 = vcmp.le.f32.partialorder %v6243_v31, 0.7853982  ;;  %v15792_v13 = vadd.f32 %v11464_v1, %v15238_v47  ;;  %v6299_v63 = vadd.s32 %v15710_v40, %v15726_v23  ;;  %v6194_v31 = vmul.u32 %v15759_v28, %v6178_v32  ;;  %v15804_v40 = vpop.f32.mrb[34].mxu1 }
 0x491   :  { %vm10283_vm15 = vcmp.lt.s32.totalorder %v10282_v42, 0  ;;  %v6332_v62 = vsel %vm15787_vm14, 0, %v6330_v30  ;;  %v6455_v12 = vshrl.u32 %v6454_v50, 23  ;;  %vm6196_vm0 = vc.u32 %v15775_v14, %v15778_v59 }
 0x492   :  { %v12156_v6 = vpop.eup %12155  ;;  %v6314_v33 = vsel %vm10283_vm15, 0, %v10282_v42  ;;  %v6197_v10 = vadd.s32 1, %v15779_v44  ;;  %v6451_v38 = vand.u32 2147483647, %v15732_v20  ;;  %vm6026_vm1 = vcmp.lt.s32.totalorder %v15742_v60, 2 }
 0x493   :  { %v12158_v47 = vpop.eup %12157  ;;  %v6031_v19 = vxor.u32 2147483648, %v12156_v6  ;;  %v6315_v26 = vsub.s32 32, %v6314_v33  ;;  %v6319_v61 = vsub.s32 4294967266, %v6314_v33  ;;  %v6316_v1 = vshll.u32 %v15764_v11, %v6314_v33 }
 0x494   :  { %v6028_v23 = vxor.u32 2147483648, %v12158_v47  ;;  %v6198_v17 = vsel %vm6196_vm0, %v6197_v10, %v15779_v44  ;;  %v10288_v46 = vadd.s32 4294967169, %v6455_v12  ;;  %v6336_v55 = vadd.s32 3, %v6332_v62 }
 0x495   :  { %v6032_v28 = vsel %vm6030_vm10, %v6031_v19, %v12158_v47  ;;  %v6317_v29 = vshrl.u32 %v6299_v63, %v6315_v26  ;;  %v6320_v41 = vadd.s32 127, %v6319_v61  ;;  %v6199_v27 = vadd.s32 %v6198_v17, %v6194_v31 }
 0x496   :  { %v6029_v22 = vsel %vm6027_vm13, %v12156_v6, %v6028_v23  ;;  %v6461_v2 = vadd.s32 1, %v10288_v46  ;;  %v6458_v24 = vand.u32 8388607, %v6451_v38  ;;  %v15817_v35 = vand.u32 3, %v6336_v55 }
 0x497   :  { %v6033_v54 = vsel %vm6026_vm1, %v6029_v22, %v6032_v28  ;;  %v6318_v21 = vor.u32 %v6317_v29, %v6316_v1  ;;  %v6321_v34 = vshll.u32 %v6320_v41, 23  ;;  %v6200_v11 = vadd.s32 536870912, %v6199_v27 }
 0x498   :  { %v6034_v53 = vsel %vm6023_vm12, nan, %v6033_v54  ;;  %vm6462_vm2 = vcmp.gt.s32.totalorder %v6461_v2, 0  ;;  %vm6141_vm3 = vcmp.lt.s32.totalorder %v15627_v4, 0  ;;  %v15827_v50 = vadd.f32 %v15823_v36, %v15461_v3 }
 0x499   :  { %10115 = vst [vmem:[#allocation2 + $0xc0] sm:$0xff] %v6034_v53  ;;  %v6322_v18 = vor.u32 4788187, %v6321_v34  ;;  %v6201_v45 = vshrl.u32 %v6200_v11, 30  ;;  %v6463_v30 = vsel %vm6462_vm2, %v6461_v2, 0  ;;  %v6325_v42 = vcvt.s32.f32 %v6318_v21 }
 0x49a   :  { %v6465_v60 = vand.u32 31, %v6463_v30  ;;  %v15830_v63 = vadd.s32 %v15778_v59, %v15775_v14  ;;  %v15834_v12 = vadd.f32 %v15823_v36, %v15526_v16  ;;  %v15838_v6 = vadd.f32 %v15823_v36, %v15630_v51 }
 0x49b   :  { %v6323_v44 = vand.u32 2147483647, %v6322_v18  ;;  %v6202_v32 = vshll.u32 %v6201_v45, 30  ;;  %v6459_v10 = vor.u32 8388608, %v6458_v24  ;;  %v15842_v47 = vshrl.u32 %v6463_v30, 5 }
 0x49c   :  { %v6466_v62 = vsub.s32 32, %v6465_v60  ;;  %v6225_v3 = vsub.s32 4, %v6201_v45  ;;  %v6468_v19 = vshll.u32 %v12345_v7, %v6465_v60  ;;  %v6471_v61 = vshll.u32 %v12346_v39, %v6465_v60 }
 0x49d   :  { %v6326_v33 = vmul.f32 %v6325_v42, %v6323_v44  ;;  %v15840_v31 = vsub.s32 %v6199_v27, %v6202_v32  ;;  %v6474_v1 = vshll.u32 %v12347_v43, %v6465_v60  ;;  %v6477_v17 = vshll.u32 %v12348_v48, %v6465_v60 }
 0x49e   :  { %v6469_v14 = vshrl.u32 %v12346_v39, %v6466_v62  ;;  %v6472_v59 = vshrl.u32 %v12347_v43, %v6466_v62  ;;  %v6475_v51 = vshrl.u32 %v12348_v48, %v6466_v62  ;;  %v6478_v46 = vshrl.u32 %v12349_v49, %v6466_v62 }
 0x49f   :  { %v6327_v26 = vxor.u32 2147483648, %v6326_v33  ;;  %v6205_v16 = vsub.s32 0, %v15840_v31  ;;  %v6480_v27 = vshll.u32 %v12349_v49, %v6465_v60  ;;  %v6481_v54 = vshrl.u32 %v12350_v58, %v6466_v62 }
 0x4a0   :  { %v6470_v23 = vor.u32 %v6469_v14, %v6468_v19  ;;  %v6473_v41 = vor.u32 %v6472_v59, %v6471_v61  ;;  %v6476_v55 = vor.u32 %v6475_v51, %v6474_v1  ;;  %v6479_v2 = vor.u32 %v6478_v46, %v6477_v17  ;;  %v15902_v17 = vpop.f32.mrb[35].mxu1 }
 0x4a1   :  { %v6328_v28 = vsel %vm6245_vm6, %v6327_v26, %v6326_v33  ;;  %v10277_v29 = vmin.u32 %v6205_v16, %v15840_v31  ;;  %v15861_v34 = vshll.u32 %v6459_v10, 8  ;;  %v6350_v11 = vand.u32 2139095040, %v15792_v13  ;;  %v15891_v16 = vpop.f32.mrb[36].mxu0 }
 0x4a2   :  { %v6331_v22 = vsel %vm15787_vm14, %v15474_v56, %v6328_v28  ;;  %v15866_v53 = vsel %vm6141_vm3, %v6225_v3, %v6201_v45  ;;  %v6467_v18 = vshrl.u32 %v12345_v7, %v6466_v62  ;;  %v6482_v24 = vor.u32 %v6481_v54, %v6480_v27 }
 0x4a3   :  { %12159 = vcosq.f32 %v6331_v22  ;;  %v6207_v21 = vclz %v10277_v29  ;;  %vm15871_vm4 = vcmp.le.f32.partialorder %v6139_v25, 0.7853982  ;;  %vm6483_vm5 = vcmp.lt.s32.totalorder %v15842_v47, 1 }
 0x4a4   :  { %12161 = vsinq.f32 %v6331_v22  ;;  %vm6485_vm6 = vcmp.lt.s32.totalorder %v15842_v47, 3  ;;  %vm6486_vm7 = vcmp.lt.s32.totalorder %v15842_v47, 4  ;;  %v6491_v44 = vsel %vm6483_vm5, %v6470_v23, %v6473_v41 }
 0x4a5   :  { %v10278_v30 = vadd.s32 4294967294, %v6207_v21  ;;  %v6488_v60 = vsel %vm6486_vm7, %v6476_v55, 2102212464  ;;  %v6492_v45 = vsel %vm6486_vm7, %v6479_v2, 920167782  ;;  %v6495_v42 = vsel %vm6483_vm5, %v6473_v41, %v6476_v55 }
 0x4a6   :  { %vm6342_vm8 = vcmp.eq.s32.totalorder %v15817_v35, 2  ;;  %vm6484_vm9 = vcmp.lt.s32.totalorder %v15842_v47, 2  ;;  %v6493_v25 = vsel %vm6485_vm6, %v6476_v55, %v6492_v45  ;;  %v6496_v32 = vsel %vm6486_vm7, %v6482_v24, 1326507024 }
 0x4a7   :  { %vm10279_vm11 = vcmp.lt.s32.totalorder %v10278_v30, 0  ;;  %v6487_v33 = vsel %vm6483_vm5, %v6467_v18, %v6470_v23  ;;  %v6494_v10 = vsel %vm6484_vm9, %v6491_v44, %v6493_v25  ;;  %v6497_v3 = vsel %vm6485_vm6, %v6479_v2, %v6496_v32 }
 0x4a8   :  { %v6210_v62 = vsel %vm10279_vm11, 0, %v10278_v30  ;;  %vm6338_vm12 = vcmp.lt.s32.totalorder %v15817_v35, 2  ;;  %v6489_v59 = vsel %vm6485_vm6, %v6473_v41, %v6488_v60  ;;  %v6498_v26 = vsel %vm6484_vm9, %v6495_v42, %v6497_v3 }
 0x4a9   :  { %v6211_v19 = vsub.s32 32, %v6210_v62  ;;  %v6215_v14 = vsub.s32 4294967266, %v6210_v62  ;;  %vm6335_vm13 = vweird.f32 %v15474_v56  ;;  %v6212_v46 = vshll.u32 %v15840_v31, %v6210_v62 }
 0x4aa   :  { %v15895_v61 = vmul.u32.u64.low %v15861_v34, %v6498_v26  ;;  %v15896_v51 = vmul.u32.u64.high %v15861_v34, %v6498_v26, %v15895_v61  ;;  %v15899_v23 = vmul.u32.u64.low %v15861_v34, %v6494_v10  ;;  %v15900_v1 = vmul.u32.u64.high %v15861_v34, %v6494_v10, %v15899_v23 }
 0x4ab   :  { %v6213_v28 = vshrl.u32 %v15830_v63, %v6211_v19  ;;  %v6216_v29 = vadd.s32 127, %v6215_v14  ;;  %v6351_v41 = vshrl.u32 %v6350_v11, 23  ;;  %v6490_v27 = vsel %vm6484_vm9, %v6487_v33, %v6489_v59 }
 0x4ac   :  { %v15910_v22 = vadd.f32 %v15827_v50, %v15358_v9  ;;  %v15914_v55 = vadd.f32 %v15834_v12, %v15440_v15  ;;  %v15918_v2 = vadd.f32 %v15838_v6, %v15522_v5  ;;  %v6347_v21 = vand.u32 2147483647, %v15792_v13 }
 0x4ad   :  { %v12160_v31 = vpop.eup %12159  ;;  %v6214_v54 = vor.u32 %v6213_v28, %v6212_v46  ;;  %v6217_v63 = vshll.u32 %v6216_v29, 23  ;;  %v10284_v11 = vadd.s32 4294967169, %v6351_v41  ;;  %v6228_v9 = vsel %vm15871_vm4, 0, %v15866_v53 }
 0x4ae   :  { %v12162_v47 = vpop.eup %12161  ;;  %v6343_v18 = vxor.u32 2147483648, %v12160_v31  ;;  %vm6508_vm10 = vc.u32 %v15896_v51, %v15899_v23  ;;  %v6509_v15 = vadd.s32 1, %v15900_v1  ;;  %v6506_v5 = vmul.u32 %v15861_v34, %v6490_v27 }
 0x4af   :  { %v6340_v50 = vxor.u32 2147483648, %v12162_v47  ;;  %v6218_v12 = vor.u32 4788187, %v6217_v63  ;;  %v6357_v6 = vadd.s32 1, %v10284_v11  ;;  %vm6339_vm14 = vcmp.eq.s32.totalorder %v15817_v35, 0 }
 0x4b0   :  { %v6344_v24 = vsel %vm6342_vm8, %v6343_v18, %v12162_v47  ;;  %v6221_v30 = vcvt.s32.f32 %v6214_v54  ;;  %v6510_v60 = vsel %vm6508_vm10, %v6509_v15, %v15900_v1  ;;  %v6232_v25 = vadd.s32 3, %v6228_v9 }
 0x4b1   :  { %v6341_v44 = vsel %vm6339_vm14, %v12160_v31, %v6340_v50  ;;  %v6219_v45 = vand.u32 2147483647, %v6218_v12  ;;  %v6511_v53 = vadd.s32 %v6510_v60, %v6506_v5  ;;  %vm6358_vm15 = vcmp.gt.s32.totalorder %v6357_v6, 0 }
 0x4b2   :  { %v6345_v42 = vsel %vm6338_vm12, %v6341_v44, %v6344_v24  ;;  %v6354_v34 = vand.u32 8388607, %v6347_v21  ;;  %v6359_v32 = vsel %vm6358_vm15, %v6357_v6, 0  ;;  %v15937_v59 = vand.u32 3, %v6232_v25 }
 0x4b3   :  { %v6346_v62 = vsel %vm6335_vm13, nan, %v6345_v42  ;;  %v6222_v33 = vmul.f32 %v6221_v30, %v6219_v45  ;;  %v6512_v10 = vadd.s32 536870912, %v6511_v53  ;;  %v6361_v3 = vand.u32 31, %v6359_v32 }
 0x4b4   :  { %10118 = vst [vmem:[#allocation2 + $0xd8] sm:$0xff] %v6346_v62  ;;  %v15940_v26 = vadd.s32 %v15899_v23, %v15896_v51  ;;  %v6355_v35 = vor.u32 8388608, %v6354_v34  ;;  %v6360_v28 = vshrl.u32 %v6359_v32, 5  ;;  %vm6453_vm0 = vcmp.lt.s32.totalorder %v15732_v20, 0  ;;  %v15978_v32 = vpop.f32.mrb[37].mxu0 }
 0x4b5   :  { %v6223_v19 = vxor.u32 2147483648, %v6222_v33  ;;  %v6513_v14 = vshrl.u32 %v6512_v10, 30  ;;  %v6362_v61 = vsub.s32 32, %v6361_v3  ;;  %v6364_v56 = vshll.u32 %v12345_v7, %v6361_v3 }
 0x4b6   :  { %v6367_v27 = vshll.u32 %v12346_v39, %v6361_v3  ;;  %v6370_v31 = vshll.u32 %v12347_v43, %v6361_v3  ;;  %v6373_v37 = vshll.u32 %v12348_v48, %v6361_v3  ;;  %v15957_v11 = vshll.u32 %v6355_v35, 8 }
 0x4b7   :  { %v6224_v1 = vsel %vm6141_vm3, %v6223_v19, %v6222_v33  ;;  %v6514_v46 = vshll.u32 %v6513_v14, 30  ;;  %v6365_v41 = vshrl.u32 %v12346_v39, %v6362_v61  ;;  %v6368_v51 = vshrl.u32 %v12347_v43, %v6362_v61 }
 0x4b8   :  { %v6227_v29 = vsel %vm15871_vm4, %v15627_v4, %v6224_v1  ;;  %v6371_v54 = vshrl.u32 %v12348_v48, %v6362_v61  ;;  %v6374_v15 = vshrl.u32 %v12349_v49, %v6362_v61  ;;  %v6376_v50 = vshll.u32 %v12349_v49, %v6361_v3 }
 0x4b9   :  { %12163 = vcosq.f32 %v6227_v29  ;;  %v15952_v23 = vsub.s32 %v6511_v53, %v6514_v46  ;;  %v6366_v63 = vor.u32 %v6365_v41, %v6364_v56  ;;  %v6369_v18 = vor.u32 %v6368_v51, %v6367_v27  ;;  %v15986_v41 = vpop.f32.mrb[36].mxu1 }
 0x4ba   :  { %12165 = vsinq.f32 %v6227_v29  ;;  %v6372_v9 = vor.u32 %v6371_v54, %v6370_v31  ;;  %v6377_v12 = vshrl.u32 %v12350_v58, %v6362_v61  ;;  %vm6379_vm1 = vcmp.lt.s32.totalorder %v6360_v28, 1 }
 0x4bb   :  { %v6517_v47 = vsub.s32 0, %v15952_v23  ;;  %v6662_v5 = vand.u32 2139095040, %v15910_v22  ;;  %vm6238_vm2 = vcmp.eq.s32.totalorder %v15937_v59, 2  ;;  %vm15967_vm3 = vcmp.le.f32.partialorder %v6451_v38, 0.7853982 }
 0x4bc   :  { %v6363_v30 = vshrl.u32 %v12345_v7, %v6362_v61  ;;  %v6375_v60 = vor.u32 %v6374_v15, %v6373_v37  ;;  %vm6382_vm4 = vcmp.lt.s32.totalorder %v6360_v28, 4  ;;  %vm6235_vm5 = vcmp.eq.s32.totalorder %v15937_v59, 0 }
 0x4bd   :  { %v10289_v24 = vmin.u32 %v6517_v47, %v15952_v23  ;;  %v6537_v44 = vsub.s32 4, %v6513_v14  ;;  %v6378_v45 = vor.u32 %v6377_v12, %v6376_v50  ;;  %vm6381_vm6 = vcmp.lt.s32.totalorder %v6360_v28, 3 }
 0x4be   :  { %v6384_v53 = vsel %vm6382_vm4, %v6372_v9, 2102212464  ;;  %vm6234_vm7 = vcmp.lt.s32.totalorder %v15937_v59, 2  ;;  %v6383_v38 = vsel %vm6379_vm1, %v6363_v30, %v6366_v63  ;;  %v6387_v25 = vsel %vm6379_vm1, %v6366_v63, %v6369_v18 }
 0x4bf   :  { %v6519_v42 = vclz %v10289_v24  ;;  %v6391_v34 = vsel %vm6379_vm1, %v6369_v18, %v6372_v9  ;;  %vm6231_vm8 = vweird.f32 %v15627_v4  ;;  %v6385_v62 = vsel %vm6381_vm6, %v6369_v18, %v6384_v53 }
 0x4c0   :  { %v6388_v33 = vsel %vm6382_vm4, %v6375_v60, 920167782  ;;  %v6392_v10 = vsel %vm6382_vm4, %v6378_v45, 1326507024  ;;  %v6663_v3 = vshrl.u32 %v6662_v5, 23  ;;  %vm6380_vm11 = vcmp.lt.s32.totalorder %v6360_v28, 2 }
 0x4c1   :  { %v10290_v19 = vadd.s32 4294967294, %v6519_v42  ;;  %v6389_v35 = vsel %vm6381_vm6, %v6372_v9, %v6388_v33  ;;  %v6393_v61 = vsel %vm6381_vm6, %v6375_v60, %v6392_v10  ;;  %v6538_v1 = vsel %vm6453_vm0, %v6537_v44, %v6513_v14 }
 0x4c2   :  { %v6390_v46 = vsel %vm6380_vm11, %v6387_v25, %v6389_v35  ;;  %v6394_v56 = vsel %vm6380_vm11, %v6391_v34, %v6393_v61  ;;  %v10296_v29 = vadd.s32 4294967169, %v6663_v3  ;;  %v6386_v51 = vsel %vm6380_vm11, %v6383_v38, %v6385_v62 }
 0x4c3   :  { %v12164_v27 = vpop.eup %12163  ;;  %vm10291_vm9 = vcmp.lt.s32.totalorder %v10290_v19, 0  ;;  %v15989_v31 = vmul.u32.u64.low %v15957_v11, %v6394_v56  ;;  %v15990_v54 = vmul.u32.u64.high %v15957_v11, %v6394_v56, %v15989_v31  ;;  %v6659_v50 = vand.u32 2147483647, %v15910_v22 }
 0x4c4   :  { %v12166_v63 = vpop.eup %12165  ;;  %v6239_v37 = vxor.u32 2147483648, %v12164_v27  ;;  %v6522_v47 = vsel %vm10291_vm9, 0, %v10290_v19  ;;  %v15993_v28 = vmul.u32.u64.low %v15957_v11, %v6390_v46  ;;  %v15994_v18 = vmul.u32.u64.high %v15957_v11, %v6390_v46, %v15993_v28 }
 0x4c5   :  { %v6236_v14 = vxor.u32 2147483648, %v12166_v63  ;;  %v6523_v9 = vsub.s32 32, %v6522_v47  ;;  %v6527_v15 = vsub.s32 4294967266, %v6522_v47  ;;  %v6540_v5 = vsel %vm15967_vm3, 0, %v6538_v1 }
 0x4c6   :  { %v6240_v12 = vsel %vm6238_vm2, %v6239_v37, %v12166_v63  ;;  %v6402_v24 = vmul.u32 %v15957_v11, %v6386_v51  ;;  %v6669_v30 = vadd.s32 1, %v10296_v29  ;;  %v6524_v44 = vshll.u32 %v15952_v23, %v6522_v47 }
 0x4c7   :  { %v6237_v60 = vsel %vm6235_vm5, %v12164_v27, %v6236_v14  ;;  %v6525_v45 = vshrl.u32 %v15940_v26, %v6523_v9  ;;  %v6528_v53 = vadd.s32 127, %v6527_v15  ;;  %vm6404_vm12 = vc.u32 %v15990_v54, %v15993_v28 }
 0x4c8   :  { %v6241_v42 = vsel %vm6234_vm7, %v6237_v60, %v6240_v12  ;;  %v6405_v38 = vadd.s32 1, %v15994_v18  ;;  %vm6670_vm13 = vcmp.gt.s32.totalorder %v6669_v30, 0  ;;  %v6544_v59 = vadd.s32 3, %v6540_v5 }
 0x4c9   :  { %v6242_v11 = vsel %vm6231_vm8, nan, %v6241_v42  ;;  %v6526_v25 = vor.u32 %v6525_v45, %v6524_v44  ;;  %v6529_v34 = vshll.u32 %v6528_v53, 23  ;;  %v6671_v62 = vsel %vm6670_vm13, %v6669_v30, 0 }
 0x4ca   :  { %10117 = vst [vmem:[#allocation2 + $0xd0] sm:$0xff] %v6242_v11  ;;  %v6406_v23 = vsel %vm6404_vm12, %v6405_v38, %v15994_v18  ;;  %v6673_v26 = vand.u32 31, %v6671_v62  ;;  %v6666_v3 = vand.u32 8388607, %v6659_v50  ;;  %v6672_v47 = vshrl.u32 %v6671_v62, 5 }
 0x4cb   :  { %v6530_v33 = vor.u32 4788187, %v6529_v34  ;;  %v6407_v10 = vadd.s32 %v6406_v23, %v6402_v24  ;;  %v6533_v61 = vcvt.s32.f32 %v6526_v25  ;;  %v16030_v30 = vand.u32 3, %v6544_v59 }
 0x4cc   :  { %v6674_v19 = vsub.s32 32, %v6673_v26  ;;  %v6676_v4 = vshll.u32 %v12345_v7, %v6673_v26  ;;  %v6679_v56 = vshll.u32 %v12346_v39, %v6673_v26  ;;  %v6682_v18 = vshll.u32 %v12347_v43, %v6673_v26 }
 0x4cd   :  { %v6531_v35 = vand.u32 2147483647, %v6530_v33  ;;  %v6408_v1 = vadd.s32 536870912, %v6407_v10  ;;  %v6685_v14 = vshll.u32 %v12348_v48, %v6673_v26  ;;  %v6688_v9 = vshll.u32 %v12349_v49, %v6673_v26 }
 0x4ce   :  { %v6677_v46 = vshrl.u32 %v12346_v39, %v6674_v19  ;;  %v6680_v29 = vshrl.u32 %v12347_v43, %v6674_v19  ;;  %v6683_v27 = vshrl.u32 %v12348_v48, %v6674_v19  ;;  %v6686_v63 = vshrl.u32 %v12349_v49, %v6674_v19 }
 0x4cf   :  { %v6534_v51 = vmul.f32 %v6533_v61, %v6531_v35  ;;  %v16022_v31 = vshrl.u32 %v6408_v1, 30  ;;  %v6689_v37 = vshrl.u32 %v12350_v58, %v6674_v19  ;;  %v6667_v42 = vor.u32 8388608, %v6666_v3  ;;  %v16046_v1 = vpop.f32.mrb[38].mxu0 }
 0x4d0   :  { %v6678_v5 = vor.u32 %v6677_v46, %v6676_v4  ;;  %v6681_v24 = vor.u32 %v6680_v29, %v6679_v56  ;;  %v6684_v60 = vor.u32 %v6683_v27, %v6682_v18  ;;  %v6687_v44 = vor.u32 %v6686_v63, %v6685_v14  ;;  %v16049_v29 = vpop.f32.mrb[37].mxu1 }
 0x4d1   :  { %v6535_v15 = vxor.u32 2147483648, %v6534_v51  ;;  %v6410_v12 = vshll.u32 %v16022_v31, 30  ;;  %v6690_v38 = vor.u32 %v6689_v37, %v6688_v9  ;;  %v6675_v25 = vshrl.u32 %v12345_v7, %v6674_v19 }
 0x4d2   :  { %vm6691_vm10 = vcmp.lt.s32.totalorder %v6672_v47, 1  ;;  %vm6692_vm14 = vcmp.lt.s32.totalorder %v6672_v47, 2  ;;  %vm6694_vm15 = vcmp.lt.s32.totalorder %v6672_v47, 4  ;;  %v6707_v35 = vshll.u32 %v6667_v42, 8 }
 0x4d3   :  { %v6536_v45 = vsel %vm6453_vm0, %v6535_v15, %v6534_v51  ;;  %v16034_v53 = vsub.s32 %v6407_v10, %v6410_v12  ;;  %v6699_v62 = vsel %vm6691_vm10, %v6678_v5, %v6681_v24  ;;  %vm6693_vm0 = vcmp.lt.s32.totalorder %v6672_v47, 3 }
 0x4d4   :  { %v6539_v11 = vsel %vm15967_vm3, %v15732_v20, %v6536_v45  ;;  %v6696_v23 = vsel %vm6694_vm15, %v6684_v60, 2102212464  ;;  %v6700_v26 = vsel %vm6694_vm15, %v6687_v44, 920167782  ;;  %v6703_v6 = vsel %vm6691_vm10, %v6681_v24, %v6684_v60 }
 0x4d5   :  { %12167 = vcosq.f32 %v6539_v11  ;;  %v6413_v34 = vsub.s32 0, %v16034_v53  ;;  %v6701_v10 = vsel %vm6693_vm0, %v6684_v60, %v6700_v26  ;;  %v6704_v59 = vsel %vm6694_vm15, %v6690_v38, 1326507024 }
 0x4d6   :  { %12169 = vsinq.f32 %v6539_v11  ;;  %v6702_v3 = vsel %vm6692_vm14, %v6699_v62, %v6701_v10  ;;  %v6705_v19 = vsel %vm6693_vm0, %v6687_v44, %v6704_v59  ;;  %v6558_v61 = vand.u32 2139095040, %v15914_v55 }
 0x4d7   :  { %v10285_v33 = vmin.u32 %v6413_v34, %v16034_v53  ;;  %v6695_v46 = vsel %vm6691_vm10, %v6675_v25, %v6678_v5  ;;  %v6697_v56 = vsel %vm6693_vm0, %v6681_v24, %v6696_v23  ;;  %v6706_v27 = vsel %vm6692_vm14, %v6703_v6, %v6705_v19 }
 0x4d8   :  { %v16052_v51 = vmul.u32.u64.low %v6707_v35, %v6702_v3  ;;  %v16053_v63 = vmul.u32.u64.high %v6707_v35, %v6702_v3, %v16052_v51  ;;  %v6559_v37 = vshrl.u32 %v6558_v61, 23  ;;  %v6433_v14 = vsub.s32 4, %v16022_v31 }
 0x4d9   :  { %v6415_v4 = vclz %v10285_v33  ;;  %v16057_v9 = vmul.u32.u64.low %v6707_v35, %v6706_v27  ;;  %v16058_v15 = vmul.u32.u64.high %v6707_v35, %v6706_v27, %v16057_v9  ;;  %vm6546_vm1 = vcmp.lt.s32.totalorder %v16030_v30, 2 }
 0x4da   :  { %vm6349_vm2 = vcmp.lt.s32.totalorder %v15792_v13, 0  ;;  %v6698_v12 = vsel %vm6692_vm14, %v6695_v46, %v6697_v56  ;;  %v10292_v5 = vadd.s32 4294967169, %v6559_v37  ;;  %vm6547_vm3 = vcmp.eq.s32.totalorder %v16030_v30, 0 }
 0x4db   :  { %v10286_v18 = vadd.s32 4294967294, %v6415_v4  ;;  %vm6550_vm4 = vcmp.eq.s32.totalorder %v16030_v30, 2  ;;  %v6555_v24 = vand.u32 2147483647, %v15914_v55  ;;  %v6403_v60 = vadd.s32 %v15993_v28, %v15990_v54 }
 0x4dc   :  { %v6717_v45 = vadd.s32 1, %v16053_v63  ;;  %v6565_v42 = vadd.s32 1, %v10292_v5  ;;  %v6434_v47 = vsel %vm6349_vm2, %v6433_v14, %v16022_v31  ;;  %v6714_v34 = vmul.u32 %v6707_v35, %v6698_v12 }
 0x4dd   :  { %vm10287_vm5 = vcmp.lt.s32.totalorder %v10286_v18, 0  ;;  %vm6716_vm6 = vc.u32 %v16058_v15, %v16052_v51  ;;  %v6562_v31 = vand.u32 8388607, %v6555_v24  ;;  %v6870_v61 = vand.u32 2139095040, %v15918_v2 }
 0x4de   :  { %v6418_v44 = vsel %vm10287_vm5, 0, %v10286_v18  ;;  %vm6566_vm7 = vcmp.gt.s32.totalorder %v6565_v42, 0  ;;  %v6718_v10 = vsel %vm6716_vm6, %v6717_v45, %v16053_v63  ;;  %vm6543_vm8 = vweird.f32 %v15732_v20 }
 0x4df   :  { %v12168_v38 = vpop.eup %12167  ;;  %v6419_v11 = vsub.s32 32, %v6418_v44  ;;  %v6423_v25 = vsub.s32 4294967266, %v6418_v44  ;;  %v6420_v26 = vshll.u32 %v16034_v53, %v6418_v44  ;;  %v6719_v59 = vadd.s32 %v6718_v10, %v6714_v34 }
 0x4e0   :  { %v12170_v62 = vpop.eup %12169  ;;  %v6551_v23 = vxor.u32 2147483648, %v12168_v38  ;;  %v6567_v3 = vsel %vm6566_vm7, %v6565_v42, 0  ;;  %vm16088_vm11 = vcmp.le.f32.partialorder %v6347_v21, 0.7853982  ;;  %v16094_v18 = vadd.f32 %v15823_v36, %v15703_v0 }
 0x4e1   :  { %v6548_v54 = vxor.u32 2147483648, %v12170_v62  ;;  %v6421_v28 = vshrl.u32 %v6403_v60, %v6419_v11  ;;  %v6424_v33 = vadd.s32 127, %v6423_v25  ;;  %v6720_v46 = vadd.s32 536870912, %v6719_v59 }
 0x4e2   :  { %v6552_v6 = vsel %vm6550_vm4, %v6551_v23, %v12170_v62  ;;  %v6569_v56 = vand.u32 31, %v6567_v3  ;;  %v6436_v20 = vsel %vm16088_vm11, 0, %v6434_v47  ;;  %v6563_v14 = vor.u32 8388608, %v6562_v31 }
 0x4e3   :  { %v6549_v53 = vsel %vm6547_vm3, %v12168_v38, %v6548_v54  ;;  %v6422_v19 = vor.u32 %v6421_v28, %v6420_v26  ;;  %v6425_v35 = vshll.u32 %v6424_v33, 23  ;;  %v16098_v30 = vshrl.u32 %v6720_v46, 30 }
 0x4e4   :  { %v6553_v4 = vsel %vm6546_vm1, %v6549_v53, %v6552_v6  ;;  %v6570_v9 = vsub.s32 32, %v6569_v56  ;;  %v16100_v60 = vshrl.u32 %v6567_v3, 5  ;;  %v6871_v21 = vshrl.u32 %v6870_v61, 23 }
 0x4e5   :  { %v6554_v27 = vsel %vm6543_vm8, nan, %v6553_v4  ;;  %v6426_v37 = vor.u32 4788187, %v6425_v35  ;;  %v6429_v5 = vcvt.s32.f32 %v6422_v19  ;;  %v6722_v44 = vshll.u32 %v16098_v30, 30 }
 0x4e6   :  { %10120 = vst [vmem:[#allocation2 + $0xe8] sm:$0xff] %v6554_v27  ;;  %v6572_v45 = vshll.u32 %v12345_v7, %v6569_v56  ;;  %v6573_v0 = vshrl.u32 %v12346_v39, %v6570_v9  ;;  %v6575_v42 = vshll.u32 %v12346_v39, %v6569_v56  ;;  %v6576_v11 = vshrl.u32 %v12347_v43, %v6570_v9 }
 0x4e7   :  { %v6427_v12 = vand.u32 2147483647, %v6426_v37  ;;  %v6579_v25 = vshrl.u32 %v12348_v48, %v6570_v9  ;;  %v6582_v47 = vshrl.u32 %v12349_v49, %v6570_v9  ;;  %v16109_v34 = vsub.s32 %v6719_v59, %v6722_v44 }
 0x4e8   :  { %v6578_v62 = vshll.u32 %v12347_v43, %v6569_v56  ;;  %v6581_v23 = vshll.u32 %v12348_v48, %v6569_v56  ;;  %v6585_v26 = vshrl.u32 %v12350_v58, %v6570_v9  ;;  %v6440_v28 = vadd.s32 3, %v6436_v20 }
 0x4e9   :  { %v6430_v38 = vmul.f32 %v6429_v5, %v6427_v12  ;;  %v6574_v33 = vor.u32 %v6573_v0, %v6572_v45  ;;  %v6577_v10 = vor.u32 %v6576_v11, %v6575_v42  ;;  %v6725_v6 = vsub.s32 0, %v16109_v34 }
 0x4ea   :  { %v6580_v31 = vor.u32 %v6579_v25, %v6578_v62  ;;  %v6583_v3 = vor.u32 %v6582_v47, %v6581_v23  ;;  %v6584_v53 = vshll.u32 %v12349_v49, %v6569_v56  ;;  %vm6661_vm9 = vcmp.lt.s32.totalorder %v15910_v22, 0 }
 0x4eb   :  { %v6431_v54 = vxor.u32 2147483648, %v6430_v38  ;;  %vm6587_vm12 = vcmp.lt.s32.totalorder %v16100_v60, 1  ;;  %v16120_v19 = vshll.u32 %v6563_v14, 8  ;;  %v10304_v35 = vadd.s32 4294967169, %v6871_v21 }
 0x4ec   :  { %v10297_v4 = vmin.u32 %v6725_v6, %v16109_v34  ;;  %v6586_v46 = vor.u32 %v6585_v26, %v6584_v53  ;;  %vm6590_vm13 = vcmp.lt.s32.totalorder %v16100_v60, 4  ;;  %v6571_v56 = vshrl.u32 %v12345_v7, %v6570_v9 }
 0x4ed   :  { %v6432_v59 = vsel %vm6349_vm2, %v6431_v54, %v6430_v38  ;;  %v6595_v27 = vsel %vm6587_vm12, %v6574_v33, %v6577_v10  ;;  %v6596_v37 = vsel %vm6590_vm13, %v6583_v3, 920167782  ;;  %vm16134_vm10 = vcmp.le.f32.partialorder %v6659_v50, 0.7853982 }
 0x4ee   :  { %v6435_v61 = vsel %vm16088_vm11, %v15792_v13, %v6432_v59  ;;  %v6727_v20 = vclz %v10297_v4  ;;  %vm6589_vm14 = vcmp.lt.s32.totalorder %v16100_v60, 3  ;;  %v6592_v14 = vsel %vm6590_vm13, %v6580_v31, 2102212464  ;;  %v16179_v4 = vpop.f32.mrb[38].mxu1 }
 0x4ef   :  { %12171 = vcosq.f32 %v6435_v61  ;;  %v6745_v9 = vsub.s32 4, %v16098_v30  ;;  %vm6588_vm15 = vcmp.lt.s32.totalorder %v16100_v60, 2  ;;  %v6597_v12 = vsel %vm6589_vm14, %v6580_v31, %v6596_v37 }
 0x4f0   :  { %12173 = vsinq.f32 %v6435_v61  ;;  %v6599_v5 = vsel %vm6587_vm12, %v6577_v10, %v6580_v31  ;;  %v10298_v21 = vadd.s32 4294967294, %v6727_v20  ;;  %v6591_v50 = vsel %vm6587_vm12, %v6571_v56, %v6574_v33 }
 0x4f1   :  { %v6598_v44 = vsel %vm6588_vm15, %v6595_v27, %v6597_v12  ;;  %v6600_v45 = vsel %vm6590_vm13, %v6586_v46, 1326507024  ;;  %v6593_v0 = vsel %vm6589_vm14, %v6577_v10, %v6592_v14  ;;  %v6715_v25 = vadd.s32 %v16052_v51, %v16058_v15  ;;  %v16168_v10 = vpop.f32.mrb[39].mxu0 }
 0x4f2   :  { %v6601_v42 = vsel %vm6589_vm14, %v6583_v3, %v6600_v45  ;;  %v16152_v38 = vmul.u32.u64.low %v16120_v19, %v6598_v44  ;;  %v16153_v11 = vmul.u32.u64.high %v16120_v19, %v6598_v44, %v16152_v38  ;;  %vm10299_vm0 = vcmp.lt.s32.totalorder %v10298_v21, 0 }
 0x4f3   :  { %v6602_v47 = vsel %vm6588_vm15, %v6599_v5, %v6601_v42  ;;  %v6877_v62 = vadd.s32 1, %v10304_v35  ;;  %v6730_v23 = vsel %vm10299_vm0, 0, %v10298_v21  ;;  %v16166_v33 = vadd.f32 %v16094_v18, %v15615_v57 }
 0x4f4   :  { %v16161_v26 = vmul.u32.u64.low %v16120_v19, %v6602_v47  ;;  %v16162_v54 = vmul.u32.u64.high %v16120_v19, %v6602_v47, %v16161_v26  ;;  %vm6439_vm1 = vweird.f32 %v15792_v13  ;;  %v6731_v6 = vsub.s32 32, %v6730_v23 }
 0x4f5   :  { %v6735_v51 = vsub.s32 4294967266, %v6730_v23  ;;  %v6746_v15 = vsel %vm6661_vm9, %v6745_v9, %v16098_v30  ;;  %v6594_v31 = vsel %vm6588_vm15, %v6591_v50, %v6593_v0  ;;  %v6441_v3 = vand.u32 3, %v6440_v28 }
 0x4f6   :  { %v6613_v53 = vadd.s32 1, %v16153_v11  ;;  %v6867_v59 = vand.u32 2147483647, %v15918_v2  ;;  %vm6878_vm2 = vcmp.gt.s32.totalorder %v6877_v62, 0  ;;  %v6732_v57 = vshll.u32 %v16109_v34, %v6730_v23 }
 0x4f7   :  { %v6733_v18 = vshrl.u32 %v6715_v25, %v6731_v6  ;;  %v6736_v35 = vadd.s32 127, %v6735_v51  ;;  %v6879_v61 = vsel %vm6878_vm2, %v6877_v62, 0  ;;  %v6748_v30 = vsel %vm16134_vm10, 0, %v6746_v15 }
 0x4f8   :  { %v6610_v60 = vmul.u32 %v16120_v19, %v6594_v31  ;;  %vm6612_vm3 = vc.u32 %v16162_v54, %v16152_v38  ;;  %v6881_v28 = vand.u32 31, %v6879_v61  ;;  %vm6446_vm4 = vcmp.eq.s32.totalorder %v6441_v3, 2 }
 0x4f9   :  { %v12172_v46 = vpop.eup %12171  ;;  %v6734_v37 = vor.u32 %v6733_v18, %v6732_v57  ;;  %v6737_v20 = vshll.u32 %v6736_v35, 23  ;;  %v6614_v34 = vsel %vm6612_vm3, %v6613_v53, %v16153_v11  ;;  %vm6442_vm5 = vcmp.lt.s32.totalorder %v6441_v3, 2 }
 0x4fa   :  { %v12174_v56 = vpop.eup %12173  ;;  %v6447_v27 = vxor.u32 2147483648, %v12172_v46  ;;  %v6615_v9 = vadd.s32 %v6614_v34, %v6610_v60  ;;  %v6882_v12 = vsub.s32 32, %v6881_v28  ;;  %vm6443_vm6 = vcmp.eq.s32.totalorder %v6441_v3, 0 }
 0x4fb   :  { %v6444_v14 = vxor.u32 2147483648, %v12174_v56  ;;  %v6738_v21 = vor.u32 4788187, %v6737_v20  ;;  %v6752_v19 = vadd.s32 3, %v6748_v30  ;;  %v6874_v45 = vand.u32 8388607, %v6867_v59 }
 0x4fc   :  { %v6448_v5 = vsel %vm6446_vm4, %v6447_v27, %v12174_v56  ;;  %v6616_v44 = vadd.s32 536870912, %v6615_v9  ;;  %v6741_v25 = vcvt.s32.f32 %v6734_v37  ;;  %v6885_v47 = vshrl.u32 %v12346_v39, %v6882_v12 }
 0x4fd   :  { %v6445_v50 = vsel %vm6443_vm6, %v12172_v46, %v6444_v14  ;;  %v6739_v42 = vand.u32 2147483647, %v6738_v21  ;;  %v6888_v23 = vshrl.u32 %v12347_v43, %v6882_v12  ;;  %v6891_v26 = vshrl.u32 %v12348_v48, %v6882_v12 }
 0x4fe   :  { %v6449_v0 = vsel %vm6442_vm5, %v6445_v50, %v6448_v5  ;;  %v6617_v62 = vshrl.u32 %v6616_v44, 30  ;;  %vm6557_vm7 = vcmp.lt.s32.totalorder %v15914_v55, 0  ;;  %v6880_v51 = vshrl.u32 %v6879_v61, 5 }
 0x4ff   :  { %v6450_v11 = vsel %vm6439_vm1, nan, %v6449_v0  ;;  %v6742_v6 = vmul.f32 %v6741_v25, %v6739_v42  ;;  %v6893_v15 = vshll.u32 %v12348_v48, %v6881_v28  ;;  %v6894_v31 = vshrl.u32 %v12349_v49, %v6882_v12 }
 0x500   :  { %10119 = vst [vmem:[#allocation2 + $0xe0] sm:$0xff] %v6450_v11  ;;  %v6618_v3 = vshll.u32 %v6617_v62, 30  ;;  %v6884_v53 = vshll.u32 %v12345_v7, %v6881_v28  ;;  %v6887_v13 = vshll.u32 %v12346_v39, %v6881_v28  ;;  %v6890_v57 = vshll.u32 %v12347_v43, %v6881_v28 }
 0x501   :  { %v6743_v18 = vxor.u32 2147483648, %v6742_v6  ;;  %v6895_v35 = vor.u32 %v6894_v31, %v6893_v15  ;;  %v6896_v46 = vshll.u32 %v12349_v49, %v6881_v28  ;;  %v6897_v30 = vshrl.u32 %v12350_v58, %v6882_v12 }
 0x502   :  { %v16202_v60 = vsub.s32 %v6615_v9, %v6618_v3  ;;  %v6886_v61 = vor.u32 %v6885_v47, %v6884_v53  ;;  %v6889_v56 = vor.u32 %v6888_v23, %v6887_v13  ;;  %v6892_v27 = vor.u32 %v6891_v26, %v6890_v57 }
 0x503   :  { %v6744_v37 = vsel %vm6661_vm9, %v6743_v18, %v6742_v6  ;;  %v16206_v20 = vand.u32 3, %v6752_v19  ;;  %v6875_v34 = vor.u32 8388608, %v6874_v45  ;;  %v6898_v14 = vor.u32 %v6897_v30, %v6896_v46  ;;  %v16237_v18 = vpop.f32.mrb[40].mxu0 }
 0x504   :  { %v6747_v5 = vsel %vm16134_vm10, %v15910_v22, %v6744_v37  ;;  %vm16213_vm8 = vcmp.le.f32.partialorder %v6555_v24, 0.7853982  ;;  %v6621_v9 = vsub.s32 0, %v16202_v60  ;;  %v6641_v21 = vsub.s32 4, %v6617_v62 }
 0x505   :  { %vm6902_vm11 = vcmp.lt.s32.totalorder %v6880_v51, 4  ;;  %12175 = vcosq.f32 %v6747_v5  ;;  %vm6899_vm9 = vcmp.lt.s32.totalorder %v6880_v51, 1  ;;  %vm6901_vm12 = vcmp.lt.s32.totalorder %v6880_v51, 3 }
 0x506   :  { %v6908_v50 = vsel %vm6902_vm11, %v6895_v35, 920167782  ;;  %12177 = vsinq.f32 %v6747_v5  ;;  %v10293_v19 = vmin.u32 %v6621_v9, %v16202_v60  ;;  %v6904_v44 = vsel %vm6902_vm11, %v6892_v27, 2102212464 }
 0x507   :  { %v6907_v63 = vsel %vm6899_vm9, %v6886_v61, %v6889_v56  ;;  %v6883_v45 = vshrl.u32 %v12345_v7, %v6882_v12  ;;  %v6909_v24 = vsel %vm6901_vm12, %v6892_v27, %v6908_v50  ;;  %v6911_v0 = vsel %vm6899_vm9, %v6889_v56, %v6892_v27 }
 0x508   :  { %v6912_v42 = vsel %vm6902_vm11, %v6898_v14, 1326507024  ;;  %v6623_v25 = vclz %v10293_v19  ;;  %v6642_v47 = vsel %vm6557_vm7, %v6641_v21, %v6617_v62  ;;  %vm6900_vm13 = vcmp.lt.s32.totalorder %v6880_v51, 2 }
 0x509   :  { %v6915_v11 = vshll.u32 %v6875_v34, 8  ;;  %v6903_v23 = vsel %vm6899_vm9, %v6883_v45, %v6886_v61  ;;  %v6905_v26 = vsel %vm6901_vm12, %v6889_v56, %v6904_v44  ;;  %v6910_v6 = vsel %vm6900_vm13, %v6907_v63, %v6909_v24  ;;  %v16244_v61 = vpop.f32.mrb[39].mxu1 }
 0x50a   :  { %v6913_v15 = vsel %vm6901_vm12, %v6895_v35, %v6912_v42  ;;  %vm6755_vm10 = vcmp.eq.s32.totalorder %v16206_v20, 0  ;;  %v10294_v12 = vadd.s32 4294967294, %v6623_v25  ;;  %vm6754_vm14 = vcmp.lt.s32.totalorder %v16206_v20, 2 }
 0x50b   :  { %v6914_v31 = vsel %vm6900_vm13, %v6911_v0, %v6913_v15  ;;  %v16228_v3 = vmul.u32.u64.low %v6915_v11, %v6910_v6  ;;  %v16229_v53 = vmul.u32.u64.high %v6915_v11, %v6910_v6, %v16228_v3  ;;  %vm6758_vm15 = vcmp.eq.s32.totalorder %v16206_v20, 2 }
 0x50c   :  { %v16233_v62 = vmul.u32.u64.low %v6915_v11, %v6914_v31  ;;  %v16234_v13 = vmul.u32.u64.high %v6915_v11, %v6914_v31, %v16233_v62  ;;  %v6766_v57 = vand.u32 2139095040, %v16166_v33  ;;  %vm6751_vm0 = vweird.f32 %v15910_v22 }
 0x50d   :  { %v6611_v35 = vadd.s32 %v16152_v38, %v16162_v54  ;;  %vm10295_vm1 = vcmp.lt.s32.totalorder %v10294_v12, 0  ;;  %v6906_v46 = vsel %vm6900_vm13, %v6903_v23, %v6905_v26  ;;  %v6763_v30 = vand.u32 2147483647, %v16166_v33 }
 0x50e   :  { %v6626_v56 = vsel %vm10295_vm1, 0, %v10294_v12  ;;  %v6644_v27 = vsel %vm16213_vm8, 0, %v6642_v47  ;;  %v6767_v37 = vshrl.u32 %v6766_v57, 23  ;;  %v11474_v34 = vadd.f32 %v15823_v36, %v15804_v40 }
 0x50f   :  { %v6627_v14 = vsub.s32 32, %v6626_v56  ;;  %v6631_v5 = vsub.s32 4294967266, %v6626_v56  ;;  %v6925_v9 = vadd.s32 1, %v16229_v53  ;;  %v11476_v38 = vadd.f32 %v15823_v36, %v15902_v17  ;;  %v12176_v54 = vpop.eup %12175 }
 0x510   :  { %v6628_v51 = vshll.u32 %v16202_v60, %v6626_v56  ;;  %v6922_v21 = vmul.u32 %v6915_v11, %v6906_v46  ;;  %vm6924_vm2 = vc.u32 %v16234_v13, %v16228_v3  ;;  %v10300_v50 = vadd.s32 4294967169, %v6767_v37  ;;  %v12178_v19 = vpop.eup %12177 }
 0x511   :  { %v6759_v44 = vxor.u32 2147483648, %v12176_v54  ;;  %v6629_v63 = vshrl.u32 %v6611_v35, %v6627_v14  ;;  %v6632_v45 = vadd.s32 127, %v6631_v5  ;;  %v6926_v40 = vsel %vm6924_vm2, %v6925_v9, %v16229_v53 }
 0x512   :  { %v6756_v24 = vxor.u32 2147483648, %v12178_v19  ;;  %v6927_v0 = vadd.s32 %v6926_v40, %v6922_v21  ;;  %v6773_v42 = vadd.s32 1, %v10300_v50  ;;  %v16257_v25 = vadd.f32 %v11474_v34, %v15697_v52 }
 0x513   :  { %v6760_v36 = vsel %vm6758_vm15, %v6759_v44, %v12178_v19  ;;  %v6630_v17 = vor.u32 %v6629_v63, %v6628_v51  ;;  %v6633_v60 = vshll.u32 %v6632_v45, 23  ;;  %v16262_v47 = vadd.f32 %v11476_v38, %v15794_v8 }
 0x514   :  { %v6757_v11 = vsel %vm6755_vm10, %v12176_v54, %v6756_v24  ;;  %v6648_v23 = vadd.s32 3, %v6644_v27  ;;  %v6928_v26 = vadd.s32 536870912, %v6927_v0  ;;  %vm6774_vm3 = vcmp.gt.s32.totalorder %v6773_v42, 0 }
 0x515   :  { %v6761_v6 = vsel %vm6754_vm14, %v6757_v11, %v6760_v36  ;;  %v6634_v15 = vor.u32 4788187, %v6633_v60  ;;  %v6770_v52 = vand.u32 8388607, %v6763_v30  ;;  %v6775_v12 = vsel %vm6774_vm3, %v6773_v42, 0 }
 0x516   :  { %v6762_v31 = vsel %vm6751_vm0, nan, %v6761_v6  ;;  %v6929_v53 = vshrl.u32 %v6928_v26, 30  ;;  %v6777_v8 = vand.u32 31, %v6775_v12  ;;  %v6637_v57 = vcvt.s32.f32 %v6630_v17 }
 0x517   :  { %10122 = vst [vmem:[#allocation2 + $0xf8] sm:$0xff] %v6762_v31  ;;  %v6635_v62 = vand.u32 2147483647, %v6634_v15  ;;  %v16272_v27 = vand.u32 3, %v6648_v23  ;;  %vm6869_vm4 = vcmp.lt.s32.totalorder %v15918_v2, 0  ;;  %v6771_v20 = vor.u32 8388608, %v6770_v52 }
 0x518   :  { %v6930_v35 = vshll.u32 %v6929_v53, 30  ;;  %v6778_v46 = vsub.s32 32, %v6777_v8  ;;  %v6923_v37 = vadd.s32 %v16228_v3, %v16234_v13  ;;  %v16278_v14 = vshrl.u32 %v6775_v12, 5 }
 0x519   :  { %v6638_v56 = vmul.f32 %v6637_v57, %v6635_v62  ;;  %v6780_v9 = vshll.u32 %v12345_v7, %v6777_v8  ;;  %v6783_v21 = vshll.u32 %v12346_v39, %v6777_v8  ;;  %v6786_v50 = vshll.u32 %v12347_v43, %v6777_v8 }
 0x51a   :  { %v16276_v34 = vsub.s32 %v6927_v0, %v6930_v35  ;;  %v6781_v22 = vshrl.u32 %v12346_v39, %v6778_v46  ;;  %v6784_v38 = vshrl.u32 %v12347_v43, %v6778_v46  ;;  %v6787_v54 = vshrl.u32 %v12348_v48, %v6778_v46 }
 0x51b   :  { %v6639_v5 = vxor.u32 2147483648, %v6638_v56  ;;  %v6790_v3 = vshrl.u32 %v12349_v49, %v6778_v46  ;;  %v6953_v19 = vsub.s32 4, %v6929_v53  ;;  %v6789_v63 = vshll.u32 %v12348_v48, %v6777_v8 }
 0x51c   :  { %v6933_v51 = vsub.s32 0, %v16276_v34  ;;  %v6782_v44 = vor.u32 %v6781_v22, %v6780_v9  ;;  %v6785_v24 = vor.u32 %v6784_v38, %v6783_v21  ;;  %v6788_v0 = vor.u32 %v6787_v54, %v6786_v50  ;;  %v16325_v54 = vpop.f32.mrb[41].mxu0 }
 0x51d   :  { %v6640_v13 = vsel %vm6557_vm7, %v6639_v5, %v6638_v56  ;;  %v6791_v42 = vor.u32 %v6790_v3, %v6789_v63  ;;  %v6792_v36 = vshll.u32 %v12349_v49, %v6777_v8  ;;  %v6793_v17 = vshrl.u32 %v12350_v58, %v6778_v46 }
 0x51e   :  { %v6643_v45 = vsel %vm16213_vm8, %v15914_v55, %v6640_v13  ;;  %v10305_v40 = vmin.u32 %v6933_v51, %v16276_v34  ;;  %v16297_v11 = vshll.u32 %v6771_v20, 8  ;;  %v7078_v23 = vand.u32 2139095040, %v16257_v25 }
 0x51f   :  { %12179 = vcosq.f32 %v6643_v45  ;;  %vm16302_vm5 = vcmp.le.f32.partialorder %v6867_v59, 0.7853982  ;;  %v6954_v26 = vsel %vm6869_vm4, %v6953_v19, %v6929_v53  ;;  %v6779_v6 = vshrl.u32 %v12345_v7, %v6778_v46 }
 0x520   :  { %12181 = vsinq.f32 %v6643_v45  ;;  %v6935_v60 = vclz %v10305_v40  ;;  %v6794_v15 = vor.u32 %v6793_v17, %v6792_v36  ;;  %vm6795_vm6 = vcmp.lt.s32.totalorder %v16278_v14, 1 }
 0x521   :  { %vm6797_vm7 = vcmp.lt.s32.totalorder %v16278_v14, 3  ;;  %vm6798_vm8 = vcmp.lt.s32.totalorder %v16278_v14, 4  ;;  %v6803_v12 = vsel %vm6795_vm6, %v6782_v44, %v6785_v24  ;;  %v6807_v59 = vsel %vm6795_vm6, %v6785_v24, %v6788_v0 }
 0x522   :  { %v10306_v52 = vadd.s32 4294967294, %v6935_v60  ;;  %v6800_v31 = vsel %vm6798_vm8, %v6788_v0, 2102212464  ;;  %v6804_v8 = vsel %vm6798_vm8, %v6791_v42, 920167782  ;;  %vm6796_vm9 = vcmp.lt.s32.totalorder %v16278_v14, 2 }
 0x523   :  { %v6808_v62 = vsel %vm6798_vm8, %v6794_v15, 1326507024  ;;  %v6805_v53 = vsel %vm6797_vm7, %v6788_v0, %v6804_v8  ;;  %vm6650_vm12 = vcmp.lt.s32.totalorder %v16272_v27, 2  ;;  %v6799_v46 = vsel %vm6795_vm6, %v6779_v6, %v6782_v44 }
 0x524   :  { %vm10307_vm11 = vcmp.lt.s32.totalorder %v10306_v52, 0  ;;  %v6809_v57 = vsel %vm6797_vm7, %v6791_v42, %v6808_v62  ;;  %v6806_v56 = vsel %vm6796_vm9, %v6803_v12, %v6805_v53  ;;  %vm6647_vm13 = vweird.f32 %v15914_v55 }
 0x525   :  { %v6938_v35 = vsel %vm10307_vm11, 0, %v10306_v52  ;;  %v6810_v20 = vsel %vm6796_vm9, %v6807_v59, %v6809_v57  ;;  %v6801_v9 = vsel %vm6797_vm7, %v6785_v24, %v6800_v31  ;;  %v7079_v38 = vshrl.u32 %v7078_v23, 23  ;;  %v16344_v24 = vld [vmem:[%s18931_s2] ss:$0 sm:$0xff] }
 0x526   :  { %v6939_v22 = vsub.s32 32, %v6938_v35  ;;  %v6943_v5 = vsub.s32 4294967266, %v6938_v35  ;;  %v16328_v51 = vmul.u32.u64.low %v16297_v11, %v6810_v20  ;;  %v16329_v21 = vmul.u32.u64.high %v16297_v11, %v6810_v20, %v16328_v51 }
 0x527   :  { %v16332_v50 = vmul.u32.u64.low %v16297_v11, %v6806_v56  ;;  %v16333_v3 = vmul.u32.u64.high %v16297_v11, %v6806_v56, %v16332_v50  ;;  %v6940_v13 = vshll.u32 %v16276_v34, %v6938_v35  ;;  %v10312_v63 = vadd.s32 4294967169, %v7079_v38  ;;  %v16348_v34 = vpop.f32.mrb[40].mxu1 }
 0x528   :  { %v6941_v19 = vshrl.u32 %v6923_v37, %v6939_v22  ;;  %v6944_v44 = vadd.s32 127, %v6943_v5  ;;  %vm6651_vm10 = vcmp.eq.s32.totalorder %v16272_v27, 0  ;;  %vm6654_vm14 = vcmp.eq.s32.totalorder %v16272_v27, 2 }
 0x529   :  { %v12180_v45 = vpop.eup %12179  ;;  %v6802_v40 = vsel %vm6796_vm9, %v6799_v46, %v6801_v9  ;;  %v11478_v0 = vadd.f32 %v16344_v24, %v15986_v41  ;;  %v6956_v60 = vsel %vm16302_vm5, 0, %v6954_v26  ;;  %vm6820_vm15 = vc.u32 %v16329_v21, %v16332_v50 }
 0x52a   :  { %v12182_v37 = vpop.eup %12181  ;;  %v6655_v42 = vxor.u32 2147483648, %v12180_v45  ;;  %v6942_v36 = vor.u32 %v6941_v19, %v6940_v13  ;;  %v6945_v17 = vshll.u32 %v6944_v44, 23  ;;  %v6821_v14 = vadd.s32 1, %v16333_v3 }
 0x52b   :  { %v6652_v23 = vxor.u32 2147483648, %v12182_v37  ;;  %v7075_v6 = vand.u32 2147483647, %v16257_v25  ;;  %v6818_v52 = vmul.u32 %v16297_v11, %v6802_v40  ;;  %v7085_v12 = vadd.s32 1, %v10312_v63 }
 0x52c   :  { %v6656_v41 = vsel %vm6654_vm14, %v6655_v42, %v12182_v37  ;;  %v6946_v15 = vor.u32 4788187, %v6945_v17  ;;  %v6949_v8 = vcvt.s32.f32 %v6942_v36  ;;  %v6960_v26 = vadd.s32 3, %v6956_v60 }
 0x52d   :  { %v6653_v31 = vsel %vm6651_vm10, %v12180_v45, %v6652_v23  ;;  %v6822_v59 = vsel %vm6820_vm15, %v6821_v14, %v16333_v3  ;;  %vm7086_vm0 = vcmp.gt.s32.totalorder %v7085_v12, 0  ;;  %v7082_v11 = vand.u32 8388607, %v7075_v6 }
 0x52e   :  { %v6657_v62 = vsel %vm6650_vm12, %v6653_v31, %v6656_v41  ;;  %v6947_v53 = vand.u32 2147483647, %v6946_v15  ;;  %v6823_v57 = vadd.s32 %v6822_v59, %v6818_v52  ;;  %v7087_v46 = vsel %vm7086_vm0, %v7085_v12, 0 }
 0x52f   :  { %v6658_v35 = vsel %vm6647_vm13, nan, %v6657_v62  ;;  %v6974_v56 = vand.u32 2139095040, %v16262_v47  ;;  %v7089_v5 = vand.u32 31, %v7087_v46  ;;  %v16370_v9 = vadd.f32 %v11478_v0, %v15891_v16 }
 0x530   :  { %10121 = vst [vmem:[#allocation2 + $0xf0] sm:$0xff] %v6658_v35  ;;  %v6950_v20 = vmul.f32 %v6949_v8, %v6947_v53  ;;  %v6824_v22 = vadd.s32 536870912, %v6823_v57  ;;  %v16372_v38 = vand.u32 3, %v6960_v26  ;;  %v7083_v3 = vor.u32 8388608, %v7082_v11 }
 0x531   :  { %v7090_v55 = vsub.s32 32, %v7089_v5  ;;  %v16376_v13 = vshrl.u32 %v7087_v46, 5  ;;  %v7092_v19 = vshll.u32 %v12345_v7, %v7089_v5  ;;  %v6975_v44 = vshrl.u32 %v6974_v56, 23  ;;  %v16411_v46 = vpop.f32.mrb[42].mxu0 }
 0x532   :  { %v6951_v27 = vxor.u32 2147483648, %v6950_v20  ;;  %v16374_v51 = vshrl.u32 %v6824_v22, 30  ;;  %v7095_v16 = vshll.u32 %v12346_v39, %v7089_v5  ;;  %v7098_v40 = vshll.u32 %v12347_v43, %v7089_v5 }
 0x533   :  { %v7093_v37 = vshrl.u32 %v12346_v39, %v7090_v55  ;;  %v7096_v42 = vshrl.u32 %v12347_v43, %v7090_v55  ;;  %v7099_v36 = vshrl.u32 %v12348_v48, %v7090_v55  ;;  %v7101_v60 = vshll.u32 %v12348_v48, %v7089_v5 }
 0x534   :  { %v6952_v63 = vsel %vm6869_vm4, %v6951_v27, %v6950_v20  ;;  %v6826_v45 = vshll.u32 %v16374_v51, 30  ;;  %v7102_v23 = vshrl.u32 %v12349_v49, %v7090_v55  ;;  %v7104_v12 = vshll.u32 %v12349_v49, %v7089_v5  ;;  %v16418_v5 = vpop.f32.mrb[41].mxu1 }
 0x535   :  { %v6955_v0 = vsel %vm16302_vm5, %v15918_v2, %v6952_v63  ;;  %v7094_v14 = vor.u32 %v7093_v37, %v7092_v19  ;;  %v7097_v41 = vor.u32 %v7096_v42, %v7095_v16  ;;  %v7100_v28 = vor.u32 %v7099_v36, %v7098_v40 }
 0x536   :  { %12183 = vcosq.f32 %v6955_v0  ;;  %v16390_v17 = vsub.s32 %v6823_v57, %v6826_v45  ;;  %v7103_v52 = vor.u32 %v7102_v23, %v7101_v60  ;;  %v7105_v31 = vshrl.u32 %v12350_v58, %v7090_v55 }
 0x537   :  { %12185 = vsinq.f32 %v6955_v0  ;;  %v16397_v8 = vshll.u32 %v7083_v3, 8  ;;  %v6971_v26 = vand.u32 2147483647, %v16262_v47  ;;  %vm6966_vm1 = vcmp.eq.s32.totalorder %v16372_v38, 2 }
 0x538   :  { %v6829_v15 = vsub.s32 0, %v16390_v17  ;;  %vm6765_vm2 = vcmp.lt.s32.totalorder %v16166_v33, 0  ;;  %vm7107_vm3 = vcmp.lt.s32.totalorder %v16376_v13, 1  ;;  %vm7110_vm4 = vcmp.lt.s32.totalorder %v16376_v13, 4 }
 0x539   :  { %v10308_v62 = vadd.s32 4294967169, %v6975_v44  ;;  %vm6963_vm5 = vcmp.eq.s32.totalorder %v16372_v38, 0  ;;  %v6849_v53 = vsub.s32 4, %v16374_v51  ;;  %v7106_v57 = vor.u32 %v7105_v31, %v7104_v12 }
 0x53a   :  { %v10301_v59 = vmin.u32 %v6829_v15, %v16390_v17  ;;  %v7115_v35 = vsel %vm7107_vm3, %v7094_v14, %v7097_v41  ;;  %v7116_v11 = vsel %vm7110_vm4, %v7103_v52, 920167782  ;;  %vm6962_vm6 = vcmp.lt.s32.totalorder %v16372_v38, 2 }
 0x53b   :  { %v7091_v20 = vshrl.u32 %v12345_v7, %v7090_v55  ;;  %vm7109_vm7 = vcmp.lt.s32.totalorder %v16376_v13, 3  ;;  %v7112_v22 = vsel %vm7110_vm4, %v7100_v28, 2102212464  ;;  %vm6959_vm8 = vweird.f32 %v15918_v2 }
 0x53c   :  { %v6831_v56 = vclz %v10301_v59  ;;  %vm7108_vm11 = vcmp.lt.s32.totalorder %v16376_v13, 2  ;;  %v7117_v27 = vsel %vm7109_vm7, %v7100_v28, %v7116_v11  ;;  %v7119_v3 = vsel %vm7107_vm3, %v7097_v41, %v7100_v28 }
 0x53d   :  { %v7120_v19 = vsel %vm7110_vm4, %v7106_v57, 1326507024  ;;  %vm16428_vm9 = vcmp.le.f32.partialorder %v6763_v30, 0.7853982  ;;  %v7111_v63 = vsel %vm7107_vm3, %v7091_v20, %v7094_v14  ;;  %v7118_v45 = vsel %vm7108_vm11, %v7115_v35, %v7117_v27 }
 0x53e   :  { %v10302_v44 = vadd.s32 4294967294, %v6831_v56  ;;  %v7121_v16 = vsel %vm7109_vm7, %v7103_v52, %v7120_v19  ;;  %v7113_v40 = vsel %vm7109_vm7, %v7097_v41, %v7112_v22  ;;  %v6981_v23 = vadd.s32 1, %v10308_v62 }
 0x53f   :  { %v7122_v0 = vsel %vm7108_vm11, %v7119_v3, %v7121_v16  ;;  %v16439_v37 = vmul.u32.u64.low %v16397_v8, %v7118_v45  ;;  %v16440_v42 = vmul.u32.u64.high %v16397_v8, %v7118_v45, %v16439_v37  ;;  %v6819_v41 = vadd.s32 %v16332_v50, %v16329_v21 }
 0x540   :  { %v12184_v30 = vpop.eup %12183  ;;  %vm10303_vm12 = vcmp.lt.s32.totalorder %v10302_v44, 0  ;;  %v16444_v36 = vmul.u32.u64.low %v16397_v8, %v7122_v0  ;;  %v16445_v60 = vmul.u32.u64.high %v16397_v8, %v7122_v0, %v16444_v36  ;;  %v16451_v52 = vand.u32 8388607, %v6971_v26 }
 0x541   :  { %v12186_v14 = vpop.eup %12185  ;;  %v6967_v15 = vxor.u32 2147483648, %v12184_v30  ;;  %v6834_v28 = vsel %vm10303_vm12, 0, %v10302_v44  ;;  %v7114_v57 = vsel %vm7108_vm11, %v7111_v63, %v7113_v40  ;;  %v6850_v62 = vsel %vm6765_vm2, %v6849_v53, %v16374_v51 }
 0x542   :  { %v6964_v12 = vxor.u32 2147483648, %v12186_v14  ;;  %v6835_v31 = vsub.s32 32, %v6834_v28  ;;  %v6839_v59 = vsub.s32 4294967266, %v6834_v28  ;;  %v7133_v21 = vadd.s32 1, %v16440_v42 }
 0x543   :  { %v6968_v35 = vsel %vm6966_vm1, %v6967_v15, %v12186_v14  ;;  %vm6982_vm13 = vcmp.gt.s32.totalorder %v6981_v23, 0  ;;  %v6836_v11 = vshll.u32 %v16390_v17, %v6834_v28  ;;  %v7130_v22 = vmul.u32 %v16397_v8, %v7114_v57 }
 0x544   :  { %v6965_v50 = vsel %vm6963_vm5, %v12184_v30, %v6964_v12  ;;  %v6837_v56 = vshrl.u32 %v6819_v41, %v6835_v31  ;;  %v6840_v20 = vadd.s32 127, %v6839_v59  ;;  %vm7132_vm10 = vc.u32 %v16445_v60, %v16439_v37 }
 0x545   :  { %v6969_v13 = vsel %vm6962_vm6, %v6965_v50, %v6968_v35  ;;  %v6983_v27 = vsel %vm6982_vm13, %v6981_v23, 0  ;;  %v7134_v19 = vsel %vm7132_vm10, %v7133_v21, %v16440_v42  ;;  %v6852_v17 = vsel %vm16428_vm9, 0, %v6850_v62 }
 0x546   :  { %v6970_v51 = vsel %vm6959_vm8, nan, %v6969_v13  ;;  %v6838_v53 = vor.u32 %v6837_v56, %v6836_v11  ;;  %v6841_v3 = vshll.u32 %v6840_v20, 23  ;;  %v7135_v44 = vadd.s32 %v7134_v19, %v7130_v22 }
 0x547   :  { %10124 = vst [vmem:[#allocation2 + $0x108] sm:$0xff] %v6970_v51  ;;  %v6985_v38 = vand.u32 31, %v6983_v27  ;;  %v6979_v8 = vor.u32 8388608, %v16451_v52  ;;  %v6856_v30 = vadd.s32 3, %v6852_v17  ;;  %vm7077_vm14 = vcmp.lt.s32.totalorder %v16257_v25, 0 }
 0x548   :  { %v6842_v63 = vor.u32 4788187, %v6841_v3  ;;  %v7136_v45 = vadd.s32 536870912, %v7135_v44  ;;  %v6845_v0 = vcvt.s32.f32 %v6838_v53  ;;  %v6984_v31 = vshrl.u32 %v6983_v27, 5 }
 0x549   :  { %v6986_v16 = vsub.s32 32, %v6985_v38  ;;  %v6994_v2 = vshll.u32 %v12347_v43, %v6985_v38  ;;  %v6997_v14 = vshll.u32 %v12348_v48, %v6985_v38  ;;  %v6988_v59 = vshll.u32 %v12345_v7, %v6985_v38 }
 0x54a   :  { %v6843_v40 = vand.u32 2147483647, %v6842_v63  ;;  %v7137_v36 = vshrl.u32 %v7136_v45, 30  ;;  %v6991_v57 = vshll.u32 %v12346_v39, %v6985_v38  ;;  %v7000_v50 = vshll.u32 %v12349_v49, %v6985_v38 }
 0x54b   :  { %v6989_v23 = vshrl.u32 %v12346_v39, %v6986_v16  ;;  %v6992_v42 = vshrl.u32 %v12347_v43, %v6986_v16  ;;  %v6995_v41 = vshrl.u32 %v12348_v48, %v6986_v16  ;;  %v6998_v28 = vshrl.u32 %v12349_v49, %v6986_v16 }
 0x54c   :  { %v6846_v15 = vmul.f32 %v6845_v0, %v6843_v40  ;;  %v7001_v52 = vshrl.u32 %v12350_v58, %v6986_v16  ;;  %v7138_v12 = vshll.u32 %v7137_v36, 30  ;;  %v16486_v11 = vand.u32 3, %v6856_v30 }
 0x54d   :  { %v6996_v62 = vor.u32 %v6995_v41, %v6994_v2  ;;  %v6999_v21 = vor.u32 %v6998_v28, %v6997_v14  ;;  %v6990_v20 = vor.u32 %v6989_v23, %v6988_v59  ;;  %v6993_v13 = vor.u32 %v6992_v42, %v6991_v57 }
 0x54e   :  { %v6847_v35 = vxor.u32 2147483648, %v6846_v15  ;;  %v16488_v56 = vsub.s32 %v7135_v44, %v7138_v12  ;;  %v6987_v27 = vshrl.u32 %v12345_v7, %v6986_v16  ;;  %v7002_v51 = vor.u32 %v7001_v52, %v7000_v50 }
 0x54f   :  { %v7286_v53 = vand.u32 2139095040, %v16370_v9  ;;  %vm16499_vm15 = vcmp.le.f32.partialorder %v7075_v6, 0.7853982  ;;  %v7161_v44 = vsub.s32 4, %v7137_v36  ;;  %vm7006_vm0 = vcmp.lt.s32.totalorder %v6984_v31, 4 }
 0x550   :  { %v6848_v22 = vsel %vm6765_vm2, %v6847_v35, %v6846_v15  ;;  %v7141_v17 = vsub.s32 0, %v16488_v56  ;;  %vm7003_vm1 = vcmp.lt.s32.totalorder %v6984_v31, 1  ;;  %v7008_v38 = vsel %vm7006_vm0, %v6996_v62, 2102212464 }
 0x551   :  { %v6851_v3 = vsel %vm16428_vm9, %v16166_v33, %v6848_v22  ;;  %v7012_v63 = vsel %vm7006_vm0, %v6999_v21, 920167782  ;;  %vm7005_vm2 = vcmp.lt.s32.totalorder %v6984_v31, 3  ;;  %v7011_v55 = vsel %vm7003_vm1, %v6990_v20, %v6993_v13  ;;  %v16523_v22 = vpop.f32.mrb[43].mxu0 }
 0x552   :  { %12187 = vcosq.f32 %v6851_v3  ;;  %v10313_v45 = vmin.u32 %v7141_v17, %v16488_v56  ;;  %v7013_v16 = vsel %vm7005_vm2, %v6996_v62, %v7012_v63  ;;  %v7015_v40 = vsel %vm7003_vm1, %v6993_v13, %v6996_v62 }
 0x553   :  { %12189 = vsinq.f32 %v6851_v3  ;;  %v7016_v0 = vsel %vm7006_vm0, %v7002_v51, 1326507024  ;;  %v7019_v6 = vshll.u32 %v6979_v8, 8  ;;  %vm7004_vm3 = vcmp.lt.s32.totalorder %v6984_v31, 2 }
 0x554   :  { %v7143_v30 = vclz %v10313_v45  ;;  %v7007_v2 = vsel %vm7003_vm1, %v6987_v27, %v6990_v20  ;;  %v7009_v23 = vsel %vm7005_vm2, %v6993_v13, %v7008_v38  ;;  %v7162_v42 = vsel %vm7077_vm14, %v7161_v44, %v7137_v36 }
 0x555   :  { %v7014_v14 = vsel %vm7004_vm3, %v7011_v55, %v7013_v16  ;;  %v7017_v15 = vsel %vm7005_vm2, %v6999_v21, %v7016_v0  ;;  %v7287_v41 = vshrl.u32 %v7286_v53, 23  ;;  %vm6859_vm4 = vcmp.eq.s32.totalorder %v16486_v11, 0  ;;  %v16533_v55 = vpop.f32.mrb[42].mxu1 }
 0x556   :  { %v10314_v28 = vadd.s32 4294967294, %v7143_v30  ;;  %v7018_v52 = vsel %vm7004_vm3, %v7015_v40, %v7017_v15  ;;  %v16508_v12 = vmul.u32.u64.low %v7019_v6, %v7014_v14  ;;  %v16509_v59 = vmul.u32.u64.high %v7019_v6, %v7014_v14, %v16508_v12 }
 0x557   :  { %v7010_v57 = vsel %vm7004_vm3, %v7007_v2, %v7009_v23  ;;  %v16512_v8 = vmul.u32.u64.low %v7019_v6, %v7018_v52  ;;  %v16513_v35 = vmul.u32.u64.high %v7019_v6, %v7018_v52, %v16512_v8  ;;  %v10320_v31 = vadd.s32 4294967169, %v7287_v41 }
 0x558   :  { %vm6862_vm5 = vcmp.eq.s32.totalorder %v16486_v11, 2  ;;  %vm10315_vm6 = vcmp.lt.s32.totalorder %v10314_v28, 0  ;;  %v7283_v36 = vand.u32 2147483647, %v16370_v9  ;;  %v11480_v62 = vadd.f32 %v16344_v24, %v16049_v29 }
 0x559   :  { %v7131_v21 = vadd.s32 %v16439_v37, %v16445_v60  ;;  %v7146_v50 = vsel %vm10315_vm6, 0, %v10314_v28  ;;  %v7164_v20 = vsel %vm16499_vm15, 0, %v7162_v42  ;;  %v7293_v13 = vadd.s32 1, %v10320_v31 }
 0x55a   :  { %v7147_v27 = vsub.s32 32, %v7146_v50  ;;  %v7151_v51 = vsub.s32 4294967266, %v7146_v50  ;;  %v7026_v53 = vmul.u32 %v7019_v6, %v7010_v57  ;;  %v7029_v3 = vadd.s32 1, %v16509_v59 }
 0x55b   :  { %v7148_v44 = vshll.u32 %v16488_v56, %v7146_v50  ;;  %vm7028_vm7 = vc.u32 %v16513_v35, %v16508_v12  ;;  %vm7294_vm8 = vcmp.gt.s32.totalorder %v7293_v13, 0  ;;  %v16530_v29 = vadd.f32 %v11480_v62, %v15978_v32 }
 0x55c   :  { %v12188_v17 = vpop.eup %12187  ;;  %v7149_v38 = vshrl.u32 %v7131_v21, %v7147_v27  ;;  %v7152_v63 = vadd.s32 127, %v7151_v51  ;;  %v7030_v45 = vsel %vm7028_vm7, %v7029_v3, %v16509_v59  ;;  %v7290_v56 = vand.u32 8388607, %v7283_v36 }
 0x55d   :  { %v12190_v37 = vpop.eup %12189  ;;  %v6863_v60 = vxor.u32 2147483648, %v12188_v17  ;;  %v7031_v40 = vadd.s32 %v7030_v45, %v7026_v53  ;;  %v7295_v0 = vsel %vm7294_vm8, %v7293_v13, 0  ;;  %v7168_v2 = vadd.s32 3, %v7164_v20 }
 0x55e   :  { %v6860_v16 = vxor.u32 2147483648, %v12190_v37  ;;  %v7150_v30 = vor.u32 %v7149_v38, %v7148_v44  ;;  %v7153_v32 = vshll.u32 %v7152_v63, 23  ;;  %vm6858_vm11 = vcmp.lt.s32.totalorder %v16486_v11, 2 }
 0x55f   :  { %v6864_v6 = vsel %vm6862_vm5, %v6863_v60, %v12190_v37  ;;  %v7032_v42 = vadd.s32 536870912, %v7031_v40  ;;  %v7297_v14 = vand.u32 31, %v7295_v0  ;;  %vm6855_vm9 = vweird.f32 %v16166_v33 }
 0x560   :  { %v6861_v23 = vsel %vm6859_vm4, %v12188_v17, %v6860_v16  ;;  %v7154_v41 = vor.u32 4788187, %v7153_v32  ;;  %v7157_v8 = vcvt.s32.f32 %v7150_v30  ;;  %v16545_v31 = vand.u32 3, %v7168_v2 }
 0x561   :  { %v6865_v15 = vsel %vm6858_vm11, %v6861_v23, %v6864_v6  ;;  %v16543_v52 = vshrl.u32 %v7032_v42, 30  ;;  %v7298_v59 = vsub.s32 32, %v7297_v14  ;;  %v7291_v62 = vor.u32 8388608, %v7290_v56 }
 0x562   :  { %v6866_v28 = vsel %vm6855_vm9, nan, %v6865_v15  ;;  %v7155_v57 = vand.u32 2147483647, %v7154_v41  ;;  %v7300_v11 = vshll.u32 %v12345_v7, %v7297_v14  ;;  %v16552_v33 = vadd.f32 %v16344_v24, %v16179_v4 }
 0x563   :  { %10123 = vst [vmem:[#allocation2 + $0x100] sm:$0xff] %v6866_v28  ;;  %v7034_v21 = vshll.u32 %v16543_v52, 30  ;;  %v7301_v50 = vshrl.u32 %v12346_v39, %v7298_v59  ;;  %v7304_v13 = vshrl.u32 %v12347_v43, %v7298_v59  ;;  %v7307_v27 = vshrl.u32 %v12348_v48, %v7298_v59 }
 0x564   :  { %v7158_v20 = vmul.f32 %v7157_v8, %v7155_v57  ;;  %v7310_v51 = vshrl.u32 %v12349_v49, %v7298_v59  ;;  %v7296_v3 = vshrl.u32 %v7295_v0, 5  ;;  %v7303_v17 = vshll.u32 %v12346_v39, %v7297_v14  ;;  %v16588_v57 = vpop.f32.mrb[44].mxu0 }
 0x565   :  { %v16557_v53 = vsub.s32 %v7031_v40, %v7034_v21  ;;  %v7306_v44 = vshll.u32 %v12347_v43, %v7297_v14  ;;  %v7302_v60 = vor.u32 %v7301_v50, %v7300_v11  ;;  %v7309_v38 = vshll.u32 %v12348_v48, %v7297_v14 }
 0x566   :  { %v7159_v37 = vxor.u32 2147483648, %v7158_v20  ;;  %v7312_v4 = vshll.u32 %v12349_v49, %v7297_v14  ;;  %v7305_v45 = vor.u32 %v7304_v13, %v7303_v17  ;;  %v7313_v56 = vshrl.u32 %v12350_v58, %v7298_v59 }
 0x567   :  { %v7037_v63 = vsub.s32 0, %v16557_v53  ;;  %v7308_v16 = vor.u32 %v7307_v27, %v7306_v44  ;;  %vm6973_vm12 = vcmp.lt.s32.totalorder %v16262_v47, 0  ;;  %v7311_v0 = vor.u32 %v7310_v51, %v7309_v38 }
 0x568   :  { %v7160_v40 = vsel %vm7077_vm14, %v7159_v37, %v7158_v20  ;;  %v16568_v6 = vshll.u32 %v7291_v62, 8  ;;  %v11484_v30 = vadd.f32 %v16344_v24, %v16244_v61  ;;  %v7027_v2 = vadd.s32 %v16508_v12, %v16513_v35 }
 0x569   :  { %v7163_v32 = vsel %vm16499_vm15, %v16257_v25, %v7160_v40  ;;  %v10309_v23 = vmin.u32 %v7037_v63, %v16557_v53  ;;  %v7314_v42 = vor.u32 %v7313_v56, %v7312_v4  ;;  %v7057_v14 = vsub.s32 4, %v16543_v52 }
 0x56a   :  { %12191 = vcosq.f32 %v7163_v32  ;;  %vm7315_vm13 = vcmp.lt.s32.totalorder %v7296_v3, 1  ;;  %vm7318_vm10 = vcmp.lt.s32.totalorder %v7296_v3, 4  ;;  %vm16581_vm14 = vcmp.le.f32.partialorder %v6971_v26, 0.7853982  ;;  %v16590_v26 = vpop.f32.mrb[43].mxu1 }
 0x56b   :  { %12193 = vsinq.f32 %v7163_v32  ;;  %v7039_v19 = vclz %v10309_v23  ;;  %v7320_v15 = vsel %vm7318_vm10, %v7308_v16, 2102212464  ;;  %v7323_v41 = vsel %vm7315_vm13, %v7302_v60, %v7305_v45 }
 0x56c   :  { %v7299_v12 = vshrl.u32 %v12345_v7, %v7298_v59  ;;  %vm7317_vm15 = vcmp.lt.s32.totalorder %v7296_v3, 3  ;;  %v7324_v35 = vsel %vm7318_vm10, %v7311_v0, 920167782  ;;  %v7327_v28 = vsel %vm7315_vm13, %v7305_v45, %v7308_v16 }
 0x56d   :  { %v10310_v8 = vadd.s32 4294967294, %v7039_v19  ;;  %vm7316_vm0 = vcmp.lt.s32.totalorder %v7296_v3, 2  ;;  %v7325_v62 = vsel %vm7317_vm15, %v7308_v16, %v7324_v35  ;;  %v7328_v21 = vsel %vm7318_vm10, %v7314_v42, 1326507024 }
 0x56e   :  { %v7319_v11 = vsel %vm7315_vm13, %v7299_v12, %v7302_v60  ;;  %v7321_v50 = vsel %vm7317_vm15, %v7305_v45, %v7320_v15  ;;  %v7326_v20 = vsel %vm7316_vm0, %v7323_v41, %v7325_v62  ;;  %v7329_v13 = vsel %vm7317_vm15, %v7311_v0, %v7328_v21 }
 0x56f   :  { %vm10311_vm1 = vcmp.lt.s32.totalorder %v10310_v8, 0  ;;  %v7330_v59 = vsel %vm7316_vm0, %v7327_v28, %v7329_v13  ;;  %v16596_v27 = vmul.u32.u64.low %v16568_v6, %v7326_v20  ;;  %v16597_v51 = vmul.u32.u64.high %v16568_v6, %v7326_v20, %v16596_v27 }
 0x570   :  { %vm7170_vm2 = vcmp.lt.s32.totalorder %v16545_v31, 2  ;;  %v7042_v17 = vsel %vm10311_vm1, 0, %v10310_v8  ;;  %v16602_v44 = vmul.u32.u64.low %v16568_v6, %v7330_v59  ;;  %v16603_v37 = vmul.u32.u64.high %v16568_v6, %v7330_v59, %v16602_v44 }
 0x571   :  { %v7182_v60 = vand.u32 2139095040, %v16530_v29  ;;  %vm7167_vm3 = vweird.f32 %v16257_v25  ;;  %v7043_v38 = vsub.s32 32, %v7042_v17  ;;  %v7047_v4 = vsub.s32 4294967266, %v7042_v17 }
 0x572   :  { %v7058_v63 = vsel %vm6973_vm12, %v7057_v14, %v16543_v52  ;;  %v7322_v45 = vsel %vm7316_vm0, %v7319_v11, %v7321_v50  ;;  %v7179_v16 = vand.u32 2147483647, %v16530_v29  ;;  %v16614_v40 = vadd.f32 %v16552_v33, %v16046_v1 }
 0x573   :  { %v7183_v56 = vshrl.u32 %v7182_v60, 23  ;;  %v16617_v0 = vadd.f32 %v11484_v30, %v16168_v10  ;;  %v7044_v32 = vshll.u32 %v16557_v53, %v7042_v17  ;;  %v7045_v23 = vshrl.u32 %v7027_v2, %v7043_v38 }
 0x574   :  { %v7048_v42 = vadd.s32 127, %v7047_v4  ;;  %v7341_v19 = vadd.s32 1, %v16597_v51  ;;  %v12192_v15 = vpop.eup %12191  ;;  %v7060_v52 = vsel %vm16581_vm14, 0, %v7058_v63  ;;  %v7338_v3 = vmul.u32 %v16568_v6, %v7322_v45 }
 0x575   :  { %vm7340_vm4 = vc.u32 %v16603_v37, %v16596_v27  ;;  %v10316_v1 = vadd.s32 4294967169, %v7183_v56  ;;  %v12194_v33 = vpop.eup %12193  ;;  %v7175_v14 = vxor.u32 2147483648, %v12192_v15  ;;  %v7046_v10 = vor.u32 %v7045_v23, %v7044_v32 }
 0x576   :  { %v7049_v30 = vshll.u32 %v7048_v42, 23  ;;  %v7342_v53 = vsel %vm7340_vm4, %v7341_v19, %v16597_v51  ;;  %v7172_v2 = vxor.u32 2147483648, %v12194_v33  ;;  %vm7174_vm5 = vcmp.eq.s32.totalorder %v16545_v31, 2 }
 0x577   :  { %v7343_v41 = vadd.s32 %v7342_v53, %v7338_v3  ;;  %v7189_v12 = vadd.s32 1, %v10316_v1  ;;  %vm7171_vm6 = vcmp.eq.s32.totalorder %v16545_v31, 0  ;;  %v7176_v35 = vsel %vm7174_vm5, %v7175_v14, %v12194_v33 }
 0x578   :  { %v7050_v28 = vor.u32 4788187, %v7049_v30  ;;  %v7064_v6 = vadd.s32 3, %v7060_v52  ;;  %v7173_v8 = vsel %vm7171_vm6, %v12192_v15, %v7172_v2  ;;  %v7186_v21 = vand.u32 8388607, %v7179_v16 }
 0x579   :  { %v7344_v62 = vadd.s32 536870912, %v7343_v41  ;;  %vm7190_vm7 = vcmp.gt.s32.totalorder %v7189_v12, 0  ;;  %v7177_v11 = vsel %vm7170_vm2, %v7173_v8, %v7176_v35  ;;  %v7053_v20 = vcvt.s32.f32 %v7046_v10 }
 0x57a   :  { %v7051_v50 = vand.u32 2147483647, %v7050_v28  ;;  %v7191_v13 = vsel %vm7190_vm7, %v7189_v12, 0  ;;  %v7178_v59 = vsel %vm7167_vm3, nan, %v7177_v11  ;;  %v16638_v63 = vand.u32 3, %v7064_v6 }
 0x57b   :  { %v16635_v51 = vshrl.u32 %v7344_v62, 30  ;;  %v7193_v17 = vand.u32 31, %v7191_v13  ;;  %10126 = vst [vmem:[#allocation2 + $0x118] sm:$0xff] %v7178_v59  ;;  %v7187_v45 = vor.u32 8388608, %v7186_v21  ;;  %v16642_v31 = vadd.f32 %v16344_v24, %v16348_v34 }
 0x57c   :  { %v7054_v44 = vmul.f32 %v7053_v20, %v7051_v50  ;;  %v7192_v25 = vshrl.u32 %v7191_v13, 5  ;;  %v7494_v23 = vand.u32 2139095040, %v16614_v40  ;;  %vm7285_vm11 = vcmp.lt.s32.totalorder %v16370_v9, 0 }
 0x57d   :  { %v7346_v60 = vshll.u32 %v16635_v51, 30  ;;  %v7194_v38 = vsub.s32 32, %v7193_v17  ;;  %v7196_v19 = vshll.u32 %v12345_v7, %v7193_v17  ;;  %v7199_v3 = vshll.u32 %v12346_v39, %v7193_v17 }
 0x57e   :  { %v7055_v4 = vxor.u32 2147483648, %v7054_v44  ;;  %v7202_v1 = vshll.u32 %v12347_v43, %v7193_v17  ;;  %v7205_v14 = vshll.u32 %v12348_v48, %v7193_v17  ;;  %v7208_v61 = vshll.u32 %v12349_v49, %v7193_v17 }
 0x57f   :  { %v16644_v56 = vsub.s32 %v7343_v41, %v7346_v60  ;;  %v7197_v32 = vshrl.u32 %v12346_v39, %v7194_v38  ;;  %v7200_v15 = vshrl.u32 %v12347_v43, %v7194_v38  ;;  %v7203_v52 = vshrl.u32 %v12348_v48, %v7194_v38 }
 0x580   :  { %v7056_v42 = vsel %vm6973_vm12, %v7055_v4, %v7054_v44  ;;  %v7206_v10 = vshrl.u32 %v12349_v49, %v7194_v38  ;;  %v7209_v12 = vshrl.u32 %v12350_v58, %v7194_v38  ;;  %v16664_v35 = vshll.u32 %v7187_v45, 8 }
 0x581   :  { %v7059_v24 = vsel %vm16581_vm14, %v16262_v47, %v7056_v42  ;;  %v7349_v34 = vsub.s32 0, %v16644_v56  ;;  %v7198_v33 = vor.u32 %v7197_v32, %v7196_v19  ;;  %v7201_v53 = vor.u32 %v7200_v15, %v7199_v3 }
 0x582   :  { %12195 = vcosq.f32 %v7059_v24  ;;  %v7204_v2 = vor.u32 %v7203_v52, %v7202_v1  ;;  %v7207_v41 = vor.u32 %v7206_v10, %v7205_v14  ;;  %v7195_v6 = vshrl.u32 %v12345_v7, %v7194_v38  ;;  %v16695_v10 = vpop.f32.mrb[45].mxu0 }
 0x583   :  { %12197 = vsinq.f32 %v7059_v24  ;;  %v10321_v30 = vmin.u32 %v7349_v34, %v16644_v56  ;;  %vm7211_vm8 = vcmp.lt.s32.totalorder %v7192_v25, 1  ;;  %v7495_v8 = vshrl.u32 %v7494_v23, 23 }
 0x584   :  { %v7210_v62 = vor.u32 %v7209_v12, %v7208_v61  ;;  %vm7212_vm9 = vcmp.lt.s32.totalorder %v7192_v25, 2  ;;  %vm7213_vm12 = vcmp.lt.s32.totalorder %v7192_v25, 3  ;;  %vm7214_vm13 = vcmp.lt.s32.totalorder %v7192_v25, 4 }
 0x585   :  { %v7351_v28 = vclz %v10321_v30  ;;  %vm7067_vm10 = vcmp.eq.s32.totalorder %v16638_v63, 0  ;;  %v7216_v11 = vsel %vm7214_vm13, %v7204_v2, 2102212464  ;;  %v7219_v50 = vsel %vm7211_vm8, %v7198_v33, %v7201_v53 }
 0x586   :  { %v7220_v20 = vsel %vm7214_vm13, %v7207_v41, 920167782  ;;  %vm7066_vm14 = vcmp.lt.s32.totalorder %v16638_v63, 2  ;;  %v7215_v13 = vsel %vm7211_vm8, %v7195_v6, %v7198_v33  ;;  %v7223_v17 = vsel %vm7211_vm8, %v7201_v53, %v7204_v2 }
 0x587   :  { %v10322_v21 = vadd.s32 4294967294, %v7351_v28  ;;  %v7221_v59 = vsel %vm7213_vm12, %v7204_v2, %v7220_v20  ;;  %v7224_v44 = vsel %vm7214_vm13, %v7210_v62, 1326507024  ;;  %vm7063_vm15 = vweird.f32 %v16262_v47  ;;  %v16703_v62 = vpop.f32.mrb[44].mxu1 }
 0x588   :  { %vm16674_vm0 = vcmp.le.f32.partialorder %v7283_v36, 0.7853982  ;;  %v7217_v38 = vsel %vm7213_vm12, %v7201_v53, %v7216_v11  ;;  %v7222_v4 = vsel %vm7212_vm9, %v7219_v50, %v7221_v59  ;;  %v7225_v45 = vsel %vm7213_vm12, %v7207_v41, %v7224_v44 }
 0x589   :  { %vm10323_vm1 = vcmp.lt.s32.totalorder %v10322_v21, 0  ;;  %v7226_v23 = vsel %vm7212_vm9, %v7223_v17, %v7225_v45  ;;  %v16683_v42 = vmul.u32.u64.low %v16664_v35, %v7222_v4  ;;  %v16684_v19 = vmul.u32.u64.high %v16664_v35, %v7222_v4, %v16683_v42 }
 0x58a   :  { %v7354_v32 = vsel %vm10323_vm1, 0, %v10322_v21  ;;  %v7339_v36 = vadd.s32 %v16596_v27, %v16603_v37  ;;  %v7369_v24 = vsub.s32 4, %v16635_v51  ;;  %v7218_v3 = vsel %vm7212_vm9, %v7215_v13, %v7217_v38 }
 0x58b   :  { %v7355_v15 = vsub.s32 32, %v7354_v32  ;;  %v7359_v52 = vsub.s32 4294967266, %v7354_v32  ;;  %v16692_v1 = vmul.u32.u64.low %v16664_v35, %v7226_v23  ;;  %v16693_v33 = vmul.u32.u64.high %v16664_v35, %v7226_v23, %v16692_v1 }
 0x58c   :  { %v12196_v34 = vpop.eup %12195  ;;  %v10328_v14 = vadd.s32 4294967169, %v7495_v8  ;;  %v7356_v2 = vshll.u32 %v16644_v56, %v7354_v32  ;;  %vm7070_vm2 = vcmp.eq.s32.totalorder %v16638_v63, 2  ;;  %v7237_v61 = vadd.s32 1, %v16684_v19 }
 0x58d   :  { %v12198_v30 = vpop.eup %12197  ;;  %v7071_v53 = vxor.u32 2147483648, %v12196_v34  ;;  %v7357_v41 = vshrl.u32 %v7339_v36, %v7355_v15  ;;  %v7360_v27 = vadd.s32 127, %v7359_v52  ;;  %v7370_v8 = vsel %vm7285_vm11, %v7369_v24, %v16635_v51 }
 0x58e   :  { %v7068_v37 = vxor.u32 2147483648, %v12198_v30  ;;  %v7501_v25 = vadd.s32 1, %v10328_v14  ;;  %v7234_v21 = vmul.u32 %v16664_v35, %v7218_v3  ;;  %vm7236_vm3 = vc.u32 %v16693_v33, %v16683_v42 }
 0x58f   :  { %v7072_v12 = vsel %vm7070_vm2, %v7071_v53, %v12198_v30  ;;  %v7358_v28 = vor.u32 %v7357_v41, %v7356_v2  ;;  %v7361_v6 = vshll.u32 %v7360_v27, 23  ;;  %v7238_v20 = vsel %vm7236_vm3, %v7237_v61, %v16684_v19 }
 0x590   :  { %v7069_v56 = vsel %vm7067_vm10, %v12196_v34, %v7068_v37  ;;  %vm7502_vm4 = vcmp.gt.s32.totalorder %v7501_v25, 0  ;;  %v7491_v13 = vand.u32 2147483647, %v16614_v40  ;;  %v7372_v59 = vsel %vm16674_vm0, 0, %v7370_v8 }
 0x591   :  { %v7073_v11 = vsel %vm7066_vm14, %v7069_v56, %v7072_v12  ;;  %v7362_v50 = vor.u32 4788187, %v7361_v6  ;;  %v7239_v17 = vadd.s32 %v7238_v20, %v7234_v21  ;;  %v7503_v35 = vsel %vm7502_vm4, %v7501_v25, 0 }
 0x592   :  { %v7074_v51 = vsel %vm7063_vm15, nan, %v7073_v11  ;;  %v7365_v38 = vcvt.s32.f32 %v7358_v28  ;;  %v7505_v4 = vand.u32 31, %v7503_v35  ;;  %v16720_v63 = vadd.f32 %v16642_v31, %v16237_v18 }
 0x593   :  { %10125 = vst [vmem:[#allocation2 + $0x110] sm:$0xff] %v7074_v51  ;;  %v7363_v44 = vand.u32 2147483647, %v7362_v50  ;;  %v7240_v45 = vadd.s32 536870912, %v7239_v17  ;;  %v7376_v23 = vadd.s32 3, %v7372_v59  ;;  %v7504_v15 = vshrl.u32 %v7503_v35, 5 }
 0x594   :  { %v7498_v47 = vand.u32 8388607, %v7491_v13  ;;  %v7506_v19 = vsub.s32 32, %v7505_v4  ;;  %v7508_v52 = vshll.u32 %v12345_v7, %v7505_v4  ;;  %v7511_v24 = vshll.u32 %v12346_v39, %v7505_v4 }
 0x595   :  { %v7366_v32 = vmul.f32 %v7365_v38, %v7363_v44  ;;  %v7241_v36 = vshrl.u32 %v7240_v45, 30  ;;  %vm7181_vm5 = vcmp.lt.s32.totalorder %v16530_v29, 0  ;;  %v7514_v31 = vshll.u32 %v12347_v43, %v7505_v4  ;;  %v16753_v45 = vpop.f32.mrb[46].mxu0 }
 0x596   :  { %v7509_v3 = vshrl.u32 %v12346_v39, %v7506_v19  ;;  %v7512_v18 = vshrl.u32 %v12347_v43, %v7506_v19  ;;  %v7515_v14 = vshrl.u32 %v12348_v48, %v7506_v19  ;;  %v7517_v30 = vshll.u32 %v12348_v48, %v7505_v4 }
 0x597   :  { %v7367_v34 = vxor.u32 2147483648, %v7366_v32  ;;  %v7242_v1 = vshll.u32 %v7241_v36, 30  ;;  %v7518_v53 = vshrl.u32 %v12349_v49, %v7506_v19  ;;  %v7520_v27 = vshll.u32 %v12349_v49, %v7505_v4 }
 0x598   :  { %v7510_v41 = vor.u32 %v7509_v3, %v7508_v52  ;;  %v7521_v37 = vshrl.u32 %v12350_v58, %v7506_v19  ;;  %v7513_v12 = vor.u32 %v7512_v18, %v7511_v24  ;;  %v7516_v28 = vor.u32 %v7515_v14, %v7514_v31  ;;  %v16757_v24 = vpop.f32.mrb[45].mxu1 }
 0x599   :  { %v7368_v2 = vsel %vm7285_vm11, %v7367_v34, %v7366_v32  ;;  %v16740_v25 = vsub.s32 %v7239_v17, %v7242_v1  ;;  %v7499_v6 = vor.u32 8388608, %v7498_v47  ;;  %v7519_v8 = vor.u32 %v7518_v53, %v7517_v30 }
 0x59a   :  { %v7371_v61 = vsel %vm16674_vm0, %v16370_v9, %v7368_v2  ;;  %v7522_v56 = vor.u32 %v7521_v37, %v7520_v27  ;;  %vm16744_vm6 = vcmp.le.f32.partialorder %v7179_v16, 0.7853982  ;;  %v7265_v50 = vsub.s32 4, %v7241_v36 }
 0x59b   :  { %12199 = vcosq.f32 %v7371_v61  ;;  %v7245_v11 = vsub.s32 0, %v16740_v25  ;;  %v7507_v60 = vshrl.u32 %v12345_v7, %v7506_v19  ;;  %vm7523_vm7 = vcmp.lt.s32.totalorder %v7504_v15, 1 }
 0x59c   :  { %12201 = vsinq.f32 %v7371_v61  ;;  %vm7525_vm8 = vcmp.lt.s32.totalorder %v7504_v15, 3  ;;  %vm7526_vm11 = vcmp.lt.s32.totalorder %v7504_v15, 4  ;;  %v7390_v20 = vand.u32 2139095040, %v16617_v0 }
 0x59d   :  { %v10317_v51 = vmin.u32 %v7245_v11, %v16740_v25  ;;  %v7527_v59 = vsel %vm7523_vm7, %v7507_v60, %v7510_v41  ;;  %v7528_v17 = vsel %vm7526_vm11, %v7516_v28, 2102212464  ;;  %v7531_v35 = vsel %vm7523_vm7, %v7510_v41, %v7513_v12 }
 0x59e   :  { %v7529_v16 = vsel %vm7525_vm8, %v7513_v12, %v7528_v17  ;;  %v7532_v44 = vsel %vm7526_vm11, %v7519_v8, 920167782  ;;  %v7535_v38 = vsel %vm7523_vm7, %v7513_v12, %v7516_v28  ;;  %v7536_v4 = vsel %vm7526_vm11, %v7522_v56, 1326507024 }
 0x59f   :  { %v7377_v32 = vand.u32 3, %v7376_v23  ;;  %v7247_v47 = vclz %v10317_v51  ;;  %v7266_v19 = vsel %vm7181_vm5, %v7265_v50, %v7241_v36  ;;  %v7539_v52 = vshll.u32 %v7499_v6, 8 }
 0x5a0   :  { %vm7524_vm9 = vcmp.lt.s32.totalorder %v7504_v15, 2  ;;  %v7533_v34 = vsel %vm7525_vm8, %v7516_v28, %v7532_v44  ;;  %v7537_v3 = vsel %vm7525_vm8, %v7519_v8, %v7536_v4  ;;  %v7391_v18 = vshrl.u32 %v7390_v20, 23 }
 0x5a1   :  { %v10318_v31 = vadd.s32 4294967294, %v7247_v47  ;;  %v7530_v1 = vsel %vm7524_vm9, %v7527_v59, %v7529_v16  ;;  %v7534_v14 = vsel %vm7524_vm9, %v7531_v35, %v7533_v34  ;;  %v7538_v30 = vsel %vm7524_vm9, %v7535_v38, %v7537_v3 }
 0x5a2   :  { %v16761_v53 = vmul.u32.u64.low %v7539_v52, %v7538_v30  ;;  %v16762_v2 = vmul.u32.u64.high %v7539_v52, %v7538_v30, %v16761_v53  ;;  %v16764_v23 = vmul.u32.u64.low %v7539_v52, %v7534_v14  ;;  %v16765_v41 = vmul.u32.u64.high %v7539_v52, %v7534_v14, %v16764_v23 }
 0x5a3   :  { %vm7379_vm12 = vcmp.eq.s32.totalorder %v7377_v32, 0  ;;  %vm7382_vm13 = vcmp.eq.s32.totalorder %v7377_v32, 2  ;;  %vm10319_vm10 = vcmp.lt.s32.totalorder %v10318_v31, 0  ;;  %v10324_v36 = vadd.s32 4294967169, %v7391_v18 }
 0x5a4   :  { %v7235_v15 = vadd.s32 %v16683_v42, %v16693_v33  ;;  %v7250_v37 = vsel %vm10319_vm10, 0, %v10318_v31  ;;  %v7268_v61 = vsel %vm16744_vm6, 0, %v7266_v19  ;;  %v7387_v12 = vand.u32 2147483647, %v16617_v0 }
 0x5a5   :  { %v12200_v27 = vpop.eup %12199  ;;  %v7251_v8 = vsub.s32 32, %v7250_v37  ;;  %v7255_v56 = vsub.s32 4294967266, %v7250_v37  ;;  %v7546_v11 = vmul.u32 %v7539_v52, %v7530_v1  ;;  %v7252_v60 = vshll.u32 %v16740_v25, %v7250_v37 }
 0x5a6   :  { %v12202_v28 = vpop.eup %12201  ;;  %v7383_v6 = vxor.u32 2147483648, %v12200_v27  ;;  %vm7548_vm14 = vc.u32 %v16762_v2, %v16764_v23  ;;  %v7549_v20 = vadd.s32 1, %v16765_v41  ;;  %v7397_v59 = vadd.s32 1, %v10324_v36 }
 0x5a7   :  { %v7380_v50 = vxor.u32 2147483648, %v12202_v28  ;;  %v7253_v33 = vshrl.u32 %v7235_v15, %v7251_v8  ;;  %v7256_v51 = vadd.s32 127, %v7255_v56  ;;  %vm7375_vm15 = vweird.f32 %v16370_v9 }
 0x5a8   :  { %v7384_v42 = vsel %vm7382_vm13, %v7383_v6, %v12202_v28  ;;  %vm7378_vm0 = vcmp.lt.s32.totalorder %v7377_v32, 2  ;;  %v7550_v35 = vsel %vm7548_vm14, %v7549_v20, %v16765_v41  ;;  %v7272_v47 = vadd.s32 3, %v7268_v61 }
 0x5a9   :  { %v7381_v17 = vsel %vm7379_vm12, %v12200_v27, %v7380_v50  ;;  %v7254_v44 = vor.u32 %v7253_v33, %v7252_v60  ;;  %v7257_v38 = vshll.u32 %v7256_v51, 23  ;;  %v7551_v25 = vadd.s32 %v7550_v35, %v7546_v11 }
 0x5aa   :  { %v7385_v16 = vsel %vm7378_vm0, %v7381_v17, %v7384_v42  ;;  %v7394_v19 = vand.u32 8388607, %v7387_v12  ;;  %vm7398_vm1 = vcmp.gt.s32.totalorder %v7397_v59, 0  ;;  %v7702_v9 = vand.u32 2139095040, %v16720_v63 }
 0x5ab   :  { %v7386_v4 = vsel %vm7375_vm15, nan, %v7385_v16  ;;  %v7258_v52 = vor.u32 4788187, %v7257_v38  ;;  %v7552_v34 = vadd.s32 536870912, %v7551_v25  ;;  %v7399_v3 = vsel %vm7398_vm1, %v7397_v59, 0 }
 0x5ac   :  { %10128 = vst [vmem:[#allocation2 + $0x128] sm:$0xff] %v7386_v4  ;;  %v7401_v32 = vand.u32 31, %v7399_v3  ;;  %v7261_v31 = vcvt.s32.f32 %v7254_v44  ;;  %v16784_v14 = vand.u32 3, %v7272_v47  ;;  %v7395_v30 = vor.u32 8388608, %v7394_v19 }
 0x5ad   :  { %v7259_v18 = vand.u32 2147483647, %v7258_v52  ;;  %v16782_v1 = vshrl.u32 %v7552_v34, 30  ;;  %v7699_v41 = vand.u32 2147483647, %v16720_v63  ;;  %v7703_v37 = vshrl.u32 %v7702_v9, 23 }
 0x5ae   :  { %v7402_v53 = vsub.s32 32, %v7401_v32  ;;  %v7404_v15 = vshll.u32 %v12345_v7, %v7401_v32  ;;  %v7407_v28 = vshll.u32 %v12346_v39, %v7401_v32  ;;  %v7410_v50 = vshll.u32 %v12347_v43, %v7401_v32 }
 0x5af   :  { %v7262_v36 = vmul.f32 %v7261_v31, %v7259_v18  ;;  %v7554_v27 = vshll.u32 %v16782_v1, 30  ;;  %v7547_v20 = vadd.s32 %v16764_v23, %v16762_v2  ;;  %v7400_v42 = vshrl.u32 %v7399_v3, 5 }
 0x5b0   :  { %v7405_v61 = vshrl.u32 %v12346_v39, %v7402_v53  ;;  %v7408_v6 = vshrl.u32 %v12347_v43, %v7402_v53  ;;  %v7411_v8 = vshrl.u32 %v12348_v48, %v7402_v53  ;;  %v7414_v60 = vshrl.u32 %v12349_v49, %v7402_v53 }
 0x5b1   :  { %v7263_v56 = vxor.u32 2147483648, %v7262_v36  ;;  %v16793_v11 = vsub.s32 %v7551_v25, %v7554_v27  ;;  %v7413_v51 = vshll.u32 %v12348_v48, %v7401_v32  ;;  %vm7493_vm2 = vcmp.lt.s32.totalorder %v16614_v40, 0 }
 0x5b2   :  { %v7406_v33 = vor.u32 %v7405_v61, %v7404_v15  ;;  %v7409_v35 = vor.u32 %v7408_v6, %v7407_v28  ;;  %v7412_v16 = vor.u32 %v7411_v8, %v7410_v50  ;;  %v7416_v2 = vshll.u32 %v12349_v49, %v7401_v32 }
 0x5b3   :  { %v7264_v59 = vsel %vm7181_vm5, %v7263_v56, %v7262_v36  ;;  %v7557_v17 = vsub.s32 0, %v16793_v11  ;;  %v7415_v38 = vor.u32 %v7414_v60, %v7413_v51  ;;  %v7417_v23 = vshrl.u32 %v12350_v58, %v7402_v53 }
 0x5b4   :  { %v7267_v44 = vsel %vm16744_vm6, %v16530_v29, %v7264_v59  ;;  %v16809_v4 = vshll.u32 %v7395_v30, 8  ;;  %v10336_v47 = vadd.s32 4294967169, %v7703_v37  ;;  %v7577_v19 = vsub.s32 4, %v16782_v1 }
 0x5b5   :  { %12203 = vcosq.f32 %v7267_v44  ;;  %v10329_v25 = vmin.u32 %v7557_v17, %v16793_v11  ;;  %v7403_v52 = vshrl.u32 %v12345_v7, %v7402_v53  ;;  %v7418_v21 = vor.u32 %v7417_v23, %v7416_v2  ;;  %v16840_v17 = vpop.f32.mrb[47].mxu0 }
 0x5b6   :  { %12205 = vsinq.f32 %v7267_v44  ;;  %vm16815_vm3 = vcmp.le.f32.partialorder %v7491_v13, 0.7853982  ;;  %vm7419_vm4 = vcmp.lt.s32.totalorder %v7400_v42, 1  ;;  %vm7420_vm5 = vcmp.lt.s32.totalorder %v7400_v42, 2 }
 0x5b7   :  { %v7559_v3 = vclz %v10329_v25  ;;  %vm7422_vm6 = vcmp.lt.s32.totalorder %v7400_v42, 4  ;;  %vm7421_vm7 = vcmp.lt.s32.totalorder %v7400_v42, 3  ;;  %v7427_v32 = vsel %vm7419_vm4, %v7406_v33, %v7409_v35 }
 0x5b8   :  { %v7424_v9 = vsel %vm7422_vm6, %v7412_v16, 2102212464  ;;  %v7428_v18 = vsel %vm7422_vm6, %v7415_v38, 920167782  ;;  %vm7278_vm8 = vcmp.eq.s32.totalorder %v16784_v14, 2  ;;  %v7423_v30 = vsel %vm7419_vm4, %v7403_v52, %v7406_v33 }
 0x5b9   :  { %v10330_v31 = vadd.s32 4294967294, %v7559_v3  ;;  %v7429_v53 = vsel %vm7421_vm7, %v7412_v16, %v7428_v18  ;;  %v7431_v36 = vsel %vm7419_vm4, %v7409_v35, %v7412_v16  ;;  %vm7275_vm11 = vcmp.eq.s32.totalorder %v16784_v14, 0 }
 0x5ba   :  { %v7425_v13 = vsel %vm7421_vm7, %v7409_v35, %v7424_v9  ;;  %v7430_v27 = vsel %vm7420_vm5, %v7427_v32, %v7429_v53  ;;  %v7432_v15 = vsel %vm7422_vm6, %v7418_v21, 1326507024  ;;  %v7709_v37 = vadd.s32 1, %v10336_v47  ;;  %v16852_v9 = vpop.f32.mrb[46].mxu1 }
 0x5bb   :  { %vm7274_vm9 = vcmp.lt.s32.totalorder %v16784_v14, 2  ;;  %vm10331_vm12 = vcmp.lt.s32.totalorder %v10330_v31, 0  ;;  %v7433_v61 = vsel %vm7421_vm7, %v7415_v38, %v7432_v15  ;;  %vm7271_vm13 = vweird.f32 %v16530_v29 }
 0x5bc   :  { %v16827_v28 = vmul.u32.u64.low %v16809_v4, %v7430_v27  ;;  %v16828_v6 = vmul.u32.u64.high %v16809_v4, %v7430_v27, %v16827_v28  ;;  %v7562_v8 = vsel %vm10331_vm12, 0, %v10330_v31  ;;  %v7434_v56 = vsel %vm7420_vm5, %v7431_v36, %v7433_v61 }
 0x5bd   :  { %v16835_v50 = vand.u32 8388607, %v7699_v41  ;;  %vm7710_vm10 = vcmp.gt.s32.totalorder %v7709_v37, 0  ;;  %v7563_v60 = vsub.s32 32, %v7562_v8  ;;  %v7567_v33 = vsub.s32 4294967266, %v7562_v8 }
 0x5be   :  { %v7578_v51 = vsel %vm7493_vm2, %v7577_v19, %v16782_v1  ;;  %v7711_v59 = vsel %vm7710_vm10, %v7709_v37, 0  ;;  %v7426_v35 = vsel %vm7420_vm5, %v7423_v30, %v7425_v13  ;;  %v7564_v23 = vshll.u32 %v16793_v11, %v7562_v8 }
 0x5bf   :  { %v16844_v16 = vmul.u32.u64.low %v16809_v4, %v7434_v56  ;;  %v16845_v44 = vmul.u32.u64.high %v16809_v4, %v7434_v56, %v16844_v16  ;;  %v7713_v38 = vand.u32 31, %v7711_v59  ;;  %v12204_v2 = vpop.eup %12203  ;;  %v7565_v25 = vshrl.u32 %v7547_v20, %v7563_v60 }
 0x5c0   :  { %v7568_v47 = vadd.s32 127, %v7567_v33  ;;  %v7445_v52 = vadd.s32 1, %v16828_v6  ;;  %v12206_v21 = vpop.eup %12205  ;;  %v7279_v3 = vxor.u32 2147483648, %v12204_v2  ;;  %v7580_v1 = vsel %vm16815_vm3, 0, %v7578_v51 }
 0x5c1   :  { %v7707_v42 = vor.u32 8388608, %v16835_v50  ;;  %v7714_v19 = vsub.s32 32, %v7713_v38  ;;  %v7276_v32 = vxor.u32 2147483648, %v12206_v21  ;;  %v7566_v18 = vor.u32 %v7565_v25, %v7564_v23 }
 0x5c2   :  { %v7569_v31 = vshll.u32 %v7568_v47, 23  ;;  %v7442_v30 = vmul.u32 %v16809_v4, %v7426_v35  ;;  %v7280_v11 = vsel %vm7278_vm8, %v7279_v3, %v12206_v21  ;;  %vm7444_vm14 = vc.u32 %v16845_v44, %v16827_v28  ;;  %v16880_v47 = vld [vmem:[%s18931_s2] ss:$0 sm:$0xff] }
 0x5c3   :  { %v16859_v20 = vshrl.u32 %v7711_v59, 5  ;;  %v7716_v53 = vshll.u32 %v12345_v7, %v7713_v38  ;;  %v7277_v36 = vsel %vm7275_vm11, %v12204_v2, %v7276_v32  ;;  %v7446_v27 = vsel %vm7444_vm14, %v7445_v52, %v16828_v6 }
 0x5c4   :  { %v7570_v13 = vor.u32 4788187, %v7569_v31  ;;  %v7719_v15 = vshll.u32 %v12346_v39, %v7713_v38  ;;  %v7281_v4 = vsel %vm7274_vm9, %v7277_v36, %v7280_v11  ;;  %v7447_v37 = vadd.s32 %v7446_v27, %v7442_v30 }
 0x5c5   :  { %v7717_v61 = vshrl.u32 %v12346_v39, %v7714_v19  ;;  %v7720_v8 = vshrl.u32 %v12347_v43, %v7714_v19  ;;  %v7282_v56 = vsel %vm7271_vm13, nan, %v7281_v4  ;;  %v7573_v60 = vcvt.s32.f32 %v7566_v18 }
 0x5c6   :  { %v7571_v50 = vand.u32 2147483647, %v7570_v13  ;;  %v7723_v33 = vshrl.u32 %v12348_v48, %v7714_v19  ;;  %10127 = vst [vmem:[#allocation2 + $0x120] sm:$0xff] %v7282_v56  ;;  %v7448_v51 = vadd.s32 536870912, %v7447_v37  ;;  %v7722_v6 = vshll.u32 %v12347_v43, %v7713_v38 }
 0x5c7   :  { %v7725_v59 = vshll.u32 %v12348_v48, %v7713_v38  ;;  %v7726_v14 = vshrl.u32 %v12349_v49, %v7714_v19  ;;  %v7718_v16 = vor.u32 %v7717_v61, %v7716_v53  ;;  %v7721_v2 = vor.u32 %v7720_v8, %v7719_v15 }
 0x5c8   :  { %v7574_v35 = vmul.f32 %v7573_v60, %v7571_v50  ;;  %v7729_v23 = vshrl.u32 %v12350_v58, %v7714_v19  ;;  %v7449_v25 = vshrl.u32 %v7448_v51, 30  ;;  %v11488_v52 = vadd.f32 %v16880_v47, %v16418_v5  ;;  %v16927_v51 = vpop.f32.mrb[48].mxu0 }
 0x5c9   :  { %v7727_v29 = vor.u32 %v7726_v14, %v7725_v59  ;;  %v11490_v21 = vadd.f32 %v16880_v47, %v16533_v55  ;;  %v7584_v32 = vadd.s32 3, %v7580_v1  ;;  %v7724_v18 = vor.u32 %v7723_v33, %v7722_v6 }
 0x5ca   :  { %v7575_v3 = vxor.u32 2147483648, %v7574_v35  ;;  %v7728_v31 = vshll.u32 %v12349_v49, %v7713_v38  ;;  %v7450_v30 = vshll.u32 %v7449_v25, 30  ;;  %vm7731_vm15 = vcmp.lt.s32.totalorder %v16859_v20, 1 }
 0x5cb   :  { %vm7734_vm0 = vcmp.lt.s32.totalorder %v16859_v20, 4  ;;  %v16889_v11 = vshll.u32 %v7707_v42, 8  ;;  %v7739_v5 = vsel %vm7731_vm15, %v7718_v16, %v7721_v2  ;;  %v7715_v13 = vshrl.u32 %v12345_v7, %v7714_v19 }
 0x5cc   :  { %v7576_v53 = vsel %vm7493_vm2, %v7575_v3, %v7574_v35  ;;  %v7730_v36 = vor.u32 %v7729_v23, %v7728_v31  ;;  %v7740_v55 = vsel %vm7734_vm0, %v7727_v29, 920167782  ;;  %v16900_v1 = vsub.s32 %v7447_v37, %v7450_v30  ;;  %v16938_v23 = vpop.f32.mrb[47].mxu1 }
 0x5cd   :  { %v7579_v38 = vsel %vm16815_vm3, %v16614_v40, %v7576_v53  ;;  %vm7733_vm1 = vcmp.lt.s32.totalorder %v16859_v20, 3  ;;  %vm7732_vm2 = vcmp.lt.s32.totalorder %v16859_v20, 2  ;;  %v7736_v42 = vsel %vm7734_vm0, %v7724_v18, 2102212464 }
 0x5ce   :  { %12207 = vcosq.f32 %v7579_v38  ;;  %v7741_v27 = vsel %vm7733_vm1, %v7724_v18, %v7740_v55  ;;  %v7453_v15 = vsub.s32 0, %v16900_v1  ;;  %v7743_v19 = vsel %vm7731_vm15, %v7721_v2, %v7724_v18 }
 0x5cf   :  { %12209 = vsinq.f32 %v7579_v38  ;;  %v7742_v34 = vsel %vm7732_vm2, %v7739_v5, %v7741_v27  ;;  %v7473_v4 = vsub.s32 4, %v7449_v25  ;;  %v7744_v37 = vsel %vm7734_vm0, %v7730_v36, 1326507024 }
 0x5d0   :  { %v16917_v61 = vmul.u32.u64.low %v16889_v11, %v7742_v34  ;;  %v16918_v8 = vmul.u32.u64.high %v16889_v11, %v7742_v34, %v16917_v61  ;;  %v7585_v56 = vand.u32 3, %v7584_v32  ;;  %v10325_v50 = vmin.u32 %v7453_v15, %v16900_v1 }
 0x5d1   :  { %v7745_v60 = vsel %vm7733_vm1, %v7727_v29, %v7744_v37  ;;  %v16925_v33 = vadd.f32 %v11488_v52, %v16325_v54  ;;  %v7735_v6 = vsel %vm7731_vm15, %v7715_v13, %v7718_v16  ;;  %v7737_v59 = vsel %vm7733_vm1, %v7721_v2, %v7736_v42 }
 0x5d2   :  { %v7746_v14 = vsel %vm7732_vm2, %v7743_v19, %v7745_v60  ;;  %v16936_v35 = vadd.f32 %v11490_v21, %v16411_v46  ;;  %vm7389_vm3 = vcmp.lt.s32.totalorder %v16617_v0, 0  ;;  %v7455_v54 = vclz %v10325_v50 }
 0x5d3   :  { %v7474_v29 = vsel %vm7389_vm3, %v7473_v4, %v7449_v25  ;;  %v16944_v52 = vmul.u32.u64.low %v16889_v11, %v7746_v14  ;;  %v16945_v16 = vmul.u32.u64.high %v16889_v11, %v7746_v14, %v16944_v52  ;;  %vm7583_vm4 = vweird.f32 %v16614_v40 }
 0x5d4   :  { %vm16950_vm5 = vcmp.le.f32.partialorder %v7387_v12, 0.7853982  ;;  %v10326_v46 = vadd.s32 4294967294, %v7455_v54  ;;  %v7738_v21 = vsel %vm7732_vm2, %v7735_v6, %v7737_v59  ;;  %v7598_v3 = vand.u32 2139095040, %v16925_v33 }
 0x5d5   :  { %vm7586_vm6 = vcmp.lt.s32.totalorder %v7585_v56, 2  ;;  %vm7587_vm7 = vcmp.eq.s32.totalorder %v7585_v56, 0  ;;  %vm7590_vm8 = vcmp.eq.s32.totalorder %v7585_v56, 2  ;;  %v7757_v25 = vadd.s32 1, %v16918_v8 }
 0x5d6   :  { %v7443_v32 = vadd.s32 %v16827_v28, %v16845_v44  ;;  %vm10327_vm11 = vcmp.lt.s32.totalorder %v10326_v46, 0  ;;  %v7476_v12 = vsel %vm16950_vm5, 0, %v7474_v29  ;;  %v7599_v18 = vshrl.u32 %v7598_v3, 23 }
 0x5d7   :  { %v7458_v30 = vsel %vm10327_vm11, 0, %v10326_v46  ;;  %v7754_v20 = vmul.u32 %v16889_v11, %v7738_v21  ;;  %vm7756_vm9 = vc.u32 %v16945_v16, %v16917_v61  ;;  %v7595_v53 = vand.u32 2147483647, %v16925_v33 }
 0x5d8   :  { %v12208_v31 = vpop.eup %12207  ;;  %v7459_v55 = vsub.s32 32, %v7458_v30  ;;  %v7463_v38 = vsub.s32 4294967266, %v7458_v30  ;;  %v7910_v28 = vand.u32 2139095040, %v16936_v35  ;;  %v7460_v13 = vshll.u32 %v16900_v1, %v7458_v30 }
 0x5d9   :  { %v12210_v36 = vpop.eup %12209  ;;  %v7591_v5 = vxor.u32 2147483648, %v12208_v31  ;;  %v7758_v42 = vsel %vm7756_vm9, %v7757_v25, %v16918_v8  ;;  %v10332_v27 = vadd.s32 4294967169, %v7599_v18  ;;  %v7480_v37 = vadd.s32 3, %v7476_v12 }
 0x5da   :  { %v7588_v44 = vxor.u32 2147483648, %v12210_v36  ;;  %v7461_v11 = vshrl.u32 %v7443_v32, %v7459_v55  ;;  %v7464_v34 = vadd.s32 127, %v7463_v38  ;;  %v7759_v19 = vadd.s32 %v7758_v42, %v7754_v20 }
 0x5db   :  { %v7592_v15 = vsel %vm7590_vm8, %v7591_v5, %v12210_v36  ;;  %v7605_v50 = vadd.s32 1, %v10332_v27  ;;  %v11492_v60 = vadd.f32 %v16880_v47, %v16590_v26  ;;  %v7602_v54 = vand.u32 8388607, %v7595_v53 }
 0x5dc   :  { %v7589_v4 = vsel %vm7587_vm7, %v12208_v31, %v7588_v44  ;;  %v7462_v59 = vor.u32 %v7461_v11, %v7460_v13  ;;  %v7465_v14 = vshll.u32 %v7464_v34, 23  ;;  %v7760_v1 = vadd.s32 536870912, %v7759_v19 }
 0x5dd   :  { %v7593_v6 = vsel %vm7586_vm6, %v7589_v4, %v7592_v15  ;;  %vm7606_vm12 = vcmp.gt.s32.totalorder %v7605_v50, 0  ;;  %v7911_v21 = vshrl.u32 %v7910_v28, 23  ;;  %v16978_v3 = vand.u32 3, %v7480_v37 }
 0x5de   :  { %v7594_v8 = vsel %vm7583_vm4, nan, %v7593_v6  ;;  %v7466_v29 = vor.u32 4788187, %v7465_v14  ;;  %v7761_v52 = vshrl.u32 %v7760_v1, 30  ;;  %v7607_v46 = vsel %vm7606_vm12, %v7605_v50, 0 }
 0x5df   :  { %10130 = vst [vmem:[#allocation2 + $0x138] sm:$0xff] %v7594_v8  ;;  %v7609_v26 = vand.u32 31, %v7607_v46  ;;  %v16982_v56 = vadd.f32 %v16880_v47, %v16703_v62  ;;  %v7469_v32 = vcvt.s32.f32 %v7462_v59  ;;  %vm7701_vm13 = vcmp.lt.s32.totalorder %v16720_v63, 0 }
 0x5e0   :  { %v7467_v25 = vand.u32 2147483647, %v7466_v29  ;;  %v7762_v40 = vshll.u32 %v7761_v52, 30  ;;  %v16986_v12 = vadd.f32 %v11492_v60, %v16523_v22  ;;  %v7755_v18 = vadd.s32 %v16917_v61, %v16945_v16 }
 0x5e1   :  { %v7603_v31 = vor.u32 8388608, %v7602_v54  ;;  %v7610_v30 = vsub.s32 32, %v7609_v26  ;;  %v7907_v20 = vand.u32 2147483647, %v16936_v35  ;;  %v7608_v62 = vshrl.u32 %v7607_v46, 5 }
 0x5e2   :  { %v7470_v36 = vmul.f32 %v7469_v32, %v7467_v25  ;;  %v16991_v5 = vsub.s32 %v7759_v19, %v7762_v40  ;;  %v10344_v55 = vadd.s32 4294967169, %v7911_v21  ;;  %v7785_v38 = vsub.s32 4, %v7761_v52 }
 0x5e3   :  { %v7612_v28 = vshll.u32 %v12345_v7, %v7609_v26  ;;  %v7613_v44 = vshrl.u32 %v12346_v39, %v7610_v30  ;;  %v7616_v22 = vshrl.u32 %v12347_v43, %v7610_v30  ;;  %v7615_v61 = vshll.u32 %v12346_v39, %v7609_v26 }
 0x5e4   :  { %v7471_v13 = vxor.u32 2147483648, %v7470_v36  ;;  %v7765_v42 = vsub.s32 0, %v16991_v5  ;;  %v7619_v16 = vshrl.u32 %v12348_v48, %v7610_v30  ;;  %v7618_v15 = vshll.u32 %v12347_v43, %v7609_v26 }
 0x5e5   :  { %v7614_v27 = vor.u32 %v7613_v44, %v7612_v28  ;;  %v7621_v11 = vshll.u32 %v12348_v48, %v7609_v26  ;;  %v7622_v34 = vshrl.u32 %v12349_v49, %v7610_v30  ;;  %v7617_v37 = vor.u32 %v7616_v22, %v7615_v61 }
 0x5e6   :  { %v7472_v19 = vsel %vm7389_vm3, %v7471_v13, %v7470_v36  ;;  %v10337_v4 = vmin.u32 %v7765_v42, %v16991_v5  ;;  %v7624_v50 = vshll.u32 %v12349_v49, %v7609_v26  ;;  %v7620_v6 = vor.u32 %v7619_v16, %v7618_v15 }
 0x5e7   :  { %v7475_v60 = vsel %vm16950_vm5, %v16617_v0, %v7472_v19  ;;  %v7623_v59 = vor.u32 %v7622_v34, %v7621_v11  ;;  %v7625_v14 = vshrl.u32 %v12350_v58, %v7610_v30  ;;  %v17010_v8 = vshll.u32 %v7603_v31, 8 }
 0x5e8   :  { %12211 = vcosq.f32 %v7475_v60  ;;  %v7767_v1 = vclz %v10337_v4  ;;  %v7917_v54 = vadd.s32 1, %v10344_v55  ;;  %v17014_v29 = vsel %vm7701_vm13, %v7785_v38, %v7761_v52 }
 0x5e9   :  { %12213 = vsinq.f32 %v7475_v60  ;;  %v7611_v46 = vshrl.u32 %v12345_v7, %v7610_v30  ;;  %v7626_v21 = vor.u32 %v7625_v14, %v7624_v50  ;;  %vm17019_vm10 = vcmp.le.f32.partialorder %v7699_v41, 0.7853982 }
 0x5ea   :  { %v10338_v26 = vadd.s32 4294967294, %v7767_v1  ;;  %vm7627_vm14 = vcmp.lt.s32.totalorder %v7608_v62, 1  ;;  %vm7629_vm15 = vcmp.lt.s32.totalorder %v7608_v62, 3  ;;  %vm7630_vm0 = vcmp.lt.s32.totalorder %v7608_v62, 4  ;;  %v17046_v1 = vpop.f32.mrb[48].mxu1 }
 0x5eb   :  { %v7632_v25 = vsel %vm7630_vm0, %v7620_v6, 2102212464  ;;  %v7635_v32 = vsel %vm7627_vm14, %v7614_v27, %v7617_v37  ;;  %v7636_v40 = vsel %vm7630_vm0, %v7623_v59, 920167782  ;;  %v7639_v31 = vsel %vm7627_vm14, %v7617_v37, %v7620_v6 }
 0x5ec   :  { %vm10339_vm1 = vcmp.lt.s32.totalorder %v10338_v26, 0  ;;  %vm7628_vm2 = vcmp.lt.s32.totalorder %v7608_v62, 2  ;;  %v7637_v52 = vsel %vm7629_vm15, %v7620_v6, %v7636_v40  ;;  %v7640_v30 = vsel %vm7630_vm0, %v7626_v21, 1326507024 }
 0x5ed   :  { %v7770_v36 = vsel %vm10339_vm1, 0, %v10338_v26  ;;  %v7631_v55 = vsel %vm7627_vm14, %v7611_v46, %v7614_v27  ;;  %v7638_v41 = vsel %vm7628_vm2, %v7635_v32, %v7637_v52  ;;  %v7641_v38 = vsel %vm7629_vm15, %v7623_v59, %v7640_v30  ;;  %v17038_v27 = vpop.f32.mrb[49].mxu0 }
 0x5ee   :  { %v7771_v28 = vsub.s32 32, %v7770_v36  ;;  %v7775_v44 = vsub.s32 4294967266, %v7770_v36  ;;  %v7633_v22 = vsel %vm7629_vm15, %v7617_v37, %v7632_v25  ;;  %v7642_v13 = vsel %vm7628_vm2, %v7639_v31, %v7641_v38 }
 0x5ef   :  { %vm7479_vm3 = vweird.f32 %v16617_v0  ;;  %v17030_v42 = vmul.u32.u64.low %v17010_v8, %v7642_v13  ;;  %v17031_v61 = vmul.u32.u64.high %v17010_v8, %v7642_v13, %v17030_v42  ;;  %v7772_v11 = vshll.u32 %v16991_v5, %v7770_v36 }
 0x5f0   :  { %v17034_v16 = vmul.u32.u64.low %v17010_v8, %v7638_v41  ;;  %v17035_v15 = vmul.u32.u64.high %v17010_v8, %v7638_v41, %v17034_v16  ;;  %v7773_v34 = vshrl.u32 %v7755_v18, %v7771_v28  ;;  %v7776_v19 = vadd.s32 127, %v7775_v44 }
 0x5f1   :  { %vm7918_vm4 = vcmp.gt.s32.totalorder %v7917_v54, 0  ;;  %vm7482_vm5 = vcmp.lt.s32.totalorder %v16978_v3, 2  ;;  %v7634_v4 = vsel %vm7628_vm2, %v7631_v55, %v7633_v22  ;;  %v7914_v37 = vand.u32 8388607, %v7907_v20 }
 0x5f2   :  { %v7919_v50 = vsel %vm7918_vm4, %v7917_v54, 0  ;;  %v12212_v60 = vpop.eup %12211  ;;  %vm7486_vm6 = vcmp.eq.s32.totalorder %v16978_v3, 2  ;;  %v7774_v6 = vor.u32 %v7773_v34, %v7772_v11  ;;  %v7777_v59 = vshll.u32 %v7776_v19, 23 }
 0x5f3   :  { %v7921_v14 = vand.u32 31, %v7919_v50  ;;  %v12214_v5 = vpop.eup %12213  ;;  %v7487_v18 = vxor.u32 2147483648, %v12212_v60  ;;  %v7788_v46 = vsel %vm17019_vm10, 0, %v17014_v29  ;;  %vm7652_vm7 = vc.u32 %v17031_v61, %v17034_v16 }
 0x5f4   :  { %v7653_v62 = vadd.s32 1, %v17035_v15  ;;  %v7484_v54 = vxor.u32 2147483648, %v12214_v5  ;;  %v7778_v21 = vor.u32 4788187, %v7777_v59  ;;  %v7650_v26 = vmul.u32 %v17010_v8, %v7634_v4 }
 0x5f5   :  { %v7922_v25 = vsub.s32 32, %v7921_v14  ;;  %vm7483_vm8 = vcmp.eq.s32.totalorder %v16978_v3, 0  ;;  %v7488_v32 = vsel %vm7486_vm6, %v7487_v18, %v12214_v5  ;;  %v7915_v31 = vor.u32 8388608, %v7914_v37 }
 0x5f6   :  { %v7654_v40 = vsel %vm7652_vm7, %v7653_v62, %v17035_v15  ;;  %v7485_v52 = vsel %vm7483_vm8, %v12212_v60, %v7484_v54  ;;  %v7779_v30 = vand.u32 2147483647, %v7778_v21  ;;  %v7781_v36 = vcvt.s32.f32 %v7774_v6 }
 0x5f7   :  { %v7655_v29 = vadd.s32 %v7654_v40, %v7650_v26  ;;  %v7489_v55 = vsel %vm7482_vm5, %v7485_v52, %v7488_v32  ;;  %v7792_v41 = vadd.s32 3, %v7788_v46  ;;  %v7925_v38 = vshrl.u32 %v12346_v39, %v7922_v25 }
 0x5f8   :  { %v7928_v28 = vshrl.u32 %v12347_v43, %v7922_v25  ;;  %v7490_v8 = vsel %vm7479_vm3, nan, %v7489_v55  ;;  %v7782_v44 = vmul.f32 %v7781_v36, %v7779_v30  ;;  %v7931_v13 = vshrl.u32 %v12348_v48, %v7922_v25 }
 0x5f9   :  { %v7656_v22 = vadd.s32 536870912, %v7655_v29  ;;  %10129 = vst [vmem:[#allocation2 + $0x130] sm:$0xff] %v7490_v8  ;;  %v7920_v42 = vshrl.u32 %v7919_v50, 5  ;;  %v7924_v15 = vshll.u32 %v12345_v7, %v7921_v14  ;;  %v7927_v11 = vshll.u32 %v12346_v39, %v7921_v14  ;;  %v17086_v8 = vpop.f32.mrb[50].mxu0 }
 0x5fa   :  { %v7934_v3 = vshrl.u32 %v12349_v49, %v7922_v25  ;;  %v7783_v34 = vxor.u32 2147483648, %v7782_v44  ;;  %v7930_v4 = vshll.u32 %v12347_v43, %v7921_v14  ;;  %v7933_v37 = vshll.u32 %v12348_v48, %v7921_v14 }
 0x5fb   :  { %v7657_v19 = vshrl.u32 %v7656_v22, 30  ;;  %v7926_v0 = vor.u32 %v7925_v38, %v7924_v15  ;;  %v7929_v60 = vor.u32 %v7928_v28, %v7927_v11  ;;  %v7936_v6 = vshll.u32 %v12349_v49, %v7921_v14  ;;  %v17094_v11 = vpop.f32.mrb[49].mxu1 }
 0x5fc   :  { %v7937_v59 = vshrl.u32 %v12350_v58, %v7922_v25  ;;  %v7784_v50 = vsel %vm7701_vm13, %v7783_v34, %v7782_v44  ;;  %v7932_v18 = vor.u32 %v7931_v13, %v7930_v4  ;;  %v7935_v46 = vor.u32 %v7934_v3, %v7933_v37 }
 0x5fd   :  { %v7658_v5 = vshll.u32 %v7657_v19, 30  ;;  %v7787_v62 = vsel %vm17019_vm10, %v16720_v63, %v7784_v50  ;;  %v17076_v54 = vand.u32 3, %v7792_v41  ;;  %v17078_v26 = vshll.u32 %v7915_v31, 8 }
 0x5fe   :  { %v7938_v21 = vor.u32 %v7937_v59, %v7936_v6  ;;  %12215 = vcosq.f32 %v7787_v62  ;;  %v7923_v14 = vshrl.u32 %v12345_v7, %v7922_v25  ;;  %vm7939_vm11 = vcmp.lt.s32.totalorder %v7920_v42, 1 }
 0x5ff   :  { %v17080_v32 = vsub.s32 %v7655_v29, %v7658_v5  ;;  %12217 = vsinq.f32 %v7787_v62  ;;  %vm7940_vm9 = vcmp.lt.s32.totalorder %v7920_v42, 2  ;;  %vm7942_vm12 = vcmp.lt.s32.totalorder %v7920_v42, 4 }
 0x600   :  { %v7947_v40 = vsel %vm7939_vm11, %v7926_v0, %v7929_v60  ;;  %vm7941_vm13 = vcmp.lt.s32.totalorder %v7920_v42, 3  ;;  %v7944_v2 = vsel %vm7942_vm12, %v7932_v18, 2102212464  ;;  %v7948_v30 = vsel %vm7942_vm12, %v7935_v46, 920167782 }
 0x601   :  { %v7661_v52 = vsub.s32 0, %v17080_v32  ;;  %v7681_v36 = vsub.s32 4, %v7657_v19  ;;  %v7949_v55 = vsel %vm7941_vm13, %v7932_v18, %v7948_v30  ;;  %v7951_v41 = vsel %vm7939_vm11, %v7929_v60, %v7932_v18 }
 0x602   :  { %v7952_v31 = vsel %vm7942_vm12, %v7938_v21, 1326507024  ;;  %v7943_v29 = vsel %vm7939_vm11, %v7923_v14, %v7926_v0  ;;  %v7950_v28 = vsel %vm7940_vm9, %v7947_v40, %v7949_v55  ;;  %v7945_v44 = vsel %vm7941_vm13, %v7929_v60, %v7944_v2 }
 0x603   :  { %v10333_v38 = vmin.u32 %v7661_v52, %v17080_v32  ;;  %v7953_v25 = vsel %vm7941_vm13, %v7935_v46, %v7952_v31  ;;  %v17090_v13 = vmul.u32.u64.low %v17078_v26, %v7950_v28  ;;  %v17091_v15 = vmul.u32.u64.high %v17078_v26, %v7950_v28, %v17090_v13 }
 0x604   :  { %v7954_v22 = vsel %vm7940_vm9, %v7951_v41, %v7953_v25  ;;  %vm17098_vm10 = vcmp.le.f32.partialorder %v7595_v53, 0.7853982  ;;  %vm7597_vm14 = vcmp.lt.s32.totalorder %v16925_v33, 0  ;;  %vm7791_vm15 = vweird.f32 %v16720_v63 }
 0x605   :  { %v7663_v34 = vclz %v10333_v38  ;;  %v7682_v4 = vsel %vm7597_vm14, %v7681_v36, %v7657_v19  ;;  %v17107_v37 = vmul.u32.u64.low %v17078_v26, %v7954_v22  ;;  %v17108_v0 = vmul.u32.u64.high %v17078_v26, %v7954_v22, %v17107_v37 }
 0x606   :  { %v7806_v60 = vand.u32 2139095040, %v16986_v12  ;;  %vm7794_vm0 = vcmp.lt.s32.totalorder %v17076_v54, 2  ;;  %v7946_v6 = vsel %vm7940_vm9, %v7943_v29, %v7945_v44  ;;  %v17115_v59 = vadd.f32 %v16982_v56, %v16588_v57 }
 0x607   :  { %v10334_v53 = vadd.s32 4294967294, %v7663_v34  ;;  %vm7795_vm1 = vcmp.eq.s32.totalorder %v17076_v54, 0  ;;  %vm7798_vm2 = vcmp.eq.s32.totalorder %v17076_v54, 2  ;;  %v7965_v19 = vadd.s32 1, %v17091_v15 }
 0x608   :  { %v7807_v50 = vshrl.u32 %v7806_v60, 23  ;;  %v12216_v5 = vpop.eup %12215  ;;  %v7651_v18 = vadd.s32 %v17034_v16, %v17031_v61  ;;  %v7684_v42 = vsel %vm17098_vm10, 0, %v7682_v4  ;;  %v7803_v46 = vand.u32 2147483647, %v16986_v12 }
 0x609   :  { %vm10335_vm3 = vcmp.lt.s32.totalorder %v10334_v53, 0  ;;  %v12218_v62 = vpop.eup %12217  ;;  %v7799_v57 = vxor.u32 2147483648, %v12216_v5  ;;  %v7962_v21 = vmul.u32 %v17078_v26, %v7946_v6  ;;  %vm7964_vm4 = vc.u32 %v17108_v0, %v17090_v13 }
 0x60a   :  { %v7666_v56 = vsel %vm10335_vm3, 0, %v10334_v53  ;;  %v7796_v14 = vxor.u32 2147483648, %v12218_v62  ;;  %v8118_v2 = vand.u32 2139095040, %v17115_v59  ;;  %v7966_v30 = vsel %vm7964_vm4, %v7965_v19, %v17091_v15 }
 0x60b   :  { %v7667_v40 = vsub.s32 32, %v7666_v56  ;;  %v7671_v52 = vsub.s32 4294967266, %v7666_v56  ;;  %v7800_v61 = vsel %vm7798_vm2, %v7799_v57, %v12218_v62  ;;  %v7668_v16 = vshll.u32 %v17080_v32, %v7666_v56 }
 0x60c   :  { %v10340_v36 = vadd.s32 4294967169, %v7807_v50  ;;  %v7797_v55 = vsel %vm7795_vm1, %v12216_v5, %v7796_v14  ;;  %v7967_v31 = vadd.s32 %v7966_v30, %v7962_v21  ;;  %v7688_v29 = vadd.s32 3, %v7684_v42 }
 0x60d   :  { %v7669_v26 = vshrl.u32 %v7651_v18, %v7667_v40  ;;  %v7672_v41 = vadd.s32 127, %v7671_v52  ;;  %v7801_v38 = vsel %vm7794_vm0, %v7797_v55, %v7800_v61  ;;  %v11496_v25 = vadd.f32 %v16880_v47, %v16757_v24 }
 0x60e   :  { %v7813_v28 = vadd.s32 1, %v10340_v36  ;;  %v7802_v32 = vsel %vm7791_vm15, nan, %v7801_v38  ;;  %v7968_v15 = vadd.s32 536870912, %v7967_v31  ;;  %v7810_v34 = vand.u32 8388607, %v7803_v46 }
 0x60f   :  { %v7670_v44 = vor.u32 %v7669_v26, %v7668_v16  ;;  %v7673_v22 = vshll.u32 %v7672_v41, 23  ;;  %10132 = vst [vmem:[#allocation2 + $0x148] sm:$0xff] %v7802_v32  ;;  %v8119_v60 = vshrl.u32 %v8118_v2, 23  ;;  %v17143_v53 = vand.u32 3, %v7688_v29 }
 0x610   :  { %vm7814_vm5 = vcmp.gt.s32.totalorder %v7813_v28, 0  ;;  %v7969_v37 = vshrl.u32 %v7968_v15, 30  ;;  %vm7909_vm6 = vcmp.lt.s32.totalorder %v16936_v35, 0  ;;  %v17147_v50 = vadd.f32 %v11496_v25, %v16695_v10 }
 0x611   :  { %v7674_v4 = vor.u32 4788187, %v7673_v22  ;;  %v7815_v54 = vsel %vm7814_vm5, %v7813_v28, 0  ;;  %v7677_v24 = vcvt.s32.f32 %v7670_v44  ;;  %v17151_v5 = vadd.s32 %v17090_v13, %v17108_v0 }
 0x612   :  { %v7817_v6 = vand.u32 31, %v7815_v54  ;;  %v7970_v63 = vshll.u32 %v7969_v37, 30  ;;  %v7811_v18 = vor.u32 8388608, %v7810_v34  ;;  %v8115_v62 = vand.u32 2147483647, %v17115_v59 }
 0x613   :  { %v7675_v19 = vand.u32 2147483647, %v7674_v4  ;;  %v17156_v21 = vshrl.u32 %v7815_v54, 5  ;;  %v10352_v14 = vadd.s32 4294967169, %v8119_v60  ;;  %v7993_v40 = vsub.s32 4, %v7969_v37 }
 0x614   :  { %v7818_v42 = vsub.s32 32, %v7817_v6  ;;  %v17154_v56 = vsub.s32 %v7967_v31, %v7970_v63  ;;  %v7820_v52 = vshll.u32 %v12345_v7, %v7817_v6  ;;  %v7823_v0 = vshll.u32 %v12346_v39, %v7817_v6 }
 0x615   :  { %v7678_v57 = vmul.f32 %v7677_v24, %v7675_v19  ;;  %v7826_v36 = vshll.u32 %v12347_v43, %v7817_v6  ;;  %v7829_v55 = vshll.u32 %v12348_v48, %v7817_v6  ;;  %v7832_v29 = vshll.u32 %v12349_v49, %v7817_v6 }
 0x616   :  { %v7821_v10 = vshrl.u32 %v12346_v39, %v7818_v42  ;;  %v7824_v2 = vshrl.u32 %v12347_v43, %v7818_v42  ;;  %v7973_v13 = vsub.s32 0, %v17154_v56  ;;  %v7827_v16 = vshrl.u32 %v12348_v48, %v7818_v42 }
 0x617   :  { %v7679_v61 = vxor.u32 2147483648, %v7678_v57  ;;  %v7830_v26 = vshrl.u32 %v12349_v49, %v7818_v42  ;;  %v7833_v44 = vshrl.u32 %v12350_v58, %v7818_v42  ;;  %v17175_v15 = vshll.u32 %v7811_v18, 8 }
 0x618   :  { %v7822_v30 = vor.u32 %v7821_v10, %v7820_v52  ;;  %v10345_v31 = vmin.u32 %v7973_v13, %v17154_v56  ;;  %v7825_v38 = vor.u32 %v7824_v2, %v7823_v0  ;;  %v7828_v25 = vor.u32 %v7827_v16, %v7826_v36  ;;  %v17213_v36 = vpop.f32.mrb[51].mxu0 }
 0x619   :  { %v7680_v41 = vsel %vm7597_vm14, %v7679_v61, %v7678_v57  ;;  %v7831_v32 = vor.u32 %v7830_v26, %v7829_v55  ;;  %v8125_v34 = vadd.s32 1, %v10352_v14  ;;  %v17179_v4 = vsel %vm7909_vm6, %v7993_v40, %v7969_v37 }
 0x61a   :  { %v7683_v28 = vsel %vm17098_vm10, %v16925_v33, %v7680_v41  ;;  %v7975_v22 = vclz %v10345_v31  ;;  %v7819_v54 = vshrl.u32 %v12345_v7, %v7818_v42  ;;  %v7834_v60 = vor.u32 %v7833_v44, %v7832_v29 }
 0x61b   :  { %12219 = vcosq.f32 %v7683_v28  ;;  %vm17184_vm7 = vcmp.le.f32.partialorder %v7907_v20, 0.7853982  ;;  %vm7835_vm8 = vcmp.lt.s32.totalorder %v17156_v21, 1  ;;  %vm7837_vm11 = vcmp.lt.s32.totalorder %v17156_v21, 3 }
 0x61c   :  { %12221 = vsinq.f32 %v7683_v28  ;;  %v10346_v6 = vadd.s32 4294967294, %v7975_v22  ;;  %vm7838_vm9 = vcmp.lt.s32.totalorder %v17156_v21, 4  ;;  %v7843_v24 = vsel %vm7835_vm8, %v7822_v30, %v7825_v38 }
 0x61d   :  { %v7840_v19 = vsel %vm7838_vm9, %v7828_v25, 2102212464  ;;  %v7844_v37 = vsel %vm7838_vm9, %v7831_v32, 920167782  ;;  %v7847_v63 = vsel %vm7835_vm8, %v7825_v38, %v7828_v25  ;;  %vm7836_vm13 = vcmp.lt.s32.totalorder %v17156_v21, 2 }
 0x61e   :  { %vm10347_vm12 = vcmp.lt.s32.totalorder %v10346_v6, 0  ;;  %v7845_v20 = vsel %vm7837_vm11, %v7828_v25, %v7844_v37  ;;  %v7848_v18 = vsel %vm7838_vm9, %v7834_v60, 1326507024  ;;  %v7839_v57 = vsel %vm7835_vm8, %v7819_v54, %v7822_v30 }
 0x61f   :  { %v7978_v42 = vsel %vm10347_vm12, 0, %v10346_v6  ;;  %v7846_v14 = vsel %vm7836_vm13, %v7843_v24, %v7845_v20  ;;  %v7849_v40 = vsel %vm7837_vm11, %v7831_v32, %v7848_v18  ;;  %vm7690_vm10 = vcmp.lt.s32.totalorder %v17143_v53, 2 }
 0x620   :  { %v7979_v52 = vsub.s32 32, %v7978_v42  ;;  %v7983_v10 = vsub.s32 4294967266, %v7978_v42  ;;  %v7841_v2 = vsel %vm7837_vm11, %v7825_v38, %v7840_v19  ;;  %v7850_v61 = vsel %vm7836_vm13, %v7847_v63, %v7849_v40 }
 0x621   :  { %vm7687_vm14 = vweird.f32 %v16925_v33  ;;  %v17205_v13 = vmul.u32.u64.low %v17175_v15, %v7850_v61  ;;  %v17206_v0 = vmul.u32.u64.high %v17175_v15, %v7850_v61, %v17205_v13  ;;  %v7980_v55 = vshll.u32 %v17154_v56, %v7978_v42  ;;  %v17223_v56 = vpop.f32.mrb[50].mxu1 }
 0x622   :  { %v17209_v16 = vmul.u32.u64.low %v17175_v15, %v7846_v14  ;;  %v17210_v30 = vmul.u32.u64.high %v17175_v15, %v7846_v14, %v17209_v16  ;;  %v7981_v26 = vshrl.u32 %v17151_v5, %v7979_v52  ;;  %v7984_v41 = vadd.s32 127, %v7983_v10 }
 0x623   :  { %vm8126_vm15 = vcmp.gt.s32.totalorder %v8125_v34, 0  ;;  %vm7691_vm0 = vcmp.eq.s32.totalorder %v17143_v53, 0  ;;  %v7842_v31 = vsel %vm7836_vm13, %v7839_v57, %v7841_v2  ;;  %v8122_v38 = vand.u32 8388607, %v8115_v62 }
 0x624   :  { %v8127_v29 = vsel %vm8126_vm15, %v8125_v34, 0  ;;  %vm7694_vm1 = vcmp.eq.s32.totalorder %v17143_v53, 2  ;;  %v7982_v25 = vor.u32 %v7981_v26, %v7980_v55  ;;  %v7985_v32 = vshll.u32 %v7984_v41, 23 }
 0x625   :  { %v12220_v28 = vpop.eup %12219  ;;  %v8129_v44 = vand.u32 31, %v8127_v29  ;;  %v7996_v54 = vsel %vm17184_vm7, 0, %v17179_v4  ;;  %vm7860_vm2 = vc.u32 %v17206_v0, %v17209_v16  ;;  %v7861_v21 = vadd.s32 1, %v17210_v30 }
 0x626   :  { %v12222_v5 = vpop.eup %12221  ;;  %v7695_v22 = vxor.u32 2147483648, %v12220_v28  ;;  %v7986_v60 = vor.u32 4788187, %v7985_v32  ;;  %v7858_v6 = vmul.u32 %v17175_v15, %v7842_v31  ;;  %v8123_v63 = vor.u32 8388608, %v8122_v38 }
 0x627   :  { %v7692_v34 = vxor.u32 2147483648, %v12222_v5  ;;  %v8130_v19 = vsub.s32 32, %v8129_v44  ;;  %v7862_v37 = vsel %vm7860_vm2, %v7861_v21, %v17210_v30  ;;  %v17235_v20 = vadd.f32 %v16880_v47, %v16852_v9 }
 0x628   :  { %v7696_v24 = vsel %vm7694_vm1, %v7695_v22, %v12222_v5  ;;  %v7987_v18 = vand.u32 2147483647, %v7986_v60  ;;  %v7989_v42 = vcvt.s32.f32 %v7982_v25  ;;  %v7863_v57 = vadd.s32 %v7862_v37, %v7858_v6 }
 0x629   :  { %v7693_v4 = vsel %vm7691_vm0, %v12220_v28, %v7692_v34  ;;  %v8000_v40 = vadd.s32 3, %v7996_v54  ;;  %v8133_v15 = vshrl.u32 %v12346_v39, %v8130_v19  ;;  %v8136_v52 = vshrl.u32 %v12347_v43, %v8130_v19 }
 0x62a   :  { %v7697_v14 = vsel %vm7690_vm10, %v7693_v4, %v7696_v24  ;;  %v7990_v2 = vmul.f32 %v7989_v42, %v7987_v18  ;;  %v7864_v9 = vadd.s32 536870912, %v7863_v57  ;;  %v8139_v61 = vshrl.u32 %v12348_v48, %v8130_v19 }
 0x62b   :  { %v7698_v10 = vsel %vm7687_vm14, nan, %v7697_v14  ;;  %v8128_v13 = vshrl.u32 %v8127_v29, 5  ;;  %v8132_v30 = vshll.u32 %v12345_v7, %v8129_v44  ;;  %v8135_v55 = vshll.u32 %v12346_v39, %v8129_v44 }
 0x62c   :  { %10131 = vst [vmem:[#allocation2 + $0x140] sm:$0xff] %v7698_v10  ;;  %v8142_v53 = vshrl.u32 %v12349_v49, %v8130_v19  ;;  %v7991_v26 = vxor.u32 2147483648, %v7990_v2  ;;  %v7865_v41 = vshrl.u32 %v7864_v9, 30  ;;  %v8138_v31 = vshll.u32 %v12347_v43, %v8129_v44  ;;  %v17268_v10 = vpop.f32.mrb[52].mxu0 }
 0x62d   :  { %v8141_v38 = vshll.u32 %v12348_v48, %v8129_v44  ;;  %v8134_v33 = vor.u32 %v8133_v15, %v8132_v30  ;;  %v8137_v28 = vor.u32 %v8136_v52, %v8135_v55  ;;  %v8144_v25 = vshll.u32 %v12349_v49, %v8129_v44  ;;  %v17276_v55 = vpop.f32.mrb[51].mxu1 }
 0x62e   :  { %v8145_v32 = vshrl.u32 %v12350_v58, %v8130_v19  ;;  %v7992_v29 = vsel %vm7909_vm6, %v7991_v26, %v7990_v2  ;;  %v7866_v5 = vshll.u32 %v7865_v41, 30  ;;  %v8140_v22 = vor.u32 %v8139_v61, %v8138_v31 }
 0x62f   :  { %v8143_v54 = vor.u32 %v8142_v53, %v8141_v38  ;;  %v7995_v21 = vsel %vm17184_vm7, %v16936_v35, %v7992_v29  ;;  %v17258_v34 = vand.u32 3, %v8000_v40  ;;  %v17260_v6 = vshll.u32 %v8123_v63, 8 }
 0x630   :  { %v8146_v60 = vor.u32 %v8145_v32, %v8144_v25  ;;  %12223 = vcosq.f32 %v7995_v21  ;;  %v17262_v24 = vsub.s32 %v7863_v57, %v7866_v5  ;;  %v8131_v44 = vshrl.u32 %v12345_v7, %v8130_v19 }
 0x631   :  { %vm8147_vm3 = vcmp.lt.s32.totalorder %v8128_v13, 1  ;;  %12225 = vsinq.f32 %v7995_v21  ;;  %vm8148_vm4 = vcmp.lt.s32.totalorder %v8128_v13, 2  ;;  %vm8150_vm5 = vcmp.lt.s32.totalorder %v8128_v13, 4 }
 0x632   :  { %v8155_v37 = vsel %vm8147_vm3, %v8134_v33, %v8137_v28  ;;  %v7869_v4 = vsub.s32 0, %v17262_v24  ;;  %vm8149_vm6 = vcmp.lt.s32.totalorder %v8128_v13, 3  ;;  %v8152_v3 = vsel %vm8150_vm5, %v8140_v22, 2102212464 }
 0x633   :  { %v8156_v18 = vsel %vm8150_vm5, %v8143_v54, 920167782  ;;  %v7889_v42 = vsub.s32 4, %v7865_v41  ;;  %v8159_v40 = vsel %vm8147_vm3, %v8137_v28, %v8140_v22  ;;  %v8160_v63 = vsel %vm8150_vm5, %v8146_v60, 1326507024 }
 0x634   :  { %v8157_v14 = vsel %vm8149_vm6, %v8140_v22, %v8156_v18  ;;  %v10341_v15 = vmin.u32 %v7869_v4, %v17262_v24  ;;  %v8151_v57 = vsel %vm8147_vm3, %v8131_v44, %v8134_v33  ;;  %v8161_v19 = vsel %vm8149_vm6, %v8143_v54, %v8160_v63 }
 0x635   :  { %v8158_v52 = vsel %vm8148_vm4, %v8155_v37, %v8157_v14  ;;  %v8153_v2 = vsel %vm8149_vm6, %v8137_v28, %v8152_v3  ;;  %v8162_v9 = vsel %vm8148_vm4, %v8159_v40, %v8161_v19  ;;  %vm17280_vm7 = vcmp.le.f32.partialorder %v7803_v46, 0.7853982 }
 0x636   :  { %v17272_v61 = vmul.u32.u64.low %v17260_v6, %v8158_v52  ;;  %v17273_v30 = vmul.u32.u64.high %v17260_v6, %v8158_v52, %v17272_v61  ;;  %vm7805_vm8 = vcmp.lt.s32.totalorder %v16986_v12, 0  ;;  %v7871_v26 = vclz %v10341_v15 }
 0x637   :  { %vm7999_vm11 = vweird.f32 %v16936_v35  ;;  %v7890_v31 = vsel %vm7805_vm8, %v7889_v42, %v7865_v41  ;;  %v17289_v38 = vmul.u32.u64.low %v17260_v6, %v8162_v9  ;;  %v17290_v33 = vmul.u32.u64.high %v17260_v6, %v8162_v9, %v17289_v38 }
 0x638   :  { %v8014_v28 = vand.u32 2139095040, %v17147_v50  ;;  %vm8002_vm9 = vcmp.lt.s32.totalorder %v17258_v34, 2  ;;  %v10342_v46 = vadd.s32 4294967294, %v7871_v26  ;;  %v8154_v25 = vsel %vm8148_vm4, %v8151_v57, %v8153_v2 }
 0x639   :  { %v17297_v32 = vadd.f32 %v17235_v20, %v16753_v45  ;;  %vm8003_vm12 = vcmp.eq.s32.totalorder %v17258_v34, 0  ;;  %vm8006_vm13 = vcmp.eq.s32.totalorder %v17258_v34, 2  ;;  %v8173_v41 = vadd.s32 1, %v17273_v30 }
 0x63a   :  { %v8015_v29 = vshrl.u32 %v8014_v28, 23  ;;  %v12224_v5 = vpop.eup %12223  ;;  %v7859_v22 = vadd.s32 %v17209_v16, %v17206_v0  ;;  %vm10343_vm10 = vcmp.lt.s32.totalorder %v10342_v46, 0  ;;  %v7892_v13 = vsel %vm17280_vm7, 0, %v7890_v31 }
 0x63b   :  { %v8011_v54 = vand.u32 2147483647, %v17147_v50  ;;  %v12226_v21 = vpop.eup %12225  ;;  %v8007_v45 = vxor.u32 2147483648, %v12224_v5  ;;  %v7874_v20 = vsel %vm10343_vm10, 0, %v10342_v46  ;;  %v8170_v60 = vmul.u32 %v17260_v6, %v8154_v25 }
 0x63c   :  { %vm8172_vm14 = vc.u32 %v17290_v33, %v17272_v61  ;;  %v8004_v44 = vxor.u32 2147483648, %v12226_v21  ;;  %v7875_v37 = vsub.s32 32, %v7874_v20  ;;  %v7879_v4 = vsub.s32 4294967266, %v7874_v20 }
 0x63d   :  { %v8326_v3 = vand.u32 2139095040, %v17297_v32  ;;  %v8008_v0 = vsel %vm8006_vm13, %v8007_v45, %v12226_v21  ;;  %v7876_v16 = vshll.u32 %v17262_v24, %v7874_v20  ;;  %v8174_v18 = vsel %vm8172_vm14, %v8173_v41, %v17273_v30 }
 0x63e   :  { %v10348_v42 = vadd.s32 4294967169, %v8015_v29  ;;  %v8005_v14 = vsel %vm8003_vm12, %v12224_v5, %v8004_v44  ;;  %v7877_v6 = vshrl.u32 %v7859_v22, %v7875_v37  ;;  %v7880_v40 = vadd.s32 127, %v7879_v4 }
 0x63f   :  { %v8175_v63 = vadd.s32 %v8174_v18, %v8170_v60  ;;  %v8009_v15 = vsel %vm8002_vm9, %v8005_v14, %v8008_v0  ;;  %v7896_v57 = vadd.s32 3, %v7892_v13  ;;  %v11500_v19 = vadd.f32 %v16880_v47, %v16938_v23 }
 0x640   :  { %v8021_v52 = vadd.s32 1, %v10348_v42  ;;  %v8010_v24 = vsel %vm7999_vm11, nan, %v8009_v15  ;;  %v7878_v2 = vor.u32 %v7877_v6, %v7876_v16  ;;  %v7881_v9 = vshll.u32 %v7880_v40, 23 }
 0x641   :  { %v8176_v30 = vadd.s32 536870912, %v8175_v63  ;;  %10134 = vst [vmem:[#allocation2 + $0x158] sm:$0xff] %v8010_v24  ;;  %v8018_v26 = vand.u32 8388607, %v8011_v54  ;;  %v8327_v28 = vshrl.u32 %v8326_v3, 23  ;;  %v17325_v46 = vand.u32 3, %v7896_v57 }
 0x642   :  { %vm8022_vm15 = vcmp.gt.s32.totalorder %v8021_v52, 0  ;;  %v7882_v31 = vor.u32 4788187, %v7881_v9  ;;  %v7885_v47 = vcvt.s32.f32 %v7878_v2  ;;  %vm8117_vm0 = vcmp.lt.s32.totalorder %v17115_v59, 0 }
 0x643   :  { %v8177_v38 = vshrl.u32 %v8176_v30, 30  ;;  %v8023_v34 = vsel %vm8022_vm15, %v8021_v52, 0  ;;  %v17329_v23 = vadd.f32 %v11500_v19, %v16840_v17  ;;  %v17333_v29 = vadd.s32 %v17272_v61, %v17290_v33 }
 0x644   :  { %v8025_v25 = vand.u32 31, %v8023_v34  ;;  %v7883_v41 = vand.u32 2147483647, %v7882_v31  ;;  %v8019_v5 = vor.u32 8388608, %v8018_v26  ;;  %v8323_v13 = vand.u32 2147483647, %v17297_v32 }
 0x645   :  { %v8178_v35 = vshll.u32 %v8177_v38, 30  ;;  %v17338_v20 = vshrl.u32 %v8023_v34, 5  ;;  %v10360_v60 = vadd.s32 4294967169, %v8327_v28  ;;  %v8201_v44 = vsub.s32 4, %v8177_v38 }
 0x646   :  { %v8026_v22 = vsub.s32 32, %v8025_v25  ;;  %v7886_v21 = vmul.f32 %v7885_v47, %v7883_v41  ;;  %v8028_v37 = vshll.u32 %v12345_v7, %v8025_v25  ;;  %v8031_v33 = vshll.u32 %v12346_v39, %v8025_v25 }
 0x647   :  { %v17336_v45 = vsub.s32 %v8175_v63, %v8178_v35  ;;  %v8034_v18 = vshll.u32 %v12347_v43, %v8025_v25  ;;  %v8037_v42 = vshll.u32 %v12348_v48, %v8025_v25  ;;  %v8040_v15 = vshll.u32 %v12349_v49, %v8025_v25 }
 0x648   :  { %v8029_v17 = vshrl.u32 %v12346_v39, %v8026_v22  ;;  %v8032_v4 = vshrl.u32 %v12347_v43, %v8026_v22  ;;  %v7887_v3 = vxor.u32 2147483648, %v7886_v21  ;;  %v8035_v0 = vshrl.u32 %v12348_v48, %v8026_v22 }
 0x649   :  { %v8181_v61 = vsub.s32 0, %v17336_v45  ;;  %v8038_v14 = vshrl.u32 %v12349_v49, %v8026_v22  ;;  %v8041_v24 = vshrl.u32 %v12350_v58, %v8026_v22  ;;  %v17357_v9 = vshll.u32 %v8019_v5, 8 }
 0x64a   :  { %v8030_v16 = vor.u32 %v8029_v17, %v8028_v37  ;;  %v7888_v6 = vsel %vm7805_vm8, %v7887_v3, %v7886_v21  ;;  %v8033_v63 = vor.u32 %v8032_v4, %v8031_v33  ;;  %v8036_v52 = vor.u32 %v8035_v0, %v8034_v18 }
 0x64b   :  { %v10353_v40 = vmin.u32 %v8181_v61, %v17336_v45  ;;  %v7891_v57 = vsel %vm17280_vm7, %v16986_v12, %v7888_v6  ;;  %v8039_v19 = vor.u32 %v8038_v14, %v8037_v42  ;;  %v8333_v30 = vadd.s32 1, %v10360_v60 }
 0x64c   :  { %12227 = vcosq.f32 %v7891_v57  ;;  %v17361_v26 = vsel %vm8117_vm0, %v8201_v44, %v8177_v38  ;;  %v8027_v31 = vshrl.u32 %v12345_v7, %v8026_v22  ;;  %v8042_v34 = vor.u32 %v8041_v24, %v8040_v15 }
 0x64d   :  { %v8183_v2 = vclz %v10353_v40  ;;  %12229 = vsinq.f32 %v7891_v57  ;;  %vm17366_vm1 = vcmp.le.f32.partialorder %v8115_v62, 0.7853982  ;;  %vm8043_vm2 = vcmp.lt.s32.totalorder %v17338_v20, 1 }
 0x64e   :  { %vm8045_vm3 = vcmp.lt.s32.totalorder %v17338_v20, 3  ;;  %vm8046_vm4 = vcmp.lt.s32.totalorder %v17338_v20, 4  ;;  %v8051_v41 = vsel %vm8043_vm2, %v8030_v16, %v8033_v63  ;;  %v8055_v47 = vsel %vm8043_vm2, %v8033_v63, %v8036_v52 }
 0x64f   :  { %v10354_v28 = vadd.s32 4294967294, %v8183_v2  ;;  %v8048_v25 = vsel %vm8046_vm4, %v8036_v52, 2102212464  ;;  %v8052_v38 = vsel %vm8046_vm4, %v8039_v19, 920167782  ;;  %vm8044_vm6 = vcmp.lt.s32.totalorder %v17338_v20, 2 }
 0x650   :  { %v8053_v62 = vsel %vm8045_vm3, %v8036_v52, %v8052_v38  ;;  %v8056_v35 = vsel %vm8046_vm4, %v8042_v34, 1326507024  ;;  %v8047_v22 = vsel %vm8043_vm2, %v8027_v31, %v8030_v16  ;;  %vm7898_vm7 = vcmp.lt.s32.totalorder %v17325_v46, 2  ;;  %v17395_v16 = vpop.f32.mrb[53].mxu0 }
 0x651   :  { %vm10355_vm5 = vcmp.lt.s32.totalorder %v10354_v28, 0  ;;  %v8054_v21 = vsel %vm8044_vm6, %v8051_v41, %v8053_v62  ;;  %v8057_v60 = vsel %vm8045_vm3, %v8039_v19, %v8056_v35  ;;  %v8049_v17 = vsel %vm8045_vm3, %v8033_v63, %v8048_v25 }
 0x652   :  { %v8186_v5 = vsel %vm10355_vm5, 0, %v10354_v28  ;;  %v8058_v4 = vsel %vm8044_vm6, %v8055_v47, %v8057_v60  ;;  %vm7895_vm8 = vweird.f32 %v16986_v12  ;;  %vm8334_vm11 = vcmp.gt.s32.totalorder %v8333_v30, 0  ;;  %v17418_v47 = vld [vmem:[%s18931_s2] ss:$0 sm:$0xff] }
 0x653   :  { %v8187_v44 = vsub.s32 32, %v8186_v5  ;;  %v8191_v37 = vsub.s32 4294967266, %v8186_v5  ;;  %v17387_v3 = vmul.u32.u64.low %v17357_v9, %v8058_v4  ;;  %v17388_v61 = vmul.u32.u64.high %v17357_v9, %v8058_v4, %v17387_v3 }
 0x654   :  { %v17391_v33 = vmul.u32.u64.low %v17357_v9, %v8054_v21  ;;  %v17392_v0 = vmul.u32.u64.high %v17357_v9, %v8054_v21, %v17391_v33  ;;  %v8188_v18 = vshll.u32 %v17336_v45, %v8186_v5  ;;  %vm7899_vm9 = vcmp.eq.s32.totalorder %v17325_v46, 0  ;;  %v17405_v45 = vpop.f32.mrb[52].mxu1 }
 0x655   :  { %v8189_v42 = vshrl.u32 %v17333_v29, %v8187_v44  ;;  %v8192_v14 = vadd.s32 127, %v8191_v37  ;;  %v8050_v6 = vsel %vm8044_vm6, %v8047_v22, %v8049_v17  ;;  %v8330_v40 = vand.u32 8388607, %v8323_v13 }
 0x656   :  { %v8335_v63 = vsel %vm8334_vm11, %v8333_v30, 0  ;;  %v12228_v15 = vpop.eup %12227  ;;  %vm7902_vm12 = vcmp.eq.s32.totalorder %v17325_v46, 2  ;;  %v8204_v2 = vsel %vm17366_vm1, 0, %v17361_v26  ;;  %vm8068_vm13 = vc.u32 %v17388_v61, %v17391_v33 }
 0x657   :  { %v8190_v57 = vor.u32 %v8189_v42, %v8188_v18  ;;  %v8193_v52 = vshll.u32 %v8192_v14, 23  ;;  %v8337_v19 = vand.u32 31, %v8335_v63  ;;  %v12230_v29 = vpop.eup %12229  ;;  %v7903_v24 = vxor.u32 2147483648, %v12228_v15 }
 0x658   :  { %v8069_v20 = vadd.s32 1, %v17392_v0  ;;  %v7900_v30 = vxor.u32 2147483648, %v12230_v29  ;;  %v8066_v34 = vmul.u32 %v17357_v9, %v8050_v6  ;;  %v8331_v38 = vor.u32 8388608, %v8330_v40 }
 0x659   :  { %v8194_v31 = vor.u32 4788187, %v8193_v52  ;;  %v8338_v28 = vsub.s32 32, %v8337_v19  ;;  %v7904_v25 = vsel %vm7902_vm12, %v7903_v24, %v12230_v29  ;;  %v17422_v26 = vadd.f32 %v17418_v47, %v17046_v1 }
 0x65a   :  { %v8070_v41 = vsel %vm8068_vm13, %v8069_v20, %v17392_v0  ;;  %v7901_v62 = vsel %vm7899_vm9, %v12228_v15, %v7900_v30  ;;  %v8197_v5 = vcvt.s32.f32 %v8190_v57  ;;  %v8208_v21 = vadd.s32 3, %v8204_v2 }
 0x65b   :  { %v8195_v35 = vand.u32 2147483647, %v8194_v31  ;;  %v8071_v9 = vadd.s32 %v8070_v41, %v8066_v34  ;;  %v7905_v22 = vsel %vm7898_vm7, %v7901_v62, %v7904_v25  ;;  %v8341_v60 = vshrl.u32 %v12346_v39, %v8338_v28 }
 0x65c   :  { %v8344_v44 = vshrl.u32 %v12347_v43, %v8338_v28  ;;  %v7906_v37 = vsel %vm7895_vm8, nan, %v7905_v22  ;;  %v8347_v4 = vshrl.u32 %v12348_v48, %v8338_v28  ;;  %v8336_v3 = vshrl.u32 %v8335_v63, 5 }
 0x65d   :  { %v8198_v17 = vmul.f32 %v8197_v5, %v8195_v35  ;;  %v8072_v1 = vadd.s32 536870912, %v8071_v9  ;;  %10133 = vst [vmem:[#allocation2 + $0x150] sm:$0xff] %v7906_v37  ;;  %v8340_v0 = vshll.u32 %v12345_v7, %v8337_v19  ;;  %v8343_v18 = vshll.u32 %v12346_v39, %v8337_v19  ;;  %v17455_v37 = vpop.f32.mrb[54].mxu0 }
 0x65e   :  { %v8350_v46 = vshrl.u32 %v12349_v49, %v8338_v28  ;;  %v8346_v6 = vshll.u32 %v12347_v43, %v8337_v19  ;;  %v8349_v40 = vshll.u32 %v12348_v48, %v8337_v19  ;;  %v8352_v57 = vshll.u32 %v12349_v49, %v8337_v19 }
 0x65f   :  { %v8199_v42 = vxor.u32 2147483648, %v8198_v17  ;;  %v8073_v14 = vshrl.u32 %v8072_v1, 30  ;;  %v8342_v12 = vor.u32 %v8341_v60, %v8340_v0  ;;  %v8345_v15 = vor.u32 %v8344_v44, %v8343_v18  ;;  %v17463_v18 = vpop.f32.mrb[53].mxu1 }
 0x660   :  { %v8353_v52 = vshrl.u32 %v12350_v58, %v8338_v28  ;;  %v8348_v24 = vor.u32 %v8347_v4, %v8346_v6  ;;  %v8351_v2 = vor.u32 %v8350_v46, %v8349_v40  ;;  %v17445_v30 = vand.u32 3, %v8208_v21 }
 0x661   :  { %v8200_v63 = vsel %vm8117_vm0, %v8199_v42, %v8198_v17  ;;  %v8074_v29 = vshll.u32 %v8073_v14, 30  ;;  %v17447_v34 = vshll.u32 %v8331_v38, 8  ;;  %v8339_v19 = vshrl.u32 %v12345_v7, %v8338_v28 }
 0x662   :  { %v8203_v20 = vsel %vm17366_vm1, %v17115_v59, %v8200_v63  ;;  %v8354_v31 = vor.u32 %v8353_v52, %v8352_v57  ;;  %vm8355_vm10 = vcmp.lt.s32.totalorder %v8336_v3, 1  ;;  %vm8356_vm14 = vcmp.lt.s32.totalorder %v8336_v3, 2 }
 0x663   :  { %12231 = vcosq.f32 %v8203_v20  ;;  %v17449_v25 = vsub.s32 %v8071_v9, %v8074_v29  ;;  %vm8358_vm15 = vcmp.lt.s32.totalorder %v8336_v3, 4  ;;  %v8363_v41 = vsel %vm8355_vm10, %v8342_v12, %v8345_v15 }
 0x664   :  { %12233 = vsinq.f32 %v8203_v20  ;;  %vm8357_vm0 = vcmp.lt.s32.totalorder %v8336_v3, 3  ;;  %v8360_v53 = vsel %vm8358_vm15, %v8348_v24, 2102212464  ;;  %v8364_v35 = vsel %vm8358_vm15, %v8351_v2, 920167782 }
 0x665   :  { %v8077_v62 = vsub.s32 0, %v17449_v25  ;;  %v8097_v5 = vsub.s32 4, %v8073_v14  ;;  %v8365_v22 = vsel %vm8357_vm0, %v8348_v24, %v8364_v35  ;;  %v8367_v21 = vsel %vm8355_vm10, %v8345_v15, %v8348_v24 }
 0x666   :  { %v8368_v38 = vsel %vm8358_vm15, %v8354_v31, 1326507024  ;;  %v8359_v9 = vsel %vm8355_vm10, %v8339_v19, %v8342_v12  ;;  %v8366_v44 = vsel %vm8356_vm14, %v8363_v41, %v8365_v22  ;;  %v8361_v17 = vsel %vm8357_vm0, %v8345_v15, %v8360_v53 }
 0x667   :  { %v10349_v60 = vmin.u32 %v8077_v62, %v17449_v25  ;;  %v8369_v28 = vsel %vm8357_vm0, %v8351_v2, %v8368_v38  ;;  %v17459_v4 = vmul.u32.u64.low %v17447_v34, %v8366_v44  ;;  %v17460_v0 = vmul.u32.u64.high %v17447_v34, %v8366_v44, %v17459_v4 }
 0x668   :  { %v8370_v1 = vsel %vm8356_vm14, %v8367_v21, %v8369_v28  ;;  %vm17467_vm1 = vcmp.le.f32.partialorder %v8011_v54, 0.7853982  ;;  %vm8013_vm2 = vcmp.lt.s32.totalorder %v17147_v50, 0  ;;  %vm8207_vm3 = vweird.f32 %v17115_v59 }
 0x669   :  { %v8079_v42 = vclz %v10349_v60  ;;  %v8098_v6 = vsel %vm8013_vm2, %v8097_v5, %v8073_v14  ;;  %v17476_v40 = vmul.u32.u64.low %v17447_v34, %v8370_v1  ;;  %v17477_v12 = vmul.u32.u64.high %v17447_v34, %v8370_v1, %v17476_v40 }
 0x66a   :  { %v8222_v15 = vand.u32 2139095040, %v17329_v23  ;;  %vm8210_vm4 = vcmp.lt.s32.totalorder %v17445_v30, 2  ;;  %v8362_v57 = vsel %vm8356_vm14, %v8359_v9, %v8361_v17  ;;  %v17484_v52 = vadd.f32 %v17422_v26, %v16927_v51 }
 0x66b   :  { %v10350_v54 = vadd.s32 4294967294, %v8079_v42  ;;  %vm8211_vm5 = vcmp.eq.s32.totalorder %v17445_v30, 0  ;;  %vm8214_vm6 = vcmp.eq.s32.totalorder %v17445_v30, 2  ;;  %v8381_v14 = vadd.s32 1, %v17460_v0 }
 0x66c   :  { %v8223_v63 = vshrl.u32 %v8222_v15, 23  ;;  %v8067_v24 = vadd.s32 %v17391_v33, %v17388_v61  ;;  %v8100_v3 = vsel %vm17467_vm1, 0, %v8098_v6  ;;  %v8219_v2 = vand.u32 2147483647, %v17329_v23 }
 0x66d   :  { %v12232_v29 = vpop.eup %12231  ;;  %vm10351_vm7 = vcmp.lt.s32.totalorder %v10350_v54, 0  ;;  %v8378_v31 = vmul.u32 %v17447_v34, %v8362_v57  ;;  %vm8380_vm8 = vc.u32 %v17477_v12, %v17459_v4  ;;  %v8534_v53 = vand.u32 2139095040, %v17484_v52 }
 0x66e   :  { %v12234_v20 = vpop.eup %12233  ;;  %v8215_v51 = vxor.u32 2147483648, %v12232_v29  ;;  %v8082_v26 = vsel %vm10351_vm7, 0, %v10350_v54  ;;  %v8382_v35 = vsel %vm8380_vm8, %v8381_v14, %v17460_v0  ;;  %v10356_v5 = vadd.s32 4294967169, %v8223_v63 }
 0x66f   :  { %v8212_v19 = vxor.u32 2147483648, %v12234_v20  ;;  %v8083_v41 = vsub.s32 32, %v8082_v26  ;;  %v8087_v62 = vsub.s32 4294967266, %v8082_v26  ;;  %v8084_v33 = vshll.u32 %v17449_v25, %v8082_v26 }
 0x670   :  { %v8216_v61 = vsel %vm8214_vm6, %v8215_v51, %v12234_v20  ;;  %v8383_v38 = vadd.s32 %v8382_v35, %v8378_v31  ;;  %v8104_v9 = vadd.s32 3, %v8100_v3  ;;  %v8229_v44 = vadd.s32 1, %v10356_v5 }
 0x671   :  { %v8213_v22 = vsel %vm8211_vm5, %v12232_v29, %v8212_v19  ;;  %v8085_v34 = vshrl.u32 %v8067_v24, %v8083_v41  ;;  %v8088_v21 = vadd.s32 127, %v8087_v62  ;;  %v11504_v28 = vadd.f32 %v17418_v47, %v17094_v11 }
 0x672   :  { %v8217_v60 = vsel %vm8210_vm4, %v8213_v22, %v8216_v61  ;;  %v8384_v0 = vadd.s32 536870912, %v8383_v38  ;;  %v8226_v42 = vand.u32 8388607, %v8219_v2  ;;  %vm8230_vm11 = vcmp.gt.s32.totalorder %v8229_v44, 0 }
 0x673   :  { %v8218_v25 = vsel %vm8207_vm3, nan, %v8217_v60  ;;  %v8086_v17 = vor.u32 %v8085_v34, %v8084_v33  ;;  %v8089_v1 = vshll.u32 %v8088_v21, 23  ;;  %v8231_v30 = vsel %vm8230_vm11, %v8229_v44, 0 }
 0x674   :  { %10136 = vst [vmem:[#allocation2 + $0x168] sm:$0xff] %v8218_v25  ;;  %v8385_v40 = vshrl.u32 %v8384_v0, 30  ;;  %v8535_v15 = vshrl.u32 %v8534_v53, 23  ;;  %v17512_v54 = vand.u32 3, %v8104_v9  ;;  %v8233_v57 = vand.u32 31, %v8231_v30 }
 0x675   :  { %v8090_v6 = vor.u32 4788187, %v8089_v1  ;;  %v8093_v11 = vcvt.s32.f32 %v8086_v17  ;;  %vm8325_vm9 = vcmp.lt.s32.totalorder %v17297_v32, 0  ;;  %v17516_v63 = vadd.f32 %v11504_v28, %v17038_v27 }
 0x676   :  { %v8386_v59 = vshll.u32 %v8385_v40, 30  ;;  %v17520_v29 = vadd.s32 %v17459_v4, %v17477_v12  ;;  %v8227_v24 = vor.u32 8388608, %v8226_v42  ;;  %v8234_v3 = vsub.s32 32, %v8233_v57 }
 0x677   :  { %v8091_v14 = vand.u32 2147483647, %v8090_v6  ;;  %v8531_v20 = vand.u32 2147483647, %v17484_v52  ;;  %v17525_v31 = vshrl.u32 %v8231_v30, 5  ;;  %v10368_v19 = vadd.s32 4294967169, %v8535_v15 }
 0x678   :  { %v17523_v26 = vsub.s32 %v8383_v38, %v8386_v59  ;;  %v8409_v41 = vsub.s32 4, %v8385_v40  ;;  %v8236_v62 = vshll.u32 %v12345_v7, %v8233_v57  ;;  %v8237_v27 = vshrl.u32 %v12346_v39, %v8234_v3 }
 0x679   :  { %v8094_v51 = vmul.f32 %v8093_v11, %v8091_v14  ;;  %v8240_v53 = vshrl.u32 %v12347_v43, %v8234_v3  ;;  %v8239_v12 = vshll.u32 %v12346_v39, %v8233_v57  ;;  %v8243_v33 = vshrl.u32 %v12348_v48, %v8234_v3 }
 0x67a   :  { %v8389_v4 = vsub.s32 0, %v17523_v26  ;;  %v8238_v35 = vor.u32 %v8237_v27, %v8236_v62  ;;  %v8242_v5 = vshll.u32 %v12347_v43, %v8233_v57  ;;  %v8245_v22 = vshll.u32 %v12348_v48, %v8233_v57 }
 0x67b   :  { %v8095_v61 = vxor.u32 2147483648, %v8094_v51  ;;  %v8246_v34 = vshrl.u32 %v12349_v49, %v8234_v3  ;;  %v8241_v60 = vor.u32 %v8240_v53, %v8239_v12  ;;  %v8248_v9 = vshll.u32 %v12349_v49, %v8233_v57 }
 0x67c   :  { %v10361_v38 = vmin.u32 %v8389_v4, %v17523_v26  ;;  %v8244_v28 = vor.u32 %v8243_v33, %v8242_v5  ;;  %v8249_v17 = vshrl.u32 %v12350_v58, %v8234_v3  ;;  %v17544_v0 = vshll.u32 %v8227_v24, 8  ;;  %v17582_v5 = vpop.f32.mrb[55].mxu0 }
 0x67d   :  { %v8096_v21 = vsel %vm8013_vm2, %v8095_v61, %v8094_v51  ;;  %v8247_v25 = vor.u32 %v8246_v34, %v8245_v22  ;;  %v8541_v42 = vadd.s32 1, %v10368_v19  ;;  %v17548_v6 = vsel %vm8325_vm9, %v8409_v41, %v8385_v40 }
 0x67e   :  { %v8099_v44 = vsel %vm17467_vm1, %v17147_v50, %v8096_v21  ;;  %v8391_v1 = vclz %v10361_v38  ;;  %v8235_v30 = vshrl.u32 %v12345_v7, %v8234_v3  ;;  %v8250_v15 = vor.u32 %v8249_v17, %v8248_v9 }
 0x67f   :  { %12235 = vcosq.f32 %v8099_v44  ;;  %vm17553_vm12 = vcmp.le.f32.partialorder %v8323_v13, 0.7853982  ;;  %vm8251_vm13 = vcmp.lt.s32.totalorder %v17525_v31, 1  ;;  %vm8253_vm10 = vcmp.lt.s32.totalorder %v17525_v31, 3 }
 0x680   :  { %12237 = vsinq.f32 %v8099_v44  ;;  %v10362_v57 = vadd.s32 4294967294, %v8391_v1  ;;  %vm8254_vm14 = vcmp.lt.s32.totalorder %v17525_v31, 4  ;;  %v8259_v11 = vsel %vm8251_vm13, %v8238_v35, %v8241_v60 }
 0x681   :  { %v8256_v14 = vsel %vm8254_vm14, %v8244_v28, 2102212464  ;;  %v8260_v40 = vsel %vm8254_vm14, %v8247_v25, 920167782  ;;  %v8263_v59 = vsel %vm8251_vm13, %v8241_v60, %v8244_v28  ;;  %vm8252_vm0 = vcmp.lt.s32.totalorder %v17525_v31, 2 }
 0x682   :  { %vm10363_vm15 = vcmp.lt.s32.totalorder %v10362_v57, 0  ;;  %v8261_v13 = vsel %vm8253_vm10, %v8244_v28, %v8260_v40  ;;  %v8264_v24 = vsel %vm8254_vm14, %v8250_v15, 1326507024  ;;  %v8255_v51 = vsel %vm8251_vm13, %v8235_v30, %v8238_v35 }
 0x683   :  { %v8394_v3 = vsel %vm10363_vm15, 0, %v10362_v57  ;;  %v8262_v19 = vsel %vm8252_vm0, %v8259_v11, %v8261_v13  ;;  %v8265_v41 = vsel %vm8253_vm10, %v8247_v25, %v8264_v24  ;;  %vm8106_vm1 = vcmp.lt.s32.totalorder %v17512_v54, 2 }
 0x684   :  { %v8395_v62 = vsub.s32 32, %v8394_v3  ;;  %v8399_v27 = vsub.s32 4294967266, %v8394_v3  ;;  %v8257_v53 = vsel %vm8253_vm10, %v8241_v60, %v8256_v14  ;;  %v8266_v61 = vsel %vm8252_vm0, %v8263_v59, %v8265_v41 }
 0x685   :  { %vm8103_vm2 = vweird.f32 %v17147_v50  ;;  %v17574_v4 = vmul.u32.u64.low %v17544_v0, %v8266_v61  ;;  %v17575_v12 = vmul.u32.u64.high %v17544_v0, %v8266_v61, %v17574_v4  ;;  %v8396_v22 = vshll.u32 %v17523_v26, %v8394_v3  ;;  %v17592_v26 = vpop.f32.mrb[54].mxu1 }
 0x686   :  { %v17578_v33 = vmul.u32.u64.low %v17544_v0, %v8262_v19  ;;  %v17579_v35 = vmul.u32.u64.high %v17544_v0, %v8262_v19, %v17578_v33  ;;  %v8397_v34 = vshrl.u32 %v17520_v29, %v8395_v62  ;;  %v8400_v21 = vadd.s32 127, %v8399_v27 }
 0x687   :  { %vm8542_vm3 = vcmp.gt.s32.totalorder %v8541_v42, 0  ;;  %vm8107_vm4 = vcmp.eq.s32.totalorder %v17512_v54, 0  ;;  %v8258_v38 = vsel %vm8252_vm0, %v8255_v51, %v8257_v53  ;;  %v8538_v60 = vand.u32 8388607, %v8531_v20 }
 0x688   :  { %v8543_v9 = vsel %vm8542_vm3, %v8541_v42, 0  ;;  %vm8110_vm5 = vcmp.eq.s32.totalorder %v17512_v54, 2  ;;  %v8398_v28 = vor.u32 %v8397_v34, %v8396_v22  ;;  %v8401_v25 = vshll.u32 %v8400_v21, 23 }
 0x689   :  { %v12236_v44 = vpop.eup %12235  ;;  %v8545_v17 = vand.u32 31, %v8543_v9  ;;  %v8412_v30 = vsel %vm17553_vm12, 0, %v17548_v6  ;;  %vm8276_vm6 = vc.u32 %v17575_v12, %v17578_v33  ;;  %v8277_v31 = vadd.s32 1, %v17579_v35 }
 0x68a   :  { %v12238_v29 = vpop.eup %12237  ;;  %v8111_v1 = vxor.u32 2147483648, %v12236_v44  ;;  %v8402_v15 = vor.u32 4788187, %v8401_v25  ;;  %v8274_v57 = vmul.u32 %v17544_v0, %v8258_v38  ;;  %v8539_v59 = vor.u32 8388608, %v8538_v60 }
 0x68b   :  { %v8108_v42 = vxor.u32 2147483648, %v12238_v29  ;;  %v8546_v14 = vsub.s32 32, %v8545_v17  ;;  %v8278_v40 = vsel %vm8276_vm6, %v8277_v31, %v17579_v35  ;;  %v17604_v13 = vadd.f32 %v17418_v47, %v17223_v56 }
 0x68c   :  { %v8112_v11 = vsel %vm8110_vm5, %v8111_v1, %v12238_v29  ;;  %v8403_v24 = vand.u32 2147483647, %v8402_v15  ;;  %v8405_v3 = vcvt.s32.f32 %v8398_v28  ;;  %v8279_v51 = vadd.s32 %v8278_v40, %v8274_v57 }
 0x68d   :  { %v8109_v6 = vsel %vm8107_vm4, %v12236_v44, %v8108_v42  ;;  %v8416_v41 = vadd.s32 3, %v8412_v30  ;;  %v8549_v0 = vshrl.u32 %v12346_v39, %v8546_v14  ;;  %v8552_v62 = vshrl.u32 %v12347_v43, %v8546_v14 }
 0x68e   :  { %v8113_v19 = vsel %vm8106_vm1, %v8109_v6, %v8112_v11  ;;  %v8406_v53 = vmul.f32 %v8405_v3, %v8403_v24  ;;  %v8280_v56 = vadd.s32 536870912, %v8279_v51  ;;  %v8555_v61 = vshrl.u32 %v12348_v48, %v8546_v14 }
 0x68f   :  { %v8114_v27 = vsel %vm8103_vm2, nan, %v8113_v19  ;;  %v8544_v4 = vshrl.u32 %v8543_v9, 5  ;;  %v8548_v35 = vshll.u32 %v12345_v7, %v8545_v17  ;;  %v8551_v22 = vshll.u32 %v12346_v39, %v8545_v17 }
 0x690   :  { %10135 = vst [vmem:[#allocation2 + $0x160] sm:$0xff] %v8114_v27  ;;  %v8558_v54 = vshrl.u32 %v12349_v49, %v8546_v14  ;;  %v8407_v34 = vxor.u32 2147483648, %v8406_v53  ;;  %v8281_v21 = vshrl.u32 %v8280_v56, 30  ;;  %v8554_v38 = vshll.u32 %v12347_v43, %v8545_v17  ;;  %v17637_v27 = vpop.f32.mrb[56].mxu0 }
 0x691   :  { %v8557_v60 = vshll.u32 %v12348_v48, %v8545_v17  ;;  %v8550_v50 = vor.u32 %v8549_v0, %v8548_v35  ;;  %v8553_v44 = vor.u32 %v8552_v62, %v8551_v22  ;;  %v8560_v28 = vshll.u32 %v12349_v49, %v8545_v17  ;;  %v17645_v22 = vpop.f32.mrb[55].mxu1 }
 0x692   :  { %v8561_v25 = vshrl.u32 %v12350_v58, %v8546_v14  ;;  %v8408_v9 = vsel %vm8325_vm9, %v8407_v34, %v8406_v53  ;;  %v8282_v29 = vshll.u32 %v8281_v21, 30  ;;  %v8556_v1 = vor.u32 %v8555_v61, %v8554_v38 }
 0x693   :  { %v8559_v30 = vor.u32 %v8558_v54, %v8557_v60  ;;  %v8411_v31 = vsel %vm17553_vm12, %v17297_v32, %v8408_v9  ;;  %v17627_v42 = vand.u32 3, %v8416_v41  ;;  %v17629_v57 = vshll.u32 %v8539_v59, 8 }
 0x694   :  { %v8562_v15 = vor.u32 %v8561_v25, %v8560_v28  ;;  %12239 = vcosq.f32 %v8411_v31  ;;  %v17631_v11 = vsub.s32 %v8279_v51, %v8282_v29  ;;  %v8547_v17 = vshrl.u32 %v12345_v7, %v8546_v14 }
 0x695   :  { %vm8563_vm7 = vcmp.lt.s32.totalorder %v8544_v4, 1  ;;  %12241 = vsinq.f32 %v8411_v31  ;;  %vm8564_vm8 = vcmp.lt.s32.totalorder %v8544_v4, 2  ;;  %vm8566_vm11 = vcmp.lt.s32.totalorder %v8544_v4, 4 }
 0x696   :  { %v8571_v40 = vsel %vm8563_vm7, %v8550_v50, %v8553_v44  ;;  %v8285_v6 = vsub.s32 0, %v17631_v11  ;;  %vm8565_vm9 = vcmp.lt.s32.totalorder %v8544_v4, 3  ;;  %v8568_v46 = vsel %vm8566_vm11, %v8556_v1, 2102212464 }
 0x697   :  { %v8572_v24 = vsel %vm8566_vm11, %v8559_v30, 920167782  ;;  %v8305_v3 = vsub.s32 4, %v8281_v21  ;;  %v8575_v41 = vsel %vm8563_vm7, %v8553_v44, %v8556_v1  ;;  %v8576_v59 = vsel %vm8566_vm11, %v8562_v15, 1326507024 }
 0x698   :  { %v8573_v19 = vsel %vm8565_vm9, %v8556_v1, %v8572_v24  ;;  %v10357_v0 = vmin.u32 %v8285_v6, %v17631_v11  ;;  %v8567_v51 = vsel %vm8563_vm7, %v8547_v17, %v8550_v50  ;;  %v8577_v14 = vsel %vm8565_vm9, %v8559_v30, %v8576_v59 }
 0x699   :  { %v8574_v62 = vsel %vm8564_vm8, %v8571_v40, %v8573_v19  ;;  %v8569_v53 = vsel %vm8565_vm9, %v8553_v44, %v8568_v46  ;;  %v8578_v56 = vsel %vm8564_vm8, %v8575_v41, %v8577_v14  ;;  %vm17649_vm12 = vcmp.le.f32.partialorder %v8219_v2, 0.7853982 }
 0x69a   :  { %v17641_v61 = vmul.u32.u64.low %v17629_v57, %v8574_v62  ;;  %v17642_v35 = vmul.u32.u64.high %v17629_v57, %v8574_v62, %v17641_v61  ;;  %vm8221_vm13 = vcmp.lt.s32.totalorder %v17329_v23, 0  ;;  %v8287_v34 = vclz %v10357_v0 }
 0x69b   :  { %vm8415_vm10 = vweird.f32 %v17297_v32  ;;  %v8306_v38 = vsel %vm8221_vm13, %v8305_v3, %v8281_v21  ;;  %v17658_v60 = vmul.u32.u64.low %v17629_v57, %v8578_v56  ;;  %v17659_v50 = vmul.u32.u64.high %v17629_v57, %v8578_v56, %v17658_v60 }
 0x69c   :  { %v8430_v44 = vand.u32 2139095040, %v17516_v63  ;;  %vm8418_vm14 = vcmp.lt.s32.totalorder %v17627_v42, 2  ;;  %v10358_v2 = vadd.s32 4294967294, %v8287_v34  ;;  %v8570_v28 = vsel %vm8564_vm8, %v8567_v51, %v8569_v53 }
 0x69d   :  { %v17666_v25 = vadd.f32 %v17604_v13, %v17086_v8  ;;  %vm8419_vm15 = vcmp.eq.s32.totalorder %v17627_v42, 0  ;;  %vm8422_vm0 = vcmp.eq.s32.totalorder %v17627_v42, 2  ;;  %v8589_v21 = vadd.s32 1, %v17642_v35 }
 0x69e   :  { %v8431_v9 = vshrl.u32 %v8430_v44, 23  ;;  %v12240_v29 = vpop.eup %12239  ;;  %v8275_v1 = vadd.s32 %v17578_v33, %v17575_v12  ;;  %vm10359_vm1 = vcmp.lt.s32.totalorder %v10358_v2, 0  ;;  %v8308_v4 = vsel %vm17649_vm12, 0, %v8306_v38 }
 0x69f   :  { %v8427_v30 = vand.u32 2147483647, %v17516_v63  ;;  %v12242_v31 = vpop.eup %12241  ;;  %v8423_v8 = vxor.u32 2147483648, %v12240_v29  ;;  %v8290_v13 = vsel %vm10359_vm1, 0, %v10358_v2  ;;  %v8586_v15 = vmul.u32 %v17629_v57, %v8570_v28 }
 0x6a0   :  { %vm8588_vm2 = vc.u32 %v17659_v50, %v17641_v61  ;;  %v8420_v17 = vxor.u32 2147483648, %v12242_v31  ;;  %v8291_v40 = vsub.s32 32, %v8290_v13  ;;  %v8295_v6 = vsub.s32 4294967266, %v8290_v13 }
 0x6a1   :  { %v8742_v46 = vand.u32 2139095040, %v17666_v25  ;;  %v8424_v12 = vsel %vm8422_vm0, %v8423_v8, %v12242_v31  ;;  %v8292_v33 = vshll.u32 %v17631_v11, %v8290_v13  ;;  %v8590_v24 = vsel %vm8588_vm2, %v8589_v21, %v17642_v35 }
 0x6a2   :  { %v10364_v3 = vadd.s32 4294967169, %v8431_v9  ;;  %v8421_v19 = vsel %vm8419_vm15, %v12240_v29, %v8420_v17  ;;  %v8293_v57 = vshrl.u32 %v8275_v1, %v8291_v40  ;;  %v8296_v41 = vadd.s32 127, %v8295_v6 }
 0x6a3   :  { %v8591_v59 = vadd.s32 %v8590_v24, %v8586_v15  ;;  %v8425_v0 = vsel %vm8418_vm14, %v8421_v19, %v8424_v12  ;;  %v8312_v51 = vadd.s32 3, %v8308_v4  ;;  %v11508_v14 = vadd.f32 %v17418_v47, %v17276_v55 }
 0x6a4   :  { %v8437_v62 = vadd.s32 1, %v10364_v3  ;;  %v8426_v11 = vsel %vm8415_vm10, nan, %v8425_v0  ;;  %v8294_v53 = vor.u32 %v8293_v57, %v8292_v33  ;;  %v8297_v56 = vshll.u32 %v8296_v41, 23 }
 0x6a5   :  { %v8592_v35 = vadd.s32 536870912, %v8591_v59  ;;  %10138 = vst [vmem:[#allocation2 + $0x178] sm:$0xff] %v8426_v11  ;;  %v8434_v34 = vand.u32 8388607, %v8427_v30  ;;  %v8743_v44 = vshrl.u32 %v8742_v46, 23  ;;  %v17694_v2 = vand.u32 3, %v8312_v51 }
 0x6a6   :  { %vm8438_vm3 = vcmp.gt.s32.totalorder %v8437_v62, 0  ;;  %v8298_v38 = vor.u32 4788187, %v8297_v56  ;;  %v8301_v55 = vcvt.s32.f32 %v8294_v53  ;;  %vm8533_vm4 = vcmp.lt.s32.totalorder %v17484_v52, 0 }
 0x6a7   :  { %v8593_v60 = vshrl.u32 %v8592_v35, 30  ;;  %v8439_v42 = vsel %vm8438_vm3, %v8437_v62, 0  ;;  %v17698_v9 = vadd.f32 %v11508_v14, %v17213_v36  ;;  %v17702_v29 = vadd.s32 %v17641_v61, %v17659_v50 }
 0x6a8   :  { %v8441_v28 = vand.u32 31, %v8439_v42  ;;  %v8299_v21 = vand.u32 2147483647, %v8298_v38  ;;  %v8435_v1 = vor.u32 8388608, %v8434_v34  ;;  %v8739_v31 = vand.u32 2147483647, %v17666_v25 }
 0x6a9   :  { %v8594_v32 = vshll.u32 %v8593_v60, 30  ;;  %v17707_v15 = vshrl.u32 %v8439_v42, 5  ;;  %v10376_v17 = vadd.s32 4294967169, %v8743_v44  ;;  %v8617_v40 = vsub.s32 4, %v8593_v60 }
 0x6aa   :  { %v8442_v4 = vsub.s32 32, %v8441_v28  ;;  %v8302_v8 = vmul.f32 %v8301_v55, %v8299_v21  ;;  %v8444_v6 = vshll.u32 %v12345_v7, %v8441_v28  ;;  %v8447_v50 = vshll.u32 %v12346_v39, %v8441_v28 }
 0x6ab   :  { %v17705_v13 = vsub.s32 %v8591_v59, %v8594_v32  ;;  %v8450_v3 = vshll.u32 %v12347_v43, %v8441_v28  ;;  %v8453_v19 = vshll.u32 %v12348_v48, %v8441_v28  ;;  %v8456_v51 = vshll.u32 %v12349_v49, %v8441_v28 }
 0x6ac   :  { %v8445_v36 = vshrl.u32 %v12346_v39, %v8442_v4  ;;  %v8448_v46 = vshrl.u32 %v12347_v43, %v8442_v4  ;;  %v8303_v12 = vxor.u32 2147483648, %v8302_v8  ;;  %v8451_v33 = vshrl.u32 %v12348_v48, %v8442_v4 }
 0x6ad   :  { %v8597_v61 = vsub.s32 0, %v17705_v13  ;;  %v8454_v57 = vshrl.u32 %v12349_v49, %v8442_v4  ;;  %v8457_v53 = vshrl.u32 %v12350_v58, %v8442_v4  ;;  %v17726_v35 = vshll.u32 %v8435_v1, 8 }
 0x6ae   :  { %v8446_v24 = vor.u32 %v8445_v36, %v8444_v6  ;;  %v8304_v41 = vsel %vm8221_vm13, %v8303_v12, %v8302_v8  ;;  %v8449_v0 = vor.u32 %v8448_v46, %v8447_v50  ;;  %v8452_v14 = vor.u32 %v8451_v33, %v8450_v3  ;;  %v17764_v3 = vpop.f32.mrb[57].mxu0 }
 0x6af   :  { %v10369_v59 = vmin.u32 %v8597_v61, %v17705_v13  ;;  %v8307_v62 = vsel %vm17649_vm12, %v17329_v23, %v8304_v41  ;;  %v8455_v11 = vor.u32 %v8454_v57, %v8453_v19  ;;  %v8749_v34 = vadd.s32 1, %v10376_v17 }
 0x6b0   :  { %12243 = vcosq.f32 %v8307_v62  ;;  %v17730_v38 = vsel %vm8533_vm4, %v8617_v40, %v8593_v60  ;;  %v8443_v42 = vshrl.u32 %v12345_v7, %v8442_v4  ;;  %v8458_v44 = vor.u32 %v8457_v53, %v8456_v51 }
 0x6b1   :  { %v8599_v56 = vclz %v10369_v59  ;;  %12245 = vsinq.f32 %v8307_v62  ;;  %vm17735_vm5 = vcmp.le.f32.partialorder %v8531_v20, 0.7853982  ;;  %vm8459_vm6 = vcmp.lt.s32.totalorder %v17707_v15, 1 }
 0x6b2   :  { %vm8461_vm7 = vcmp.lt.s32.totalorder %v17707_v15, 3  ;;  %vm8462_vm8 = vcmp.lt.s32.totalorder %v17707_v15, 4  ;;  %v8467_v55 = vsel %vm8459_vm6, %v8446_v24, %v8449_v0  ;;  %v8471_v32 = vsel %vm8459_vm6, %v8449_v0, %v8452_v14 }
 0x6b3   :  { %v10370_v28 = vadd.s32 4294967294, %v8599_v56  ;;  %v8464_v21 = vsel %vm8462_vm8, %v8452_v14, 2102212464  ;;  %v8468_v60 = vsel %vm8462_vm8, %v8455_v11, 920167782  ;;  %vm8460_vm9 = vcmp.lt.s32.totalorder %v17707_v15, 2 }
 0x6b4   :  { %v8469_v20 = vsel %vm8461_vm7, %v8452_v14, %v8468_v60  ;;  %v8472_v1 = vsel %vm8462_vm8, %v8458_v44, 1326507024  ;;  %v8463_v8 = vsel %vm8459_vm6, %v8443_v42, %v8446_v24  ;;  %vm8314_vm12 = vcmp.lt.s32.totalorder %v17694_v2, 2 }
 0x6b5   :  { %vm10371_vm11 = vcmp.lt.s32.totalorder %v10370_v28, 0  ;;  %v8470_v17 = vsel %vm8460_vm9, %v8467_v55, %v8469_v20  ;;  %v8473_v40 = vsel %vm8461_vm7, %v8455_v11, %v8472_v1  ;;  %v8465_v46 = vsel %vm8461_vm7, %v8449_v0, %v8464_v21 }
 0x6b6   :  { %v8602_v4 = vsel %vm10371_vm11, 0, %v10370_v28  ;;  %v8474_v12 = vsel %vm8460_vm9, %v8471_v32, %v8473_v40  ;;  %vm8311_vm13 = vweird.f32 %v17329_v23  ;;  %vm8750_vm10 = vcmp.gt.s32.totalorder %v8749_v34, 0 }
 0x6b7   :  { %v8603_v6 = vsub.s32 32, %v8602_v4  ;;  %v8607_v36 = vsub.s32 4294967266, %v8602_v4  ;;  %v17756_v61 = vmul.u32.u64.low %v17726_v35, %v8474_v12  ;;  %v17757_v50 = vmul.u32.u64.high %v17726_v35, %v8474_v12, %v17756_v61 }
 0x6b8   :  { %v17760_v33 = vmul.u32.u64.low %v17726_v35, %v8470_v17  ;;  %v17761_v24 = vmul.u32.u64.high %v17726_v35, %v8470_v17, %v17760_v33  ;;  %v8604_v19 = vshll.u32 %v17705_v13, %v8602_v4  ;;  %vm8315_vm14 = vcmp.eq.s32.totalorder %v17694_v2, 0  ;;  %v17774_v13 = vpop.f32.mrb[56].mxu1 }
 0x6b9   :  { %v8605_v57 = vshrl.u32 %v17702_v29, %v8603_v6  ;;  %v8608_v41 = vadd.s32 127, %v8607_v36  ;;  %v8466_v59 = vsel %vm8460_vm9, %v8463_v8, %v8465_v46  ;;  %v8746_v0 = vand.u32 8388607, %v8739_v31 }
 0x6ba   :  { %v8751_v51 = vsel %vm8750_vm10, %v8749_v34, 0  ;;  %v12244_v62 = vpop.eup %12243  ;;  %vm8318_vm15 = vcmp.eq.s32.totalorder %v17694_v2, 2  ;;  %v8620_v42 = vsel %vm17735_vm5, 0, %v17730_v38  ;;  %vm8484_vm0 = vc.u32 %v17757_v50, %v17760_v33 }
 0x6bb   :  { %v8606_v14 = vor.u32 %v8605_v57, %v8604_v19  ;;  %v8609_v11 = vshll.u32 %v8608_v41, 23  ;;  %v8753_v53 = vand.u32 31, %v8751_v51  ;;  %v12246_v29 = vpop.eup %12245  ;;  %v8319_v56 = vxor.u32 2147483648, %v12244_v62 }
 0x6bc   :  { %v8485_v15 = vadd.s32 1, %v17761_v24  ;;  %v8316_v34 = vxor.u32 2147483648, %v12246_v29  ;;  %v8482_v28 = vmul.u32 %v17726_v35, %v8466_v59  ;;  %v8747_v32 = vor.u32 8388608, %v8746_v0 }
 0x6bd   :  { %v8610_v44 = vor.u32 4788187, %v8609_v11  ;;  %v8754_v21 = vsub.s32 32, %v8753_v53  ;;  %v8320_v55 = vsel %vm8318_vm15, %v8319_v56, %v12246_v29  ;;  %v17786_v20 = vadd.f32 %v17418_v47, %v17405_v45 }
 0x6be   :  { %v8486_v60 = vsel %vm8484_vm0, %v8485_v15, %v17761_v24  ;;  %v8317_v38 = vsel %vm8315_vm14, %v12244_v62, %v8316_v34  ;;  %v8613_v4 = vcvt.s32.f32 %v8606_v14  ;;  %v8624_v40 = vadd.s32 3, %v8620_v42 }
 0x6bf   :  { %v8611_v1 = vand.u32 2147483647, %v8610_v44  ;;  %v8487_v8 = vadd.s32 %v8486_v60, %v8482_v28  ;;  %v8321_v17 = vsel %vm8314_vm12, %v8317_v38, %v8320_v55  ;;  %v8757_v35 = vshrl.u32 %v12346_v39, %v8754_v21 }
 0x6c0   :  { %v8760_v6 = vshrl.u32 %v12347_v43, %v8754_v21  ;;  %v8322_v36 = vsel %vm8311_vm13, nan, %v8321_v17  ;;  %v8763_v47 = vshrl.u32 %v12348_v48, %v8754_v21  ;;  %v8752_v12 = vshrl.u32 %v8751_v51, 5 }
 0x6c1   :  { %v8614_v46 = vmul.f32 %v8613_v4, %v8611_v1  ;;  %v8488_v45 = vadd.s32 536870912, %v8487_v8  ;;  %10137 = vst [vmem:[#allocation2 + $0x170] sm:$0xff] %v8322_v36  ;;  %v8756_v61 = vshll.u32 %v12345_v7, %v8753_v53  ;;  %v8759_v24 = vshll.u32 %v12346_v39, %v8753_v53 }
 0x6c2   :  { %v8766_v2 = vshrl.u32 %v12349_v49, %v8754_v21  ;;  %v8762_v41 = vshll.u32 %v12347_v43, %v8753_v53  ;;  %v8765_v59 = vshll.u32 %v12348_v48, %v8753_v53  ;;  %v8768_v62 = vshll.u32 %v12349_v49, %v8753_v53 }
 0x6c3   :  { %v8615_v19 = vxor.u32 2147483648, %v8614_v46  ;;  %v8489_v57 = vshrl.u32 %v8488_v45, 30  ;;  %v8758_v23 = vor.u32 %v8757_v35, %v8756_v61  ;;  %v8761_v0 = vor.u32 %v8760_v6, %v8759_v24  ;;  %v17819_v6 = vpop.f32.mrb[58].mxu0  ;;  %v17827_v61 = vpop.f32.mrb[57].mxu1 }
 0x6c4   :  { %v8769_v14 = vshrl.u32 %v12350_v58, %v8754_v21  ;;  %v8764_v29 = vor.u32 %v8763_v47, %v8762_v41  ;;  %v8767_v56 = vor.u32 %v8766_v2, %v8765_v59  ;;  %v17809_v15 = vand.u32 3, %v8624_v40 }
 0x6c5   :  { %v8616_v51 = vsel %vm8533_vm4, %v8615_v19, %v8614_v46  ;;  %v8490_v11 = vshll.u32 %v8489_v57, 30  ;;  %v17811_v44 = vshll.u32 %v8747_v32, 8  ;;  %v8755_v53 = vshrl.u32 %v12345_v7, %v8754_v21 }
 0x6c6   :  { %v8619_v42 = vsel %vm17735_vm5, %v17484_v52, %v8616_v51  ;;  %v8770_v34 = vor.u32 %v8769_v14, %v8768_v62  ;;  %vm8771_vm1 = vcmp.lt.s32.totalorder %v8752_v12, 1  ;;  %vm8772_vm2 = vcmp.lt.s32.totalorder %v8752_v12, 2 }
 0x6c7   :  { %12247 = vcosq.f32 %v8619_v42  ;;  %v17813_v28 = vsub.s32 %v8487_v8, %v8490_v11  ;;  %vm8774_vm3 = vcmp.lt.s32.totalorder %v8752_v12, 4  ;;  %v8779_v55 = vsel %vm8771_vm1, %v8758_v23, %v8761_v0 }
 0x6c8   :  { %12249 = vsinq.f32 %v8619_v42  ;;  %vm8773_vm4 = vcmp.lt.s32.totalorder %v8752_v12, 3  ;;  %v8776_v54 = vsel %vm8774_vm3, %v8764_v29, 2102212464  ;;  %v8780_v38 = vsel %vm8774_vm3, %v8767_v56, 920167782 }
 0x6c9   :  { %v8493_v60 = vsub.s32 0, %v17813_v28  ;;  %v8513_v1 = vsub.s32 4, %v8489_v57  ;;  %v8781_v4 = vsel %vm8773_vm4, %v8764_v29, %v8780_v38  ;;  %v8783_v17 = vsel %vm8771_vm1, %v8761_v0, %v8764_v29 }
 0x6ca   :  { %v8784_v32 = vsel %vm8774_vm3, %v8770_v34, 1326507024  ;;  %v8775_v8 = vsel %vm8771_vm1, %v8755_v53, %v8758_v23  ;;  %v8782_v35 = vsel %vm8772_vm2, %v8779_v55, %v8781_v4  ;;  %v8777_v36 = vsel %vm8773_vm4, %v8761_v0, %v8776_v54 }
 0x6cb   :  { %v10365_v40 = vmin.u32 %v8493_v60, %v17813_v28  ;;  %v8785_v21 = vsel %vm8773_vm4, %v8767_v56, %v8784_v32  ;;  %v17823_v45 = vmul.u32.u64.low %v17811_v44, %v8782_v35  ;;  %v17824_v47 = vmul.u32.u64.high %v17811_v44, %v8782_v35, %v17823_v45  ;;  %v17873_v35 = vld [vmem:[%s18931_s2] ss:$0 sm:$0xff] }
 0x6cc   :  { %v8786_v46 = vsel %vm8772_vm2, %v8783_v17, %v8785_v21  ;;  %vm17831_vm5 = vcmp.le.f32.partialorder %v8427_v30, 0.7853982  ;;  %vm8429_vm6 = vcmp.lt.s32.totalorder %v17516_v63, 0  ;;  %vm8623_vm7 = vweird.f32 %v17484_v52 }
 0x6cd   :  { %v8495_v2 = vclz %v10365_v40  ;;  %v8514_v19 = vsel %vm8429_vm6, %v8513_v1, %v8489_v57  ;;  %v17840_v41 = vmul.u32.u64.low %v17811_v44, %v8786_v46  ;;  %v17841_v59 = vmul.u32.u64.high %v17811_v44, %v8786_v46, %v17840_v41 }
 0x6ce   :  { %v8638_v23 = vand.u32 2139095040, %v17698_v9  ;;  %vm8626_vm8 = vcmp.lt.s32.totalorder %v17809_v15, 2  ;;  %v8778_v0 = vsel %vm8772_vm2, %v8775_v8, %v8777_v36  ;;  %v17848_v62 = vadd.f32 %v17786_v20, %v17268_v10 }
 0x6cf   :  { %v10366_v30 = vadd.s32 4294967294, %v8495_v2  ;;  %vm8627_vm11 = vcmp.eq.s32.totalorder %v17809_v15, 0  ;;  %vm8630_vm9 = vcmp.eq.s32.totalorder %v17809_v15, 2  ;;  %v8797_v57 = vadd.s32 1, %v17824_v47 }
 0x6d0   :  { %v8639_v14 = vshrl.u32 %v8638_v23, 23  ;;  %v8483_v11 = vadd.s32 %v17760_v33, %v17757_v50  ;;  %v8516_v12 = vsel %vm17831_vm5, 0, %v8514_v19  ;;  %v8635_v29 = vand.u32 2147483647, %v17698_v9 }
 0x6d1   :  { %v12248_v51 = vpop.eup %12247  ;;  %vm10367_vm12 = vcmp.lt.s32.totalorder %v10366_v30, 0  ;;  %v8794_v42 = vmul.u32 %v17811_v44, %v8778_v0  ;;  %vm8796_vm13 = vc.u32 %v17841_v59, %v17823_v45  ;;  %v8950_v60 = vand.u32 2139095040, %v17848_v62 }
 0x6d2   :  { %v12250_v56 = vpop.eup %12249  ;;  %v8631_v10 = vxor.u32 2147483648, %v12248_v51  ;;  %v8498_v20 = vsel %vm10367_vm12, 0, %v10366_v30  ;;  %v8798_v54 = vsel %vm8796_vm13, %v8797_v57, %v17824_v47  ;;  %v10372_v38 = vadd.s32 4294967169, %v8639_v14 }
 0x6d3   :  { %v8628_v34 = vxor.u32 2147483648, %v12250_v56  ;;  %v8499_v53 = vsub.s32 32, %v8498_v20  ;;  %v8503_v55 = vsub.s32 4294967266, %v8498_v20  ;;  %v8500_v33 = vshll.u32 %v17813_v28, %v8498_v20 }
 0x6d4   :  { %v8632_v50 = vsel %vm8630_vm9, %v8631_v10, %v12250_v56  ;;  %v8799_v17 = vadd.s32 %v8798_v54, %v8794_v42  ;;  %v8520_v40 = vadd.s32 3, %v8516_v12  ;;  %v8645_v8 = vadd.s32 1, %v10372_v38 }
 0x6d5   :  { %v8629_v1 = vsel %vm8627_vm11, %v12248_v51, %v8628_v34  ;;  %v8501_v44 = vshrl.u32 %v8483_v11, %v8499_v53  ;;  %v8504_v4 = vadd.s32 127, %v8503_v55  ;;  %v11512_v28 = vadd.f32 %v17873_v35, %v17463_v18 }
 0x6d6   :  { %v8633_v32 = vsel %vm8626_vm8, %v8629_v1, %v8632_v50  ;;  %v8800_v47 = vadd.s32 536870912, %v8799_v17  ;;  %v8642_v15 = vand.u32 8388607, %v8635_v29  ;;  %vm8646_vm10 = vcmp.gt.s32.totalorder %v8645_v8, 0 }
 0x6d7   :  { %v8634_v21 = vsel %vm8623_vm7, nan, %v8633_v32  ;;  %v8502_v36 = vor.u32 %v8501_v44, %v8500_v33  ;;  %v8505_v46 = vshll.u32 %v8504_v4, 23  ;;  %v8647_v41 = vsel %vm8646_vm10, %v8645_v8, 0 }
 0x6d8   :  { %10140 = vst [vmem:[#allocation2 + $0x188] sm:$0xff] %v8634_v21  ;;  %v8801_v19 = vshrl.u32 %v8800_v47, 30  ;;  %v8951_v23 = vshrl.u32 %v8950_v60, 23  ;;  %v17881_v30 = vand.u32 3, %v8520_v40  ;;  %v8649_v0 = vand.u32 31, %v8647_v41 }
 0x6d9   :  { %v8506_v2 = vor.u32 4788187, %v8505_v46  ;;  %v8509_v18 = vcvt.s32.f32 %v8502_v36  ;;  %vm8741_vm14 = vcmp.lt.s32.totalorder %v17666_v25, 0  ;;  %v17885_v14 = vadd.f32 %v11512_v28, %v17395_v16 }
 0x6da   :  { %v8802_v52 = vshll.u32 %v8801_v19, 30  ;;  %v17889_v51 = vadd.s32 %v17823_v45, %v17841_v59  ;;  %v8643_v11 = vor.u32 8388608, %v8642_v15  ;;  %v8650_v12 = vsub.s32 32, %v8649_v0 }
 0x6db   :  { %v8507_v57 = vand.u32 2147483647, %v8506_v2  ;;  %v8947_v56 = vand.u32 2147483647, %v17848_v62  ;;  %v17894_v42 = vshrl.u32 %v8647_v41, 5  ;;  %v10384_v34 = vadd.s32 4294967169, %v8951_v23 }
 0x6dc   :  { %v17892_v20 = vsub.s32 %v8799_v17, %v8802_v52  ;;  %v8825_v53 = vsub.s32 4, %v8801_v19  ;;  %v8652_v55 = vshll.u32 %v12345_v7, %v8649_v0  ;;  %v8653_v16 = vshrl.u32 %v12346_v39, %v8650_v12 }
 0x6dd   :  { %v8510_v10 = vmul.f32 %v8509_v18, %v8507_v57  ;;  %v8656_v60 = vshrl.u32 %v12347_v43, %v8650_v12  ;;  %v8655_v59 = vshll.u32 %v12346_v39, %v8649_v0  ;;  %v8659_v33 = vshrl.u32 %v12348_v48, %v8650_v12 }
 0x6de   :  { %v8805_v45 = vsub.s32 0, %v17892_v20  ;;  %v8654_v54 = vor.u32 %v8653_v16, %v8652_v55  ;;  %v8658_v38 = vshll.u32 %v12347_v43, %v8649_v0  ;;  %v8661_v1 = vshll.u32 %v12348_v48, %v8649_v0 }
 0x6df   :  { %v8511_v50 = vxor.u32 2147483648, %v8510_v10  ;;  %v8662_v44 = vshrl.u32 %v12349_v49, %v8650_v12  ;;  %v8657_v32 = vor.u32 %v8656_v60, %v8655_v59  ;;  %v8664_v40 = vshll.u32 %v12349_v49, %v8649_v0 }
 0x6e0   :  { %v10377_v17 = vmin.u32 %v8805_v45, %v17892_v20  ;;  %v8660_v28 = vor.u32 %v8659_v33, %v8658_v38  ;;  %v8665_v36 = vshrl.u32 %v12350_v58, %v8650_v12  ;;  %v17913_v47 = vshll.u32 %v8643_v11, 8  ;;  %v17951_v38 = vpop.f32.mrb[59].mxu0 }
 0x6e1   :  { %v8512_v4 = vsel %vm8429_vm6, %v8511_v50, %v8510_v10  ;;  %v8663_v21 = vor.u32 %v8662_v44, %v8661_v1  ;;  %v8957_v15 = vadd.s32 1, %v10384_v34  ;;  %v17917_v2 = vsel %vm8741_vm14, %v8825_v53, %v8801_v19 }
 0x6e2   :  { %v8515_v8 = vsel %vm17831_vm5, %v17516_v63, %v8512_v4  ;;  %v8807_v46 = vclz %v10377_v17  ;;  %v8651_v41 = vshrl.u32 %v12345_v7, %v8650_v12  ;;  %v8666_v23 = vor.u32 %v8665_v36, %v8664_v40 }
 0x6e3   :  { %12251 = vcosq.f32 %v8515_v8  ;;  %vm17922_vm15 = vcmp.le.f32.partialorder %v8739_v31, 0.7853982  ;;  %vm8667_vm0 = vcmp.lt.s32.totalorder %v17894_v42, 1  ;;  %vm8669_vm1 = vcmp.lt.s32.totalorder %v17894_v42, 3 }
 0x6e4   :  { %12253 = vsinq.f32 %v8515_v8  ;;  %v10378_v0 = vadd.s32 4294967294, %v8807_v46  ;;  %vm8670_vm2 = vcmp.lt.s32.totalorder %v17894_v42, 4  ;;  %v8675_v18 = vsel %vm8667_vm0, %v8654_v54, %v8657_v32 }
 0x6e5   :  { %v8672_v57 = vsel %vm8670_vm2, %v8660_v28, 2102212464  ;;  %v8676_v19 = vsel %vm8670_vm2, %v8663_v21, 920167782  ;;  %v8679_v52 = vsel %vm8667_vm0, %v8657_v32, %v8660_v28  ;;  %vm8668_vm4 = vcmp.lt.s32.totalorder %v17894_v42, 2 }
 0x6e6   :  { %vm10379_vm3 = vcmp.lt.s32.totalorder %v10378_v0, 0  ;;  %v8677_v31 = vsel %vm8669_vm1, %v8660_v28, %v8676_v19  ;;  %v8680_v11 = vsel %vm8670_vm2, %v8666_v23, 1326507024  ;;  %v8671_v10 = vsel %vm8667_vm0, %v8651_v41, %v8654_v54 }
 0x6e7   :  { %v8810_v12 = vsel %vm10379_vm3, 0, %v10378_v0  ;;  %v8678_v34 = vsel %vm8668_vm4, %v8675_v18, %v8677_v31  ;;  %v8681_v53 = vsel %vm8669_vm1, %v8663_v21, %v8680_v11  ;;  %vm8522_vm5 = vcmp.lt.s32.totalorder %v17881_v30, 2 }
 0x6e8   :  { %v8811_v55 = vsub.s32 32, %v8810_v12  ;;  %v8815_v16 = vsub.s32 4294967266, %v8810_v12  ;;  %v8673_v60 = vsel %vm8669_vm1, %v8657_v32, %v8672_v57  ;;  %v8682_v50 = vsel %vm8668_vm4, %v8679_v52, %v8681_v53 }
 0x6e9   :  { %vm8519_vm6 = vweird.f32 %v17516_v63  ;;  %v17943_v45 = vmul.u32.u64.low %v17913_v47, %v8682_v50  ;;  %v17944_v59 = vmul.u32.u64.high %v17913_v47, %v8682_v50, %v17943_v45  ;;  %v8812_v1 = vshll.u32 %v17892_v20, %v8810_v12  ;;  %v17961_v20 = vpop.f32.mrb[58].mxu1 }
 0x6ea   :  { %v17947_v33 = vmul.u32.u64.low %v17913_v47, %v8678_v34  ;;  %v17948_v54 = vmul.u32.u64.high %v17913_v47, %v8678_v34, %v17947_v33  ;;  %v8813_v44 = vshrl.u32 %v17889_v51, %v8811_v55  ;;  %v8816_v4 = vadd.s32 127, %v8815_v16 }
 0x6eb   :  { %vm8958_vm7 = vcmp.gt.s32.totalorder %v8957_v15, 0  ;;  %vm8523_vm8 = vcmp.eq.s32.totalorder %v17881_v30, 0  ;;  %v8674_v17 = vsel %vm8668_vm4, %v8671_v10, %v8673_v60  ;;  %v8954_v32 = vand.u32 8388607, %v8947_v56 }
 0x6ec   :  { %v8959_v40 = vsel %vm8958_vm7, %v8957_v15, 0  ;;  %vm8526_vm11 = vcmp.eq.s32.totalorder %v17881_v30, 2  ;;  %v8814_v28 = vor.u32 %v8813_v44, %v8812_v1  ;;  %v8817_v21 = vshll.u32 %v8816_v4, 23 }
 0x6ed   :  { %v12252_v8 = vpop.eup %12251  ;;  %v8961_v36 = vand.u32 31, %v8959_v40  ;;  %v8828_v41 = vsel %vm17922_vm15, 0, %v17917_v2  ;;  %vm8692_vm9 = vc.u32 %v17944_v59, %v17947_v33  ;;  %v8693_v42 = vadd.s32 1, %v17948_v54 }
 0x6ee   :  { %v12254_v51 = vpop.eup %12253  ;;  %v8527_v46 = vxor.u32 2147483648, %v12252_v8  ;;  %v8818_v23 = vor.u32 4788187, %v8817_v21  ;;  %v8690_v0 = vmul.u32 %v17913_v47, %v8674_v17  ;;  %v8955_v52 = vor.u32 8388608, %v8954_v32 }
 0x6ef   :  { %v8524_v15 = vxor.u32 2147483648, %v12254_v51  ;;  %v8962_v57 = vsub.s32 32, %v8961_v36  ;;  %v8694_v19 = vsel %vm8692_vm9, %v8693_v42, %v17948_v54  ;;  %v17973_v31 = vadd.f32 %v17873_v35, %v17592_v26 }
 0x6f0   :  { %v8528_v18 = vsel %vm8526_vm11, %v8527_v46, %v12254_v51  ;;  %v8819_v11 = vand.u32 2147483647, %v8818_v23  ;;  %v8821_v12 = vcvt.s32.f32 %v8814_v28  ;;  %v8695_v10 = vadd.s32 %v8694_v19, %v8690_v0 }
 0x6f1   :  { %v8525_v2 = vsel %vm8523_vm8, %v12252_v8, %v8524_v15  ;;  %v8832_v53 = vadd.s32 3, %v8828_v41  ;;  %v8965_v47 = vshrl.u32 %v12346_v39, %v8962_v57  ;;  %v8968_v55 = vshrl.u32 %v12347_v43, %v8962_v57 }
 0x6f2   :  { %v8529_v34 = vsel %vm8522_vm5, %v8525_v2, %v8528_v18  ;;  %v8822_v60 = vmul.f32 %v8821_v12, %v8819_v11  ;;  %v8696_v26 = vadd.s32 536870912, %v8695_v10  ;;  %v8971_v50 = vshrl.u32 %v12348_v48, %v8962_v57 }
 0x6f3   :  { %v8530_v16 = vsel %vm8519_vm6, nan, %v8529_v34  ;;  %v8960_v45 = vshrl.u32 %v8959_v40, 5  ;;  %v8964_v54 = vshll.u32 %v12345_v7, %v8961_v36  ;;  %v8967_v1 = vshll.u32 %v12346_v39, %v8961_v36 }
 0x6f4   :  { %10139 = vst [vmem:[#allocation2 + $0x180] sm:$0xff] %v8530_v16  ;;  %v8974_v30 = vshrl.u32 %v12349_v49, %v8962_v57  ;;  %v8823_v44 = vxor.u32 2147483648, %v8822_v60  ;;  %v8697_v4 = vshrl.u32 %v8696_v26, 30  ;;  %v8970_v17 = vshll.u32 %v12347_v43, %v8961_v36  ;;  %v18006_v16 = vpop.f32.mrb[60].mxu0 }
 0x6f5   :  { %v8973_v32 = vshll.u32 %v12348_v48, %v8961_v36  ;;  %v8966_v63 = vor.u32 %v8965_v47, %v8964_v54  ;;  %v8969_v8 = vor.u32 %v8968_v55, %v8967_v1  ;;  %v8976_v28 = vshll.u32 %v12349_v49, %v8961_v36  ;;  %v18014_v1 = vpop.f32.mrb[59].mxu1 }
 0x6f6   :  { %v8977_v21 = vshrl.u32 %v12350_v58, %v8962_v57  ;;  %v8824_v40 = vsel %vm8741_vm14, %v8823_v44, %v8822_v60  ;;  %v8698_v51 = vshll.u32 %v8697_v4, 30  ;;  %v8972_v46 = vor.u32 %v8971_v50, %v8970_v17 }
 0x6f7   :  { %v8975_v41 = vor.u32 %v8974_v30, %v8973_v32  ;;  %v8827_v42 = vsel %vm17922_vm15, %v17666_v25, %v8824_v40  ;;  %v17996_v15 = vand.u32 3, %v8832_v53  ;;  %v17998_v0 = vshll.u32 %v8955_v52, 8 }
 0x6f8   :  { %v8978_v23 = vor.u32 %v8977_v21, %v8976_v28  ;;  %12255 = vcosq.f32 %v8827_v42  ;;  %v18000_v18 = vsub.s32 %v8695_v10, %v8698_v51  ;;  %v8963_v36 = vshrl.u32 %v12345_v7, %v8962_v57 }
 0x6f9   :  { %vm8979_vm12 = vcmp.lt.s32.totalorder %v8960_v45, 1  ;;  %12257 = vsinq.f32 %v8827_v42  ;;  %vm8980_vm13 = vcmp.lt.s32.totalorder %v8960_v45, 2  ;;  %vm8982_vm10 = vcmp.lt.s32.totalorder %v8960_v45, 4 }
 0x6fa   :  { %v8987_v19 = vsel %vm8979_vm12, %v8966_v63, %v8969_v8  ;;  %v8701_v2 = vsub.s32 0, %v18000_v18  ;;  %vm8981_vm14 = vcmp.lt.s32.totalorder %v8960_v45, 3  ;;  %v8984_v24 = vsel %vm8982_vm10, %v8972_v46, 2102212464 }
 0x6fb   :  { %v8988_v11 = vsel %vm8982_vm10, %v8975_v41, 920167782  ;;  %v8721_v12 = vsub.s32 4, %v8697_v4  ;;  %v8991_v53 = vsel %vm8979_vm12, %v8969_v8, %v8972_v46  ;;  %v8992_v52 = vsel %vm8982_vm10, %v8978_v23, 1326507024 }
 0x6fc   :  { %v8989_v34 = vsel %vm8981_vm14, %v8972_v46, %v8988_v11  ;;  %v10373_v47 = vmin.u32 %v8701_v2, %v18000_v18  ;;  %v8983_v10 = vsel %vm8979_vm12, %v8963_v36, %v8966_v63  ;;  %v8993_v57 = vsel %vm8981_vm14, %v8975_v41, %v8992_v52 }
 0x6fd   :  { %v8990_v55 = vsel %vm8980_vm13, %v8987_v19, %v8989_v34  ;;  %v8985_v60 = vsel %vm8981_vm14, %v8969_v8, %v8984_v24  ;;  %v8994_v26 = vsel %vm8980_vm13, %v8991_v53, %v8993_v57  ;;  %vm18018_vm15 = vcmp.le.f32.partialorder %v8635_v29, 0.7853982 }
 0x6fe   :  { %v18010_v50 = vmul.u32.u64.low %v17998_v0, %v8990_v55  ;;  %v18011_v54 = vmul.u32.u64.high %v17998_v0, %v8990_v55, %v18010_v50  ;;  %vm8637_vm0 = vcmp.lt.s32.totalorder %v17698_v9, 0  ;;  %v8703_v44 = vclz %v10373_v47 }
 0x6ff   :  { %vm8831_vm1 = vweird.f32 %v17666_v25  ;;  %v8722_v17 = vsel %vm8637_vm0, %v8721_v12, %v8697_v4  ;;  %v18027_v32 = vmul.u32.u64.low %v17998_v0, %v8994_v26  ;;  %v18028_v63 = vmul.u32.u64.high %v17998_v0, %v8994_v26, %v18027_v32 }
 0x700   :  { %v8846_v8 = vand.u32 2139095040, %v17885_v14  ;;  %vm8834_vm2 = vcmp.lt.s32.totalorder %v17996_v15, 2  ;;  %v10374_v29 = vadd.s32 4294967294, %v8703_v44  ;;  %v8986_v28 = vsel %vm8980_vm13, %v8983_v10, %v8985_v60 }
 0x701   :  { %v18035_v21 = vadd.f32 %v17973_v31, %v17455_v37  ;;  %vm8835_vm3 = vcmp.eq.s32.totalorder %v17996_v15, 0  ;;  %vm8838_vm4 = vcmp.eq.s32.totalorder %v17996_v15, 2  ;;  %v9005_v4 = vadd.s32 1, %v18011_v54 }
 0x702   :  { %v8847_v40 = vshrl.u32 %v8846_v8, 23  ;;  %v12256_v51 = vpop.eup %12255  ;;  %v8691_v46 = vadd.s32 %v17947_v33, %v17944_v59  ;;  %vm10375_vm5 = vcmp.lt.s32.totalorder %v10374_v29, 0  ;;  %v8724_v45 = vsel %vm18018_vm15, 0, %v8722_v17 }
 0x703   :  { %v8843_v41 = vand.u32 2147483647, %v17885_v14  ;;  %v12258_v42 = vpop.eup %12257  ;;  %v8839_v37 = vxor.u32 2147483648, %v12256_v51  ;;  %v8706_v31 = vsel %vm10375_vm5, 0, %v10374_v29  ;;  %v9002_v23 = vmul.u32 %v17998_v0, %v8986_v28 }
 0x704   :  { %vm9004_vm6 = vc.u32 %v18028_v63, %v18010_v50  ;;  %v8836_v36 = vxor.u32 2147483648, %v12258_v42  ;;  %v8707_v19 = vsub.s32 32, %v8706_v31  ;;  %v8711_v2 = vsub.s32 4294967266, %v8706_v31 }
 0x705   :  { %v9158_v24 = vand.u32 2139095040, %v18035_v21  ;;  %v8840_v59 = vsel %vm8838_vm4, %v8839_v37, %v12258_v42  ;;  %v8708_v33 = vshll.u32 %v18000_v18, %v8706_v31  ;;  %v9006_v11 = vsel %vm9004_vm6, %v9005_v4, %v18011_v54 }
 0x706   :  { %v10380_v12 = vadd.s32 4294967169, %v8847_v40  ;;  %v8837_v34 = vsel %vm8835_vm3, %v12256_v51, %v8836_v36  ;;  %v8709_v0 = vshrl.u32 %v8691_v46, %v8707_v19  ;;  %v8712_v53 = vadd.s32 127, %v8711_v2 }
 0x707   :  { %v9007_v52 = vadd.s32 %v9006_v11, %v9002_v23  ;;  %v8841_v47 = vsel %vm8834_vm2, %v8837_v34, %v8840_v59  ;;  %v8728_v10 = vadd.s32 3, %v8724_v45  ;;  %v11516_v57 = vadd.f32 %v17873_v35, %v17645_v22 }
 0x708   :  { %v8853_v55 = vadd.s32 1, %v10380_v12  ;;  %v8842_v18 = vsel %vm8831_vm1, nan, %v8841_v47  ;;  %v8710_v60 = vor.u32 %v8709_v0, %v8708_v33  ;;  %v8713_v26 = vshll.u32 %v8712_v53, 23 }
 0x709   :  { %v9008_v54 = vadd.s32 536870912, %v9007_v52  ;;  %10142 = vst [vmem:[#allocation2 + $0x198] sm:$0xff] %v8842_v18  ;;  %v8850_v44 = vand.u32 8388607, %v8843_v41  ;;  %v9159_v8 = vshrl.u32 %v9158_v24, 23  ;;  %v18063_v29 = vand.u32 3, %v8728_v10 }
 0x70a   :  { %vm8854_vm7 = vcmp.gt.s32.totalorder %v8853_v55, 0  ;;  %v8714_v17 = vor.u32 4788187, %v8713_v26  ;;  %v8717_v22 = vcvt.s32.f32 %v8710_v60  ;;  %vm8949_vm8 = vcmp.lt.s32.totalorder %v17848_v62, 0 }
 0x70b   :  { %v9009_v32 = vshrl.u32 %v9008_v54, 30  ;;  %v8855_v15 = vsel %vm8854_vm7, %v8853_v55, 0  ;;  %v18067_v40 = vadd.f32 %v11516_v57, %v17582_v5  ;;  %v18071_v51 = vadd.s32 %v18010_v50, %v18028_v63 }
 0x70c   :  { %v8857_v28 = vand.u32 31, %v8855_v15  ;;  %v8715_v4 = vand.u32 2147483647, %v8714_v17  ;;  %v8851_v46 = vor.u32 8388608, %v8850_v44  ;;  %v9155_v42 = vand.u32 2147483647, %v18035_v21 }
 0x70d   :  { %v9010_v25 = vshll.u32 %v9009_v32, 30  ;;  %v18076_v23 = vshrl.u32 %v8855_v15, 5  ;;  %v10392_v36 = vadd.s32 4294967169, %v9159_v8  ;;  %v9033_v19 = vsub.s32 4, %v9009_v32 }
 0x70e   :  { %v8858_v45 = vsub.s32 32, %v8857_v28  ;;  %v8718_v37 = vmul.f32 %v8717_v22, %v8715_v4  ;;  %v8860_v2 = vshll.u32 %v12345_v7, %v8857_v28  ;;  %v8863_v63 = vshll.u32 %v12346_v39, %v8857_v28 }
 0x70f   :  { %v18074_v31 = vsub.s32 %v9007_v52, %v9010_v25  ;;  %v8866_v12 = vshll.u32 %v12347_v43, %v8857_v28  ;;  %v8869_v34 = vshll.u32 %v12348_v48, %v8857_v28  ;;  %v8872_v10 = vshll.u32 %v12349_v49, %v8857_v28 }
 0x710   :  { %v8861_v5 = vshrl.u32 %v12346_v39, %v8858_v45  ;;  %v8864_v24 = vshrl.u32 %v12347_v43, %v8858_v45  ;;  %v8719_v59 = vxor.u32 2147483648, %v8718_v37  ;;  %v8867_v33 = vshrl.u32 %v12348_v48, %v8858_v45 }
 0x711   :  { %v9013_v50 = vsub.s32 0, %v18074_v31  ;;  %v8870_v0 = vshrl.u32 %v12349_v49, %v8858_v45  ;;  %v8873_v60 = vshrl.u32 %v12350_v58, %v8858_v45  ;;  %v18095_v54 = vshll.u32 %v8851_v46, 8 }
 0x712   :  { %v8862_v11 = vor.u32 %v8861_v5, %v8860_v2  ;;  %v8720_v53 = vsel %vm8637_vm0, %v8719_v59, %v8718_v37  ;;  %v8865_v47 = vor.u32 %v8864_v24, %v8863_v63  ;;  %v8868_v57 = vor.u32 %v8867_v33, %v8866_v12  ;;  %v18133_v12 = vpop.f32.mrb[61].mxu0 }
 0x713   :  { %v10385_v52 = vmin.u32 %v9013_v50, %v18074_v31  ;;  %v8723_v55 = vsel %vm18018_vm15, %v17698_v9, %v8720_v53  ;;  %v8871_v18 = vor.u32 %v8870_v0, %v8869_v34  ;;  %v9165_v44 = vadd.s32 1, %v10392_v36 }
 0x714   :  { %12259 = vcosq.f32 %v8723_v55  ;;  %v18099_v17 = vsel %vm8949_vm8, %v9033_v19, %v9009_v32  ;;  %v8859_v15 = vshrl.u32 %v12345_v7, %v8858_v45  ;;  %v8874_v8 = vor.u32 %v8873_v60, %v8872_v10 }
 0x715   :  { %v9015_v26 = vclz %v10385_v52  ;;  %12261 = vsinq.f32 %v8723_v55  ;;  %vm18104_vm11 = vcmp.le.f32.partialorder %v8947_v56, 0.7853982  ;;  %vm8875_vm9 = vcmp.lt.s32.totalorder %v18076_v23, 1 }
 0x716   :  { %vm8877_vm12 = vcmp.lt.s32.totalorder %v18076_v23, 3  ;;  %vm8878_vm13 = vcmp.lt.s32.totalorder %v18076_v23, 4  ;;  %v8883_v22 = vsel %vm8875_vm9, %v8862_v11, %v8865_v47  ;;  %v8887_v25 = vsel %vm8875_vm9, %v8865_v47, %v8868_v57 }
 0x717   :  { %v10386_v28 = vadd.s32 4294967294, %v9015_v26  ;;  %v8880_v4 = vsel %vm8878_vm13, %v8868_v57, 2102212464  ;;  %v8884_v32 = vsel %vm8878_vm13, %v8871_v18, 920167782  ;;  %vm8876_vm14 = vcmp.lt.s32.totalorder %v18076_v23, 2 }
 0x718   :  { %v8885_v56 = vsel %vm8877_vm12, %v8868_v57, %v8884_v32  ;;  %v8888_v46 = vsel %vm8878_vm13, %v8874_v8, 1326507024  ;;  %v8879_v37 = vsel %vm8875_vm9, %v8859_v15, %v8862_v11  ;;  %vm8730_vm15 = vcmp.lt.s32.totalorder %v18063_v29, 2 }
 0x719   :  { %vm10387_vm10 = vcmp.lt.s32.totalorder %v10386_v28, 0  ;;  %v8886_v36 = vsel %vm8876_vm14, %v8883_v22, %v8885_v56  ;;  %v8889_v19 = vsel %vm8877_vm12, %v8871_v18, %v8888_v46  ;;  %v8881_v24 = vsel %vm8877_vm12, %v8865_v47, %v8880_v4 }
 0x71a   :  { %v9018_v45 = vsel %vm10387_vm10, 0, %v10386_v28  ;;  %v8890_v59 = vsel %vm8876_vm14, %v8887_v25, %v8889_v19  ;;  %vm8727_vm0 = vweird.f32 %v17698_v9  ;;  %vm9166_vm1 = vcmp.gt.s32.totalorder %v9165_v44, 0 }
 0x71b   :  { %v9019_v2 = vsub.s32 32, %v9018_v45  ;;  %v9023_v5 = vsub.s32 4294967266, %v9018_v45  ;;  %v18125_v50 = vmul.u32.u64.low %v18095_v54, %v8890_v59  ;;  %v18126_v63 = vmul.u32.u64.high %v18095_v54, %v8890_v59, %v18125_v50 }
 0x71c   :  { %v18129_v33 = vmul.u32.u64.low %v18095_v54, %v8886_v36  ;;  %v18130_v11 = vmul.u32.u64.high %v18095_v54, %v8886_v36, %v18129_v33  ;;  %v9020_v34 = vshll.u32 %v18074_v31, %v9018_v45  ;;  %vm8731_vm2 = vcmp.eq.s32.totalorder %v18063_v29, 0  ;;  %v18143_v31 = vpop.f32.mrb[60].mxu1 }
 0x71d   :  { %v9021_v0 = vshrl.u32 %v18071_v51, %v9019_v2  ;;  %v9024_v53 = vadd.s32 127, %v9023_v5  ;;  %v8882_v52 = vsel %vm8876_vm14, %v8879_v37, %v8881_v24  ;;  %v9162_v47 = vand.u32 8388607, %v9155_v42 }
 0x71e   :  { %v9167_v10 = vsel %vm9166_vm1, %v9165_v44, 0  ;;  %v12260_v55 = vpop.eup %12259  ;;  %vm8734_vm3 = vcmp.eq.s32.totalorder %v18063_v29, 2  ;;  %v9036_v15 = vsel %vm18104_vm11, 0, %v18099_v17  ;;  %vm8900_vm4 = vc.u32 %v18126_v63, %v18129_v33 }
 0x71f   :  { %v9022_v57 = vor.u32 %v9021_v0, %v9020_v34  ;;  %v9025_v18 = vshll.u32 %v9024_v53, 23  ;;  %v9169_v60 = vand.u32 31, %v9167_v10  ;;  %v12262_v51 = vpop.eup %12261  ;;  %v8735_v26 = vxor.u32 2147483648, %v12260_v55 }
 0x720   :  { %v8901_v23 = vadd.s32 1, %v18130_v11  ;;  %v8732_v44 = vxor.u32 2147483648, %v12262_v51  ;;  %v8898_v28 = vmul.u32 %v18095_v54, %v8882_v52  ;;  %v9163_v25 = vor.u32 8388608, %v9162_v47 }
 0x721   :  { %v9026_v8 = vor.u32 4788187, %v9025_v18  ;;  %v9170_v4 = vsub.s32 32, %v9169_v60  ;;  %v8736_v22 = vsel %vm8734_vm3, %v8735_v26, %v12262_v51  ;;  %v18155_v56 = vadd.f32 %v17873_v35, %v17774_v13 }
 0x722   :  { %v8902_v32 = vsel %vm8900_vm4, %v8901_v23, %v18130_v11  ;;  %v8733_v17 = vsel %vm8731_vm2, %v12260_v55, %v8732_v44  ;;  %v9029_v45 = vcvt.s32.f32 %v9022_v57  ;;  %v9040_v19 = vadd.s32 3, %v9036_v15 }
 0x723   :  { %v9027_v46 = vand.u32 2147483647, %v9026_v8  ;;  %v8903_v37 = vadd.s32 %v8902_v32, %v8898_v28  ;;  %v8737_v36 = vsel %vm8730_vm15, %v8733_v17, %v8736_v22  ;;  %v9173_v54 = vshrl.u32 %v12346_v39, %v9170_v4 }
 0x724   :  { %v9176_v2 = vshrl.u32 %v12347_v43, %v9170_v4  ;;  %v8738_v5 = vsel %vm8727_vm0, nan, %v8737_v36  ;;  %v9179_v59 = vshrl.u32 %v12348_v48, %v9170_v4  ;;  %v9168_v50 = vshrl.u32 %v9167_v10, 5 }
 0x725   :  { %v9030_v24 = vmul.f32 %v9029_v45, %v9027_v46  ;;  %v8904_v13 = vadd.s32 536870912, %v8903_v37  ;;  %10141 = vst [vmem:[#allocation2 + $0x190] sm:$0xff] %v8738_v5  ;;  %v9172_v11 = vshll.u32 %v12345_v7, %v9169_v60  ;;  %v9175_v34 = vshll.u32 %v12346_v39, %v9169_v60  ;;  %v18188_v5 = vpop.f32.mrb[62].mxu0 }
 0x726   :  { %v9182_v29 = vshrl.u32 %v12349_v49, %v9170_v4  ;;  %v9178_v52 = vshll.u32 %v12347_v43, %v9169_v60  ;;  %v9181_v47 = vshll.u32 %v12348_v48, %v9169_v60  ;;  %v9184_v57 = vshll.u32 %v12349_v49, %v9169_v60 }
 0x727   :  { %v9031_v0 = vxor.u32 2147483648, %v9030_v24  ;;  %v8905_v53 = vshrl.u32 %v8904_v13, 30  ;;  %v9174_v9 = vor.u32 %v9173_v54, %v9172_v11  ;;  %v9177_v55 = vor.u32 %v9176_v2, %v9175_v34  ;;  %v18196_v34 = vpop.f32.mrb[61].mxu1 }
 0x728   :  { %v9185_v18 = vshrl.u32 %v12350_v58, %v9170_v4  ;;  %v9180_v26 = vor.u32 %v9179_v59, %v9178_v52  ;;  %v9183_v15 = vor.u32 %v9182_v29, %v9181_v47  ;;  %v18178_v44 = vand.u32 3, %v9040_v19 }
 0x729   :  { %v9032_v10 = vsel %vm8949_vm8, %v9031_v0, %v9030_v24  ;;  %v8906_v51 = vshll.u32 %v8905_v53, 30  ;;  %v18180_v28 = vshll.u32 %v9163_v25, 8  ;;  %v9171_v60 = vshrl.u32 %v12345_v7, %v9170_v4 }
 0x72a   :  { %v9035_v23 = vsel %vm18104_vm11, %v17848_v62, %v9032_v10  ;;  %v9186_v8 = vor.u32 %v9185_v18, %v9184_v57  ;;  %vm9187_vm5 = vcmp.lt.s32.totalorder %v9168_v50, 1  ;;  %vm9188_vm6 = vcmp.lt.s32.totalorder %v9168_v50, 2 }
 0x72b   :  { %12263 = vcosq.f32 %v9035_v23  ;;  %v18182_v22 = vsub.s32 %v8903_v37, %v8906_v51  ;;  %vm9190_vm7 = vcmp.lt.s32.totalorder %v9168_v50, 4  ;;  %v9195_v32 = vsel %vm9187_vm5, %v9174_v9, %v9177_v55 }
 0x72c   :  { %12265 = vsinq.f32 %v9035_v23  ;;  %vm9189_vm8 = vcmp.lt.s32.totalorder %v9168_v50, 3  ;;  %v9192_v30 = vsel %vm9190_vm7, %v9180_v26, 2102212464  ;;  %v9196_v46 = vsel %vm9190_vm7, %v9183_v15, 920167782 }
 0x72d   :  { %v8909_v17 = vsub.s32 0, %v18182_v22  ;;  %v8929_v45 = vsub.s32 4, %v8905_v53  ;;  %v9197_v36 = vsel %vm9189_vm8, %v9180_v26, %v9196_v46  ;;  %v9199_v19 = vsel %vm9187_vm5, %v9177_v55, %v9180_v26 }
 0x72e   :  { %v9200_v25 = vsel %vm9190_vm7, %v9186_v8, 1326507024  ;;  %v9191_v37 = vsel %vm9187_vm5, %v9171_v60, %v9174_v9  ;;  %v9198_v2 = vsel %vm9188_vm6, %v9195_v32, %v9197_v36  ;;  %v9193_v24 = vsel %vm9189_vm8, %v9177_v55, %v9192_v30 }
 0x72f   :  { %v10381_v54 = vmin.u32 %v8909_v17, %v18182_v22  ;;  %v9201_v4 = vsel %vm9189_vm8, %v9183_v15, %v9200_v25  ;;  %v18192_v59 = vmul.u32.u64.low %v18180_v28, %v9198_v2  ;;  %v18193_v11 = vmul.u32.u64.high %v18180_v28, %v9198_v2, %v18192_v59 }
 0x730   :  { %v9202_v13 = vsel %vm9188_vm6, %v9199_v19, %v9201_v4  ;;  %vm18200_vm11 = vcmp.le.f32.partialorder %v8843_v41, 0.7853982  ;;  %vm8845_vm9 = vcmp.lt.s32.totalorder %v17885_v14, 0  ;;  %vm9039_vm12 = vweird.f32 %v17848_v62 }
 0x731   :  { %v8911_v0 = vclz %v10381_v54  ;;  %v8930_v52 = vsel %vm8845_vm9, %v8929_v45, %v8905_v53  ;;  %v18209_v47 = vmul.u32.u64.low %v18180_v28, %v9202_v13  ;;  %v18210_v9 = vmul.u32.u64.high %v18180_v28, %v9202_v13, %v18209_v47 }
 0x732   :  { %v9054_v55 = vand.u32 2139095040, %v18067_v40  ;;  %vm9042_vm13 = vcmp.lt.s32.totalorder %v18178_v44, 2  ;;  %v9194_v57 = vsel %vm9188_vm6, %v9191_v37, %v9193_v24  ;;  %v18217_v18 = vadd.f32 %v18155_v56, %v17637_v27 }
 0x733   :  { %v10382_v41 = vadd.s32 4294967294, %v8911_v0  ;;  %vm9043_vm10 = vcmp.eq.s32.totalorder %v18178_v44, 0  ;;  %vm9046_vm14 = vcmp.eq.s32.totalorder %v18178_v44, 2  ;;  %v9213_v53 = vadd.s32 1, %v18193_v11 }
 0x734   :  { %v9055_v10 = vshrl.u32 %v9054_v55, 23  ;;  %v8899_v26 = vadd.s32 %v18129_v33, %v18126_v63  ;;  %v8932_v50 = vsel %vm18200_vm11, 0, %v8930_v52  ;;  %v9051_v15 = vand.u32 2147483647, %v18067_v40 }
 0x735   :  { %v12264_v51 = vpop.eup %12263  ;;  %vm10383_vm15 = vcmp.lt.s32.totalorder %v10382_v41, 0  ;;  %v9210_v8 = vmul.u32 %v18180_v28, %v9194_v57  ;;  %vm9212_vm0 = vc.u32 %v18210_v9, %v18192_v59  ;;  %v9366_v30 = vand.u32 2139095040, %v18217_v18 }
 0x736   :  { %v12266_v23 = vpop.eup %12265  ;;  %v9047_v27 = vxor.u32 2147483648, %v12264_v51  ;;  %v8914_v56 = vsel %vm10383_vm15, 0, %v10382_v41  ;;  %v9214_v46 = vsel %vm9212_vm0, %v9213_v53, %v18193_v11  ;;  %v10388_v45 = vadd.s32 4294967169, %v9055_v10 }
 0x737   :  { %v9044_v60 = vxor.u32 2147483648, %v12266_v23  ;;  %v8915_v32 = vsub.s32 32, %v8914_v56  ;;  %v8919_v17 = vsub.s32 4294967266, %v8914_v56  ;;  %v8916_v33 = vshll.u32 %v18182_v22, %v8914_v56 }
 0x738   :  { %v9048_v63 = vsel %vm9046_vm14, %v9047_v27, %v12266_v23  ;;  %v9215_v25 = vadd.s32 %v9214_v46, %v9210_v8  ;;  %v8936_v37 = vadd.s32 3, %v8932_v50  ;;  %v9061_v2 = vadd.s32 1, %v10388_v45 }
 0x739   :  { %v9045_v36 = vsel %vm9043_vm10, %v12264_v51, %v9044_v60  ;;  %v8917_v28 = vshrl.u32 %v8899_v26, %v8915_v32  ;;  %v8920_v19 = vadd.s32 127, %v8919_v17  ;;  %v11520_v4 = vadd.f32 %v17873_v35, %v17827_v61 }
 0x73a   :  { %v9049_v54 = vsel %vm9042_vm13, %v9045_v36, %v9048_v63  ;;  %v9216_v11 = vadd.s32 536870912, %v9215_v25  ;;  %v9058_v0 = vand.u32 8388607, %v9051_v15  ;;  %vm9062_vm1 = vcmp.gt.s32.totalorder %v9061_v2, 0 }
 0x73b   :  { %v9050_v22 = vsel %vm9039_vm12, nan, %v9049_v54  ;;  %v8918_v24 = vor.u32 %v8917_v28, %v8916_v33  ;;  %v8921_v13 = vshll.u32 %v8920_v19, 23  ;;  %v9063_v44 = vsel %vm9062_vm1, %v9061_v2, 0 }
 0x73c   :  { %10144 = vst [vmem:[#allocation2 + $0x1a8] sm:$0xff] %v9050_v22  ;;  %v9217_v47 = vshrl.u32 %v9216_v11, 30  ;;  %v9367_v55 = vshrl.u32 %v9366_v30, 23  ;;  %v18245_v41 = vand.u32 3, %v8936_v37  ;;  %v9065_v57 = vand.u32 31, %v9063_v44 }
 0x73d   :  { %v8922_v52 = vor.u32 4788187, %v8921_v13  ;;  %v8925_v61 = vcvt.s32.f32 %v8918_v24  ;;  %vm9157_vm2 = vcmp.lt.s32.totalorder %v18035_v21, 0  ;;  %v18249_v35 = vadd.f32 %v11520_v4, %v17764_v3 }
 0x73e   :  { %v9218_v62 = vshll.u32 %v9217_v47, 30  ;;  %v18253_v10 = vadd.s32 %v18192_v59, %v18210_v9  ;;  %v9059_v51 = vor.u32 8388608, %v9058_v0  ;;  %v9066_v26 = vsub.s32 32, %v9065_v57 }
 0x73f   :  { %v8923_v53 = vand.u32 2147483647, %v8922_v52  ;;  %v9363_v50 = vand.u32 2147483647, %v18217_v18  ;;  %v18258_v56 = vshrl.u32 %v9063_v44, 5  ;;  %v10400_v8 = vadd.s32 4294967169, %v9367_v55 }
 0x740   :  { %v18256_v27 = vsub.s32 %v9215_v25, %v9218_v62  ;;  %v9241_v60 = vsub.s32 4, %v9217_v47  ;;  %v9068_v32 = vshll.u32 %v12345_v7, %v9065_v57  ;;  %v9069_v3 = vshrl.u32 %v12346_v39, %v9066_v26 }
 0x741   :  { %v8926_v23 = vmul.f32 %v8925_v61, %v8923_v53  ;;  %v9072_v17 = vshrl.u32 %v12347_v43, %v9066_v26  ;;  %v9071_v9 = vshll.u32 %v12346_v39, %v9065_v57  ;;  %v9075_v63 = vshrl.u32 %v12348_v48, %v9066_v26 }
 0x742   :  { %v9221_v59 = vsub.s32 0, %v18256_v27  ;;  %v9070_v33 = vor.u32 %v9069_v3, %v9068_v32  ;;  %v9074_v46 = vshll.u32 %v12347_v43, %v9065_v57  ;;  %v9077_v45 = vshll.u32 %v12348_v48, %v9065_v57 }
 0x743   :  { %v8927_v30 = vxor.u32 2147483648, %v8926_v23  ;;  %v9078_v36 = vshrl.u32 %v12349_v49, %v9066_v26  ;;  %v9073_v25 = vor.u32 %v9072_v17, %v9071_v9  ;;  %v9080_v54 = vshll.u32 %v12349_v49, %v9065_v57 }
 0x744   :  { %v10393_v19 = vmin.u32 %v9221_v59, %v18256_v27  ;;  %v9076_v2 = vor.u32 %v9075_v63, %v9074_v46  ;;  %v9081_v22 = vshrl.u32 %v12350_v58, %v9066_v26  ;;  %v18277_v13 = vshll.u32 %v9059_v51, 8 }
 0x745   :  { %v8928_v28 = vsel %vm8845_vm9, %v8927_v30, %v8926_v23  ;;  %v9079_v4 = vor.u32 %v9078_v36, %v9077_v45  ;;  %v9373_v11 = vadd.s32 1, %v10400_v8  ;;  %v18281_v0 = vsel %vm9157_vm2, %v9241_v60, %v9217_v47 }
 0x746   :  { %v8931_v37 = vsel %vm18200_vm11, %v17885_v14, %v8928_v28  ;;  %v9223_v24 = vclz %v10393_v19  ;;  %v9067_v52 = vshrl.u32 %v12345_v7, %v9066_v26  ;;  %v9082_v44 = vor.u32 %v9081_v22, %v9080_v54 }
 0x747   :  { %12267 = vcosq.f32 %v8931_v37  ;;  %vm18286_vm3 = vcmp.le.f32.partialorder %v9155_v42, 0.7853982  ;;  %vm9083_vm4 = vcmp.lt.s32.totalorder %v18258_v56, 1  ;;  %vm9085_vm5 = vcmp.lt.s32.totalorder %v18258_v56, 3 }
 0x748   :  { %12269 = vsinq.f32 %v8931_v37  ;;  %v10394_v55 = vadd.s32 4294967294, %v9223_v24  ;;  %vm9086_vm6 = vcmp.lt.s32.totalorder %v18258_v56, 4  ;;  %v9091_v53 = vsel %vm9083_vm4, %v9070_v33, %v9073_v25 }
 0x749   :  { %v9088_v57 = vsel %vm9086_vm6, %v9076_v2, 2102212464  ;;  %v9092_v47 = vsel %vm9086_vm6, %v9079_v4, 920167782  ;;  %v9095_v61 = vsel %vm9083_vm4, %v9073_v25, %v9076_v2  ;;  %vm9084_vm8 = vcmp.lt.s32.totalorder %v18258_v56, 2 }
 0x74a   :  { %vm10395_vm7 = vcmp.lt.s32.totalorder %v10394_v55, 0  ;;  %v9093_v42 = vsel %vm9085_vm5, %v9076_v2, %v9092_v47  ;;  %v9096_v62 = vsel %vm9086_vm6, %v9082_v44, 1326507024  ;;  %v9087_v26 = vsel %vm9083_vm4, %v9067_v52, %v9070_v33  ;;  %v18315_v33 = vpop.f32.mrb[63].mxu0 }
 0x74b   :  { %v9226_v51 = vsel %vm10395_vm7, 0, %v10394_v55  ;;  %v9094_v23 = vsel %vm9084_vm8, %v9091_v53, %v9093_v42  ;;  %v9097_v8 = vsel %vm9085_vm5, %v9079_v4, %v9096_v62  ;;  %vm8938_vm11 = vcmp.lt.s32.totalorder %v18245_v41, 2 }
 0x74c   :  { %v9227_v60 = vsub.s32 32, %v9226_v51  ;;  %v9231_v32 = vsub.s32 4294967266, %v9226_v51  ;;  %v9089_v3 = vsel %vm9085_vm5, %v9073_v25, %v9088_v57  ;;  %v9098_v17 = vsel %vm9084_vm8, %v9095_v61, %v9097_v8  ;;  %v18338_v61 = vld [vmem:[%s18931_s2] ss:$0 sm:$0xff]  ;;  %s12351_s2 = smov [#allocation2]  }
 0x74d   :  { %vm8935_vm9 = vweird.f32 %v17885_v14  ;;  %v18307_v30 = vmul.u32.u64.low %v18277_v13, %v9098_v17  ;;  %v18308_v59 = vmul.u32.u64.high %v18277_v13, %v9098_v17, %v18307_v30  ;;  %v9228_v46 = vshll.u32 %v18256_v27, %v9226_v51  ;;  %v18325_v27 = vpop.f32.mrb[62].mxu1  ;;  %s10160_s22 = sshll.u32 %s12351_s2, 4  ;;  %s10161_s22 = int_to_ptr.vmem [resolvable:$true] %s10160_s22 }
 0x74e   :  { %v18311_v9 = vmul.u32.u64.low %v18277_v13, %v9094_v23  ;;  %v18312_v63 = vmul.u32.u64.high %v18277_v13, %v9094_v23, %v18311_v9  ;;  %v9229_v45 = vshrl.u32 %v18253_v10, %v9227_v60  ;;  %v9232_v36 = vadd.s32 127, %v9231_v32  ;;  %s12321_s23 = scalar_lea.vmem %s10161_s22, 8192  ;;  %p12326_p1 = scmp.lt.s32.totalorder %s10161_s22, %s10161_s22 }
 0x74f   :  { %vm9374_vm12 = vcmp.gt.s32.totalorder %v9373_v11, 0  ;;  %vm8939_vm13 = vcmp.eq.s32.totalorder %v18245_v41, 0  ;;  %v9090_v28 = vsel %vm9084_vm8, %v9087_v26, %v9089_v3  ;;  %v9370_v19 = vand.u32 8388607, %v9363_v50  ;;  %p12322_p0 = scmp.ne.s32.totalorder %s10161_s22, %s12321_s23  ;;  %p12327_p2 = scmp.lt.s32.totalorder %s12321_s23, %s12321_s23 }
 0x750   :  { %v9375_v25 = vsel %vm9374_vm12, %v9373_v11, 0  ;;  %vm8942_vm10 = vcmp.eq.s32.totalorder %v18245_v41, 2  ;;  %v9230_v37 = vor.u32 %v9229_v45, %v9228_v46  ;;  %v9233_v2 = vshll.u32 %v9232_v36, 23 }
 0x751   :  { %v12268_v54 = vpop.eup %12267  ;;  %v9377_v4 = vand.u32 31, %v9375_v25  ;;  %v9244_v24 = vsel %vm18286_vm3, 0, %v18281_v0  ;;  %vm9108_vm14 = vc.u32 %v18308_v59, %v18311_v9  ;;  %v9109_v56 = vadd.s32 1, %v18312_v63  ;;  %p12328_p3 = por %p12327_p2, %p12326_p1 }
 0x752   :  { %v12270_v10 = vpop.eup %12269  ;;  %v8943_v22 = vxor.u32 2147483648, %v12268_v54  ;;  %v9234_v52 = vor.u32 4788187, %v9233_v2  ;;  %v9106_v44 = vmul.u32 %v18277_v13, %v9090_v28  ;;  %v9371_v47 = vor.u32 8388608, %v9370_v19 }
 0x753   :  { %v8940_v11 = vxor.u32 2147483648, %v12270_v10  ;;  %v9378_v55 = vsub.s32 32, %v9377_v4  ;;  %v9110_v53 = vsel %vm9108_vm14, %v9109_v56, %v18312_v63  ;;  %v18342_v0 = vadd.f32 %v18338_v61, %v17961_v20  ;;  %p12329_p4 = pnand %p12328_p3, %p12322_p0 }
 0x754   :  { %v8944_v57 = vsel %vm8942_vm10, %v8943_v22, %v12270_v10  ;;  %v9235_v62 = vand.u32 2147483647, %v9234_v52  ;;  %v9237_v51 = vcvt.s32.f32 %v9230_v37  ;;  %v9111_v13 = vadd.s32 %v9110_v53, %v9106_v44 }
 0x755   :  { %v8941_v42 = vsel %vm8939_vm13, %v12268_v54, %v8940_v11  ;;  %v9248_v23 = vadd.s32 3, %v9244_v24  ;;  %v9381_v8 = vshrl.u32 %v12346_v39, %v9378_v55  ;;  %v9384_v60 = vshrl.u32 %v12347_v43, %v9378_v55 }
 0x756   :  { %v8945_v26 = vsel %vm8938_vm11, %v8941_v42, %v8944_v57  ;;  %v9238_v3 = vmul.f32 %v9237_v51, %v9235_v62  ;;  %v9112_v20 = vadd.s32 536870912, %v9111_v13  ;;  %v9387_v17 = vshrl.u32 %v12348_v48, %v9378_v55 }
 0x757   :  { %v8946_v32 = vsel %vm8935_vm9, nan, %v8945_v26  ;;  %v9376_v30 = vshrl.u32 %v9375_v25, 5  ;;  %v9380_v63 = vshll.u32 %v12345_v7, %v9377_v4  ;;  %v9383_v46 = vshll.u32 %v12346_v39, %v9377_v4 }
 0x758   :  { %10143 = vst [vmem:[#allocation2 + $0x1a0] sm:$0xff] %v8946_v32  ;;  %v9390_v41 = vshrl.u32 %v12349_v49, %v9378_v55  ;;  %v9239_v45 = vxor.u32 2147483648, %v9238_v3  ;;  %v9113_v36 = vshrl.u32 %v9112_v20, 30  ;;  %v9386_v28 = vshll.u32 %v12347_v43, %v9377_v4 }
 0x759   :  { %v9389_v19 = vshll.u32 %v12348_v48, %v9377_v4  ;;  %v9382_v14 = vor.u32 %v9381_v8, %v9380_v63  ;;  %v9385_v54 = vor.u32 %v9384_v60, %v9383_v46  ;;  %v9392_v37 = vshll.u32 %v12349_v49, %v9377_v4  ;;  %v18381_v63 = vpop.f32.mrb[63].mxu1 }
 0x75a   :  { %v9393_v2 = vshrl.u32 %v12350_v58, %v9378_v55  ;;  %v9240_v25 = vsel %vm9157_vm2, %v9239_v45, %v9238_v3  ;;  %v9114_v10 = vshll.u32 %v9113_v36, 30  ;;  %v9388_v22 = vor.u32 %v9387_v17, %v9386_v28 }
 0x75b   :  { %v9391_v24 = vor.u32 %v9390_v41, %v9389_v19  ;;  %v9243_v56 = vsel %vm18286_vm3, %v18035_v21, %v9240_v25  ;;  %v18365_v11 = vand.u32 3, %v9248_v23  ;;  %v18367_v44 = vshll.u32 %v9371_v47, 8 }
 0x75c   :  { %v9394_v52 = vor.u32 %v9393_v2, %v9392_v37  ;;  %12271 = vcosq.f32 %v9243_v56  ;;  %v18369_v57 = vsub.s32 %v9111_v13, %v9114_v10  ;;  %v9379_v4 = vshrl.u32 %v12345_v7, %v9378_v55 }
 0x75d   :  { %vm9395_vm15 = vcmp.lt.s32.totalorder %v9376_v30, 1  ;;  %12273 = vsinq.f32 %v9243_v56  ;;  %vm9396_vm0 = vcmp.lt.s32.totalorder %v9376_v30, 2  ;;  %vm9398_vm1 = vcmp.lt.s32.totalorder %v9376_v30, 4 }
 0x75e   :  { %v9403_v53 = vsel %vm9395_vm15, %v9382_v14, %v9385_v54  ;;  %v9117_v42 = vsub.s32 0, %v18369_v57  ;;  %vm9397_vm2 = vcmp.lt.s32.totalorder %v9376_v30, 3  ;;  %v9400_v29 = vsel %vm9398_vm1, %v9388_v22, 2102212464 }
 0x75f   :  { %v9404_v62 = vsel %vm9398_vm1, %v9391_v24, 920167782  ;;  %v9137_v51 = vsub.s32 4, %v9113_v36  ;;  %v9407_v23 = vsel %vm9395_vm15, %v9385_v54, %v9388_v22  ;;  %v9408_v47 = vsel %vm9398_vm1, %v9394_v52, 1326507024 }
 0x760   :  { %v9405_v26 = vsel %vm9397_vm2, %v9388_v22, %v9404_v62  ;;  %v10389_v8 = vmin.u32 %v9117_v42, %v18369_v57  ;;  %v9399_v13 = vsel %vm9395_vm15, %v9379_v4, %v9382_v14  ;;  %v9409_v55 = vsel %vm9397_vm2, %v9391_v24, %v9408_v47 }
 0x761   :  { %v9406_v60 = vsel %vm9396_vm0, %v9403_v53, %v9405_v26  ;;  %v9401_v32 = vsel %vm9397_vm2, %v9385_v54, %v9400_v29  ;;  %v9410_v3 = vsel %vm9396_vm0, %v9407_v23, %v9409_v55  ;;  %vm18385_vm3 = vcmp.le.f32.partialorder %v9051_v15, 0.7853982 }
 0x762   :  { %v18377_v20 = vmul.u32.u64.low %v18367_v44, %v9406_v60  ;;  %v18378_v17 = vmul.u32.u64.high %v18367_v44, %v9406_v60, %v18377_v20  ;;  %vm9053_vm4 = vcmp.lt.s32.totalorder %v18067_v40, 0  ;;  %v9119_v41 = vclz %v10389_v8 }
 0x763   :  { %vm9247_vm5 = vweird.f32 %v18035_v21  ;;  %v9138_v45 = vsel %vm9053_vm4, %v9137_v51, %v9113_v36  ;;  %v18394_v28 = vmul.u32.u64.low %v18367_v44, %v9410_v3  ;;  %v18395_v19 = vmul.u32.u64.high %v18367_v44, %v9410_v3, %v18394_v28 }
 0x764   :  { %v9262_v14 = vand.u32 2139095040, %v18249_v35  ;;  %vm9250_vm6 = vcmp.lt.s32.totalorder %v18365_v11, 2  ;;  %v10390_v15 = vadd.s32 4294967294, %v9119_v41  ;;  %v9402_v54 = vsel %vm9396_vm0, %v9399_v13, %v9401_v32 }
 0x765   :  { %v18402_v37 = vadd.f32 %v18342_v0, %v17819_v6  ;;  %vm9251_vm7 = vcmp.eq.s32.totalorder %v18365_v11, 0  ;;  %vm9254_vm8 = vcmp.eq.s32.totalorder %v18365_v11, 2  ;;  %v9421_v36 = vadd.s32 1, %v18378_v17 }
 0x766   :  { %v9263_v2 = vshrl.u32 %v9262_v14, 23  ;;  %v12272_v25 = vpop.eup %12271  ;;  %v9107_v10 = vadd.s32 %v18311_v9, %v18308_v59  ;;  %vm10391_vm11 = vcmp.lt.s32.totalorder %v10390_v15, 0  ;;  %v9140_v30 = vsel %vm18385_vm3, 0, %v9138_v45 }
 0x767   :  { %v9259_v22 = vand.u32 2147483647, %v18249_v35  ;;  %v12274_v24 = vpop.eup %12273  ;;  %v9255_v6 = vxor.u32 2147483648, %v12272_v25  ;;  %v9122_v0 = vsel %vm10391_vm11, 0, %v10390_v15  ;;  %v9418_v56 = vmul.u32 %v18367_v44, %v9402_v54 }
 0x768   :  { %vm9420_vm9 = vc.u32 %v18395_v19, %v18377_v20  ;;  %v9252_v52 = vxor.u32 2147483648, %v12274_v24  ;;  %v9123_v4 = vsub.s32 32, %v9122_v0  ;;  %v9127_v53 = vsub.s32 4294967266, %v9122_v0 }
 0x769   :  { %v9574_v42 = vand.u32 2139095040, %v18402_v37  ;;  %v9256_v59 = vsel %vm9254_vm8, %v9255_v6, %v12274_v24  ;;  %v9124_v9 = vshll.u32 %v18369_v57, %v9122_v0  ;;  %v9422_v29 = vsel %vm9420_vm9, %v9421_v36, %v18378_v17 }
 0x76a   :  { %v10396_v62 = vadd.s32 4294967169, %v9263_v2  ;;  %v9253_v51 = vsel %vm9251_vm7, %v12272_v25, %v9252_v52  ;;  %v9125_v44 = vshrl.u32 %v9107_v10, %v9123_v4  ;;  %v9128_v26 = vadd.s32 127, %v9127_v53 }
 0x76b   :  { %v9423_v23 = vadd.s32 %v9422_v29, %v9418_v56  ;;  %v9257_v47 = vsel %vm9250_vm6, %v9253_v51, %v9256_v59  ;;  %v9144_v8 = vadd.s32 3, %v9140_v30  ;;  %v11524_v60 = vadd.f32 %v18338_v61, %v18014_v1 }
 0x76c   :  { %v9269_v13 = vadd.s32 1, %v10396_v62  ;;  %v9258_v57 = vsel %vm9247_vm5, nan, %v9257_v47  ;;  %v9126_v55 = vor.u32 %v9125_v44, %v9124_v9  ;;  %v9129_v32 = vshll.u32 %v9128_v26, 23 }
 0x76d   :  { %v9424_v3 = vadd.s32 536870912, %v9423_v23  ;;  %10146 = vst [vmem:[#allocation2 + $0x1b8] sm:$0xff] %v9258_v57  ;;  %v9266_v17 = vand.u32 8388607, %v9259_v22  ;;  %v9575_v28 = vshrl.u32 %v9574_v42, 23  ;;  %v18430_v14 = vand.u32 3, %v9144_v8 }
 0x76e   :  { %vm9270_vm12 = vcmp.gt.s32.totalorder %v9269_v13, 0  ;;  %v9130_v41 = vor.u32 4788187, %v9129_v32  ;;  %v9133_v1 = vcvt.s32.f32 %v9126_v55  ;;  %vm9365_vm13 = vcmp.lt.s32.totalorder %v18217_v18, 0 }
 0x76f   :  { %v9425_v45 = vshrl.u32 %v9424_v3, 30  ;;  %v9271_v11 = vsel %vm9270_vm12, %v9269_v13, 0  ;;  %v18434_v36 = vadd.f32 %v11524_v60, %v17951_v38  ;;  %v9419_v2 = vadd.s32 %v18377_v20, %v18395_v19 }
 0x770   :  { %v9273_v15 = vand.u32 31, %v9271_v11  ;;  %v9131_v54 = vand.u32 2147483647, %v9130_v41  ;;  %v9267_v25 = vor.u32 8388608, %v9266_v17  ;;  %v9571_v30 = vand.u32 2147483647, %v18402_v37 }
 0x771   :  { %v9426_v21 = vshll.u32 %v9425_v45, 30  ;;  %v9272_v0 = vshrl.u32 %v9271_v11, 5  ;;  %v10408_v56 = vadd.s32 4294967169, %v9575_v28  ;;  %v9449_v52 = vsub.s32 4, %v9425_v45 }
 0x772   :  { %v9274_v10 = vsub.s32 32, %v9273_v15  ;;  %v9134_v24 = vmul.f32 %v9133_v1, %v9131_v54  ;;  %v9276_v4 = vshll.u32 %v12345_v7, %v9273_v15  ;;  %v9279_v20 = vshll.u32 %v12346_v39, %v9273_v15 }
 0x773   :  { %v18439_v6 = vsub.s32 %v9423_v23, %v9426_v21  ;;  %v9282_v29 = vshll.u32 %v12347_v43, %v9273_v15  ;;  %v9285_v62 = vshll.u32 %v12348_v48, %v9273_v15  ;;  %v9288_v47 = vshll.u32 %v12349_v49, %v9273_v15 }
 0x774   :  { %v9277_v53 = vshrl.u32 %v12346_v39, %v9274_v10  ;;  %v9280_v38 = vshrl.u32 %v12347_v43, %v9274_v10  ;;  %v9135_v42 = vxor.u32 2147483648, %v9134_v24  ;;  %v9283_v19 = vshrl.u32 %v12348_v48, %v9274_v10 }
 0x775   :  { %v9429_v59 = vsub.s32 0, %v18439_v6  ;;  %v9286_v51 = vshrl.u32 %v12349_v49, %v9274_v10  ;;  %v9289_v57 = vshrl.u32 %v12350_v58, %v9274_v10  ;;  %v18458_v32 = vshll.u32 %v9267_v25, 8 }
 0x776   :  { %v9278_v9 = vor.u32 %v9277_v53, %v9276_v4  ;;  %v9136_v44 = vsel %vm9053_vm4, %v9135_v42, %v9134_v24  ;;  %v9281_v23 = vor.u32 %v9280_v38, %v9279_v20  ;;  %v9284_v13 = vor.u32 %v9283_v19, %v9282_v29 }
 0x777   :  { %v10401_v26 = vmin.u32 %v9429_v59, %v18439_v6  ;;  %v9139_v8 = vsel %vm18385_vm3, %v18067_v40, %v9136_v44  ;;  %v9287_v60 = vor.u32 %v9286_v51, %v9285_v62  ;;  %v9581_v3 = vadd.s32 1, %v10408_v56 }
 0x778   :  { %12275 = vcosq.f32 %v9139_v8  ;;  %v9450_v17 = vsel %vm9365_vm13, %v9449_v52, %v9425_v45  ;;  %v9275_v41 = vshrl.u32 %v12345_v7, %v9274_v10  ;;  %v9290_v11 = vor.u32 %v9289_v57, %v9288_v47 }
 0x779   :  { %v9431_v55 = vclz %v10401_v26  ;;  %12277 = vsinq.f32 %v9139_v8  ;;  %vm18465_vm10 = vcmp.le.f32.partialorder %v9363_v50, 0.7853982  ;;  %vm9291_vm14 = vcmp.lt.s32.totalorder %v9272_v0, 1 }
 0x77a   :  { %vm9293_vm15 = vcmp.lt.s32.totalorder %v9272_v0, 3  ;;  %vm9294_vm0 = vcmp.lt.s32.totalorder %v9272_v0, 4  ;;  %v9299_v54 = vsel %vm9291_vm14, %v9278_v9, %v9281_v23  ;;  %v9303_v21 = vsel %vm9291_vm14, %v9281_v23, %v9284_v13 }
 0x77b   :  { %v10402_v28 = vadd.s32 4294967294, %v9431_v55  ;;  %v9296_v15 = vsel %vm9294_vm0, %v9284_v13, 2102212464  ;;  %v9300_v1 = vsel %vm9294_vm0, %v9287_v60, 920167782  ;;  %vm9292_vm2 = vcmp.lt.s32.totalorder %v9272_v0, 2 }
 0x77c   :  { %v9301_v45 = vsel %vm9293_vm15, %v9284_v13, %v9300_v1  ;;  %v9304_v25 = vsel %vm9294_vm0, %v9290_v11, 1326507024  ;;  %v9295_v24 = vsel %vm9291_vm14, %v9275_v41, %v9278_v9  ;;  %vm9146_vm3 = vcmp.lt.s32.totalorder %v18430_v14, 2 }
 0x77d   :  { %vm10403_vm1 = vcmp.lt.s32.totalorder %v10402_v28, 0  ;;  %v9302_v50 = vsel %vm9292_vm2, %v9299_v54, %v9301_v45  ;;  %v9305_v56 = vsel %vm9293_vm15, %v9287_v60, %v9304_v25  ;;  %v9297_v53 = vsel %vm9293_vm15, %v9281_v23, %v9296_v15 }
 0x77e   :  { %v9434_v10 = vsel %vm10403_vm1, 0, %v10402_v28  ;;  %v9306_v38 = vsel %vm9292_vm2, %v9303_v21, %v9305_v56  ;;  %vm9143_vm4 = vweird.f32 %v18067_v40  ;;  %vm9582_vm5 = vcmp.gt.s32.totalorder %v9581_v3, 0 }
 0x77f   :  { %v9435_v52 = vsub.s32 32, %v9434_v10  ;;  %v9439_v4 = vsub.s32 4294967266, %v9434_v10  ;;  %v18477_v42 = vmul.u32.u64.low %v18458_v32, %v9306_v38  ;;  %v18478_v59 = vmul.u32.u64.high %v18458_v32, %v9306_v38, %v18477_v42 }
 0x780   :  { %v18481_v20 = vmul.u32.u64.low %v18458_v32, %v9302_v50  ;;  %v18482_v19 = vmul.u32.u64.high %v18458_v32, %v9302_v50, %v18481_v20  ;;  %v9436_v9 = vshll.u32 %v18439_v6, %v9434_v10  ;;  %vm9147_vm6 = vcmp.eq.s32.totalorder %v18430_v14, 0 }
 0x781   :  { %v9437_v29 = vshrl.u32 %v9419_v2, %v9435_v52  ;;  %v9440_v62 = vadd.s32 127, %v9439_v4  ;;  %v9298_v51 = vsel %vm9292_vm2, %v9295_v24, %v9297_v53  ;;  %v9578_v44 = vand.u32 8388607, %v9571_v30 }
 0x782   :  { %v9583_v26 = vsel %vm9582_vm5, %v9581_v3, 0  ;;  %v12276_v23 = vpop.eup %12275  ;;  %vm9150_vm7 = vcmp.eq.s32.totalorder %v18430_v14, 2  ;;  %v9452_v2 = vsel %vm18465_vm10, 0, %v9450_v17  ;;  %vm9316_vm8 = vc.u32 %v18478_v59, %v18481_v20 }
 0x783   :  { %v9438_v47 = vor.u32 %v9437_v29, %v9436_v9  ;;  %v9441_v8 = vshll.u32 %v9440_v62, 23  ;;  %v9585_v13 = vand.u32 31, %v9583_v26  ;;  %v12278_v60 = vpop.eup %12277  ;;  %v9151_v57 = vxor.u32 2147483648, %v12276_v23 }
 0x784   :  { %v9317_v6 = vadd.s32 1, %v18482_v19  ;;  %v9148_v0 = vxor.u32 2147483648, %v12278_v60  ;;  %v9314_v3 = vmul.u32 %v18458_v32, %v9298_v51  ;;  %v9579_v15 = vor.u32 8388608, %v9578_v44 }
 0x785   :  { %v9442_v55 = vor.u32 4788187, %v9441_v8  ;;  %v9586_v41 = vsub.s32 32, %v9585_v13  ;;  %v9152_v11 = vsel %vm9150_vm7, %v9151_v57, %v12278_v60  ;;  %v18500_v54 = vadd.f32 %v18338_v61, %v18143_v31 }
 0x786   :  { %v9318_v28 = vsel %vm9316_vm8, %v9317_v6, %v18482_v19  ;;  %v9149_v17 = vsel %vm9147_vm6, %v12276_v23, %v9148_v0  ;;  %v9445_v21 = vcvt.s32.f32 %v9438_v47  ;;  %v9456_v10 = vadd.s32 3, %v9452_v2 }
 0x787   :  { %v9443_v1 = vand.u32 2147483647, %v9442_v55  ;;  %v9319_v45 = vadd.s32 %v9318_v28, %v9314_v3  ;;  %v9153_v25 = vsel %vm9146_vm3, %v9149_v17, %v9152_v11  ;;  %v9589_v32 = vshrl.u32 %v12346_v39, %v9586_v41 }
 0x788   :  { %v9592_v24 = vshrl.u32 %v12347_v43, %v9586_v41  ;;  %v9154_v50 = vsel %vm9143_vm4, nan, %v9153_v25  ;;  %v9595_v52 = vshrl.u32 %v12348_v48, %v9586_v41  ;;  %v9584_v4 = vshrl.u32 %v9583_v26, 5 }
 0x789   :  { %v9446_v56 = vmul.f32 %v9445_v21, %v9443_v1  ;;  %v9320_v31 = vadd.s32 536870912, %v9319_v45  ;;  %10145 = vst [vmem:[#allocation2 + $0x1b0] sm:$0xff] %v9154_v50  ;;  %v9588_v53 = vshll.u32 %v12345_v7, %v9585_v13  ;;  %v9591_v38 = vshll.u32 %v12346_v39, %v9585_v13 }
 0x78a   :  { %v9598_v14 = vshrl.u32 %v12349_v49, %v9586_v41  ;;  %v9594_v9 = vshll.u32 %v12347_v43, %v9585_v13  ;;  %v9597_v29 = vshll.u32 %v12348_v48, %v9585_v13  ;;  %v9600_v51 = vshll.u32 %v12349_v49, %v9585_v13 }
 0x78b   :  { %v9447_v42 = vxor.u32 2147483648, %v9446_v56  ;;  %v9321_v19 = vshrl.u32 %v9320_v31, 30  ;;  %v9590_v40 = vor.u32 %v9589_v32, %v9588_v53  ;;  %v9593_v62 = vor.u32 %v9592_v24, %v9591_v38 }
 0x78c   :  { %v9601_v44 = vshrl.u32 %v12350_v58, %v9586_v41  ;;  %v9596_v47 = vor.u32 %v9595_v52, %v9594_v9  ;;  %v9599_v8 = vor.u32 %v9598_v14, %v9597_v29  ;;  %v18523_v57 = vand.u32 3, %v9456_v10 }
 0x78d   :  { %v9448_v26 = vsel %vm9365_vm13, %v9447_v42, %v9446_v56  ;;  %v9322_v23 = vshll.u32 %v9321_v19, 30  ;;  %v18525_v6 = vshll.u32 %v9579_v15, 8  ;;  %v9587_v13 = vshrl.u32 %v12345_v7, %v9586_v41 }
 0x78e   :  { %v9451_v60 = vsel %vm18465_vm10, %v18217_v18, %v9448_v26  ;;  %v9602_v2 = vor.u32 %v9601_v44, %v9600_v51  ;;  %vm9603_vm11 = vcmp.lt.s32.totalorder %v9584_v4, 1  ;;  %vm9604_vm9 = vcmp.lt.s32.totalorder %v9584_v4, 2 }
 0x78f   :  { %12279 = vcosq.f32 %v9451_v60  ;;  %v18527_v0 = vsub.s32 %v9319_v45, %v9322_v23  ;;  %vm9606_vm12 = vcmp.lt.s32.totalorder %v9584_v4, 4  ;;  %v9611_v55 = vsel %vm9603_vm11, %v9590_v40, %v9593_v62 }
 0x790   :  { %12281 = vsinq.f32 %v9451_v60  ;;  %vm9605_vm13 = vcmp.lt.s32.totalorder %v9584_v4, 3  ;;  %v9608_v46 = vsel %vm9606_vm12, %v9596_v47, 2102212464  ;;  %v9612_v11 = vsel %vm9606_vm12, %v9599_v8, 920167782 }
 0x791   :  { %v9325_v3 = vsub.s32 0, %v18527_v0  ;;  %v9345_v28 = vsub.s32 4, %v9321_v19  ;;  %v9613_v17 = vsel %vm9605_vm13, %v9596_v47, %v9612_v11  ;;  %v9615_v1 = vsel %vm9603_vm11, %v9593_v62, %v9596_v47 }
 0x792   :  { %v9616_v15 = vsel %vm9606_vm12, %v9602_v2, 1326507024  ;;  %v9607_v45 = vsel %vm9603_vm11, %v9587_v13, %v9590_v40  ;;  %v9614_v25 = vsel %vm9604_vm9, %v9611_v55, %v9613_v17  ;;  %v9609_v10 = vsel %vm9605_vm13, %v9593_v62, %v9608_v46 }
 0x793   :  { %v10397_v21 = vmin.u32 %v9325_v3, %v18527_v0  ;;  %v9617_v41 = vsel %vm9605_vm13, %v9599_v8, %v9616_v15  ;;  %v18535_v24 = vmul.u32.u64.low %v18525_v6, %v9614_v25  ;;  %v18536_v50 = vmul.u32.u64.high %v18525_v6, %v9614_v25, %v18535_v24 }
 0x794   :  { %v9618_v32 = vsel %vm9604_vm9, %v9615_v1, %v9617_v41  ;;  %vm18540_vm10 = vcmp.le.f32.partialorder %v9259_v22, 0.7853982  ;;  %vm9261_vm14 = vcmp.lt.s32.totalorder %v18249_v35, 0  ;;  %vm9455_vm15 = vweird.f32 %v18217_v18 }
 0x795   :  { %v9327_v31 = vclz %v10397_v21  ;;  %v9346_v52 = vsel %vm9261_vm14, %v9345_v28, %v9321_v19  ;;  %v18549_v53 = vmul.u32.u64.low %v18525_v6, %v9618_v32  ;;  %v18550_v38 = vmul.u32.u64.high %v18525_v6, %v9618_v32, %v18549_v53 }
 0x796   :  { %v9470_v14 = vand.u32 2139095040, %v18434_v36  ;;  %vm9458_vm0 = vcmp.lt.s32.totalorder %v18523_v57, 2  ;;  %v9610_v42 = vsel %vm9604_vm9, %v9607_v45, %v9609_v10  ;;  %v18557_v9 = vadd.f32 %v18500_v54, %v18006_v16 }
 0x797   :  { %v10398_v22 = vadd.s32 4294967294, %v9327_v31  ;;  %vm9459_vm1 = vcmp.eq.s32.totalorder %v18523_v57, 0  ;;  %vm9462_vm2 = vcmp.eq.s32.totalorder %v18523_v57, 2  ;;  %v9629_v19 = vadd.s32 1, %v18536_v50 }
 0x798   :  { %v9471_v29 = vshrl.u32 %v9470_v14, 23  ;;  %v9315_v62 = vadd.s32 %v18481_v20, %v18478_v59  ;;  %v9348_v4 = vsel %vm18540_vm10, 0, %v9346_v52  ;;  %v9467_v51 = vand.u32 2147483647, %v18434_v36 }
 0x799   :  { %v12280_v40 = vpop.eup %12279  ;;  %vm10399_vm3 = vcmp.lt.s32.totalorder %v10398_v22, 0  ;;  %v9626_v26 = vmul.u32 %v18525_v6, %v9610_v42  ;;  %vm9628_vm4 = vc.u32 %v18550_v38, %v18535_v24  ;;  %v9782_v60 = vand.u32 2139095040, %v18557_v9 }
 0x79a   :  { %v12282_v44 = vpop.eup %12281  ;;  %v9463_v16 = vxor.u32 2147483648, %v12280_v40  ;;  %v9330_v54 = vsel %vm10399_vm3, 0, %v10398_v22  ;;  %v9630_v2 = vsel %vm9628_vm4, %v9629_v19, %v18536_v50  ;;  %v10404_v13 = vadd.s32 4294967169, %v9471_v29 }
 0x79b   :  { %v9460_v23 = vxor.u32 2147483648, %v12282_v44  ;;  %v9331_v47 = vsub.s32 32, %v9330_v54  ;;  %v9335_v8 = vsub.s32 4294967266, %v9330_v54  ;;  %v9332_v20 = vshll.u32 %v18527_v0, %v9330_v54 }
 0x79c   :  { %v9464_v59 = vsel %vm9462_vm2, %v9463_v16, %v12282_v44  ;;  %v9631_v46 = vadd.s32 %v9630_v2, %v9626_v26  ;;  %v9352_v28 = vadd.s32 3, %v9348_v4  ;;  %v9477_v17 = vadd.s32 1, %v10404_v13 }
 0x79d   :  { %v9461_v55 = vsel %vm9459_vm1, %v12280_v40, %v9460_v23  ;;  %v9333_v3 = vshrl.u32 %v9315_v62, %v9331_v47  ;;  %v9336_v6 = vadd.s32 127, %v9335_v8  ;;  %v11528_v1 = vadd.f32 %v18338_v61, %v18196_v34 }
 0x79e   :  { %v9465_v11 = vsel %vm9458_vm0, %v9461_v55, %v9464_v59  ;;  %v9632_v45 = vadd.s32 536870912, %v9631_v46  ;;  %v9474_v25 = vand.u32 8388607, %v9467_v51  ;;  %vm9478_vm5 = vcmp.gt.s32.totalorder %v9477_v17, 0 }
 0x79f   :  { %v9466_v0 = vsel %vm9455_vm15, nan, %v9465_v11  ;;  %v9334_v15 = vor.u32 %v9333_v3, %v9332_v20  ;;  %v9337_v21 = vshll.u32 %v9336_v6, 23  ;;  %v9479_v57 = vsel %vm9478_vm5, %v9477_v17, 0 }
 0x7a0   :  { %10148 = vst [vmem:[#allocation2 + $0x1c8] sm:$0xff] %v9466_v0  ;;  %v9633_v10 = vshrl.u32 %v9632_v45, 30  ;;  %v9783_v32 = vshrl.u32 %v9782_v60, 23  ;;  %v18584_v50 = vand.u32 3, %v9352_v28  ;;  %v9481_v31 = vand.u32 31, %v9479_v57 }
 0x7a1   :  { %v9338_v41 = vor.u32 4788187, %v9337_v21  ;;  %v9341_v34 = vcvt.s32.f32 %v9334_v15  ;;  %vm9573_vm6 = vcmp.lt.s32.totalorder %v18402_v37, 0  ;;  %v18588_v53 = vadd.f32 %v11528_v1, %v18133_v12 }
 0x7a2   :  { %v9634_v18 = vshll.u32 %v9633_v10, 30  ;;  %v9627_v14 = vadd.s32 %v18535_v24, %v18550_v38  ;;  %v9475_v22 = vor.u32 8388608, %v9474_v25  ;;  %v9482_v42 = vsub.s32 32, %v9481_v31 }
 0x7a3   :  { %v9339_v52 = vand.u32 2147483647, %v9338_v41  ;;  %v9779_v19 = vand.u32 2147483647, %v18557_v9  ;;  %v9480_v62 = vshrl.u32 %v9479_v57, 5  ;;  %v10416_v4 = vadd.s32 4294967169, %v9783_v32 }
 0x7a4   :  { %v18592_v40 = vsub.s32 %v9631_v46, %v9634_v18  ;;  %v9657_v44 = vsub.s32 4, %v9633_v10  ;;  %v9484_v16 = vshll.u32 %v12345_v7, %v9481_v31  ;;  %v9485_v54 = vshrl.u32 %v12346_v39, %v9482_v42 }
 0x7a5   :  { %v9342_v29 = vmul.f32 %v9341_v34, %v9339_v52  ;;  %v9488_v26 = vshrl.u32 %v12347_v43, %v9482_v42  ;;  %v9487_v24 = vshll.u32 %v12346_v39, %v9481_v31  ;;  %v9491_v38 = vshrl.u32 %v12348_v48, %v9482_v42 }
 0x7a6   :  { %v9637_v23 = vsub.s32 0, %v18592_v40  ;;  %v9486_v47 = vor.u32 %v9485_v54, %v9484_v16  ;;  %v9490_v8 = vshll.u32 %v12347_v43, %v9481_v31  ;;  %v9493_v60 = vshll.u32 %v12348_v48, %v9481_v31 }
 0x7a7   :  { %v9343_v12 = vxor.u32 2147483648, %v9342_v29  ;;  %v9494_v59 = vshrl.u32 %v12349_v49, %v9482_v42  ;;  %v9489_v13 = vor.u32 %v9488_v26, %v9487_v24  ;;  %v9496_v55 = vshll.u32 %v12349_v49, %v9481_v31 }
 0x7a8   :  { %v10409_v2 = vmin.u32 %v9637_v23, %v18592_v40  ;;  %v9492_v6 = vor.u32 %v9491_v38, %v9490_v8  ;;  %v9497_v11 = vshrl.u32 %v12350_v58, %v9482_v42  ;;  %v18611_v17 = vshll.u32 %v9475_v22, 8 }
 0x7a9   :  { %v9344_v20 = vsel %vm9261_vm14, %v9343_v12, %v9342_v29  ;;  %v9495_v46 = vor.u32 %v9494_v59, %v9493_v60  ;;  %v9789_v1 = vadd.s32 1, %v10416_v4  ;;  %v9658_v0 = vsel %vm9573_vm6, %v9657_v44, %v9633_v10 }
 0x7aa   :  { %v9347_v3 = vsel %vm18540_vm10, %v18249_v35, %v9344_v20  ;;  %v9639_v28 = vclz %v10409_v2  ;;  %v9483_v15 = vshrl.u32 %v12345_v7, %v9482_v42  ;;  %v9498_v21 = vor.u32 %v9497_v11, %v9496_v55 }
 0x7ab   :  { %12283 = vcosq.f32 %v9347_v3  ;;  %vm18618_vm7 = vcmp.le.f32.partialorder %v9571_v30, 0.7853982  ;;  %vm9499_vm8 = vcmp.lt.s32.totalorder %v9480_v62, 1  ;;  %vm9501_vm11 = vcmp.lt.s32.totalorder %v9480_v62, 3 }
 0x7ac   :  { %12285 = vsinq.f32 %v9347_v3  ;;  %v10410_v45 = vadd.s32 4294967294, %v9639_v28  ;;  %vm9502_vm9 = vcmp.lt.s32.totalorder %v9480_v62, 4  ;;  %v9507_v41 = vsel %vm9499_vm8, %v9486_v47, %v9489_v13 }
 0x7ad   :  { %v9504_v25 = vsel %vm9502_vm9, %v9492_v6, 2102212464  ;;  %v9508_v57 = vsel %vm9502_vm9, %v9495_v46, 920167782  ;;  %v9511_v32 = vsel %vm9499_vm8, %v9489_v13, %v9492_v6  ;;  %vm9500_vm13 = vcmp.lt.s32.totalorder %v9480_v62, 2 }
 0x7ae   :  { %vm10411_vm12 = vcmp.lt.s32.totalorder %v10410_v45, 0  ;;  %v9509_v10 = vsel %vm9501_vm11, %v9492_v6, %v9508_v57  ;;  %v9512_v31 = vsel %vm9502_vm9, %v9498_v21, 1326507024  ;;  %v9503_v34 = vsel %vm9499_vm8, %v9483_v15, %v9486_v47 }
 0x7af   :  { %v9642_v52 = vsel %vm10411_vm12, 0, %v10410_v45  ;;  %v9510_v30 = vsel %vm9500_vm13, %v9507_v41, %v9509_v10  ;;  %v9513_v18 = vsel %vm9501_vm11, %v9495_v46, %v9512_v31  ;;  %vm9354_vm10 = vcmp.lt.s32.totalorder %v18584_v50, 2 }
 0x7b0   :  { %v9643_v22 = vsub.s32 32, %v9642_v52  ;;  %v9647_v42 = vsub.s32 4294967266, %v9642_v52  ;;  %v9505_v29 = vsel %vm9501_vm11, %v9489_v13, %v9504_v25  ;;  %v9514_v4 = vsel %vm9500_vm13, %v9511_v32, %v9513_v18 }
 0x7b1   :  { %vm9351_vm14 = vweird.f32 %v18249_v35  ;;  %v18630_v44 = vmul.u32.u64.low %v18611_v17, %v9514_v4  ;;  %v18631_v16 = vmul.u32.u64.high %v18611_v17, %v9514_v4, %v18630_v44  ;;  %v9644_v12 = vshll.u32 %v18592_v40, %v9642_v52 }
 0x7b2   :  { %v18634_v54 = vmul.u32.u64.low %v18611_v17, %v9510_v30  ;;  %v18635_v26 = vmul.u32.u64.high %v18611_v17, %v9510_v30, %v18634_v54  ;;  %v9645_v23 = vshrl.u32 %v9627_v14, %v9643_v22  ;;  %v9648_v24 = vadd.s32 127, %v9647_v42 }
 0x7b3   :  { %vm9790_vm15 = vcmp.gt.s32.totalorder %v9789_v1, 0  ;;  %vm9355_vm0 = vcmp.eq.s32.totalorder %v18584_v50, 0  ;;  %v9506_v38 = vsel %vm9500_vm13, %v9503_v34, %v9505_v29  ;;  %v9786_v47 = vand.u32 8388607, %v9779_v19 }
 0x7b4   :  { %v9791_v8 = vsel %vm9790_vm15, %v9789_v1, 0  ;;  %vm9358_vm1 = vcmp.eq.s32.totalorder %v18584_v50, 2  ;;  %v9646_v59 = vor.u32 %v9645_v23, %v9644_v12  ;;  %v9649_v20 = vshll.u32 %v9648_v24, 23 }
 0x7b5   :  { %v12284_v60 = vpop.eup %12283  ;;  %v9793_v2 = vand.u32 31, %v9791_v8  ;;  %v9660_v14 = vsel %vm18618_vm7, 0, %v9658_v0  ;;  %vm9524_vm2 = vc.u32 %v18631_v16, %v18634_v54  ;;  %v9525_v40 = vadd.s32 1, %v18635_v26 }
 0x7b6   :  { %v12286_v13 = vpop.eup %12285  ;;  %v9359_v55 = vxor.u32 2147483648, %v12284_v60  ;;  %v9650_v3 = vor.u32 4788187, %v9649_v20  ;;  %v9522_v6 = vmul.u32 %v18611_v17, %v9506_v38  ;;  %v9787_v1 = vor.u32 8388608, %v9786_v47 }
 0x7b7   :  { %v9356_v62 = vxor.u32 2147483648, %v12286_v13  ;;  %v9794_v46 = vsub.s32 32, %v9793_v2  ;;  %v9526_v28 = vsel %vm9524_vm2, %v9525_v40, %v18635_v26  ;;  %v18653_v15 = vadd.f32 %v18338_v61, %v18325_v27 }
 0x7b8   :  { %v9360_v11 = vsel %vm9358_vm1, %v9359_v55, %v12286_v13  ;;  %v9651_v21 = vand.u32 2147483647, %v9650_v3  ;;  %v9653_v45 = vcvt.s32.f32 %v9646_v59  ;;  %v9527_v25 = vadd.s32 %v9526_v28, %v9522_v6 }
 0x7b9   :  { %v9357_v0 = vsel %vm9355_vm0, %v12284_v60, %v9356_v62  ;;  %v9664_v57 = vadd.s32 3, %v9660_v14  ;;  %v9797_v17 = vshrl.u32 %v12346_v39, %v9794_v46  ;;  %v9800_v32 = vshrl.u32 %v12347_v43, %v9794_v46 }
 0x7ba   :  { %v9361_v41 = vsel %vm9354_vm10, %v9357_v0, %v9360_v11  ;;  %v9654_v31 = vmul.f32 %v9653_v45, %v9651_v21  ;;  %v9528_v27 = vadd.s32 536870912, %v9527_v25  ;;  %v9803_v52 = vshrl.u32 %v12348_v48, %v9794_v46 }
 0x7bb   :  { %v9362_v10 = vsel %vm9351_vm14, nan, %v9361_v41  ;;  %v9792_v34 = vshrl.u32 %v9791_v8, 5  ;;  %v9796_v30 = vshll.u32 %v12345_v7, %v9793_v2  ;;  %v9799_v18 = vshll.u32 %v12346_v39, %v9793_v2 }
 0x7bc   :  { %10147 = vst [vmem:[#allocation2 + $0x1c0] sm:$0xff] %v9362_v10  ;;  %v9806_v50 = vshrl.u32 %v12349_v49, %v9794_v46  ;;  %v9655_v22 = vxor.u32 2147483648, %v9654_v31  ;;  %v9529_v42 = vshrl.u32 %v9528_v27, 30  ;;  %v9802_v29 = vshll.u32 %v12347_v43, %v9793_v2 }
 0x7bd   :  { %v9805_v4 = vshll.u32 %v12348_v48, %v9793_v2  ;;  %v9798_v35 = vor.u32 %v9797_v17, %v9796_v30  ;;  %v9801_v44 = vor.u32 %v9800_v32, %v9799_v18  ;;  %v9808_v26 = vshll.u32 %v12349_v49, %v9793_v2 }
 0x7be   :  { %v9809_v12 = vshrl.u32 %v12350_v58, %v9794_v46  ;;  %v9656_v23 = vsel %vm9573_vm6, %v9655_v22, %v9654_v31  ;;  %v9530_v24 = vshll.u32 %v9529_v42, 30  ;;  %v9804_v38 = vor.u32 %v9803_v52, %v9802_v29 }
 0x7bf   :  { %v9807_v47 = vor.u32 %v9806_v50, %v9805_v4  ;;  %v9659_v8 = vsel %vm18618_vm7, %v18402_v37, %v9656_v23  ;;  %v18676_v60 = vand.u32 3, %v9664_v57  ;;  %v9827_v20 = vshll.u32 %v9787_v1, 8 }
 0x7c0   :  { %v9810_v59 = vor.u32 %v9809_v12, %v9808_v26  ;;  %12287 = vcosq.f32 %v9659_v8  ;;  %v18678_v13 = vsub.s32 %v9527_v25, %v9530_v24  ;;  %v9795_v2 = vshrl.u32 %v12345_v7, %v9794_v46 }
 0x7c1   :  { %vm9811_vm3 = vcmp.lt.s32.totalorder %v9792_v34, 1  ;;  %12289 = vsinq.f32 %v9659_v8  ;;  %vm9812_vm4 = vcmp.lt.s32.totalorder %v9792_v34, 2  ;;  %vm9814_vm5 = vcmp.lt.s32.totalorder %v9792_v34, 4 }
 0x7c2   :  { %v9819_v55 = vsel %vm9811_vm3, %v9798_v35, %v9801_v44  ;;  %v9533_v14 = vsub.s32 0, %v18678_v13  ;;  %vm9813_vm6 = vcmp.lt.s32.totalorder %v9792_v34, 3  ;;  %v9816_v40 = vsel %vm9814_vm5, %v9804_v38, 2102212464 }
 0x7c3   :  { %v9820_v56 = vsel %vm9814_vm5, %v9807_v47, 920167782  ;;  %v9553_v62 = vsub.s32 4, %v9529_v42  ;;  %v9823_v6 = vsel %vm9811_vm3, %v9801_v44, %v9804_v38  ;;  %v9824_v11 = vsel %vm9814_vm5, %v9810_v59, 1326507024 }
 0x7c4   :  { %v9821_v3 = vsel %vm9813_vm6, %v9804_v38, %v9820_v56  ;;  %v10405_v28 = vmin.u32 %v9533_v14, %v18678_v13  ;;  %v9815_v1 = vsel %vm9811_vm3, %v9795_v2, %v9798_v35  ;;  %v9825_v46 = vsel %vm9813_vm6, %v9807_v47, %v9824_v11 }
 0x7c5   :  { %v9822_v0 = vsel %vm9812_vm4, %v9819_v55, %v9821_v3  ;;  %v9817_v21 = vsel %vm9813_vm6, %v9801_v44, %v9816_v40  ;;  %v9826_v45 = vsel %vm9812_vm4, %v9823_v6, %v9825_v46  ;;  %vm18691_vm7 = vcmp.le.f32.partialorder %v9467_v51, 0.7853982 }
 0x7c6   :  { %v18685_v25 = vmul.u32.u64.low %v9827_v20, %v9822_v0  ;;  %v18686_v41 = vmul.u32.u64.high %v9827_v20, %v9822_v0, %v18685_v25  ;;  %vm9469_vm8 = vcmp.lt.s32.totalorder %v18434_v36, 0  ;;  %v9535_v17 = vclz %v10405_v28 }
 0x7c7   :  { %v9554_v32 = vsel %vm9469_vm8, %v9553_v62, %v9529_v42  ;;  %v18698_v10 = vmul.u32.u64.low %v9827_v20, %v9826_v45  ;;  %v18699_v31 = vmul.u32.u64.high %v9827_v20, %v9826_v45, %v18698_v10  ;;  %v9678_v27 = vand.u32 2139095040, %v18588_v53 }
 0x7c8   :  { %vm9666_vm11 = vcmp.lt.s32.totalorder %v18676_v60, 2  ;;  %v10406_v52 = vadd.s32 4294967294, %v9535_v17  ;;  %v9818_v30 = vsel %vm9812_vm4, %v9815_v1, %v9817_v21  ;;  %v18706_v51 = vadd.f32 %v18653_v15, %v18188_v5 }
 0x7c9   :  { %vm9667_vm9 = vcmp.eq.s32.totalorder %v18676_v60, 0  ;;  %vm9670_vm12 = vcmp.eq.s32.totalorder %v18676_v60, 2  ;;  %v9837_v18 = vadd.s32 1, %v18686_v41  ;;  %v9679_v50 = vshrl.u32 %v9678_v27, 23 }
 0x7ca   :  { %v12288_v22 = vpop.eup %12287  ;;  %v9523_v42 = vadd.s32 %v18634_v54, %v18631_v16  ;;  %vm10407_vm13 = vcmp.lt.s32.totalorder %v10406_v52, 0  ;;  %v9556_v34 = vsel %vm18691_vm7, 0, %v9554_v32  ;;  %v9675_v29 = vand.u32 2147483647, %v18588_v53 }
 0x7cb   :  { %v12290_v4 = vpop.eup %12289  ;;  %v9671_v5 = vxor.u32 2147483648, %v12288_v22  ;;  %v9538_v15 = vsel %vm10407_vm13, 0, %v10406_v52  ;;  %v9834_v35 = vmul.u32 %v9827_v20, %v9818_v30  ;;  %vm9836_vm10 = vc.u32 %v18699_v31, %v18685_v25 }
 0x7cc   :  { %v9668_v44 = vxor.u32 2147483648, %v12290_v4  ;;  %v9539_v26 = vsub.s32 32, %v9538_v15  ;;  %v9543_v12 = vsub.s32 4294967266, %v9538_v15  ;;  %v9990_v23 = vand.u32 2139095040, %v18706_v51 }
 0x7cd   :  { %v9672_v16 = vsel %vm9670_vm12, %v9671_v5, %v12290_v4  ;;  %v9540_v54 = vshll.u32 %v18678_v13, %v9538_v15  ;;  %v9838_v24 = vsel %vm9836_vm10, %v9837_v18, %v18686_v41  ;;  %v10412_v38 = vadd.s32 4294967169, %v9679_v50 }
 0x7ce   :  { %v9669_v47 = vsel %vm9667_vm9, %v12288_v22, %v9668_v44  ;;  %v9541_v8 = vshrl.u32 %v9523_v42, %v9539_v26  ;;  %v9544_v59 = vadd.s32 127, %v9543_v12  ;;  %v9839_v20 = vadd.s32 %v9838_v24, %v9834_v35 }
 0x7cf   :  { %vm9663_vm14 = vweird.f32 %v18402_v37  ;;  %v9673_v2 = vsel %vm9666_vm11, %v9669_v47, %v9672_v16  ;;  %v9685_v55 = vadd.s32 1, %v10412_v38  ;;  %v11532_v14 = vadd.f32 %v18338_v61, %v18381_v63 }
 0x7d0   :  { %v9674_v40 = vsel %vm9663_vm14, nan, %v9673_v2  ;;  %v9542_v13 = vor.u32 %v9541_v8, %v9540_v54  ;;  %v9545_v56 = vshll.u32 %v9544_v59, 23  ;;  %v9840_v62 = vadd.s32 536870912, %v9839_v20 }
 0x7d1   :  { %10150 = vst [vmem:[#allocation2 + $0x1d8] sm:$0xff] %v9674_v40  ;;  %v9560_v3 = vadd.s32 3, %v9556_v34  ;;  %v9682_v6 = vand.u32 8388607, %v9675_v29  ;;  %vm9686_vm15 = vcmp.gt.s32.totalorder %v9685_v55, 0  ;;  %v9991_v60 = vshrl.u32 %v9990_v23, 23 }
 0x7d2   :  { %v9546_v11 = vor.u32 4788187, %v9545_v56  ;;  %v18732_v28 = vshrl.u32 %v9840_v62, 30  ;;  %v9687_v37 = vsel %vm9686_vm15, %v9685_v55, 0  ;;  %v9549_v46 = vcvt.s32.f32 %v9542_v13 }
 0x7d3   :  { %v9689_v1 = vand.u32 31, %v9687_v37  ;;  %v18736_v63 = vadd.f32 %v11532_v14, %v18315_v33  ;;  %v18738_v21 = vand.u32 3, %v9560_v3  ;;  %v9683_v45 = vor.u32 8388608, %v9682_v6 }
 0x7d4   :  { %v9547_v0 = vand.u32 2147483647, %v9546_v11  ;;  %v9842_v61 = vshll.u32 %v18732_v28, 30  ;;  %v9987_v17 = vand.u32 2147483647, %v18706_v51  ;;  %v9835_v10 = vadd.s32 %v18685_v25, %v18699_v31 }
 0x7d5   :  { %v9690_v41 = vsub.s32 32, %v9689_v1  ;;  %v10424_v52 = vadd.s32 4294967169, %v9991_v60  ;;  %v9688_v30 = vshrl.u32 %v9687_v37, 5  ;;  %v9692_v18 = vshll.u32 %v12345_v7, %v9689_v1 }
 0x7d6   :  { %v9550_v32 = vmul.f32 %v9549_v46, %v9547_v0  ;;  %v18743_v27 = vsub.s32 %v9839_v20, %v9842_v61  ;;  %v9695_v34 = vshll.u32 %v12346_v39, %v9689_v1  ;;  %v9698_v25 = vshll.u32 %v12347_v43, %v9689_v1 }
 0x7d7   :  { %v9693_v50 = vshrl.u32 %v12346_v39, %v9690_v41  ;;  %v9696_v33 = vshrl.u32 %v12347_v43, %v9690_v41  ;;  %v9699_v4 = vshrl.u32 %v12348_v48, %v9690_v41  ;;  %v9701_v31 = vshll.u32 %v12348_v48, %v9689_v1 }
 0x7d8   :  { %v9551_v22 = vxor.u32 2147483648, %v9550_v32  ;;  %v9845_v42 = vsub.s32 0, %v18743_v27  ;;  %v9702_v15 = vshrl.u32 %v12349_v49, %v9690_v41  ;;  %v9704_v12 = vshll.u32 %v12349_v49, %v9689_v1 }
 0x7d9   :  { %v9694_v5 = vor.u32 %v9693_v50, %v9692_v18  ;;  %v9697_v26 = vor.u32 %v9696_v33, %v9695_v34  ;;  %v9700_v16 = vor.u32 %v9699_v4, %v9698_v25  ;;  %v9705_v24 = vshrl.u32 %v12350_v58, %v9690_v41 }
 0x7da   :  { %v9552_v35 = vsel %vm9469_vm8, %v9551_v22, %v9550_v32  ;;  %v10417_v44 = vmin.u32 %v9845_v42, %v18743_v27  ;;  %v9703_v54 = vor.u32 %v9702_v15, %v9701_v31  ;;  %v18762_v47 = vshll.u32 %v9683_v45, 8 }
 0x7db   :  { %v9555_v23 = vsel %vm18691_vm7, %v18434_v36, %v9552_v35  ;;  %v9997_v8 = vadd.s32 1, %v10424_v52  ;;  %v9865_v59 = vsub.s32 4, %v18732_v28  ;;  %v9691_v20 = vshrl.u32 %v12345_v7, %v9690_v41 }
 0x7dc   :  { %12291 = vcosq.f32 %v9555_v23  ;;  %v9847_v38 = vclz %v10417_v44  ;;  %v9706_v2 = vor.u32 %v9705_v24, %v9704_v12  ;;  %vm9781_vm0 = vcmp.lt.s32.totalorder %v18557_v9, 0 }
 0x7dd   :  { %12293 = vsinq.f32 %v9555_v23  ;;  %vm9707_vm1 = vcmp.lt.s32.totalorder %v9688_v30, 1  ;;  %vm9709_vm2 = vcmp.lt.s32.totalorder %v9688_v30, 3  ;;  %vm9710_vm3 = vcmp.lt.s32.totalorder %v9688_v30, 4 }
 0x7de   :  { %v10418_v55 = vadd.s32 4294967294, %v9847_v38  ;;  %v9712_v57 = vsel %vm9710_vm3, %v9700_v16, 2102212464  ;;  %v9715_v14 = vsel %vm9707_vm1, %v9694_v5, %v9697_v26  ;;  %v9716_v40 = vsel %vm9710_vm3, %v9703_v54, 920167782 }
 0x7df   :  { %v9719_v13 = vsel %vm9707_vm1, %v9697_v26, %v9700_v16  ;;  %vm9708_vm5 = vcmp.lt.s32.totalorder %v9688_v30, 2  ;;  %v9717_v56 = vsel %vm9709_vm2, %v9700_v16, %v9716_v40  ;;  %v9720_v62 = vsel %vm9710_vm3, %v9706_v2, 1326507024 }
 0x7e0   :  { %vm10419_vm4 = vcmp.lt.s32.totalorder %v10418_v55, 0  ;;  %v9711_v6 = vsel %vm9707_vm1, %v9691_v20, %v9694_v5  ;;  %v9718_v11 = vsel %vm9708_vm5, %v9715_v14, %v9717_v56  ;;  %v9721_v37 = vsel %vm9709_vm2, %v9703_v54, %v9720_v62 }
 0x7e1   :  { %v9850_v3 = vsel %vm10419_vm4, 0, %v10418_v55  ;;  %vm18772_vm6 = vcmp.le.f32.partialorder %v9779_v19, 0.7853982  ;;  %v9713_v46 = vsel %vm9709_vm2, %v9697_v26, %v9712_v57  ;;  %v9722_v61 = vsel %vm9708_vm5, %v9719_v13, %v9721_v37 }
 0x7e2   :  { %v9851_v1 = vsub.s32 32, %v9850_v3  ;;  %v9855_v0 = vsub.s32 4294967266, %v9850_v3  ;;  %vm9559_vm7 = vweird.f32 %v18434_v36  ;;  %v9852_v19 = vshll.u32 %v18743_v27, %v9850_v3 }
 0x7e3   :  { %v18780_v45 = vmul.u32.u64.low %v18762_v47, %v9722_v61  ;;  %v18781_v41 = vmul.u32.u64.high %v18762_v47, %v9722_v61, %v18780_v45  ;;  %v18784_v32 = vmul.u32.u64.low %v18762_v47, %v9718_v11  ;;  %v18785_v52 = vmul.u32.u64.high %v18762_v47, %v9718_v11, %v18784_v32 }
 0x7e4   :  { %v9853_v18 = vshrl.u32 %v9835_v10, %v9851_v1  ;;  %v9856_v50 = vadd.s32 127, %v9855_v0  ;;  %vm9998_vm8 = vcmp.gt.s32.totalorder %v9997_v8, 0  ;;  %vm9562_vm11 = vcmp.lt.s32.totalorder %v18738_v21, 2 }
 0x7e5   :  { %v9714_v33 = vsel %vm9708_vm5, %v9711_v6, %v9713_v46  ;;  %v9994_v22 = vand.u32 8388607, %v9987_v17  ;;  %v9999_v42 = vsel %vm9998_vm8, %v9997_v8, 0  ;;  %vm9566_vm9 = vcmp.eq.s32.totalorder %v18738_v21, 2 }
 0x7e6   :  { %v12292_v34 = vpop.eup %12291  ;;  %v9854_v4 = vor.u32 %v9853_v18, %v9852_v19  ;;  %v9857_v5 = vshll.u32 %v9856_v50, 23  ;;  %v10001_v25 = vand.u32 31, %v9999_v42  ;;  %v9866_v10 = vsel %vm9781_vm0, %v9865_v59, %v18732_v28 }
 0x7e7   :  { %v12294_v31 = vpop.eup %12293  ;;  %v9567_v15 = vxor.u32 2147483648, %v12292_v34  ;;  %vm9732_vm12 = vc.u32 %v18781_v41, %v18784_v32  ;;  %v9733_v27 = vadd.s32 1, %v18785_v52  ;;  %v9730_v44 = vmul.u32 %v18762_v47, %v9714_v33 }
 0x7e8   :  { %v9564_v30 = vxor.u32 2147483648, %v12294_v31  ;;  %v9858_v35 = vor.u32 4788187, %v9857_v5  ;;  %v10002_v26 = vsub.s32 32, %v10001_v25  ;;  %vm9563_vm13 = vcmp.eq.s32.totalorder %v18738_v21, 0 }
 0x7e9   :  { %v9568_v12 = vsel %vm9566_vm9, %v9567_v15, %v12294_v31  ;;  %v9734_v23 = vsel %vm9732_vm12, %v9733_v27, %v18785_v52  ;;  %v9995_v16 = vor.u32 8388608, %v9994_v22  ;;  %v9861_v38 = vcvt.s32.f32 %v9854_v4 }
 0x7ea   :  { %v9565_v54 = vsel %vm9563_vm13, %v12292_v34, %v9564_v30  ;;  %v9859_v24 = vand.u32 2147483647, %v9858_v35  ;;  %v9735_v28 = vadd.s32 %v9734_v23, %v9730_v44  ;;  %v9868_v59 = vsel %vm18772_vm6, 0, %v9866_v10 }
 0x7eb   :  { %v9569_v8 = vsel %vm9562_vm11, %v9565_v54, %v9568_v12  ;;  %v10005_v20 = vshrl.u32 %v12346_v39, %v10002_v26  ;;  %v10008_v47 = vshrl.u32 %v12347_v43, %v10002_v26  ;;  %v10000_v14 = vshrl.u32 %v9999_v42, 5 }
 0x7ec   :  { %v9570_v2 = vsel %vm9559_vm7, nan, %v9569_v8  ;;  %v9862_v55 = vmul.f32 %v9861_v38, %v9859_v24  ;;  %v9736_v57 = vadd.s32 536870912, %v9735_v28  ;;  %v10004_v40 = vshll.u32 %v12345_v7, %v10001_v25 }
 0x7ed   :  { %10149 = vst [vmem:[#allocation2 + $0x1d0] sm:$0xff] %v9570_v2  ;;  %v10007_v13 = vshll.u32 %v12346_v39, %v10001_v25  ;;  %v10011_v21 = vshrl.u32 %v12348_v48, %v10002_v26  ;;  %v10014_v56 = vshrl.u32 %v12349_v49, %v10002_v26  ;;  %v10010_v6 = vshll.u32 %v12347_v43, %v10001_v25 }
 0x7ee   :  { %v9863_v62 = vxor.u32 2147483648, %v9862_v55  ;;  %v18815_v3 = vshrl.u32 %v9736_v57, 30  ;;  %v10013_v36 = vshll.u32 %v12348_v48, %v10001_v25  ;;  %v10006_v11 = vor.u32 %v10005_v20, %v10004_v40 }
 0x7ef   :  { %v10009_v37 = vor.u32 %v10008_v47, %v10007_v13  ;;  %v10016_v1 = vshll.u32 %v12349_v49, %v10001_v25  ;;  %v10017_v0 = vshrl.u32 %v12350_v58, %v10002_v26  ;;  %v10012_v19 = vor.u32 %v10011_v21, %v10010_v6 }
 0x7f0   :  { %v9864_v46 = vsel %vm9781_vm0, %v9863_v62, %v9862_v55  ;;  %v9738_v61 = vshll.u32 %v18815_v3, 30  ;;  %v10015_v45 = vor.u32 %v10014_v56, %v10013_v36  ;;  %v9872_v50 = vadd.s32 3, %v9868_v59 }
 0x7f1   :  { %v9867_v52 = vsel %vm18772_vm6, %v18557_v9, %v9864_v46  ;;  %v10018_v18 = vor.u32 %v10017_v0, %v10016_v1  ;;  %vm10019_vm10 = vcmp.lt.s32.totalorder %v10000_v14, 1  ;;  %vm10022_vm14 = vcmp.lt.s32.totalorder %v10000_v14, 4 }
 0x7f2   :  { %12295 = vcosq.f32 %v9867_v52  ;;  %v9739_v33 = vsub.s32 %v9735_v28, %v9738_v61  ;;  %v10027_v22 = vsel %vm10019_vm10, %v10006_v11, %v10009_v37  ;;  %v10035_v42 = vshll.u32 %v9995_v16, 8 }
 0x7f3   :  { %12297 = vsinq.f32 %v9867_v52  ;;  %vm10020_vm15 = vcmp.lt.s32.totalorder %v10000_v14, 2  ;;  %vm10021_vm0 = vcmp.lt.s32.totalorder %v10000_v14, 3  ;;  %v10028_v4 = vsel %vm10022_vm14, %v10015_v45, 920167782 }
 0x7f4   :  { %v9741_v34 = vsub.s32 0, %v9739_v33  ;;  %v10024_v5 = vsel %vm10022_vm14, %v10012_v19, 2102212464  ;;  %v10029_v25 = vsel %vm10021_vm0, %v10012_v19, %v10028_v4  ;;  %v10031_v60 = vsel %vm10019_vm10, %v10009_v37, %v10012_v19 }
 0x7f5   :  { %v10032_v31 = vsel %vm10022_vm14, %v10018_v18, 1326507024  ;;  %v10003_v10 = vshrl.u32 %v12345_v7, %v10002_v26  ;;  %v10030_v27 = vsel %vm10020_vm15, %v10027_v22, %v10029_v25  ;;  %v9873_v35 = vand.u32 3, %v9872_v50 }
 0x7f6   :  { %v10413_v15 = vmin.u32 %v9741_v34, %v9739_v33  ;;  %v10033_v30 = vsel %vm10021_vm0, %v10015_v45, %v10032_v31  ;;  %v18832_v12 = vmul.u32.u64.low %v10035_v42, %v10030_v27  ;;  %v18833_v23 = vmul.u32.u64.high %v10035_v42, %v10030_v27, %v18832_v12 }
 0x7f7   :  { %v10034_v44 = vsel %vm10020_vm15, %v10031_v60, %v10033_v30  ;;  %v10023_v54 = vsel %vm10019_vm10, %v10003_v10, %v10006_v11  ;;  %v10025_v24 = vsel %vm10021_vm0, %v10009_v37, %v10024_v5  ;;  %v9886_v8 = vand.u32 2139095040, %v18736_v63 }
 0x7f8   :  { %v9743_v16 = vclz %v10413_v15  ;;  %v18837_v38 = vmul.u32.u64.low %v10035_v42, %v10034_v44  ;;  %v18838_v28 = vmul.u32.u64.high %v10035_v42, %v10034_v44, %v18837_v38  ;;  %vm9874_vm1 = vcmp.lt.s32.totalorder %v9873_v35, 2 }
 0x7f9   :  { %v10026_v59 = vsel %vm10020_vm15, %v10023_v54, %v10025_v24  ;;  %v10045_v20 = vadd.s32 1, %v18833_v23  ;;  %v9887_v47 = vshrl.u32 %v9886_v8, 23  ;;  %vm9875_vm2 = vcmp.eq.s32.totalorder %v9873_v35, 0 }
 0x7fa   :  { %v10414_v26 = vadd.s32 4294967294, %v9743_v16  ;;  %vm9878_vm3 = vcmp.eq.s32.totalorder %v9873_v35, 2  ;;  %v9883_v55 = vand.u32 2147483647, %v18736_v63  ;;  %v9731_v13 = vadd.s32 %v18784_v32, %v18781_v41 }
 0x7fb   :  { %vm10044_vm5 = vc.u32 %v18838_v28, %v18832_v12  ;;  %v10042_v6 = vmul.u32 %v10035_v42, %v10026_v59  ;;  %v10420_v1 = vadd.s32 4294967169, %v9887_v47  ;;  %vm9871_vm6 = vweird.f32 %v18557_v9 }
 0x7fc   :  { %v12296_v2 = vpop.eup %12295  ;;  %vm10415_vm4 = vcmp.lt.s32.totalorder %v10414_v26, 0  ;;  %v10046_v37 = vsel %vm10044_vm5, %v10045_v20, %v18833_v23  ;;  %v9761_v32 = vsub.s32 4, %v18815_v3  ;;  %vm9677_vm7 = vcmp.lt.s32.totalorder %v18588_v53, 0 }
 0x7fd   :  { %v12298_v57 = vpop.eup %12297  ;;  %v9879_v40 = vxor.u32 2147483648, %v12296_v2  ;;  %v9746_v21 = vsel %vm10415_vm4, 0, %v10414_v26  ;;  %v10047_v45 = vadd.s32 %v10046_v37, %v10042_v6  ;;  %v9893_v52 = vadd.s32 1, %v10420_v1 }
 0x7fe   :  { %v9876_v14 = vxor.u32 2147483648, %v12298_v57  ;;  %v9747_v56 = vsub.s32 32, %v9746_v21  ;;  %v9751_v62 = vsub.s32 4294967266, %v9746_v21  ;;  %v9748_v11 = vshll.u32 %v9739_v33, %v9746_v21 }
 0x7ff   :  { %v9880_v36 = vsel %vm9878_vm3, %v9879_v40, %v12298_v57  ;;  %v10048_v22 = vadd.s32 536870912, %v10047_v45  ;;  %vm9894_vm8 = vcmp.gt.s32.totalorder %v9893_v52, 0  ;;  %v9890_v34 = vand.u32 8388607, %v9883_v55 }
 0x800   :  { %v9877_v0 = vsel %vm9875_vm2, %v12296_v2, %v9876_v14  ;;  %v9749_v46 = vshrl.u32 %v9731_v13, %v9747_v56  ;;  %v9752_v61 = vadd.s32 127, %v9751_v62  ;;  %v9895_v9 = vsel %vm9894_vm8, %v9893_v52, 0 }
 0x801   :  { %v9881_v41 = vsel %vm9874_vm1, %v9877_v0, %v9880_v36  ;;  %v18854_v42 = vshrl.u32 %v10048_v22, 30  ;;  %v9762_v4 = vsel %vm9677_vm7, %v9761_v32, %v18815_v3  ;;  %v9897_v5 = vand.u32 31, %v9895_v9 }
 0x802   :  { %v9882_v19 = vsel %vm9871_vm6, nan, %v9881_v41  ;;  %v9750_v18 = vor.u32 %v9749_v46, %v9748_v11  ;;  %v9753_v50 = vshll.u32 %v9752_v61, 23  ;;  %vm18864_vm11 = vcmp.le.f32.partialorder %v9675_v29, 0.7853982 }
 0x803   :  { %10152 = vst [vmem:[#allocation2 + $0x1e8] sm:$0xff] %v9882_v19  ;;  %v10050_v31 = vshll.u32 %v18854_v42, 30  ;;  %v9898_v10 = vsub.s32 32, %v9897_v5  ;;  %v9764_v30 = vsel %vm18864_vm11, 0, %v9762_v4  ;;  %v9891_v44 = vor.u32 8388608, %v9890_v34 }
 0x804   :  { %v9754_v33 = vor.u32 4788187, %v9753_v50  ;;  %v9757_v60 = vcvt.s32.f32 %v9750_v18  ;;  %v9896_v23 = vshrl.u32 %v9895_v9, 5  ;;  %v9900_v3 = vshll.u32 %v12345_v7, %v9897_v5 }
 0x805   :  { %v10051_v35 = vsub.s32 %v10047_v45, %v10050_v31  ;;  %v9901_v16 = vshrl.u32 %v12346_v39, %v9898_v10  ;;  %v9904_v54 = vshrl.u32 %v12347_v43, %v9898_v10  ;;  %v9903_v29 = vshll.u32 %v12346_v39, %v9897_v5 }
 0x806   :  { %v9755_v25 = vand.u32 2147483647, %v9754_v33  ;;  %v9907_v8 = vshrl.u32 %v12348_v48, %v9898_v10  ;;  %v9906_v59 = vshll.u32 %v12347_v43, %v9897_v5  ;;  %v9909_v20 = vshll.u32 %v12348_v48, %v9897_v5 }
 0x807   :  { %v10053_v38 = vsub.s32 0, %v10051_v35  ;;  %v9902_v26 = vor.u32 %v9901_v16, %v9900_v3  ;;  %v9910_v47 = vshrl.u32 %v12349_v49, %v9898_v10  ;;  %v9905_v40 = vor.u32 %v9904_v54, %v9903_v29 }
 0x808   :  { %v9758_v27 = vmul.f32 %v9757_v60, %v9755_v25  ;;  %v9912_v13 = vshll.u32 %v12349_v49, %v9897_v5  ;;  %v9908_v21 = vor.u32 %v9907_v8, %v9906_v59  ;;  %v9913_v56 = vshrl.u32 %v12350_v58, %v9898_v10 }
 0x809   :  { %v10425_v57 = vmin.u32 %v10053_v38, %v10051_v35  ;;  %v9911_v14 = vor.u32 %v9910_v47, %v9909_v20  ;;  %v9768_v43 = vadd.s32 3, %v9764_v30  ;;  %v10043_v48 = vadd.s32 %v18832_v12, %v18838_v28 }
 0x80a   :  { %v9759_v24 = vxor.u32 2147483648, %v9758_v27  ;;  %v9899_v6 = vshrl.u32 %v12345_v7, %v9898_v10  ;;  %v9914_v36 = vor.u32 %v9913_v56, %v9912_v13  ;;  %v9931_v11 = vshll.u32 %v9891_v44, 8 }
 0x80b   :  { %v10055_v62 = vclz %v10425_v57  ;;  %vm9915_vm9 = vcmp.lt.s32.totalorder %v9896_v23, 1  ;;  %vm9917_vm12 = vcmp.lt.s32.totalorder %v9896_v23, 3  ;;  %vm9918_vm13 = vcmp.lt.s32.totalorder %v9896_v23, 4 }
 0x80c   :  { %v9760_v2 = vsel %vm9677_vm7, %v9759_v24, %v9758_v27  ;;  %v9920_v37 = vsel %vm9918_vm13, %v9908_v21, 2102212464  ;;  %v9923_v1 = vsel %vm9915_vm9, %v9902_v26, %v9905_v40  ;;  %v9924_v0 = vsel %vm9918_vm13, %v9911_v14, 920167782 }
 0x80d   :  { %v9763_v39 = vsel %vm18864_vm11, %v18588_v53, %v9760_v2  ;;  %v10426_v49 = vadd.s32 4294967294, %v10055_v62  ;;  %v9927_v46 = vsel %vm9915_vm9, %v9905_v40, %v9908_v21  ;;  %vm9916_vm14 = vcmp.lt.s32.totalorder %v9896_v23, 2 }
 0x80e   :  { %12299 = vcosq.f32 %v9763_v39  ;;  %v9925_v58 = vsel %vm9917_vm12, %v9908_v21, %v9924_v0  ;;  %v9928_v61 = vsel %vm9918_vm13, %v9914_v36, 1326507024  ;;  %v9919_v28 = vsel %vm9915_vm9, %v9899_v6, %v9902_v26 }
 0x80f   :  { %12301 = vsinq.f32 %v9763_v39  ;;  %vm10427_vm10 = vcmp.lt.s32.totalorder %v10426_v49, 0  ;;  %v9926_v45 = vsel %vm9916_vm14, %v9923_v1, %v9925_v58  ;;  %v9929_v7 = vsel %vm9917_vm12, %v9911_v14, %v9928_v61 }
 0x810   :  { %v10058_v12 = vsel %vm10427_vm10, 0, %v10426_v49  ;;  %v9921_v52 = vsel %vm9917_vm12, %v9905_v40, %v9920_v37  ;;  %v9930_v19 = vsel %vm9916_vm14, %v9927_v46, %v9929_v7  ;;  %v9769_v34 = vand.u32 3, %v9768_v43 }
 0x811   :  { %v10059_v41 = vsub.s32 32, %v10058_v12  ;;  %v10063_v32 = vsub.s32 4294967266, %v10058_v12  ;;  %v18893_v18 = vmul.u32.u64.low %v9931_v11, %v9930_v19  ;;  %v18894_v50 = vmul.u32.u64.high %v9931_v11, %v9930_v19, %v18893_v18 }
 0x812   :  { %v18896_v22 = vmul.u32.u64.low %v9931_v11, %v9926_v45  ;;  %v18897_v33 = vmul.u32.u64.high %v9931_v11, %v9926_v45, %v18896_v22  ;;  %v10060_v9 = vshll.u32 %v10051_v35, %v10058_v12  ;;  %v9922_v25 = vsel %vm9916_vm14, %v9919_v28, %v9921_v52 }
 0x813   :  { %v10061_v4 = vshrl.u32 %v10043_v48, %v10059_v41  ;;  %v10064_v5 = vadd.s32 127, %v10063_v32  ;;  %vm9774_vm0 = vcmp.eq.s32.totalorder %v9769_v34, 2  ;;  %v9938_v16 = vmul.u32 %v9931_v11, %v9922_v25 }
 0x814   :  { %vm9940_vm15 = vc.u32 %v18894_v50, %v18896_v22  ;;  %v9941_v30 = vadd.s32 1, %v18897_v33  ;;  %vm9770_vm1 = vcmp.lt.s32.totalorder %v9769_v34, 2  ;;  %vm9771_vm2 = vcmp.eq.s32.totalorder %v9769_v34, 0 }
 0x815   :  { %v10062_v31 = vor.u32 %v10061_v4, %v10060_v9  ;;  %v10065_v15 = vshll.u32 %v10064_v5, 23  ;;  %vm9767_vm3 = vweird.f32 %v18588_v53  ;;  %v10073_v26 = vsub.s32 4, %v18854_v42 }
 0x816   :  { %v9942_v54 = vsel %vm9940_vm15, %v9941_v30, %v18897_v33  ;;  %vm9989_vm4 = vcmp.lt.s32.totalorder %v18706_v51, 0  ;;  %vm9988_vm5 = vcmp.le.f32.partialorder %v9987_v17, 0.7853982  ;;  %v9939_v1 = vadd.s32 %v18896_v22, %v18894_v50 }
 0x817   :  { %v10066_v3 = vor.u32 4788187, %v10065_v15  ;;  %v10069_v38 = vcvt.s32.f32 %v10062_v31  ;;  %v9943_v29 = vadd.s32 %v9942_v54, %v9938_v16  ;;  %v10074_v40 = vsel %vm9989_vm4, %v10073_v26, %v18854_v42 }
 0x818   :  { %v12300_v60 = vpop.eup %12299  ;;  %v10076_v21 = vsel %vm9988_vm5, 0, %v10074_v40  ;;  %vm10079_vm9 = vweird.f32 %v18706_v51  ;;  %vm9885_vm12 = vcmp.lt.s32.totalorder %v18736_v63, 0  ;;  %vm9884_vm13 = vcmp.le.f32.partialorder %v9883_v55, 0.7853982 }
 0x819   :  { %v12302_v10 = vpop.eup %12301  ;;  %v9775_v27 = vxor.u32 2147483648, %v12300_v60  ;;  %v10067_v24 = vand.u32 2147483647, %v10066_v3  ;;  %v9944_v47 = vadd.s32 536870912, %v9943_v29  ;;  %v10080_v43 = vadd.s32 3, %v10076_v21 }
 0x81a   :  { %v9772_v44 = vxor.u32 2147483648, %v12302_v10 }
 0x81b   :  { %v9776_v35 = vsel %vm9774_vm0, %v9775_v27, %v12302_v10  ;;  %v10070_v20 = vmul.f32 %v10069_v38, %v10067_v24  ;;  %v9945_v57 = vshrl.u32 %v9944_v47, 30  ;;  %v10081_v6 = vand.u32 3, %v10080_v43 }
 0x81c   :  { %v9773_v23 = vsel %vm9771_vm2, %v12300_v60, %v9772_v44  ;;  %vm9975_vm0 = vweird.f32 %v18736_v63 }
 0x81d   :  { %v9777_v8 = vsel %vm9770_vm1, %v9773_v23, %v9776_v35  ;;  %v10071_v2 = vxor.u32 2147483648, %v10070_v20  ;;  %v9946_v39 = vshll.u32 %v9945_v57, 30  ;;  %vm10086_vm7 = vcmp.eq.s32.totalorder %v10081_v6, 2 }
 0x81e   :  { %v9778_v59 = vsel %vm9767_vm3, nan, %v9777_v8  ;;  %vm10082_vm8 = vcmp.lt.s32.totalorder %v10081_v6, 2  ;;  %vm10083_vm11 = vcmp.eq.s32.totalorder %v10081_v6, 0  ;;  %v9969_v22 = vsub.s32 4, %v9945_v57 }
 0x81f   :  { %10151 = vst [vmem:[#allocation2 + $0x1e0] sm:$0xff] %v9778_v59  ;;  %v10072_v13 = vsel %vm9989_vm4, %v10071_v2, %v10070_v20  ;;  %v9947_v14 = vsub.s32 %v9943_v29, %v9946_v39 }
 0x820   :  { %v10075_v53 = vsel %vm9988_vm5, %v18706_v51, %v10072_v13  ;;  %v9970_v4 = vsel %vm9885_vm12, %v9969_v22, %v9945_v57 }
 0x821   :  { %12303 = vcosq.f32 %v10075_v53  ;;  %v9949_v56 = vsub.s32 0, %v9947_v14  ;;  %v9972_v5 = vsel %vm9884_vm13, 0, %v9970_v4 }
 0x822   :  { %12305 = vsinq.f32 %v10075_v53  ;;  %v9976_v25 = vadd.s32 3, %v9972_v5 }
 0x823   :  { %v10421_v48 = vmin.u32 %v9949_v56, %v9947_v14 }
 0x824   :  { %v9977_v60 = vand.u32 3, %v9976_v25 }
 0x825   :  { %v9951_v62 = vclz %v10421_v48 }
 0x826   :  { %vm9982_vm10 = vcmp.eq.s32.totalorder %v9977_v60, 2  ;;  %vm9979_vm14 = vcmp.eq.s32.totalorder %v9977_v60, 0  ;;  %vm9978_vm15 = vcmp.lt.s32.totalorder %v9977_v60, 2 }
 0x827   :  { %v10422_v36 = vadd.s32 4294967294, %v9951_v62 }
 0x829   :  { %vm10423_vm6 = vcmp.lt.s32.totalorder %v10422_v36, 0 }
 0x82a   :  { %v9954_v17 = vsel %vm10423_vm6, 0, %v10422_v36 }
 0x82b   :  { %v12304_v11 = vpop.eup %12303  ;;  %v9955_v0 = vsub.s32 32, %v9954_v17  ;;  %v9959_v46 = vsub.s32 4294967266, %v9954_v17  ;;  %v9956_v12 = vshll.u32 %v9947_v14, %v9954_v17 }
 0x82c   :  { %v12306_v42 = vpop.eup %12305  ;;  %v10087_v49 = vxor.u32 2147483648, %v12304_v11 }
 0x82d   :  { %v10084_v37 = vxor.u32 2147483648, %v12306_v42  ;;  %v9957_v28 = vshrl.u32 %v9939_v1, %v9955_v0  ;;  %v9960_v45 = vadd.s32 127, %v9959_v46 }
 0x82e   :  { %v10088_v58 = vsel %vm10086_vm7, %v10087_v49, %v12306_v42 }
 0x82f   :  { %v10085_v61 = vsel %vm10083_vm11, %v12304_v11, %v10084_v37  ;;  %v9958_v32 = vor.u32 %v9957_v28, %v9956_v12  ;;  %v9961_v52 = vshll.u32 %v9960_v45, 23 }
 0x830   :  { %v10089_v7 = vsel %vm10082_vm8, %v10085_v61, %v10088_v58 }
 0x831   :  { %v10090_v41 = vsel %vm10079_vm9, nan, %v10089_v7  ;;  %v9962_v19 = vor.u32 4788187, %v9961_v52  ;;  %v9965_v33 = vcvt.s32.f32 %v9958_v32 }
 0x832   :  { %10154 = vst [vmem:[#allocation2 + $0x1f8] sm:$0xff] %v10090_v41 }
 0x833   :  { %v9963_v18 = vand.u32 2147483647, %v9962_v19 }
 0x835   :  { %v9966_v50 = vmul.f32 %v9965_v33, %v9963_v18 }
 0x837   :  { %v9967_v34 = vxor.u32 2147483648, %v9966_v50 }
 0x839   :  { %v9968_v9 = vsel %vm9885_vm12, %v9967_v34, %v9966_v50 }
 0x83a   :  { %v9971_v51 = vsel %vm9884_vm13, %v18736_v63, %v9968_v9 }
 0x83b   :  { %12307 = vcosq.f32 %v9971_v51 }
 0x83c   :  { %12309 = vsinq.f32 %v9971_v51 }
 0x845   :  { %v12308_v31 = vpop.eup %12307 }
 0x846   :  { %v12310_v15 = vpop.eup %12309  ;;  %v9983_v10 = vxor.u32 2147483648, %v12308_v31 }
 0x847   :  { %v9980_v27 = vxor.u32 2147483648, %v12310_v15 }
 0x848   :  { %v9984_v30 = vsel %vm9982_vm10, %v9983_v10, %v12310_v15 }
 0x849   :  { %v9981_v55 = vsel %vm9979_vm14, %v12308_v31, %v9980_v27 }
 0x84a   :  { %v9985_v44 = vsel %vm9978_vm15, %v9981_v55, %v9984_v30 }
 0x84b   :  { %v9986_v3 = vsel %vm9975_vm0, nan, %v9985_v44 }
 0x84c   :  { %10153 = vst [vmem:[#allocation2 + $0x1f0] sm:$0xff] %v9986_v3 }
 0x84d   :  { %12332 = shalt.err (!%p12329_p4)
}
 0x84e   :  { %s12333_s26 = scalar_lea.hbm %s18932_s3, 8192 }
 0x84f   :  { %p12334_p5 = scmp.ne.s32.totalorder %s18932_s3, %s12333_s26  ;;  %p12337_p6 = scmp.lt.u32.totalorder %s12333_s26, %s18932_s3 }
 0x851   :  { %p12339_p7 = pnand %p12337_p6, %p12334_p5 }
 0x853   :  { %12342 = shalt.err (!%p12339_p7)
}
 0x854   :  { %s12352_s30 = smov 128   ;;  %s12353_s4 = smov 8  }
 0x855   :  { %10166 = dma.vmem_to_hbm [thread:$0]  %s10161_s22, 8192, %s18932_s3, [#allocation3], %s12352_s30, %s12352_s30, %s12353_s4  }
 0x856   :  { %12343 = dma.done.wait [#allocation3], 8192  }
 0x857   :  { %12344 = vsyncadd [#allocation3], 4294959104 }
 0x858   :  { %10170 = vsyncpa [#allocation3], 1 }

</bundles_post_ra>
